<compile_context>
chip_gen: v7x
topology: tpu7x:2x2x1
jax: 0.10.0
libtpu: 0.0.40
codegen_flags: <defaults>
</compile_context>

<pallas_src>
import functools

import jax
import jax.numpy as jnp
import numpy as np
from jax.experimental import pallas as pl
from jax.experimental.pallas import tpu as pltpu


_LPAD = 1     # left halo column inside each padded row
_SLACK = 8    # flat-row slack before the padded image (keeps extreme tap reads in bounds)


# ---------------------------------------------------------------------------
# Kernel: per image -> 1x1 reduce/concat/integrate, then two 3x3 conv+BN+ReLU
# ---------------------------------------------------------------------------

def _upstage_kernel(x_ref, r_ref, mask_ref,
                    wred_ref, sred_ref, bred_ref,
                    wtop_ref, wbot_ref, sint_ref, bint_ref,
                    w0_ref, s0_ref, b0_ref,
                    w1_ref, s1_ref, b1_ref,
                    o_ref,
                    pad0_ref, pad1_ref,
                    *, H, Wp, Lp):
    # x: (1, Lp, Cin) bf16, route: (1, Lp, Cr) bf16  -- padded-row layout (Lp = H*Wp,
    #    halo columns already zero).  mask: (Lp, 1) f32, 1.0 on interior columns.
    # pad0/pad1: flat bf16 scratch of shape (SLACK + (H+2)*Wp + 8, C).
    C = o_ref.shape[-1]
    B = _SLACK
    keep = mask_ref[...] > 0.0                       # (Lp, 1) interior-column mask

    # ---- fused 1x1 stage: relu(bn(reduce(x))) -> concat(route) -> relu(bn(int)) ----
    # integration over concat([red, route]) == red @ W_top + route @ W_bot
    x = x_ref[0]                                     # (Lp, Cin) bf16
    r = r_ref[0]                                     # (Lp, Cr)  bf16
    red = jnp.dot(x, wred_ref[...], preferred_element_type=jnp.float32)
    red = jnp.maximum(red * sred_ref[...] + bred_ref[...], 0.0)
    y = jnp.dot(red.astype(jnp.bfloat16), wtop_ref[...],
                preferred_element_type=jnp.float32)
    y = y + jnp.dot(r, wbot_ref[...], preferred_element_type=jnp.float32)
    y = jnp.maximum(y * sint_ref[...] + bint_ref[...], 0.0)       # (Lp, C) f32

    zrow = jnp.zeros((Wp, C), jnp.bfloat16)

    def store_padded(dst_ref, val_f32):
        # One contiguous interior store (halo columns zeroed via `keep`, so garbage
        # from invalid virtual columns never enters the buffer) plus the two zero
        # halo rows.  No full-buffer zero fill, no strided stores.
        dst_ref[B:B + Wp, :] = zrow                                        # top halo
        dst_ref[B + Wp:B + Wp + Lp, :] = (
            jnp.where(keep, val_f32, 0.0).astype(jnp.bfloat16))            # rows 1..H
        dst_ref[B + (H + 1) * Wp:B + (H + 2) * Wp, :] = zrow               # bottom halo

    def conv3x3(src_ref, w_ref, s_ref, b_ref):
        # 3x3 conv over the flattened padded image: every tap is a CONTIGUOUS
        # (Lp, C) slice of the scratch fed straight to the MXU (no per-tap
        # strided slice + reshape copies).  Rows at halo columns compute garbage
        # that is masked on store / sliced off in the wrapper.
        acc = jnp.zeros((Lp, C), jnp.float32)
        for ky in range(3):
            for kx in range(3):
                off = B + ky * Wp + (kx - 1)
                acc = acc + jnp.dot(src_ref[off:off + Lp, :], w_ref[ky * 3 + kx],
                                    preferred_element_type=jnp.float32)
        return jnp.maximum(acc * s_ref[...] + b_ref[...], 0.0)             # (Lp, C) f32

    store_padded(pad0_ref, y)                               # integration output -> VMEM
    mid = conv3x3(pad0_ref, w0_ref, s0_ref, b0_ref)         # main_block[0]
    store_padded(pad1_ref, mid)                             # intermediate stays in VMEM
    out = conv3x3(pad1_ref, w1_ref, s1_ref, b1_ref)         # main_block[1]
    o_ref[0] = out.astype(o_ref.dtype)                      # halo cols dropped in wrapper


# ---------------------------------------------------------------------------
# pallas_call wrapper
# ---------------------------------------------------------------------------

def _upstage_pallas(x_pad, r_pad, mask, params, *, H, Wp):
    N, Lp, Cin = x_pad.shape
    Cr = r_pad.shape[-1]
    w_red, s_red, b_red = params["reduce"]
    w_top, w_bot, s_int, b_int = params["integration"]
    w0, s0, b0 = params["main0"]
    w1, s1, b1 = params["main1"]
    C = w_red.shape[1]
    flat = _SLACK + (H + 2) * Wp + 8

    rep2 = lambda n: (0, 0)
    rep3 = lambda n: (0, 0, 0)

    flops = N * 2 * Lp * (Cin * C + C * C + Cr * C + 2 * 9 * C * C)
    bytes_accessed = (N * Lp * (2 * (Cin + Cr) + 4 * C)
                      + 2 * (Cin + C + Cr + 18 * C) * C + 4 * 8 * C + 4 * Lp)

    kernel = functools.partial(_upstage_kernel, H=H, Wp=Wp, Lp=Lp)

    return pl.pallas_call(
        kernel,
        out_shape=jax.ShapeDtypeStruct((N, Lp, C), jnp.float32),
        grid=(N,),
        in_specs=[
            pl.BlockSpec((1, Lp, Cin), lambda n: (n, 0, 0)),
            pl.BlockSpec((1, Lp, Cr), lambda n: (n, 0, 0)),
            pl.BlockSpec((Lp, 1), rep2),
            pl.BlockSpec((Cin, C), rep2),
            pl.BlockSpec((1, C), rep2),
            pl.BlockSpec((1, C), rep2),
            pl.BlockSpec((C, C), rep2),
            pl.BlockSpec((Cr, C), rep2),
            pl.BlockSpec((1, C), rep2),
            pl.BlockSpec((1, C), rep2),
            pl.BlockSpec((9, C, C), rep3),
            pl.BlockSpec((1, C), rep2),
            pl.BlockSpec((1, C), rep2),
            pl.BlockSpec((9, C, C), rep3),
            pl.BlockSpec((1, C), rep2),
            pl.BlockSpec((1, C), rep2),
        ],
        out_specs=pl.BlockSpec((1, Lp, C), lambda n: (n, 0, 0)),
        scratch_shapes=[
            pltpu.VMEM((flat, C), jnp.bfloat16),
            pltpu.VMEM((flat, C), jnp.bfloat16),
        ],
        compiler_params=pltpu.CompilerParams(
            dimension_semantics=("parallel",),
            vmem_limit_bytes=32 * 1024 * 1024),
        cost_estimate=pl.CostEstimate(flops=flops, transcendentals=0,
                                      bytes_accessed=bytes_accessed),
    )(x_pad, r_pad, mask, w_red, s_red, b_red, w_top, w_bot, s_int, b_int,
      w0, s0, b0, w1, s1, b1)


# ---------------------------------------------------------------------------
# UpStage forward (NCHW in / NCHW out, matching PyTorch)
# ---------------------------------------------------------------------------

def up_stage_forward(params, x_nchw, route_nchw):
    N, Cin, H, W = x_nchw.shape
    Cr = route_nchw.shape[1]
    w_red = params["reduce"][0]
    C = w_red.shape[1]
    # integration weight split (rows [:C] act on reduce output, rows [C:] on route)
    assert Cin == C + Cr, (
        "UpStage assumes integration input channels == out_channels + route channels")

    L = _LPAD
    Wp = ((W + 2 + 7) // 8) * 8        # padded row width (>= W+2), multiple of 8
    Lp = H * Wp

    def to_padded_rows(a_nchw):
        a = jnp.transpose(a_nchw, (0, 2, 3, 1))                       # NHWC
        a = jnp.pad(a, ((0, 0), (0, 0), (L, Wp - L - W), (0, 0)))     # zero halo cols
        return a.reshape(N, Lp, a.shape[-1]).astype(jnp.bfloat16)     # bf16 streaming

    x = to_padded_rows(x_nchw)
    r = to_padded_rows(route_nchw)

    cols = np.arange(Lp) % Wp
    mask = jnp.asarray(((cols >= L) & (cols < L + W))
                       .astype(np.float32).reshape(Lp, 1))

    o = _upstage_pallas(x, r, mask, params, H=H, Wp=Wp)               # (N, Lp, C)
    o = o.reshape(N, H, Wp, C)[:, :, L:L + W, :]                      # drop halo cols
    return jnp.transpose(o, (0, 3, 1, 2))                             # NCHW


# ---------------------------------------------------------------------------
# Parameter construction (PyTorch-shaped weights, BN folded in eval mode)
# ---------------------------------------------------------------------------

def _fold_bn(gamma, beta, mean, var, eps=1e-5):
    scale = gamma / jnp.sqrt(var + eps)
    bias = beta - mean * scale
    return scale, bias


def _make_conv_block_params(key, in_ch, out_ch, ksize):
    kw, kg, kb, km, kv = jax.random.split(key, 5)
    w_pt = 0.1 * jax.random.normal(kw, (out_ch, in_ch, ksize, ksize), jnp.float32)
    gamma = jax.random.uniform(kg, (out_ch,), minval=0.5, maxval=1.5)
    beta = 0.1 * jax.random.normal(kb, (out_ch,))
    mean = 0.1 * jax.random.normal(km, (out_ch,))
    var = jax.random.uniform(kv, (out_ch,), minval=0.5, maxval=1.5)
    scale, bias = _fold_bn(gamma, beta, mean, var)
    scale = scale.reshape(1, out_ch).astype(jnp.float32)
    bias = bias.reshape(1, out_ch).astype(jnp.float32)
    if ksize == 1:
        w = w_pt[:, :, 0, 0].T.astype(jnp.bfloat16)                      # (Cin, Cout)
    else:
        w = jnp.transpose(w_pt, (2, 3, 1, 0)).reshape(
            ksize * ksize, in_ch, out_ch).astype(jnp.bfloat16)           # (9, Cin, Cout)
    return w, scale, bias


def make_upstage_params(key, in_channels, out_channels):
    assert in_channels > out_channels
    k0, k1, k2, k3 = jax.random.split(key, 4)
    w_int, s_int, b_int = _make_conv_block_params(k1, in_channels, out_channels, 1)
    return {
        "reduce": _make_conv_block_params(k0, in_channels, out_channels, 1),
        # integration weight split along its input-channel rows:
        # rows [:out] act on the reduce output, rows [out:] act on `route`.
        "integration": (w_int[:out_channels], w_int[out_channels:], s_int, b_int),
        "main0": _make_conv_block_params(k2, out_channels, out_channels, 3),
        "main1": _make_conv_block_params(k3, out_channels, out_channels, 3),
    }


# ---------------------------------------------------------------------------
# Pure-JAX reference (same folded params) for a correctness sanity check
# ---------------------------------------------------------------------------

def _ref_forward(params, x_nhwc, route_nhwc):
    def conv1x1(x, w, s, b):
        y = x @ w.astype(jnp.float32)
        return jnp.maximum(y * s + b, 0.0)

    def conv3x3(x, w, s, b):
        n, h, wd, c = x.shape
        co = w.shape[2]
        xp = jnp.pad(x, ((0, 0), (1, 1), (1, 1), (0, 0)))
        wf = w.astype(jnp.float32)
        acc = jnp.zeros((n, h, wd, co), jnp.float32)
        for ky in range(3):
            for kx in range(3):
                acc = acc + jnp.einsum("nhwc,co->nhwo",
                                       xp[:, ky:ky + h, kx:kx + wd, :],
                                       wf[ky * 3 + kx])
        return jnp.maximum(acc * s + b, 0.0)

    w_red, s_red, b_red = params["reduce"]
    w_top, w_bot, s_int, b_int = params["integration"]
    o = conv1x1(x_nhwc, w_red, s_red, b_red)
    o = jnp.concatenate([o, route_nhwc], axis=-1)
    o = conv1x1(o, jnp.concatenate([w_top, w_bot], axis=0), s_int, b_int)
    o = conv3x3(o, *params["main0"])
    o = conv3x3(o, *params["main1"])
    return o


if __name__ == "__main__":
    in_channels, out_channels = 8, 4
    N, H, W = 2, 16, 16

    key = jax.random.PRNGKey(0)
    kx_, kr_, kp_ = jax.random.split(key, 3)

    x = jax.random.normal(kx_, (N, in_channels, H, W), dtype=jnp.float32)
    # route channels satisfy out_channels + route_ch == in_channels
    route = jax.random.normal(kr_, (N, in_channels - out_channels, H, W),
                              dtype=jnp.float32)

    params = make_upstage_params(kp_, in_channels, out_channels)

    fwd = jax.jit(up_stage_forward)
    out = jax.block_until_ready(fwd(params, x, route))
    assert out.shape == (N, out_channels, H, W)

    # Sanity check against a pure-JAX f32 reference (bf16 matmul inputs in the
    # kernel -> loose tolerance).
    ref = _ref_forward(params,
                       jnp.transpose(x, (0, 2, 3, 1)),
                       jnp.transpose(route, (0, 2, 3, 1)))
    ref_nchw = jnp.transpose(ref, (0, 3, 1, 2))
    max_err = float(jnp.max(jnp.abs(out - ref_nchw)))
    assert max_err < 5e-2, f"max abs error too large: {max_err}"

    print("KERNEL_OK")
</pallas_src>

<mosaic_0001>
module attributes {stable_mosaic.version = 11 : i64} {
  func.func @_upstage_kernel(%arg0: i32, %arg1: memref<1x384x8xbf16, #tpu.memory_space<vmem>>, %arg2: memref<1x384x4xbf16, #tpu.memory_space<vmem>>, %arg3: memref<384x1xf32, #tpu.memory_space<vmem>>, %arg4: memref<8x4xbf16, #tpu.memory_space<vmem>>, %arg5: memref<1x4xf32, #tpu.memory_space<vmem>>, %arg6: memref<1x4xf32, #tpu.memory_space<vmem>>, %arg7: memref<4x4xbf16, #tpu.memory_space<vmem>>, %arg8: memref<4x4xbf16, #tpu.memory_space<vmem>>, %arg9: memref<1x4xf32, #tpu.memory_space<vmem>>, %arg10: memref<1x4xf32, #tpu.memory_space<vmem>>, %arg11: memref<9x4x4xbf16, #tpu.memory_space<vmem>>, %arg12: memref<1x4xf32, #tpu.memory_space<vmem>>, %arg13: memref<1x4xf32, #tpu.memory_space<vmem>>, %arg14: memref<9x4x4xbf16, #tpu.memory_space<vmem>>, %arg15: memref<1x4xf32, #tpu.memory_space<vmem>>, %arg16: memref<1x4xf32, #tpu.memory_space<vmem>>, %arg17: memref<1x384x4xf32, #tpu.memory_space<vmem>>, %arg18: memref<448x4xbf16, #tpu.memory_space<vmem>>, %arg19: memref<448x4xbf16, #tpu.memory_space<vmem>>) attributes {dimension_semantics = [#tpu.dimension_semantics<parallel>], iteration_bounds = array<i64: 2>, scalar_prefetch = 0 : i64, scratch_operands = 2 : i64, tpu.core_type = #tpu.core_type<tc>, window_params = [{transform_indices = @transform_0, window_bounds = array<i64: 1, 384, 8>}, {transform_indices = @transform_1, window_bounds = array<i64: 1, 384, 4>}, {pipeline_mode = #tpu.pipeline_mode<synchronous>, transform_indices = @transform_2, window_bounds = array<i64: 384, 1>}, {pipeline_mode = #tpu.pipeline_mode<synchronous>, transform_indices = @transform_3, window_bounds = array<i64: 8, 4>}, {pipeline_mode = #tpu.pipeline_mode<synchronous>, transform_indices = @transform_4, window_bounds = array<i64: 1, 4>}, {pipeline_mode = #tpu.pipeline_mode<synchronous>, transform_indices = @transform_5, window_bounds = array<i64: 1, 4>}, {pipeline_mode = #tpu.pipeline_mode<synchronous>, transform_indices = @transform_6, window_bounds = array<i64: 4, 4>}, {pipeline_mode = #tpu.pipeline_mode<synchronous>, transform_indices = @transform_7, window_bounds = array<i64: 4, 4>}, {pipeline_mode = #tpu.pipeline_mode<synchronous>, transform_indices = @transform_8, window_bounds = array<i64: 1, 4>}, {pipeline_mode = #tpu.pipeline_mode<synchronous>, transform_indices = @transform_9, window_bounds = array<i64: 1, 4>}, {pipeline_mode = #tpu.pipeline_mode<synchronous>, transform_indices = @transform_10, window_bounds = array<i64: 9, 4, 4>}, {pipeline_mode = #tpu.pipeline_mode<synchronous>, transform_indices = @transform_11, window_bounds = array<i64: 1, 4>}, {pipeline_mode = #tpu.pipeline_mode<synchronous>, transform_indices = @transform_12, window_bounds = array<i64: 1, 4>}, {pipeline_mode = #tpu.pipeline_mode<synchronous>, transform_indices = @transform_13, window_bounds = array<i64: 9, 4, 4>}, {pipeline_mode = #tpu.pipeline_mode<synchronous>, transform_indices = @transform_14, window_bounds = array<i64: 1, 4>}, {pipeline_mode = #tpu.pipeline_mode<synchronous>, transform_indices = @transform_15, window_bounds = array<i64: 1, 4>}, {transform_indices = @transform_16, window_bounds = array<i64: 1, 384, 4>}]} {
    %c0 = arith.constant 0 : index
    %c0_0 = arith.constant 0 : index
    %0 = vector.load %arg3[%c0, %c0_0] : memref<384x1xf32, #tpu.memory_space<vmem>>, vector<384x1xf32>
    %cst = arith.constant 0.000000e+00 : f32
    %1 = vector.broadcast %cst : f32 to vector<384x1xf32>
    %2 = arith.cmpf ogt, %0, %1 : vector<384x1xf32>
    %c0_1 = arith.constant 0 : index
    %c0_2 = arith.constant 0 : index
    %c0_3 = arith.constant 0 : index
    %3 = vector.load %arg1[%c0_1, %c0_2, %c0_3] : memref<1x384x8xbf16, #tpu.memory_space<vmem>>, vector<1x384x8xbf16>
    %4 = vector.shape_cast %3 : vector<1x384x8xbf16> to vector<384x8xbf16>
    %c0_4 = arith.constant 0 : index
    %c0_5 = arith.constant 0 : index
    %c0_6 = arith.constant 0 : index
    %5 = vector.load %arg2[%c0_4, %c0_5, %c0_6] : memref<1x384x4xbf16, #tpu.memory_space<vmem>>, vector<1x384x4xbf16>
    %6 = vector.shape_cast %5 : vector<1x384x4xbf16> to vector<384x4xbf16>
    %c0_7 = arith.constant 0 : index
    %c0_8 = arith.constant 0 : index
    %7 = vector.load %arg4[%c0_7, %c0_8] : memref<8x4xbf16, #tpu.memory_space<vmem>>, vector<8x4xbf16>
    %cst_9 = arith.constant dense<0.000000e+00> : vector<384x4xf32>
    %8 = tpu.matmul %4, %7, %cst_9 {dimension_numbers = #tpu.dot_dimension_numbers<[1], [0], [0], [1], [0, 0, 1, 1], [], []>} : vector<384x8xbf16>, vector<8x4xbf16>, vector<384x4xf32> -> vector<384x4xf32>
    %c0_10 = arith.constant 0 : index
    %c0_11 = arith.constant 0 : index
    %9 = vector.load %arg5[%c0_10, %c0_11] : memref<1x4xf32, #tpu.memory_space<vmem>>, vector<1x4xf32>
    %10 = vector.broadcast %9 : vector<1x4xf32> to vector<384x4xf32>
    %11 = arith.mulf %8, %10 : vector<384x4xf32>
    %c0_12 = arith.constant 0 : index
    %c0_13 = arith.constant 0 : index
    %12 = vector.load %arg6[%c0_12, %c0_13] : memref<1x4xf32, #tpu.memory_space<vmem>>, vector<1x4xf32>
    %13 = vector.broadcast %12 : vector<1x4xf32> to vector<384x4xf32>
    %14 = arith.addf %11, %13 : vector<384x4xf32>
    %cst_14 = arith.constant 0.000000e+00 : f32
    %15 = vector.broadcast %cst_14 : f32 to vector<384x4xf32>
    %16 = arith.maximumf %14, %15 : vector<384x4xf32>
    %17 = arith.truncf %16 : vector<384x4xf32> to vector<384x4xbf16>
    %c0_15 = arith.constant 0 : index
    %c0_16 = arith.constant 0 : index
    %18 = vector.load %arg7[%c0_15, %c0_16] : memref<4x4xbf16, #tpu.memory_space<vmem>>, vector<4x4xbf16>
    %cst_17 = arith.constant dense<0.000000e+00> : vector<384x4xf32>
    %19 = tpu.matmul %17, %18, %cst_17 {dimension_numbers = #tpu.dot_dimension_numbers<[1], [0], [0], [1], [0, 0, 1, 1], [], []>} : vector<384x4xbf16>, vector<4x4xbf16>, vector<384x4xf32> -> vector<384x4xf32>
    %c0_18 = arith.constant 0 : index
    %c0_19 = arith.constant 0 : index
    %20 = vector.load %arg8[%c0_18, %c0_19] : memref<4x4xbf16, #tpu.memory_space<vmem>>, vector<4x4xbf16>
    %cst_20 = arith.constant dense<0.000000e+00> : vector<384x4xf32>
    %21 = tpu.matmul %6, %20, %cst_20 {dimension_numbers = #tpu.dot_dimension_numbers<[1], [0], [0], [1], [0, 0, 1, 1], [], []>} : vector<384x4xbf16>, vector<4x4xbf16>, vector<384x4xf32> -> vector<384x4xf32>
    %22 = arith.addf %19, %21 : vector<384x4xf32>
    %c0_21 = arith.constant 0 : index
    %c0_22 = arith.constant 0 : index
    %23 = vector.load %arg9[%c0_21, %c0_22] : memref<1x4xf32, #tpu.memory_space<vmem>>, vector<1x4xf32>
    %24 = vector.broadcast %23 : vector<1x4xf32> to vector<384x4xf32>
    %25 = arith.mulf %22, %24 : vector<384x4xf32>
    %c0_23 = arith.constant 0 : index
    %c0_24 = arith.constant 0 : index
    %26 = vector.load %arg10[%c0_23, %c0_24] : memref<1x4xf32, #tpu.memory_space<vmem>>, vector<1x4xf32>
    %27 = vector.broadcast %26 : vector<1x4xf32> to vector<384x4xf32>
    %28 = arith.addf %25, %27 : vector<384x4xf32>
    %cst_25 = arith.constant 0.000000e+00 : f32
    %29 = vector.broadcast %cst_25 : f32 to vector<384x4xf32>
    %30 = arith.maximumf %28, %29 : vector<384x4xf32>
    %cst_26 = arith.constant 0.000000e+00 : bf16
    %31 = vector.broadcast %cst_26 : bf16 to vector<24x4xbf16>
    %c8 = arith.constant 8 : index
    %c0_27 = arith.constant 0 : index
    %32 = vector.load %arg18[%c8, %c0_27] : memref<448x4xbf16, #tpu.memory_space<vmem>>, vector<24x4xbf16>
    tpu.vector_store %arg18[%c8, %c0_27], %31 {strides = array<i32>} : memref<448x4xbf16, #tpu.memory_space<vmem>>, vector<24x4xbf16>,
    %cst_28 = arith.constant 0.000000e+00 : f32
    %33 = vector.shape_cast %2 : vector<384x1xi1> to vector<384x1xi1>
    %34 = vector.broadcast %33 : vector<384x1xi1> to vector<384x4xi1>
    %35 = vector.broadcast %cst_28 : f32 to vector<384x4xf32>
    %36 = arith.select %34, %30, %35 : vector<384x4xi1>, vector<384x4xf32>
    %37 = arith.truncf %36 : vector<384x4xf32> to vector<384x4xbf16>
    %c32 = arith.constant 32 : index
    %c0_29 = arith.constant 0 : index
    %38 = vector.load %arg18[%c32, %c0_29] : memref<448x4xbf16, #tpu.memory_space<vmem>>, vector<384x4xbf16>
    tpu.vector_store %arg18[%c32, %c0_29], %37 {strides = array<i32>} : memref<448x4xbf16, #tpu.memory_space<vmem>>, vector<384x4xbf16>,
    %c416 = arith.constant 416 : index
    %c0_30 = arith.constant 0 : index
    %39 = vector.load %arg18[%c416, %c0_30] : memref<448x4xbf16, #tpu.memory_space<vmem>>, vector<24x4xbf16>
    tpu.vector_store %arg18[%c416, %c0_30], %31 {strides = array<i32>} : memref<448x4xbf16, #tpu.memory_space<vmem>>, vector<24x4xbf16>,
    %cst_31 = arith.constant 0.000000e+00 : f32
    %40 = vector.broadcast %cst_31 : f32 to vector<384x4xf32>
    %c7 = arith.constant 7 : index
    %c0_32 = arith.constant 0 : index
    %41 = vector.load %arg18[%c7, %c0_32] : memref<448x4xbf16, #tpu.memory_space<vmem>>, vector<384x4xbf16>
    %c0_33 = arith.constant 0 : index
    %c0_34 = arith.constant 0 : index
    %c0_35 = arith.constant 0 : index
    %42 = vector.load %arg11[%c0_33, %c0_34, %c0_35] : memref<9x4x4xbf16, #tpu.memory_space<vmem>>, vector<1x4x4xbf16>
    %43 = vector.shape_cast %42 : vector<1x4x4xbf16> to vector<4x4xbf16>
    %cst_36 = arith.constant dense<0.000000e+00> : vector<384x4xf32>
    %44 = tpu.matmul %41, %43, %cst_36 {dimension_numbers = #tpu.dot_dimension_numbers<[1], [0], [0], [1], [0, 0, 1, 1], [], []>} : vector<384x4xbf16>, vector<4x4xbf16>, vector<384x4xf32> -> vector<384x4xf32>
    %45 = arith.addf %40, %44 : vector<384x4xf32>
    %c8_37 = arith.constant 8 : index
    %c0_38 = arith.constant 0 : index
    %46 = vector.load %arg18[%c8_37, %c0_38] : memref<448x4xbf16, #tpu.memory_space<vmem>>, vector<384x4xbf16>
    %c1 = arith.constant 1 : index
    %c0_39 = arith.constant 0 : index
    %c0_40 = arith.constant 0 : index
    %47 = vector.load %arg11[%c1, %c0_39, %c0_40] : memref<9x4x4xbf16, #tpu.memory_space<vmem>>, vector<1x4x4xbf16>
    %48 = vector.shape_cast %47 : vector<1x4x4xbf16> to vector<4x4xbf16>
    %cst_41 = arith.constant dense<0.000000e+00> : vector<384x4xf32>
    %49 = tpu.matmul %46, %48, %cst_41 {dimension_numbers = #tpu.dot_dimension_numbers<[1], [0], [0], [1], [0, 0, 1, 1], [], []>} : vector<384x4xbf16>, vector<4x4xbf16>, vector<384x4xf32> -> vector<384x4xf32>
    %50 = arith.addf %45, %49 : vector<384x4xf32>
    %c9 = arith.constant 9 : index
    %c0_42 = arith.constant 0 : index
    %51 = vector.load %arg18[%c9, %c0_42] : memref<448x4xbf16, #tpu.memory_space<vmem>>, vector<384x4xbf16>
    %c2 = arith.constant 2 : index
    %c0_43 = arith.constant 0 : index
    %c0_44 = arith.constant 0 : index
    %52 = vector.load %arg11[%c2, %c0_43, %c0_44] : memref<9x4x4xbf16, #tpu.memory_space<vmem>>, vector<1x4x4xbf16>
    %53 = vector.shape_cast %52 : vector<1x4x4xbf16> to vector<4x4xbf16>
    %cst_45 = arith.constant dense<0.000000e+00> : vector<384x4xf32>
    %54 = tpu.matmul %51, %53, %cst_45 {dimension_numbers = #tpu.dot_dimension_numbers<[1], [0], [0], [1], [0, 0, 1, 1], [], []>} : vector<384x4xbf16>, vector<4x4xbf16>, vector<384x4xf32> -> vector<384x4xf32>
    %55 = arith.addf %50, %54 : vector<384x4xf32>
    %c31 = arith.constant 31 : index
    %c0_46 = arith.constant 0 : index
    %56 = vector.load %arg18[%c31, %c0_46] : memref<448x4xbf16, #tpu.memory_space<vmem>>, vector<384x4xbf16>
    %c3 = arith.constant 3 : index
    %c0_47 = arith.constant 0 : index
    %c0_48 = arith.constant 0 : index
    %57 = vector.load %arg11[%c3, %c0_47, %c0_48] : memref<9x4x4xbf16, #tpu.memory_space<vmem>>, vector<1x4x4xbf16>
    %58 = vector.shape_cast %57 : vector<1x4x4xbf16> to vector<4x4xbf16>
    %cst_49 = arith.constant dense<0.000000e+00> : vector<384x4xf32>
    %59 = tpu.matmul %56, %58, %cst_49 {dimension_numbers = #tpu.dot_dimension_numbers<[1], [0], [0], [1], [0, 0, 1, 1], [], []>} : vector<384x4xbf16>, vector<4x4xbf16>, vector<384x4xf32> -> vector<384x4xf32>
    %60 = arith.addf %55, %59 : vector<384x4xf32>
    %c32_50 = arith.constant 32 : index
    %c0_51 = arith.constant 0 : index
    %61 = vector.load %arg18[%c32_50, %c0_51] : memref<448x4xbf16, #tpu.memory_space<vmem>>, vector<384x4xbf16>
    %c4 = arith.constant 4 : index
    %c0_52 = arith.constant 0 : index
    %c0_53 = arith.constant 0 : index
    %62 = vector.load %arg11[%c4, %c0_52, %c0_53] : memref<9x4x4xbf16, #tpu.memory_space<vmem>>, vector<1x4x4xbf16>
    %63 = vector.shape_cast %62 : vector<1x4x4xbf16> to vector<4x4xbf16>
    %cst_54 = arith.constant dense<0.000000e+00> : vector<384x4xf32>
    %64 = tpu.matmul %61, %63, %cst_54 {dimension_numbers = #tpu.dot_dimension_numbers<[1], [0], [0], [1], [0, 0, 1, 1], [], []>} : vector<384x4xbf16>, vector<4x4xbf16>, vector<384x4xf32> -> vector<384x4xf32>
    %65 = arith.addf %60, %64 : vector<384x4xf32>
    %c33 = arith.constant 33 : index
    %c0_55 = arith.constant 0 : index
    %66 = vector.load %arg18[%c33, %c0_55] : memref<448x4xbf16, #tpu.memory_space<vmem>>, vector<384x4xbf16>
    %c5 = arith.constant 5 : index
    %c0_56 = arith.constant 0 : index
    %c0_57 = arith.constant 0 : index
    %67 = vector.load %arg11[%c5, %c0_56, %c0_57] : memref<9x4x4xbf16, #tpu.memory_space<vmem>>, vector<1x4x4xbf16>
    %68 = vector.shape_cast %67 : vector<1x4x4xbf16> to vector<4x4xbf16>
    %cst_58 = arith.constant dense<0.000000e+00> : vector<384x4xf32>
    %69 = tpu.matmul %66, %68, %cst_58 {dimension_numbers = #tpu.dot_dimension_numbers<[1], [0], [0], [1], [0, 0, 1, 1], [], []>} : vector<384x4xbf16>, vector<4x4xbf16>, vector<384x4xf32> -> vector<384x4xf32>
    %70 = arith.addf %65, %69 : vector<384x4xf32>
    %c55 = arith.constant 55 : index
    %c0_59 = arith.constant 0 : index
    %71 = vector.load %arg18[%c55, %c0_59] : memref<448x4xbf16, #tpu.memory_space<vmem>>, vector<384x4xbf16>
    %c6 = arith.constant 6 : index
    %c0_60 = arith.constant 0 : index
    %c0_61 = arith.constant 0 : index
    %72 = vector.load %arg11[%c6, %c0_60, %c0_61] : memref<9x4x4xbf16, #tpu.memory_space<vmem>>, vector<1x4x4xbf16>
    %73 = vector.shape_cast %72 : vector<1x4x4xbf16> to vector<4x4xbf16>
    %cst_62 = arith.constant dense<0.000000e+00> : vector<384x4xf32>
    %74 = tpu.matmul %71, %73, %cst_62 {dimension_numbers = #tpu.dot_dimension_numbers<[1], [0], [0], [1], [0, 0, 1, 1], [], []>} : vector<384x4xbf16>, vector<4x4xbf16>, vector<384x4xf32> -> vector<384x4xf32>
    %75 = arith.addf %70, %74 : vector<384x4xf32>
    %c56 = arith.constant 56 : index
    %c0_63 = arith.constant 0 : index
    %76 = vector.load %arg18[%c56, %c0_63] : memref<448x4xbf16, #tpu.memory_space<vmem>>, vector<384x4xbf16>
    %c7_64 = arith.constant 7 : index
    %c0_65 = arith.constant 0 : index
    %c0_66 = arith.constant 0 : index
    %77 = vector.load %arg11[%c7_64, %c0_65, %c0_66] : memref<9x4x4xbf16, #tpu.memory_space<vmem>>, vector<1x4x4xbf16>
    %78 = vector.shape_cast %77 : vector<1x4x4xbf16> to vector<4x4xbf16>
    %cst_67 = arith.constant dense<0.000000e+00> : vector<384x4xf32>
    %79 = tpu.matmul %76, %78, %cst_67 {dimension_numbers = #tpu.dot_dimension_numbers<[1], [0], [0], [1], [0, 0, 1, 1], [], []>} : vector<384x4xbf16>, vector<4x4xbf16>, vector<384x4xf32> -> vector<384x4xf32>
    %80 = arith.addf %75, %79 : vector<384x4xf32>
    %c57 = arith.constant 57 : index
    %c0_68 = arith.constant 0 : index
    %81 = vector.load %arg18[%c57, %c0_68] : memref<448x4xbf16, #tpu.memory_space<vmem>>, vector<384x4xbf16>
    %c8_69 = arith.constant 8 : index
    %c0_70 = arith.constant 0 : index
    %c0_71 = arith.constant 0 : index
    %82 = vector.load %arg11[%c8_69, %c0_70, %c0_71] : memref<9x4x4xbf16, #tpu.memory_space<vmem>>, vector<1x4x4xbf16>
    %83 = vector.shape_cast %82 : vector<1x4x4xbf16> to vector<4x4xbf16>
    %cst_72 = arith.constant dense<0.000000e+00> : vector<384x4xf32>
    %84 = tpu.matmul %81, %83, %cst_72 {dimension_numbers = #tpu.dot_dimension_numbers<[1], [0], [0], [1], [0, 0, 1, 1], [], []>} : vector<384x4xbf16>, vector<4x4xbf16>, vector<384x4xf32> -> vector<384x4xf32>
    %85 = arith.addf %80, %84 : vector<384x4xf32>
    %c0_73 = arith.constant 0 : index
    %c0_74 = arith.constant 0 : index
    %86 = vector.load %arg12[%c0_73, %c0_74] : memref<1x4xf32, #tpu.memory_space<vmem>>, vector<1x4xf32>
    %87 = vector.broadcast %86 : vector<1x4xf32> to vector<384x4xf32>
    %88 = arith.mulf %85, %87 : vector<384x4xf32>
    %c0_75 = arith.constant 0 : index
    %c0_76 = arith.constant 0 : index
    %89 = vector.load %arg13[%c0_75, %c0_76] : memref<1x4xf32, #tpu.memory_space<vmem>>, vector<1x4xf32>
    %90 = vector.broadcast %89 : vector<1x4xf32> to vector<384x4xf32>
    %91 = arith.addf %88, %90 : vector<384x4xf32>
    %cst_77 = arith.constant 0.000000e+00 : f32
    %92 = vector.broadcast %cst_77 : f32 to vector<384x4xf32>
    %93 = arith.maximumf %91, %92 : vector<384x4xf32>
    %c8_78 = arith.constant 8 : index
    %c0_79 = arith.constant 0 : index
    %94 = vector.load %arg19[%c8_78, %c0_79] : memref<448x4xbf16, #tpu.memory_space<vmem>>, vector<24x4xbf16>
    tpu.vector_store %arg19[%c8_78, %c0_79], %31 {strides = array<i32>} : memref<448x4xbf16, #tpu.memory_space<vmem>>, vector<24x4xbf16>,
    %cst_80 = arith.constant 0.000000e+00 : f32
    %95 = vector.shape_cast %2 : vector<384x1xi1> to vector<384x1xi1>
    %96 = vector.broadcast %95 : vector<384x1xi1> to vector<384x4xi1>
    %97 = vector.broadcast %cst_80 : f32 to vector<384x4xf32>
    %98 = arith.select %96, %93, %97 : vector<384x4xi1>, vector<384x4xf32>
    %99 = arith.truncf %98 : vector<384x4xf32> to vector<384x4xbf16>
    %c32_81 = arith.constant 32 : index
    %c0_82 = arith.constant 0 : index
    %100 = vector.load %arg19[%c32_81, %c0_82] : memref<448x4xbf16, #tpu.memory_space<vmem>>, vector<384x4xbf16>
    tpu.vector_store %arg19[%c32_81, %c0_82], %99 {strides = array<i32>} : memref<448x4xbf16, #tpu.memory_space<vmem>>, vector<384x4xbf16>,
    %c416_83 = arith.constant 416 : index
    %c0_84 = arith.constant 0 : index
    %101 = vector.load %arg19[%c416_83, %c0_84] : memref<448x4xbf16, #tpu.memory_space<vmem>>, vector<24x4xbf16>
    tpu.vector_store %arg19[%c416_83, %c0_84], %31 {strides = array<i32>} : memref<448x4xbf16, #tpu.memory_space<vmem>>, vector<24x4xbf16>,
    %cst_85 = arith.constant 0.000000e+00 : f32
    %102 = vector.broadcast %cst_85 : f32 to vector<384x4xf32>
    %c7_86 = arith.constant 7 : index
    %c0_87 = arith.constant 0 : index
    %103 = vector.load %arg19[%c7_86, %c0_87] : memref<448x4xbf16, #tpu.memory_space<vmem>>, vector<384x4xbf16>
    %c0_88 = arith.constant 0 : index
    %c0_89 = arith.constant 0 : index
    %c0_90 = arith.constant 0 : index
    %104 = vector.load %arg14[%c0_88, %c0_89, %c0_90] : memref<9x4x4xbf16, #tpu.memory_space<vmem>>, vector<1x4x4xbf16>
    %105 = vector.shape_cast %104 : vector<1x4x4xbf16> to vector<4x4xbf16>
    %cst_91 = arith.constant dense<0.000000e+00> : vector<384x4xf32>
    %106 = tpu.matmul %103, %105, %cst_91 {dimension_numbers = #tpu.dot_dimension_numbers<[1], [0], [0], [1], [0, 0, 1, 1], [], []>} : vector<384x4xbf16>, vector<4x4xbf16>, vector<384x4xf32> -> vector<384x4xf32>
    %107 = arith.addf %102, %106 : vector<384x4xf32>
    %c8_92 = arith.constant 8 : index
    %c0_93 = arith.constant 0 : index
    %108 = vector.load %arg19[%c8_92, %c0_93] : memref<448x4xbf16, #tpu.memory_space<vmem>>, vector<384x4xbf16>
    %c1_94 = arith.constant 1 : index
    %c0_95 = arith.constant 0 : index
    %c0_96 = arith.constant 0 : index
    %109 = vector.load %arg14[%c1_94, %c0_95, %c0_96] : memref<9x4x4xbf16, #tpu.memory_space<vmem>>, vector<1x4x4xbf16>
    %110 = vector.shape_cast %109 : vector<1x4x4xbf16> to vector<4x4xbf16>
    %cst_97 = arith.constant dense<0.000000e+00> : vector<384x4xf32>
    %111 = tpu.matmul %108, %110, %cst_97 {dimension_numbers = #tpu.dot_dimension_numbers<[1], [0], [0], [1], [0, 0, 1, 1], [], []>} : vector<384x4xbf16>, vector<4x4xbf16>, vector<384x4xf32> -> vector<384x4xf32>
    %112 = arith.addf %107, %111 : vector<384x4xf32>
    %c9_98 = arith.constant 9 : index
    %c0_99 = arith.constant 0 : index
    %113 = vector.load %arg19[%c9_98, %c0_99] : memref<448x4xbf16, #tpu.memory_space<vmem>>, vector<384x4xbf16>
    %c2_100 = arith.constant 2 : index
    %c0_101 = arith.constant 0 : index
    %c0_102 = arith.constant 0 : index
    %114 = vector.load %arg14[%c2_100, %c0_101, %c0_102] : memref<9x4x4xbf16, #tpu.memory_space<vmem>>, vector<1x4x4xbf16>
    %115 = vector.shape_cast %114 : vector<1x4x4xbf16> to vector<4x4xbf16>
    %cst_103 = arith.constant dense<0.000000e+00> : vector<384x4xf32>
    %116 = tpu.matmul %113, %115, %cst_103 {dimension_numbers = #tpu.dot_dimension_numbers<[1], [0], [0], [1], [0, 0, 1, 1], [], []>} : vector<384x4xbf16>, vector<4x4xbf16>, vector<384x4xf32> -> vector<384x4xf32>
    %117 = arith.addf %112, %116 : vector<384x4xf32>
    %c31_104 = arith.constant 31 : index
    %c0_105 = arith.constant 0 : index
    %118 = vector.load %arg19[%c31_104, %c0_105] : memref<448x4xbf16, #tpu.memory_space<vmem>>, vector<384x4xbf16>
    %c3_106 = arith.constant 3 : index
    %c0_107 = arith.constant 0 : index
    %c0_108 = arith.constant 0 : index
    %119 = vector.load %arg14[%c3_106, %c0_107, %c0_108] : memref<9x4x4xbf16, #tpu.memory_space<vmem>>, vector<1x4x4xbf16>
    %120 = vector.shape_cast %119 : vector<1x4x4xbf16> to vector<4x4xbf16>
    %cst_109 = arith.constant dense<0.000000e+00> : vector<384x4xf32>
    %121 = tpu.matmul %118, %120, %cst_109 {dimension_numbers = #tpu.dot_dimension_numbers<[1], [0], [0], [1], [0, 0, 1, 1], [], []>} : vector<384x4xbf16>, vector<4x4xbf16>, vector<384x4xf32> -> vector<384x4xf32>
    %122 = arith.addf %117, %121 : vector<384x4xf32>
    %c32_110 = arith.constant 32 : index
    %c0_111 = arith.constant 0 : index
    %123 = vector.load %arg19[%c32_110, %c0_111] : memref<448x4xbf16, #tpu.memory_space<vmem>>, vector<384x4xbf16>
    %c4_112 = arith.constant 4 : index
    %c0_113 = arith.constant 0 : index
    %c0_114 = arith.constant 0 : index
    %124 = vector.load %arg14[%c4_112, %c0_113, %c0_114] : memref<9x4x4xbf16, #tpu.memory_space<vmem>>, vector<1x4x4xbf16>
    %125 = vector.shape_cast %124 : vector<1x4x4xbf16> to vector<4x4xbf16>
    %cst_115 = arith.constant dense<0.000000e+00> : vector<384x4xf32>
    %126 = tpu.matmul %123, %125, %cst_115 {dimension_numbers = #tpu.dot_dimension_numbers<[1], [0], [0], [1], [0, 0, 1, 1], [], []>} : vector<384x4xbf16>, vector<4x4xbf16>, vector<384x4xf32> -> vector<384x4xf32>
    %127 = arith.addf %122, %126 : vector<384x4xf32>
    %c33_116 = arith.constant 33 : index
    %c0_117 = arith.constant 0 : index
    %128 = vector.load %arg19[%c33_116, %c0_117] : memref<448x4xbf16, #tpu.memory_space<vmem>>, vector<384x4xbf16>
    %c5_118 = arith.constant 5 : index
    %c0_119 = arith.constant 0 : index
    %c0_120 = arith.constant 0 : index
    %129 = vector.load %arg14[%c5_118, %c0_119, %c0_120] : memref<9x4x4xbf16, #tpu.memory_space<vmem>>, vector<1x4x4xbf16>
    %130 = vector.shape_cast %129 : vector<1x4x4xbf16> to vector<4x4xbf16>
    %cst_121 = arith.constant dense<0.000000e+00> : vector<384x4xf32>
    %131 = tpu.matmul %128, %130, %cst_121 {dimension_numbers = #tpu.dot_dimension_numbers<[1], [0], [0], [1], [0, 0, 1, 1], [], []>} : vector<384x4xbf16>, vector<4x4xbf16>, vector<384x4xf32> -> vector<384x4xf32>
    %132 = arith.addf %127, %131 : vector<384x4xf32>
    %c55_122 = arith.constant 55 : index
    %c0_123 = arith.constant 0 : index
    %133 = vector.load %arg19[%c55_122, %c0_123] : memref<448x4xbf16, #tpu.memory_space<vmem>>, vector<384x4xbf16>
    %c6_124 = arith.constant 6 : index
    %c0_125 = arith.constant 0 : index
    %c0_126 = arith.constant 0 : index
    %134 = vector.load %arg14[%c6_124, %c0_125, %c0_126] : memref<9x4x4xbf16, #tpu.memory_space<vmem>>, vector<1x4x4xbf16>
    %135 = vector.shape_cast %134 : vector<1x4x4xbf16> to vector<4x4xbf16>
    %cst_127 = arith.constant dense<0.000000e+00> : vector<384x4xf32>
    %136 = tpu.matmul %133, %135, %cst_127 {dimension_numbers = #tpu.dot_dimension_numbers<[1], [0], [0], [1], [0, 0, 1, 1], [], []>} : vector<384x4xbf16>, vector<4x4xbf16>, vector<384x4xf32> -> vector<384x4xf32>
    %137 = arith.addf %132, %136 : vector<384x4xf32>
    %c56_128 = arith.constant 56 : index
    %c0_129 = arith.constant 0 : index
    %138 = vector.load %arg19[%c56_128, %c0_129] : memref<448x4xbf16, #tpu.memory_space<vmem>>, vector<384x4xbf16>
    %c7_130 = arith.constant 7 : index
    %c0_131 = arith.constant 0 : index
    %c0_132 = arith.constant 0 : index
    %139 = vector.load %arg14[%c7_130, %c0_131, %c0_132] : memref<9x4x4xbf16, #tpu.memory_space<vmem>>, vector<1x4x4xbf16>
    %140 = vector.shape_cast %139 : vector<1x4x4xbf16> to vector<4x4xbf16>
    %cst_133 = arith.constant dense<0.000000e+00> : vector<384x4xf32>
    %141 = tpu.matmul %138, %140, %cst_133 {dimension_numbers = #tpu.dot_dimension_numbers<[1], [0], [0], [1], [0, 0, 1, 1], [], []>} : vector<384x4xbf16>, vector<4x4xbf16>, vector<384x4xf32> -> vector<384x4xf32>
    %142 = arith.addf %137, %141 : vector<384x4xf32>
    %c57_134 = arith.constant 57 : index
    %c0_135 = arith.constant 0 : index
    %143 = vector.load %arg19[%c57_134, %c0_135] : memref<448x4xbf16, #tpu.memory_space<vmem>>, vector<384x4xbf16>
    %c8_136 = arith.constant 8 : index
    %c0_137 = arith.constant 0 : index
    %c0_138 = arith.constant 0 : index
    %144 = vector.load %arg14[%c8_136, %c0_137, %c0_138] : memref<9x4x4xbf16, #tpu.memory_space<vmem>>, vector<1x4x4xbf16>
    %145 = vector.shape_cast %144 : vector<1x4x4xbf16> to vector<4x4xbf16>
    %cst_139 = arith.constant dense<0.000000e+00> : vector<384x4xf32>
    %146 = tpu.matmul %143, %145, %cst_139 {dimension_numbers = #tpu.dot_dimension_numbers<[1], [0], [0], [1], [0, 0, 1, 1], [], []>} : vector<384x4xbf16>, vector<4x4xbf16>, vector<384x4xf32> -> vector<384x4xf32>
    %147 = arith.addf %142, %146 : vector<384x4xf32>
    %c0_140 = arith.constant 0 : index
    %c0_141 = arith.constant 0 : index
    %148 = vector.load %arg15[%c0_140, %c0_141] : memref<1x4xf32, #tpu.memory_space<vmem>>, vector<1x4xf32>
    %149 = vector.broadcast %148 : vector<1x4xf32> to vector<384x4xf32>
    %150 = arith.mulf %147, %149 : vector<384x4xf32>
    %c0_142 = arith.constant 0 : index
    %c0_143 = arith.constant 0 : index
    %151 = vector.load %arg16[%c0_142, %c0_143] : memref<1x4xf32, #tpu.memory_space<vmem>>, vector<1x4xf32>
    %152 = vector.broadcast %151 : vector<1x4xf32> to vector<384x4xf32>
    %153 = arith.addf %150, %152 : vector<384x4xf32>
    %cst_144 = arith.constant 0.000000e+00 : f32
    %154 = vector.broadcast %cst_144 : f32 to vector<384x4xf32>
    %155 = arith.maximumf %153, %154 : vector<384x4xf32>
    %c0_145 = arith.constant 0 : index
    %c0_146 = arith.constant 0 : index
    %c0_147 = arith.constant 0 : index
    %156 = vector.load %arg17[%c0_145, %c0_146, %c0_147] : memref<1x384x4xf32, #tpu.memory_space<vmem>>, vector<1x384x4xf32>
    %157 = vector.shape_cast %156 : vector<1x384x4xf32> to vector<384x4xf32>
    %158 = vector.shape_cast %155 : vector<384x4xf32> to vector<1x384x4xf32>
    tpu.vector_store %arg17[%c0_145, %c0_146, %c0_147], %158 {strides = array<i32>} : memref<1x384x4xf32, #tpu.memory_space<vmem>>, vector<1x384x4xf32>,
    return
  }
  func.func @transform_0(%arg0: i32) -> (i32, i32, i32) {
    %c0_i32 = arith.constant 0 : i32
    %c0_i32_0 = arith.constant 0 : i32
    %c0_i32_1 = arith.constant 0 : i32
    return %arg0, %c0_i32, %c0_i32_0 : i32, i32, i32
  }
  func.func @transform_1(%arg0: i32) -> (i32, i32, i32) {
    %c0_i32 = arith.constant 0 : i32
    %c0_i32_0 = arith.constant 0 : i32
    %c0_i32_1 = arith.constant 0 : i32
    return %arg0, %c0_i32, %c0_i32_0 : i32, i32, i32
  }
  func.func @transform_2(%arg0: i32) -> (i32, i32) {
    %c0_i32 = arith.constant 0 : i32
    %c0_i32_0 = arith.constant 0 : i32
    %c0_i32_1 = arith.constant 0 : i32
    return %c0_i32, %c0_i32_0 : i32, i32
  }
  func.func @transform_3(%arg0: i32) -> (i32, i32) {
    %c0_i32 = arith.constant 0 : i32
    %c0_i32_0 = arith.constant 0 : i32
    %c0_i32_1 = arith.constant 0 : i32
    return %c0_i32, %c0_i32_0 : i32, i32
  }
  func.func @transform_4(%arg0: i32) -> (i32, i32) {
    %c0_i32 = arith.constant 0 : i32
    %c0_i32_0 = arith.constant 0 : i32
    %c0_i32_1 = arith.constant 0 : i32
    return %c0_i32, %c0_i32_0 : i32, i32
  }
  func.func @transform_5(%arg0: i32) -> (i32, i32) {
    %c0_i32 = arith.constant 0 : i32
    %c0_i32_0 = arith.constant 0 : i32
    %c0_i32_1 = arith.constant 0 : i32
    return %c0_i32, %c0_i32_0 : i32, i32
  }
  func.func @transform_6(%arg0: i32) -> (i32, i32) {
    %c0_i32 = arith.constant 0 : i32
    %c0_i32_0 = arith.constant 0 : i32
    %c0_i32_1 = arith.constant 0 : i32
    return %c0_i32, %c0_i32_0 : i32, i32
  }
  func.func @transform_7(%arg0: i32) -> (i32, i32) {
    %c0_i32 = arith.constant 0 : i32
    %c0_i32_0 = arith.constant 0 : i32
    %c0_i32_1 = arith.constant 0 : i32
    return %c0_i32, %c0_i32_0 : i32, i32
  }
  func.func @transform_8(%arg0: i32) -> (i32, i32) {
    %c0_i32 = arith.constant 0 : i32
    %c0_i32_0 = arith.constant 0 : i32
    %c0_i32_1 = arith.constant 0 : i32
    return %c0_i32, %c0_i32_0 : i32, i32
  }
  func.func @transform_9(%arg0: i32) -> (i32, i32) {
    %c0_i32 = arith.constant 0 : i32
    %c0_i32_0 = arith.constant 0 : i32
    %c0_i32_1 = arith.constant 0 : i32
    return %c0_i32, %c0_i32_0 : i32, i32
  }
  func.func @transform_10(%arg0: i32) -> (i32, i32, i32) {
    %c0_i32 = arith.constant 0 : i32
    %c0_i32_0 = arith.constant 0 : i32
    %c0_i32_1 = arith.constant 0 : i32
    %c0_i32_2 = arith.constant 0 : i32
    return %c0_i32, %c0_i32_0, %c0_i32_1 : i32, i32, i32
  }
  func.func @transform_11(%arg0: i32) -> (i32, i32) {
    %c0_i32 = arith.constant 0 : i32
    %c0_i32_0 = arith.constant 0 : i32
    %c0_i32_1 = arith.constant 0 : i32
    return %c0_i32, %c0_i32_0 : i32, i32
  }
  func.func @transform_12(%arg0: i32) -> (i32, i32) {
    %c0_i32 = arith.constant 0 : i32
    %c0_i32_0 = arith.constant 0 : i32
    %c0_i32_1 = arith.constant 0 : i32
    return %c0_i32, %c0_i32_0 : i32, i32
  }
  func.func @transform_13(%arg0: i32) -> (i32, i32, i32) {
    %c0_i32 = arith.constant 0 : i32
    %c0_i32_0 = arith.constant 0 : i32
    %c0_i32_1 = arith.constant 0 : i32
    %c0_i32_2 = arith.constant 0 : i32
    return %c0_i32, %c0_i32_0, %c0_i32_1 : i32, i32, i32
  }
  func.func @transform_14(%arg0: i32) -> (i32, i32) {
    %c0_i32 = arith.constant 0 : i32
    %c0_i32_0 = arith.constant 0 : i32
    %c0_i32_1 = arith.constant 0 : i32
    return %c0_i32, %c0_i32_0 : i32, i32
  }
  func.func @transform_15(%arg0: i32) -> (i32, i32) {
    %c0_i32 = arith.constant 0 : i32
    %c0_i32_0 = arith.constant 0 : i32
    %c0_i32_1 = arith.constant 0 : i32
    return %c0_i32, %c0_i32_0 : i32, i32
  }
  func.func @transform_16(%arg0: i32) -> (i32, i32, i32) {
    %c0_i32 = arith.constant 0 : i32
    %c0_i32_0 = arith.constant 0 : i32
    %c0_i32_1 = arith.constant 0 : i32
    return %arg0, %c0_i32, %c0_i32_0 : i32, i32, i32
  }
}

</mosaic_0001>

<bundles_post_ra>
// kernel: up_stage_forward.1
= control target key start
LH: loop header
LB: loop body
LE: loop exit
PB: predicated region body
PF: predicated region fallthrough
CT: control target
= control target key end

     0   :  { %s14958_s21 = smov 0   ;;  %s19211_s0 = inlined_call_operand.vmem [shape: bf16[2,384,8], index: 0, kind: input, shape index: {}]   ;;  %s19212_s1 = inlined_call_operand.vmem [shape: bf16[2,384,4], index: 1, kind: input, shape index: {}]   ;;  %s19213_s2 = inlined_call_operand.vmem [shape: f32[384,1], index: 2, kind: input, shape index: {}]   ;;  %s19214_s3 = inlined_call_operand.vmem [shape: bf16[8,4], index: 3, kind: input, shape index: {}]   ;;  %s19215_s4 = inlined_call_operand.vmem [shape: f32[1,4], index: 4, kind: input, shape index: {}]   ;;  %s19216_s5 = inlined_call_operand.vmem [shape: f32[1,4], index: 5, kind: input, shape index: {}]   ;;  %s19217_s6 = inlined_call_operand.vmem [shape: bf16[4,4], index: 6, kind: input, shape index: {}]   ;;  %s19218_s7 = inlined_call_operand.vmem [shape: bf16[4,4], index: 7, kind: input, shape index: {}]   ;;  %s19219_s8 = inlined_call_operand.vmem [shape: f32[1,4], index: 8, kind: input, shape index: {}]   ;;  %s19220_s9 = inlined_call_operand.vmem [shape: f32[1,4], index: 9, kind: input, shape index: {}]   ;;  %s19221_s10 = inlined_call_operand.vmem [shape: bf16[9,4,4], index: 10, kind: input, shape index: {}]   ;;  %s19222_s11 = inlined_call_operand.vmem [shape: f32[1,4], index: 11, kind: input, shape index: {}]   ;;  %s19223_s12 = inlined_call_operand.vmem [shape: f32[1,4], index: 12, kind: input, shape index: {}]   ;;  %s19224_s13 = inlined_call_operand.vmem [shape: bf16[9,4,4], index: 13, kind: input, shape index: {}]   ;;  %s19225_s14 = inlined_call_operand.vmem [shape: f32[1,4], index: 14, kind: input, shape index: {}]   ;;  %s19226_s15 = inlined_call_operand.vmem [shape: f32[1,4], index: 15, kind: input, shape index: {}]   ;;  %s19227_s16 = inlined_call_operand.vmem [shape: f32[2,384,4], index: 16, kind: output, shape index: {}]  }
   0x1   :  { %19430 = sst [smem:[#allocation119_spill]] %s19211_s0 }
   0x2 LB: > { %s11778_s22 = sadd.s32 4294967295, %s14870_s21   ;;  %p11782_p0 = scmp.ge.s32.totalorder %s14870_s21, 1  ;;  %s14870_s21 = sphi %s14958_s21, %s26_s21  }
   0x3   : > { %p472_p1 = scmp.lt.s32.totalorder %s14870_s21, 3 }
   0x5   : > { %p473_p2 = pnand %p11782_p0, %p472_p1 }
   0x7   : > { %476 = sbr.rel (%p473_p2) target bundleno = 2570 (0xa0a), region = 84 }
   0xe   : > { %v735_v0 = vld [vmem:[%s19214_s3] sm:$0xf]  ;;  %vm929_vm0 = vcmask 1043456   ;;  %p527_p3 = scmp.lt.s32.totalorder %s11778_s22, 1  ;;  %vm1535_vm1 = vcmask 1041408   ;;  %s19431_s17 = sld [smem:[#allocation119_spill]] }
   0xf   : > { %14757 = vmatprep.subr.msk.bf16.mxu0 %vm929_vm0, %v735_v0  ;;  %v931_v1 = vsel %vm929_vm0, %v735_v0, 0  ;;  %v1341_v2 = vld [vmem:[%s19218_s7] sm:$0x3]  ;;  %vm856_vm2 = vcmask 64512   ;;  %vm1462_vm3 = vcmask 31744   ;;  %v19228_v45 = vmov 0  }
  0x10   : > { %v1340_v3 = vld [vmem:[%s19217_s6] sm:$0x3]  ;;  %12890 = vmatpush3.bf16.msra.mxu0 %v931_v1  ;;  %s19937_s22 = smov (!%p527_p3, %s11778_s22), 1  ;;  %v1537_v4 = vsel %vm1535_vm1, %v1341_v2, 0  ;;  %14759 = vmatprep.subr.msk.bf16.mxu1 %vm1535_vm1, %v1341_v2  ;;  %2224 = vst.msk [vmem:[#allocation2 + $0x8] sm:$0xff] %vm1462_vm3, %v19228_v45  ;;  %2561 = vst.msk [vmem:[#allocation2 + $0xd0] sm:$0xff] %vm1462_vm3, %v19228_v45 }
  0x11   : > { %14758 = vmatprep.subr.msk.bf16.mxu0 %vm1535_vm1, %v1341_v2  ;;  %13940 = vmatpush3.bf16.msra.mxu1 %v1537_v4  ;;  %s14779_s29 = smul.u32 192, %s19937_s22  ;;  %v1837_v16 = vsel %vm1535_vm1, %v1340_v3, 0  ;;  %v543_v43 = vld [vmem:[%s19213_s2] sm:$0xff]  ;;  %7067 = vst.msk [vmem:[#allocation3 + $0x8] sm:$0xff] %vm1462_vm3, %v19228_v45  ;;  %7164 = vst.msk [vmem:[#allocation3 + $0xd0] sm:$0xff] %vm1462_vm3, %v19228_v45  ;;  %v545_v47 = vld [vmem:[%s19213_s2 + $0x10] sm:$0xff] }
  0x12   : > { %14760 = vmatprep.subr.msk.bf16.mxu1 %vm1535_vm1, %v1340_v3  ;;  %vm591_vm4 = vcmp.gt.f32.partialorder %v543_v43, 0.0  ;;  %14790 = vset.pattern.permute.xlu0 %v19228_v45  ;;  %v544_v48 = vld [vmem:[%s19213_s2 + $0x8] sm:$0xff]  ;;  %vm593_vm5 = vcmp.gt.f32.partialorder %v545_v47, 0.0  ;;  %v546_v52 = vld [vmem:[%s19213_s2 + $0x18] sm:$0xff]  ;;  %v547_v53 = vld [vmem:[%s19213_s2 + $0x20] sm:$0xff]  ;;  %s14780_s30 = smul.u32 384, %s19937_s22 }
  0x13   : > { %s15006_s23 = scalar_lea.vmem %s19212_s1, %s14779_s29  ;;  %v2225_v46 = vsel %vm591_vm4, 1, %v19228_v45  ;;  %14791 = vset.pattern.permute.xlu1 %v19228_v45  ;;  %vm592_vm6 = vcmp.gt.f32.partialorder %v544_v48, 0.0  ;;  %v2227_v49 = vsel %vm593_vm5, 1, %v19228_v45  ;;  %vm594_vm7 = vcmp.gt.f32.partialorder %v546_v52, 0.0  ;;  %v548_v57 = vld [vmem:[%s19213_s2 + $0x28] sm:$0xff]  ;;  %v549_v58 = vld [vmem:[%s19213_s2 + $0x30] sm:$0xff] }
  0x14   : > { %s14987_s18 = scalar_lea.vmem %s19431_s17, %s14779_s29  ;;  %v14816_v14 = vld [vmem:[%s15006_s23 + $0x60] sm:$0xff]   ;;  %v14817_v15 = vld [vmem:[%s15006_s23 + $0x68] sm:$0xff]   ;;  %v14818_v17 = vld [vmem:[%s15006_s23 + $0x70] sm:$0xff]   ;;  %2274 = vperm.xlu0 %14790, %v2225_v46   ;;  %v2226_v50 = vsel %vm592_vm6, 1, %v19228_v45  ;;  %2280 = vperm.xlu1 %14791, %v2227_v49   ;;  %vm595_vm8 = vcmp.gt.f32.partialorder %v547_v53, 0.0  ;;  %v2228_v55 = vsel %vm594_vm7, 1, %v19228_v45  ;;  %s19018_s22 = scalar_lea.vmem %s19227_s16, %s14780_s30 }
  0x15   : > { %v14792_v5 = vld [vmem:[%s14987_s18] sm:$0xff]   ;;  %v14793_v6 = vld [vmem:[%s14987_s18 + $0x8] sm:$0xff]   ;;  %v14794_v7 = vld [vmem:[%s14987_s18 + $0x10] sm:$0xff]   ;;  %12965 = vmatprep.mubr.msk.bf16.mxu1 %vm1462_vm3, %v14816_v14  ;;  %v2229_v56 = vsel %vm595_vm8, 1, %v19228_v45  ;;  %vm596_vm9 = vcmp.gt.f32.partialorder %v548_v57, 0.0  ;;  %vm597_vm10 = vcmp.gt.f32.partialorder %v549_v58, 0.0 }
  0x16   : > { %12891 = vmatprep.mubr.msk.bf16.mxu0 %vm856_vm2, %v14792_v5  ;;  %v14795_v8 = vld [vmem:[%s14987_s18 + $0x18] sm:$0xff]   ;;  %v14796_v9 = vld [vmem:[%s14987_s18 + $0x20] sm:$0xff]   ;;  %v14797_v10 = vld [vmem:[%s14987_s18 + $0x28] sm:$0xff]   ;;  %12966 = vmatmul.mubr.msk.bf16.vlgmr.msra.gmra.mrb[0].mxu1 %vm1462_vm3, %v14817_v15  ;;  %v2230_v59 = vsel %vm596_vm9, 1, %v19228_v45  ;;  %v2231_v60 = vsel %vm597_vm10, 1, %v19228_v45 }
  0x17   : > { %12892 = vmatmul.mubr.msk.bf16.vlgmr.msra.gmra.mrb[0].mxu0 %vm856_vm2, %v14793_v6  ;;  %v14798_v11 = vld [vmem:[%s14987_s18 + $0x30] sm:$0xff]   ;;  %v14799_v12 = vld [vmem:[%s14987_s18 + $0x38] sm:$0xff]   ;;  %v14800_v13 = vld [vmem:[%s14987_s18 + $0x40] sm:$0xff]   ;;  %12990 = vmatpush3.bf16.msra.mxu1 %v1837_v16 }
  0x18   : > { %12895 = vmatprep.mubr.msk.bf16.mxu0 %vm856_vm2, %v14794_v7  ;;  %12940 = vmatpush3.bf16.msra.mxu0 %v1537_v4  ;;  %v14801_v18 = vld [vmem:[%s14987_s18 + $0x48] sm:$0xff]   ;;  %v14802_v19 = vld [vmem:[%s14987_s18 + $0x50] sm:$0xff]   ;;  %v14819_v20 = vld [vmem:[%s15006_s23 + $0x78] sm:$0xff]  }
  0x19   : > { %12969 = vmatprep.mubr.msk.bf16.mxu1 %vm1462_vm3, %v14818_v17  ;;  %v14820_v21 = vld [vmem:[%s15006_s23 + $0x80] sm:$0xff]   ;;  %v14803_v22 = vld [vmem:[%s14987_s18 + $0x58] sm:$0xff]   ;;  %v14821_v23 = vld [vmem:[%s15006_s23 + $0x88] sm:$0xff]   ;;  %2277 = vperm.xlu0 %14790, %v2226_v50  }
  0x1a   : > { %v14804_v24 = vld [vmem:[%s14987_s18 + $0x60] sm:$0xff]   ;;  %v14822_v25 = vld [vmem:[%s15006_s23 + $0x90] sm:$0xff]   ;;  %v14805_v26 = vld [vmem:[%s14987_s18 + $0x68] sm:$0xff]   ;;  %2283 = vperm.xlu1 %14791, %v2228_v55  }
  0x1b   : > { %v14823_v27 = vld [vmem:[%s15006_s23 + $0x98] sm:$0xff]   ;;  %v14806_v28 = vld [vmem:[%s14987_s18 + $0x70] sm:$0xff]   ;;  %v14824_v29 = vld [vmem:[%s15006_s23 + $0xa0] sm:$0xff]  }
  0x1c   : > { %v14807_v30 = vld [vmem:[%s14987_s18 + $0x78] sm:$0xff]   ;;  %v14825_v31 = vld [vmem:[%s15006_s23 + $0xa8] sm:$0xff]   ;;  %v14808_v32 = vld [vmem:[%s14987_s18 + $0x80] sm:$0xff]  }
  0x1d   : > { %v14809_v33 = vld [vmem:[%s14987_s18 + $0x88] sm:$0xff]   ;;  %v14810_v34 = vld [vmem:[%s14987_s18 + $0x90] sm:$0xff]   ;;  %v14811_v35 = vld [vmem:[%s14987_s18 + $0x98] sm:$0xff]   ;;  %2286 = vperm.xlu0 %14790, %v2229_v56  }
  0x1e   : > { %12970 = vmatmul.mubr.msk.bf16.gmra.mrb[4].mxu1 %vm1462_vm3, %v14819_v20  ;;  %v14812_v36 = vld [vmem:[%s14987_s18 + $0xa0] sm:$0xff]   ;;  %v14813_v37 = vld [vmem:[%s14987_s18 + $0xa8] sm:$0xff]   ;;  %v14814_v38 = vld [vmem:[%s14987_s18 + $0xb0] sm:$0xff]   ;;  %2289 = vperm.xlu1 %14791, %v2230_v59  }
  0x1f   : > { %12896 = vmatmul.mubr.msk.bf16.gmra.mrb[4].mxu0 %vm856_vm2, %v14795_v8  ;;  %12973 = vmatprep.mubr.msk.bf16.mxu1 %vm1462_vm3, %v14820_v21  ;;  %v14815_v39 = vld [vmem:[%s14987_s18 + $0xb8] sm:$0xff]   ;;  %v14826_v40 = vld [vmem:[%s15006_s23 + $0xb0] sm:$0xff]   ;;  %v14828_v42 = vld [vmem:[%s15006_s23] sm:$0xff]  }
  0x20   : > { %12899 = vmatprep.mubr.msk.bf16.mxu0 %vm856_vm2, %v14796_v9  ;;  %v14827_v41 = vld [vmem:[%s15006_s23 + $0xb8] sm:$0xff]   ;;  %v14829_v44 = vld [vmem:[%s15006_s23 + $0x8] sm:$0xff]   ;;  %v14830_v51 = vld [vmem:[%s15006_s23 + $0x10] sm:$0xff]  }
  0x21   : > { %v14831_v54 = vld [vmem:[%s15006_s23 + $0x18] sm:$0xff]   ;;  %2292 = vperm.xlu0 %14790, %v2231_v60   ;;  %v14832_v61 = vld [vmem:[%s15006_s23 + $0x20] sm:$0xff]   ;;  %v14833_v0 = vld [vmem:[%s15006_s23 + $0x28] sm:$0xff]  }
  0x22   : > { %v550_v62 = vld [vmem:[%s19213_s2 + $0x38] sm:$0xff]  ;;  %v551_v63 = vld [vmem:[%s19213_s2 + $0x40] sm:$0xff]  ;;  %v552_v3 = vld [vmem:[%s19213_s2 + $0x48] sm:$0xff] }
  0x23   : > { %vm598_vm11 = vcmp.gt.f32.partialorder %v550_v62, 0.0  ;;  %vm599_vm12 = vcmp.gt.f32.partialorder %v551_v63, 0.0  ;;  %v553_v4 = vld [vmem:[%s19213_s2 + $0x50] sm:$0xff]  ;;  %vm600_vm13 = vcmp.gt.f32.partialorder %v552_v3, 0.0  ;;  %v554_v8 = vld [vmem:[%s19213_s2 + $0x58] sm:$0xff]  ;;  %v555_v9 = vld [vmem:[%s19213_s2 + $0x60] sm:$0xff] }
  0x24   : > { %v2232_v1 = vsel %vm598_vm11, 1, %v19228_v45  ;;  %v2233_v2 = vsel %vm599_vm12, 1, %v19228_v45  ;;  %vm601_vm14 = vcmp.gt.f32.partialorder %v553_v4, 0.0  ;;  %v2234_v5 = vsel %vm600_vm13, 1, %v19228_v45  ;;  %v14834_v7 = vld [vmem:[%s15006_s23 + $0x30] sm:$0xff]   ;;  %v14836_v17 = vld [vmem:[%s15006_s23 + $0x40] sm:$0xff]  }
  0x25   : > { %2295 = vperm.xlu1 %14791, %v2232_v1   ;;  %2298 = vperm.xlu0 %14790, %v2233_v2   ;;  %v2235_v6 = vsel %vm601_vm14, 1, %v19228_v45  ;;  %vm602_vm15 = vcmp.gt.f32.partialorder %v554_v8, 0.0  ;;  %v557_v14 = vld [vmem:[%s19213_s2 + $0x70] sm:$0xff]  ;;  %v14837_v20 = vld [vmem:[%s15006_s23 + $0x48] sm:$0xff]   ;;  %v570_v46 = vld [vmem:[%s19213_s2 + $0xd8] sm:$0xff] }
  0x26   : > { %12974 = vmatmul.mubr.msk.bf16.gmra.mrb[8].mxu1 %vm1462_vm3, %v14821_v23  ;;  %vm605_vm5 = vcmp.gt.f32.partialorder %v557_v14, 0.0  ;;  %v560_v23 = vld [vmem:[%s19213_s2 + $0x88] sm:$0xff]  ;;  %v571_v47 = vld [vmem:[%s19213_s2 + $0xe0] sm:$0xff]  ;;  %v577_v59 = vld [vmem:[%s19213_s2 + $0x110] sm:$0xff] }
  0x27   : > { %12900 = vmatmul.mubr.msk.bf16.gmra.mrb[8].mxu0 %vm856_vm2, %v14797_v10  ;;  %12977 = vmatprep.mubr.msk.bf16.mxu1 %vm1462_vm3, %v14822_v25  ;;  %v14835_v10 = vld [vmem:[%s15006_s23 + $0x38] sm:$0xff]   ;;  %v2239_v16 = vsel %vm605_vm5, 1, %v19228_v45  ;;  %vm608_vm8 = vcmp.gt.f32.partialorder %v560_v23, 0.0  ;;  %vm618_vm5 = vcmp.gt.f32.partialorder %v570_v46, 0.0  ;;  %v572_v50 = vld [vmem:[%s19213_s2 + $0xe8] sm:$0xff]  ;;  %v575_v55 = vld [vmem:[%s19213_s2 + $0x100] sm:$0xff] }
  0x28   : > { %12903 = vmatprep.mubr.msk.bf16.mxu0 %vm856_vm2, %v14798_v11  ;;  %v2236_v11 = vsel %vm602_vm15, 1, %v19228_v45  ;;  %v2242_v25 = vsel %vm608_vm8, 1, %v19228_v45  ;;  %v2252_v48 = vsel %vm618_vm5, 1, %v19228_v45  ;;  %v576_v58 = vld [vmem:[%s19213_s2 + $0x108] sm:$0xff]  ;;  %v578_v62 = vld [vmem:[%s19213_s2 + $0x118] sm:$0xff]  ;;  %v579_v63 = vld [vmem:[%s19213_s2 + $0x120] sm:$0xff] }
  0x29   : > { %2301 = vperm.xlu1 %14791, %v2234_v5   ;;  %2304 = vperm.xlu0 %14790, %v2235_v6   ;;  %v580_v2 = vld [vmem:[%s19213_s2 + $0x128] sm:$0xff]  ;;  %v581_v3 = vld [vmem:[%s19213_s2 + $0x130] sm:$0xff]  ;;  %v582_v6 = vld [vmem:[%s19213_s2 + $0x138] sm:$0xff] }
  0x2a   : > { %v586_v14 = vld [vmem:[%s19213_s2 + $0x158] sm:$0xff] }
  0x2d   : > { %2307 = vperm.xlu1 %14791, %v2236_v11   ;;  %v585_v11 = vld [vmem:[%s19213_s2 + $0x150] sm:$0xff] }
  0x2e   : > { %12978 = vmatmul.mubr.msk.bf16.gmra.mrb[12].mxu1 %vm1462_vm3, %v14823_v27  ;;  %v14838_v27 = vld [vmem:[%s15006_s23 + $0x50] sm:$0xff]  }
  0x2f   : > { %12904 = vmatmul.mubr.msk.bf16.gmra.mrb[12].mxu0 %vm856_vm2, %v14799_v12  ;;  %12981 = vmatprep.mubr.msk.bf16.mxu1 %vm1462_vm3, %v14824_v29  ;;  %v563_v29 = vld [vmem:[%s19213_s2 + $0xa0] sm:$0xff] }
  0x30   : > { %12907 = vmatprep.mubr.msk.bf16.mxu0 %vm856_vm2, %v14800_v13  ;;  %v556_v13 = vld [vmem:[%s19213_s2 + $0x68] sm:$0xff]  ;;  %vm611_vm11 = vcmp.gt.f32.partialorder %v563_v29, 0.0 }
  0x31   : > { %vm604_vm4 = vcmp.gt.f32.partialorder %v556_v13, 0.0 }
  0x32   : > { %v2238_v15 = vsel %vm604_vm4, 1, %v19228_v45 }
  0x33   : > { %2313 = vperm.xlu1 %14791, %v2238_v15   ;;  %v587_v15 = vld [vmem:[%s19213_s2 + $0x160] sm:$0xff] }
  0x36   : > { %12982 = vmatmul.mubr.msk.bf16.gmra.mrb[16].mxu1 %vm1462_vm3, %v14825_v31 }
  0x37   : > { %12908 = vmatmul.mubr.msk.bf16.gmra.mrb[16].mxu0 %vm856_vm2, %v14801_v18  ;;  %12985 = vmatprep.mubr.msk.bf16.mxu1 %vm1462_vm3, %v14826_v40  ;;  %v558_v18 = vld [vmem:[%s19213_s2 + $0x78] sm:$0xff] }
  0x38   : > { %12911 = vmatprep.mubr.msk.bf16.mxu0 %vm856_vm2, %v14802_v19  ;;  %v559_v19 = vld [vmem:[%s19213_s2 + $0x80] sm:$0xff]  ;;  %vm606_vm6 = vcmp.gt.f32.partialorder %v558_v18, 0.0  ;;  %v588_v18 = vld [vmem:[%s19213_s2 + $0x168] sm:$0xff] }
  0x39   : > { %vm607_vm7 = vcmp.gt.f32.partialorder %v559_v19, 0.0  ;;  %v2240_v21 = vsel %vm606_vm6, 1, %v19228_v45  ;;  %vm619_vm6 = vcmp.gt.f32.partialorder %v571_v47, 0.0  ;;  %v589_v19 = vld [vmem:[%s19213_s2 + $0x170] sm:$0xff] }
  0x3a   : > { %2319 = vperm.xlu1 %14791, %v2240_v21   ;;  %v2253_v49 = vsel %vm619_vm6, 1, %v19228_v45  ;;  %v11910_v21 = vld [vmem:[%s19221_s10 + $0x2] sm:$0x3] }
  0x3b   : > { %14761 = vmatprep.subr.msk.bf16.mxu0 %vm1535_vm1, %v11910_v21 }
  0x3e   : > { %12986 = vmatmul.mubr.msk.bf16.gmra.mrb[20].mxu1 %vm1462_vm3, %v14827_v41  ;;  %2325 = vperm.xlu1 %14791, %v2242_v25   ;;  %v568_v41 = vld [vmem:[%s19213_s2 + $0xc8] sm:$0xff] }
  0x3f   : > { %12912 = vmatmul.mubr.msk.bf16.gmra.mrb[20].mxu0 %vm856_vm2, %v14803_v22  ;;  %v2241_v22 = vsel %vm607_vm7, 1, %v19228_v45  ;;  %vm620_vm7 = vcmp.gt.f32.partialorder %v572_v50, 0.0 }
  0x40   : > { %12915 = vmatprep.mubr.msk.bf16.mxu0 %vm856_vm2, %v14804_v24  ;;  %v561_v24 = vld [vmem:[%s19213_s2 + $0x90] sm:$0xff]  ;;  %v2254_v52 = vsel %vm620_vm7, 1, %v19228_v45  ;;  %vm633_vm7 = vcmp.gt.f32.partialorder %v585_v11, 0.0 }
  0x41   : > { %vm609_vm9 = vcmp.gt.f32.partialorder %v561_v24, 0.0  ;;  %v2267_v13 = vsel %vm633_vm7, 1, %v19228_v45  ;;  %v2741_v24 = vsel %vm1535_vm1, %v11910_v21, 0 }
  0x47   : > { %12916 = vmatmul.mubr.msk.bf16.gmra.mrb[24].mxu0 %vm856_vm2, %v14805_v26  ;;  %v2243_v26 = vsel %vm609_vm9, 1, %v19228_v45 }
  0x48   : > { %12919 = vmatprep.mubr.msk.bf16.mxu0 %vm856_vm2, %v14806_v28  ;;  %v562_v28 = vld [vmem:[%s19213_s2 + $0x98] sm:$0xff] }
  0x49   : > { %vm610_vm10 = vcmp.gt.f32.partialorder %v562_v28, 0.0  ;;  %v15306_v28 = vld [vmem:[%s19216_s5] ss:$0 sm:$0xff] }
  0x4a   : > { %v2244_v31 = vsel %vm610_vm10, 1, %v19228_v45  ;;  %vm623_vm10 = vcmp.gt.f32.partialorder %v575_v55, 0.0 }
  0x4b   : > { %2331 = vperm.xlu1 %14791, %v2244_v31   ;;  %v2257_v57 = vsel %vm623_vm10, 1, %v19228_v45  ;;  %vm636_vm10 = vcmp.gt.f32.partialorder %v588_v18, 0.0 }
  0x4f   : > { %12920 = vmatmul.mubr.msk.bf16.gmra.mrb[28].mxu0 %vm856_vm2, %v14807_v30  ;;  %v14839_v30 = vld [vmem:[%s15006_s23 + $0x58] sm:$0xff]  }
  0x50   : > { %12923 = vmatprep.mubr.msk.bf16.mxu0 %vm856_vm2, %v14808_v32  ;;  %v2245_v32 = vsel %vm611_vm11, 1, %v19228_v45  ;;  %vm624_vm11 = vcmp.gt.f32.partialorder %v576_v58, 0.0 }
  0x51   : > { %v2258_v60 = vsel %vm624_vm11, 1, %v19228_v45  ;;  %vm637_vm11 = vcmp.gt.f32.partialorder %v589_v19, 0.0 }
  0x52   : > { %v2271_v23 = vsel %vm637_vm11, 1, %v19228_v45 }
  0x57   : > { %12924 = vmatmul.mubr.msk.bf16.gmra.mrb[32].mxu0 %vm856_vm2, %v14809_v33  ;;  %v564_v33 = vld [vmem:[%s19213_s2 + $0xa8] sm:$0xff] }
  0x58   : > { %12927 = vmatprep.mubr.msk.bf16.mxu0 %vm856_vm2, %v14810_v34  ;;  %v565_v34 = vld [vmem:[%s19213_s2 + $0xb0] sm:$0xff]  ;;  %vm612_vm12 = vcmp.gt.f32.partialorder %v564_v33, 0.0 }
  0x59   : > { %vm613_vm13 = vcmp.gt.f32.partialorder %v565_v34, 0.0 }
  0x5f   : > { %12928 = vmatmul.mubr.msk.bf16.gmra.mrb[36].mxu0 %vm856_vm2, %v14811_v35  ;;  %v2246_v35 = vsel %vm612_vm12, 1, %v19228_v45  ;;  %vm625_vm12 = vcmp.gt.f32.partialorder %v577_v59, 0.0 }
  0x60   : > { %12931 = vmatprep.mubr.msk.bf16.mxu0 %vm856_vm2, %v14812_v36  ;;  %v2247_v36 = vsel %vm613_vm13, 1, %v19228_v45  ;;  %2337 = vperm.xlu1 %14791, %v2246_v35   ;;  %vm626_vm13 = vcmp.gt.f32.partialorder %v578_v62, 0.0 }
  0x67   : > { %12932 = vmatmul.mubr.msk.bf16.gmra.mrb[40].mxu0 %vm856_vm2, %v14813_v37  ;;  %v566_v37 = vld [vmem:[%s19213_s2 + $0xb8] sm:$0xff] }
  0x68   : > { %12935 = vmatprep.mubr.msk.bf16.mxu0 %vm856_vm2, %v14814_v38  ;;  %v567_v38 = vld [vmem:[%s19213_s2 + $0xc0] sm:$0xff]  ;;  %vm614_vm14 = vcmp.gt.f32.partialorder %v566_v37, 0.0 }
  0x69   : > { %vm615_vm15 = vcmp.gt.f32.partialorder %v567_v38, 0.0 }
  0x6a   : > { %v2249_v40 = vsel %vm615_vm15, 1, %v19228_v45  ;;  %vm628_vm15 = vcmp.gt.f32.partialorder %v580_v2, 0.0 }
  0x6b   : > { %v2262_v4 = vsel %vm628_vm15, 1, %v19228_v45 }
  0x6f   : > { %12936 = vmatmul.mubr.msk.bf16.gmra.mrb[44].mxu0 %vm856_vm2, %v14815_v39  ;;  %vm603_vm2 = vcmp.gt.f32.partialorder %v555_v9, 0.0  ;;  %v2248_v39 = vsel %vm614_vm14, 1, %v19228_v45  ;;  %vm627_vm14 = vcmp.gt.f32.partialorder %v579_v63, 0.0 }
  0x70   : > { %12941 = vmatprep.mubr.msk.bf16.mxu0 %vm1462_vm3, %v14828_v42  ;;  %v2237_v12 = vsel %vm603_vm2, 1, %v19228_v45  ;;  %2343 = vperm.xlu1 %14791, %v2248_v39   ;;  %v569_v42 = vld [vmem:[%s19213_s2 + $0xd0] sm:$0xff]  ;;  %vm616_vm2 = vcmp.gt.f32.partialorder %v568_v41, 0.0  ;;  %v2261_v1 = vsel %vm627_vm14, 1, %v19228_v45 }
  0x71   : > { %2310 = vperm.xlu0 %14790, %v2237_v12   ;;  %vm617_vm4 = vcmp.gt.f32.partialorder %v569_v42, 0.0  ;;  %v2250_v43 = vsel %vm616_vm2, 1, %v19228_v45  ;;  %vm629_vm2 = vcmp.gt.f32.partialorder %v581_v3, 0.0 }
  0x72   : > { %v2263_v5 = vsel %vm629_vm2, 1, %v19228_v45 }
  0x74   : > { %2349 = vperm.xlu1 %14791, %v2250_v43  }
  0x75   : > { %2316 = vperm.xlu0 %14790, %v2239_v16  }
  0x77   : > { %12942 = vmatmul.mubr.msk.bf16.vlgmr.msra.gmra.mrb[48].mxu0 %vm1462_vm3, %v14829_v44  ;;  %v2251_v44 = vsel %vm617_vm4, 1, %v19228_v45  ;;  %vm630_vm4 = vcmp.gt.f32.partialorder %v582_v6, 0.0 }
  0x78   : > { %12945 = vmatprep.mubr.msk.bf16.mxu0 %vm1462_vm3, %v14830_v51  ;;  %2355 = vperm.xlu1 %14791, %v2252_v48   ;;  %v573_v51 = vld [vmem:[%s19213_s2 + $0xf0] sm:$0xff]  ;;  %v2264_v8 = vsel %vm630_vm4, 1, %v19228_v45 }
  0x79   : > { %2322 = vperm.xlu0 %14790, %v2241_v22   ;;  %vm621_vm8 = vcmp.gt.f32.partialorder %v573_v51, 0.0  ;;  %v2270_v22 = vsel %vm636_vm10, 1, %v19228_v45  ;;  %13040 = vmatpush3.bf16.msra.mxu0 %v2741_v24 }
  0x7a   : > { %v2255_v53 = vsel %vm621_vm8, 1, %v19228_v45  ;;  %vm634_vm8 = vcmp.gt.f32.partialorder %v586_v14, 0.0 }
  0x7b   : > { %v2268_v16 = vsel %vm634_vm8, 1, %v19228_v45 }
  0x7c   : > { %2361 = vperm.xlu1 %14791, %v2254_v52  }
  0x7d   : > { %2328 = vperm.xlu0 %14790, %v2243_v26   ;;  %v15301_v26 = vld [vmem:[%s19215_s4] ss:$0 sm:$0xff] }
  0x7f   : > { %12946 = vmatmul.mubr.msk.bf16.gmra.mrb[52].mxu0 %vm1462_vm3, %v14831_v54  ;;  %v574_v54 = vld [vmem:[%s19213_s2 + $0xf8] sm:$0xff] }
  0x80   : > { %12949 = vmatprep.mubr.msk.bf16.mxu0 %vm1462_vm3, %v14832_v61  ;;  %vm622_vm9 = vcmp.gt.f32.partialorder %v574_v54, 0.0  ;;  %v2259_v61 = vsel %vm625_vm12, 1, %v19228_v45 }
  0x81   : > { %2334 = vperm.xlu0 %14790, %v2245_v32   ;;  %v2256_v56 = vsel %vm622_vm9, 1, %v19228_v45  ;;  %vm635_vm9 = vcmp.gt.f32.partialorder %v587_v15, 0.0 }
  0x82   : > { %2367 = vperm.xlu1 %14791, %v2256_v56  }
  0x85   : > { %2340 = vperm.xlu0 %14790, %v2247_v36  }
  0x86   : > { %2373 = vperm.xlu1 %14791, %v2258_v60  }
  0x87   : > { %12950 = vmatmul.mubr.msk.bf16.gmra.mrb[56].mxu0 %vm1462_vm3, %v14833_v0  ;;  %v2260_v0 = vsel %vm626_vm13, 1, %v19228_v45  ;;  %vm2222_vm13 = vcmask 31748  }
  0x88   : > { %12953 = vmatprep.mubr.msk.bf16.mxu0 %vm1462_vm3, %v14834_v7  ;;  %v583_v7 = vld [vmem:[%s19213_s2 + $0x140] sm:$0xff]  ;;  %2223 = vst.msk [vmem:[#allocation2] sm:$0xf0] %vm2222_vm13, %v19228_v45  ;;  %7066 = vst.msk [vmem:[#allocation3] sm:$0xf0] %vm2222_vm13, %v19228_v45 }
  0x89   : > { %2346 = vperm.xlu0 %14790, %v2249_v40   ;;  %vm631_vm5 = vcmp.gt.f32.partialorder %v583_v7, 0.0 }
  0x8a   : > { %2379 = vperm.xlu1 %14791, %v2260_v0   ;;  %v2265_v9 = vsel %vm631_vm5, 1, %v19228_v45 }
  0x8d   : > { %2352 = vperm.xlu0 %14790, %v2251_v44  }
  0x8e   : > { %2385 = vperm.xlu1 %14791, %v2262_v4  }
  0x8f   : > { %12954 = vmatmul.mubr.msk.bf16.gmra.mrb[60].mxu0 %vm1462_vm3, %v14835_v10  ;;  %v584_v10 = vld [vmem:[%s19213_s2 + $0x148] sm:$0xff] }
  0x90   : > { %12957 = vmatprep.mubr.msk.bf16.mxu0 %vm1462_vm3, %v14836_v17  ;;  %vm632_vm6 = vcmp.gt.f32.partialorder %v584_v10, 0.0  ;;  %v2269_v17 = vsel %vm635_vm9, 1, %v19228_v45 }
  0x91   : > { %2358 = vperm.xlu0 %14790, %v2253_v49   ;;  %v2266_v12 = vsel %vm632_vm6, 1, %v19228_v45 }
  0x92   : > { %2391 = vperm.xlu1 %14791, %v2264_v8  }
  0x95   : > { %2364 = vperm.xlu0 %14790, %v2255_v53  }
  0x96   : > { %2397 = vperm.xlu1 %14791, %v2266_v12  }
  0x97   : > { %12958 = vmatmul.mubr.msk.bf16.gmra.mrb[64].mxu0 %vm1462_vm3, %v14837_v20  ;;  %v590_v20 = vld [vmem:[%s19213_s2 + $0x178] sm:$0xff] }
  0x98   : > { %12961 = vmatprep.mubr.msk.bf16.mxu0 %vm1462_vm3, %v14838_v27  ;;  %vm638_vm12 = vcmp.gt.f32.partialorder %v590_v20, 0.0 }
  0x99   : > { %2370 = vperm.xlu0 %14790, %v2257_v57   ;;  %v2272_v25 = vsel %vm638_vm12, 1, %v19228_v45 }
  0x9a   : > { %2403 = vperm.xlu1 %14791, %v2268_v16  }
  0x9d   : > { %2376 = vperm.xlu0 %14790, %v2259_v61  }
  0x9e   : > { %2409 = vperm.xlu1 %14791, %v2270_v22  }
  0x9f   : > { %12962 = vmatmul.mubr.msk.bf16.gmra.mrb[68].mxu0 %vm1462_vm3, %v14839_v30 }
  0xa1   : > { %2382 = vperm.xlu0 %14790, %v2261_v1  }
  0xa2   : > { %2415 = vperm.xlu1 %14791, %v2272_v25  }
  0xa5   : > { %2388 = vperm.xlu0 %14790, %v2263_v5  }
  0xa9   : > { %2394 = vperm.xlu0 %14790, %v2265_v9  }
  0xad   : > { %2400 = vperm.xlu0 %14790, %v2267_v13  }
  0xb1   : > { %2406 = vperm.xlu0 %14790, %v2269_v17  }
  0xb5   : > { %2412 = vperm.xlu0 %14790, %v2271_v23  }
  0xea   : > { %v12893_v27 = vpop.f32.mrb[0].mxu0 }
  0xeb   : > { %v1167_v29 = vmul.f32 %v12893_v27, %v15301_v26  ;;  %v967_v30 = vpop.f32.mrb[1].mxu0 }
  0xec   : > { %v1165_v31 = vmul.f32 %v15301_v26, %v967_v30  ;;  %v12894_v32 = vpop.f32.mrb[2].mxu0 }
  0xed   : > { %v1222_v33 = vadd.f32 %v15306_v28, %v1167_v29  ;;  %v1168_v34 = vmul.f32 %v12894_v32, %v15301_v26  ;;  %v970_v35 = vpop.f32.mrb[3].mxu0 }
  0xee   : > { %v1220_v36 = vadd.f32 %v15306_v28, %v1165_v31  ;;  %v1166_v37 = vmul.f32 %v15301_v26, %v970_v35 }
  0xef   : > { %v1223_v38 = vadd.f32 %v15306_v28, %v1168_v34  ;;  %v1270_v40 = vmax.f32 %v1222_v33, 0.0 }
  0xf0   : > { %v1221_v39 = vadd.f32 %v15306_v28, %v1166_v37  ;;  %v1268_v42 = vmax.f32 %v1220_v36, 0.0 }
  0xf1   : > { %v1271_v41 = vmax.f32 %v1223_v38, 0.0 }
  0xf2   : > { %v1269_v43 = vmax.f32 %v1221_v39, 0.0  ;;  %v12897_v44 = vpop.f32.mrb[4].mxu0 }
  0xf3   : > { %v1317_v46 = vpack.c.bf16 %v1271_v41, %v1270_v40  ;;  %v1171_v47 = vmul.f32 %v12897_v44, %v15301_v26  ;;  %v983_v48 = vpop.f32.mrb[5].mxu0 }
  0xf4   : > { %v1316_v49 = vpack.c.bf16 %v1269_v43, %v1268_v42  ;;  %v1169_v50 = vmul.f32 %v15301_v26, %v983_v48  ;;  %v12898_v51 = vpop.f32.mrb[6].mxu0 }
  0xf5   : > { %v1226_v52 = vadd.f32 %v15306_v28, %v1171_v47  ;;  %v1172_v53 = vmul.f32 %v12898_v51, %v15301_v26  ;;  %v986_v54 = vpop.f32.mrb[7].mxu0 }
  0xf6   : > { %v1224_v55 = vadd.f32 %v15306_v28, %v1169_v50  ;;  %v1170_v56 = vmul.f32 %v15301_v26, %v986_v54  ;;  %12991 = vmatprep.mubr.msk.bf16.mxu1 %vm1462_vm3, %v1316_v49 }
  0xf7   : > { %v1227_v57 = vadd.f32 %v15306_v28, %v1172_v53  ;;  %12992 = vmatmul.mubr.msk.bf16.vlgmr.msra.gmra.mrb[24].mxu1 %vm1462_vm3, %v1317_v46  ;;  %v1274_v59 = vmax.f32 %v1226_v52, 0.0 }
  0xf8   : > { %v1225_v58 = vadd.f32 %v15306_v28, %v1170_v56  ;;  %v1272_v61 = vmax.f32 %v1224_v55, 0.0 }
  0xf9   : > { %v1275_v60 = vmax.f32 %v1227_v57, 0.0 }
  0xfa   : > { %v1273_v62 = vmax.f32 %v1225_v58, 0.0  ;;  %v12901_v63 = vpop.f32.mrb[8].mxu0 }
  0xfb   : > { %v1319_v0 = vpack.c.bf16 %v1275_v60, %v1274_v59  ;;  %v1175_v1 = vmul.f32 %v12901_v63, %v15301_v26  ;;  %v999_v2 = vpop.f32.mrb[9].mxu0 }
  0xfc   : > { %v1318_v3 = vpack.c.bf16 %v1273_v62, %v1272_v61  ;;  %v1173_v4 = vmul.f32 %v15301_v26, %v999_v2  ;;  %v12902_v5 = vpop.f32.mrb[10].mxu0 }
  0xfd   : > { %v1230_v6 = vadd.f32 %v15306_v28, %v1175_v1  ;;  %v1176_v7 = vmul.f32 %v12902_v5, %v15301_v26  ;;  %v1002_v8 = vpop.f32.mrb[11].mxu0 }
  0xfe   : > { %v1228_v9 = vadd.f32 %v15306_v28, %v1173_v4  ;;  %v1174_v10 = vmul.f32 %v15301_v26, %v1002_v8  ;;  %12995 = vmatprep.mubr.msk.bf16.mxu1 %vm1462_vm3, %v1318_v3 }
  0xff   : > { %v1231_v11 = vadd.f32 %v15306_v28, %v1176_v7  ;;  %12996 = vmatmul.mubr.msk.bf16.gmra.mrb[28].mxu1 %vm1462_vm3, %v1319_v0  ;;  %v1278_v13 = vmax.f32 %v1230_v6, 0.0 }
 0x100   : > { %v1229_v12 = vadd.f32 %v15306_v28, %v1174_v10  ;;  %v1276_v15 = vmax.f32 %v1228_v9, 0.0 }
 0x101   : > { %v1279_v14 = vmax.f32 %v1231_v11, 0.0 }
 0x102   : > { %v1277_v16 = vmax.f32 %v1229_v12, 0.0  ;;  %v12905_v17 = vpop.f32.mrb[12].mxu0 }
 0x103   : > { %v1321_v18 = vpack.c.bf16 %v1279_v14, %v1278_v13  ;;  %v1179_v19 = vmul.f32 %v12905_v17, %v15301_v26  ;;  %v1015_v20 = vpop.f32.mrb[13].mxu0 }
 0x104   : > { %v1320_v21 = vpack.c.bf16 %v1277_v16, %v1276_v15  ;;  %v1177_v22 = vmul.f32 %v15301_v26, %v1015_v20  ;;  %v12906_v23 = vpop.f32.mrb[14].mxu0 }
 0x105   : > { %v1234_v24 = vadd.f32 %v15306_v28, %v1179_v19  ;;  %v1180_v25 = vmul.f32 %v12906_v23, %v15301_v26  ;;  %v1018_v27 = vpop.f32.mrb[15].mxu0 }
 0x106   : > { %v1232_v29 = vadd.f32 %v15306_v28, %v1177_v22  ;;  %v1178_v30 = vmul.f32 %v15301_v26, %v1018_v27  ;;  %12999 = vmatprep.mubr.msk.bf16.mxu1 %vm1462_vm3, %v1320_v21 }
 0x107   : > { %v1235_v31 = vadd.f32 %v15306_v28, %v1180_v25  ;;  %13000 = vmatmul.mubr.msk.bf16.gmra.mrb[32].mxu1 %vm1462_vm3, %v1321_v18  ;;  %v1282_v33 = vmax.f32 %v1234_v24, 0.0 }
 0x108   : > { %v1233_v32 = vadd.f32 %v15306_v28, %v1178_v30  ;;  %v1280_v35 = vmax.f32 %v1232_v29, 0.0 }
 0x109   : > { %v1283_v34 = vmax.f32 %v1235_v31, 0.0 }
 0x10a   : > { %v1281_v36 = vmax.f32 %v1233_v32, 0.0  ;;  %v12909_v37 = vpop.f32.mrb[16].mxu0 }
 0x10b   : > { %v1323_v38 = vpack.c.bf16 %v1283_v34, %v1282_v33  ;;  %v1183_v39 = vmul.f32 %v12909_v37, %v15301_v26  ;;  %v1031_v40 = vpop.f32.mrb[17].mxu0 }
 0x10c   : > { %v1322_v41 = vpack.c.bf16 %v1281_v36, %v1280_v35  ;;  %v1181_v42 = vmul.f32 %v15301_v26, %v1031_v40  ;;  %v12910_v43 = vpop.f32.mrb[18].mxu0 }
 0x10d   : > { %v1238_v44 = vadd.f32 %v15306_v28, %v1183_v39  ;;  %v1184_v46 = vmul.f32 %v12910_v43, %v15301_v26  ;;  %v1034_v47 = vpop.f32.mrb[19].mxu0 }
 0x10e   : > { %v1236_v48 = vadd.f32 %v15306_v28, %v1181_v42  ;;  %v1182_v49 = vmul.f32 %v15301_v26, %v1034_v47  ;;  %13003 = vmatprep.mubr.msk.bf16.mxu1 %vm1462_vm3, %v1322_v41 }
 0x10f   : > { %v1239_v50 = vadd.f32 %v15306_v28, %v1184_v46  ;;  %13004 = vmatmul.mubr.msk.bf16.gmra.mrb[36].mxu1 %vm1462_vm3, %v1323_v38  ;;  %v1286_v52 = vmax.f32 %v1238_v44, 0.0 }
 0x110   : > { %v1237_v51 = vadd.f32 %v15306_v28, %v1182_v49  ;;  %v1284_v54 = vmax.f32 %v1236_v48, 0.0 }
 0x111   : > { %v1287_v53 = vmax.f32 %v1239_v50, 0.0 }
 0x112   : > { %v1285_v55 = vmax.f32 %v1237_v51, 0.0  ;;  %v12913_v56 = vpop.f32.mrb[20].mxu0 }
 0x113   : > { %v1325_v57 = vpack.c.bf16 %v1287_v53, %v1286_v52  ;;  %v1187_v58 = vmul.f32 %v12913_v56, %v15301_v26  ;;  %v1047_v59 = vpop.f32.mrb[21].mxu0 }
 0x114   : > { %v1324_v60 = vpack.c.bf16 %v1285_v55, %v1284_v54  ;;  %v1185_v61 = vmul.f32 %v15301_v26, %v1047_v59  ;;  %v12914_v62 = vpop.f32.mrb[22].mxu0 }
 0x115   : > { %v1242_v63 = vadd.f32 %v15306_v28, %v1187_v58  ;;  %v1188_v0 = vmul.f32 %v12914_v62, %v15301_v26  ;;  %v1050_v1 = vpop.f32.mrb[23].mxu0 }
 0x116   : > { %v1240_v2 = vadd.f32 %v15306_v28, %v1185_v61  ;;  %v1186_v3 = vmul.f32 %v15301_v26, %v1050_v1  ;;  %13007 = vmatprep.mubr.msk.bf16.mxu1 %vm1462_vm3, %v1324_v60 }
 0x117   : > { %v1243_v4 = vadd.f32 %v15306_v28, %v1188_v0  ;;  %13008 = vmatmul.mubr.msk.bf16.gmra.mrb[40].mxu1 %vm1462_vm3, %v1325_v57  ;;  %v1290_v6 = vmax.f32 %v1242_v63, 0.0 }
 0x118   : > { %v1241_v5 = vadd.f32 %v15306_v28, %v1186_v3  ;;  %v1288_v8 = vmax.f32 %v1240_v2, 0.0 }
 0x119   : > { %v1291_v7 = vmax.f32 %v1243_v4, 0.0 }
 0x11a   : > { %v1289_v9 = vmax.f32 %v1241_v5, 0.0  ;;  %v12917_v10 = vpop.f32.mrb[24].mxu0 }
 0x11b   : > { %v1327_v11 = vpack.c.bf16 %v1291_v7, %v1290_v6  ;;  %v1191_v12 = vmul.f32 %v12917_v10, %v15301_v26  ;;  %v1063_v13 = vpop.f32.mrb[25].mxu0 }
 0x11c   : > { %v1326_v14 = vpack.c.bf16 %v1289_v9, %v1288_v8  ;;  %v1189_v15 = vmul.f32 %v15301_v26, %v1063_v13  ;;  %v12918_v16 = vpop.f32.mrb[26].mxu0 }
 0x11d   : > { %v1246_v17 = vadd.f32 %v15306_v28, %v1191_v12  ;;  %v1192_v18 = vmul.f32 %v12918_v16, %v15301_v26  ;;  %v1066_v19 = vpop.f32.mrb[27].mxu0 }
 0x11e   : > { %v1244_v20 = vadd.f32 %v15306_v28, %v1189_v15  ;;  %v1190_v21 = vmul.f32 %v15301_v26, %v1066_v19  ;;  %13011 = vmatprep.mubr.msk.bf16.mxu1 %vm1462_vm3, %v1326_v14 }
 0x11f   : > { %v1294_v22 = vmax.f32 %v1246_v17, 0.0  ;;  %v1247_v23 = vadd.f32 %v15306_v28, %v1192_v18  ;;  %13012 = vmatmul.mubr.msk.bf16.gmra.mrb[44].mxu1 %vm1462_vm3, %v1327_v11 }
 0x120   : > { %v1292_v24 = vmax.f32 %v1244_v20, 0.0  ;;  %v1245_v25 = vadd.f32 %v15306_v28, %v1190_v21 }
 0x121   : > { %v1295_v27 = vmax.f32 %v1247_v23, 0.0 }
 0x122   : > { %v1293_v29 = vmax.f32 %v1245_v25, 0.0  ;;  %v12921_v30 = vpop.f32.mrb[28].mxu0 }
 0x123   : > { %v1329_v31 = vpack.c.bf16 %v1295_v27, %v1294_v22  ;;  %v1195_v32 = vmul.f32 %v12921_v30, %v15301_v26  ;;  %v1079_v33 = vpop.f32.mrb[29].mxu0 }
 0x124   : > { %v1328_v34 = vpack.c.bf16 %v1293_v29, %v1292_v24  ;;  %v1193_v35 = vmul.f32 %v15301_v26, %v1079_v33  ;;  %v12922_v36 = vpop.f32.mrb[30].mxu0 }
 0x125   : > { %v1250_v37 = vadd.f32 %v15306_v28, %v1195_v32  ;;  %v1196_v38 = vmul.f32 %v12922_v36, %v15301_v26  ;;  %v1082_v39 = vpop.f32.mrb[31].mxu0 }
 0x126   : > { %v1248_v40 = vadd.f32 %v15306_v28, %v1193_v35  ;;  %v1194_v41 = vmul.f32 %v15301_v26, %v1082_v39  ;;  %13015 = vmatprep.mubr.msk.bf16.mxu1 %vm1462_vm3, %v1328_v34 }
 0x127   : > { %v1298_v42 = vmax.f32 %v1250_v37, 0.0  ;;  %v1251_v43 = vadd.f32 %v15306_v28, %v1196_v38  ;;  %13016 = vmatmul.mubr.msk.bf16.gmra.mrb[0].mxu1 %vm1462_vm3, %v1329_v31 }
 0x128   : > { %v1296_v44 = vmax.f32 %v1248_v40, 0.0  ;;  %v1249_v46 = vadd.f32 %v15306_v28, %v1194_v41 }
 0x129   : > { %v1299_v47 = vmax.f32 %v1251_v43, 0.0 }
 0x12a   : > { %v1297_v48 = vmax.f32 %v1249_v46, 0.0  ;;  %v12925_v49 = vpop.f32.mrb[32].mxu0 }
 0x12b   : > { %v1331_v50 = vpack.c.bf16 %v1299_v47, %v1298_v42  ;;  %v1199_v51 = vmul.f32 %v12925_v49, %v15301_v26  ;;  %v1095_v52 = vpop.f32.mrb[33].mxu0 }
 0x12c   : > { %v1330_v53 = vpack.c.bf16 %v1297_v48, %v1296_v44  ;;  %v1197_v54 = vmul.f32 %v15301_v26, %v1095_v52  ;;  %v12926_v55 = vpop.f32.mrb[34].mxu0 }
 0x12d   : > { %v1254_v56 = vadd.f32 %v15306_v28, %v1199_v51  ;;  %v1200_v57 = vmul.f32 %v12926_v55, %v15301_v26  ;;  %v1098_v58 = vpop.f32.mrb[35].mxu0 }
 0x12e   : > { %v1252_v59 = vadd.f32 %v15306_v28, %v1197_v54  ;;  %v1198_v60 = vmul.f32 %v15301_v26, %v1098_v58  ;;  %13019 = vmatprep.mubr.msk.bf16.mxu1 %vm1462_vm3, %v1330_v53 }
 0x12f   : > { %v1302_v61 = vmax.f32 %v1254_v56, 0.0  ;;  %v1255_v62 = vadd.f32 %v15306_v28, %v1200_v57  ;;  %13020 = vmatmul.mubr.msk.bf16.gmra.mrb[4].mxu1 %vm1462_vm3, %v1331_v50 }
 0x130   : > { %v1300_v63 = vmax.f32 %v1252_v59, 0.0  ;;  %v1253_v0 = vadd.f32 %v15306_v28, %v1198_v60 }
 0x131   : > { %v1303_v1 = vmax.f32 %v1255_v62, 0.0 }
 0x132   : > { %v1301_v2 = vmax.f32 %v1253_v0, 0.0  ;;  %v12929_v3 = vpop.f32.mrb[36].mxu0 }
 0x133   : > { %v1333_v4 = vpack.c.bf16 %v1303_v1, %v1302_v61  ;;  %v1203_v5 = vmul.f32 %v12929_v3, %v15301_v26  ;;  %v1111_v6 = vpop.f32.mrb[37].mxu0 }
 0x134   : > { %v1332_v7 = vpack.c.bf16 %v1301_v2, %v1300_v63  ;;  %v1201_v8 = vmul.f32 %v15301_v26, %v1111_v6  ;;  %v12930_v9 = vpop.f32.mrb[38].mxu0 }
 0x135   : > { %v1258_v10 = vadd.f32 %v15306_v28, %v1203_v5  ;;  %v1204_v11 = vmul.f32 %v12930_v9, %v15301_v26  ;;  %v1114_v12 = vpop.f32.mrb[39].mxu0  ;;  %v2590_v9 = vld [vmem:[#allocation2] sm:$0xf0] }
 0x136   : > { %v1256_v13 = vadd.f32 %v15306_v28, %v1201_v8  ;;  %v1202_v14 = vmul.f32 %v15301_v26, %v1114_v12  ;;  %13023 = vmatprep.mubr.msk.bf16.mxu1 %vm1462_vm3, %v1332_v7  ;;  %v15454_v8 = vld [vmem:[#allocation2 + $0x8] sm:$0xff] }
 0x137   : > { %v1306_v15 = vmax.f32 %v1258_v10, 0.0  ;;  %v1259_v16 = vadd.f32 %v15306_v28, %v1204_v11  ;;  %13024 = vmatmul.mubr.msk.bf16.gmra.mrb[8].mxu1 %vm1462_vm3, %v1333_v4  ;;  %v2619_v10 = vrot.slane %v2590_v9, 4  ;;  %v2620_v11 = vrot.slane %v15454_v8, 4 }
 0x138   : > { %v1304_v17 = vmax.f32 %v1256_v13, 0.0  ;;  %v1257_v18 = vadd.f32 %v15306_v28, %v1202_v14 }
 0x139   : > { %v1307_v19 = vmax.f32 %v1259_v16, 0.0  ;;  %v2621_v13 = vsel %vm929_vm0, %v2619_v10, %v2620_v11 }
 0x13a   : > { %v1305_v20 = vmax.f32 %v1257_v18, 0.0  ;;  %v12933_v21 = vpop.f32.mrb[40].mxu0  ;;  %13041 = vmatprep.mubr.msk.bf16.mxu0 %vm1462_vm3, %v2621_v13 }
 0x13b   : > { %v1335_v22 = vpack.c.bf16 %v1307_v19, %v1306_v15  ;;  %v1207_v23 = vmul.f32 %v12933_v21, %v15301_v26  ;;  %v1127_v24 = vpop.f32.mrb[41].mxu0  ;;  %v15476_v19 = vld [vmem:[%s19221_s10] sm:$0x3] }
 0x13c   : > { %v1334_v25 = vpack.c.bf16 %v1305_v20, %v1304_v17  ;;  %v1205_v27 = vmul.f32 %v15301_v26, %v1127_v24  ;;  %v12934_v29 = vpop.f32.mrb[42].mxu0  ;;  %14762 = vmatprep.subr.msk.bf16.mxu0 %vm1535_vm1, %v15476_v19 }
 0x13d   : > { %v1262_v30 = vadd.f32 %v15306_v28, %v1207_v23  ;;  %v1208_v31 = vmul.f32 %v12934_v29, %v15301_v26  ;;  %v1130_v32 = vpop.f32.mrb[43].mxu0  ;;  %v19230_v29 = vshll.u32 %v15454_v8, 16 }
 0x13e   : > { %v1260_v33 = vadd.f32 %v15306_v28, %v1205_v27  ;;  %v1206_v34 = vmul.f32 %v15301_v26, %v1130_v32  ;;  %13027 = vmatprep.mubr.msk.bf16.mxu1 %vm1462_vm3, %v1334_v25  ;;  %v19234_v27 = vshrl.u32 %v15454_v8, 16 }
 0x13f   : > { %v1310_v35 = vmax.f32 %v1262_v30, 0.0  ;;  %v1263_v36 = vadd.f32 %v15306_v28, %v1208_v31  ;;  %13028 = vmatmul.mubr.msk.bf16.gmra.mrb[12].mxu1 %vm1462_vm3, %v1335_v22  ;;  %v3506_v31 = vrot.slane %v19230_v29, 5 }
 0x140   : > { %v1308_v37 = vmax.f32 %v1260_v33, 0.0  ;;  %v1261_v38 = vadd.f32 %v15306_v28, %v1206_v34  ;;  %v3505_v30 = vrot.slane %v19234_v27, 4  ;;  %v15500_v33 = vpop.permute.xlu0 %2274  ;;  %v15502_v34 = vpop.permute.xlu1 %2280 }
 0x141   : > { %v1311_v39 = vmax.f32 %v1263_v36, 0.0  ;;  %19432 = vst [vmem:[#allocation4_spill] sm:$0xff] %v15500_v33  ;;  %19433 = vst [vmem:[#allocation5_spill] sm:$0xff] %v15502_v34  ;;  %vm2419_vm14 = vcmp.eq.s32.totalorder %v15502_v34, 1  ;;  %vm2417_vm2 = vcmp.eq.s32.totalorder %v15500_v33, 1 }
 0x142   : > { %v1309_v40 = vmax.f32 %v1261_v38, 0.0  ;;  %v12937_v41 = vpop.f32.mrb[44].mxu0  ;;  %v15498_v32 = vor.u32 %v3506_v31, %v3505_v30 }
 0x143   : > { %v1337_v42 = vpack.c.bf16 %v1311_v39, %v1310_v35  ;;  %v1211_v43 = vmul.f32 %v12937_v41, %v15301_v26  ;;  %v1143_v44 = vpop.f32.mrb[45].mxu0 }
 0x144   : > { %v1336_v46 = vpack.c.bf16 %v1309_v40, %v1308_v37  ;;  %v1209_v47 = vmul.f32 %v15301_v26, %v1143_v44  ;;  %v12938_v48 = vpop.f32.mrb[46].mxu0  ;;  %v15504_v35 = vpop.permute.xlu0 %2277 }
 0x145   : > { %v1266_v49 = vadd.f32 %v15306_v28, %v1211_v43  ;;  %v1212_v50 = vmul.f32 %v12938_v48, %v15301_v26  ;;  %v1146_v51 = vpop.f32.mrb[47].mxu0  ;;  %19434 = vst [vmem:[#allocation6_spill] sm:$0xff] %v15504_v35  ;;  %v15506_v36 = vpop.permute.xlu1 %2283  ;;  %vm2418_vm4 = vcmp.eq.s32.totalorder %v15504_v35, 1 }
 0x146   : > { %v1264_v52 = vadd.f32 %v15306_v28, %v1209_v47  ;;  %v1210_v53 = vmul.f32 %v15301_v26, %v1146_v51  ;;  %13031 = vmatprep.mubr.msk.bf16.mxu1 %vm1462_vm3, %v1336_v46  ;;  %19435 = vst [vmem:[#allocation7_spill] sm:$0xff] %v15506_v36  ;;  %vm2420_vm15 = vcmp.eq.s32.totalorder %v15506_v36, 1 }
 0x147   : > { %v1314_v54 = vmax.f32 %v1266_v49, 0.0  ;;  %v1267_v55 = vadd.f32 %v15306_v28, %v1212_v50  ;;  %13032 = vmatmul.mubr.msk.bf16.gmra.mrb[16].mxu1 %vm1462_vm3, %v1337_v42 }
 0x148   : > { %v1312_v56 = vmax.f32 %v1264_v52, 0.0  ;;  %v1265_v57 = vadd.f32 %v15306_v28, %v1210_v53  ;;  %v15508_v37 = vpop.permute.xlu0 %2286  ;;  %v15537_v52 = vld [vmem:[%s19219_s8] ss:$0 sm:$0xff] }
 0x149   : > { %v1315_v58 = vmax.f32 %v1267_v55, 0.0  ;;  %19436 = vst [vmem:[#allocation8_spill] sm:$0xff] %v15508_v37  ;;  %v15510_v38 = vpop.permute.xlu1 %2289  ;;  %v15543_v55 = vld [vmem:[%s19220_s9] ss:$0 sm:$0xff]  ;;  %vm19245_vm5 = vcmp.eq.s32.totalorder %v15508_v37, 1 }
 0x14a   : > { %v1313_v59 = vmax.f32 %v1265_v57, 0.0  ;;  %v15426_v60 = vpop.f32.mrb[48].mxu0  ;;  %19437 = vst [vmem:[#allocation9_spill] sm:$0xff] %v15510_v38  ;;  %vm19244_vm6 = vcmp.eq.s32.totalorder %v15510_v38, 1 }
 0x14b   : > { %v1339_v61 = vpack.c.bf16 %v1315_v58, %v1314_v54  ;;  %v15428_v62 = vpop.f32.mrb[49].mxu0 }
 0x14c   : > { %v1338_v63 = vpack.c.bf16 %v1313_v59, %v1312_v56  ;;  %v15430_v0 = vpop.f32.mrb[50].mxu0  ;;  %v15512_v39 = vpop.permute.xlu0 %2292 }
 0x14d   : > { %v15432_v26 = vpop.f32.mrb[51].mxu0  ;;  %19438 = vst [vmem:[#allocation10_spill] sm:$0xff] %v15512_v39  ;;  %v15514_v40 = vpop.permute.xlu1 %2295  ;;  %vm2423_vm7 = vcmp.eq.s32.totalorder %v15512_v39, 1 }
 0x14e   : > { %13035 = vmatprep.mubr.msk.bf16.mxu1 %vm1462_vm3, %v1338_v63  ;;  %19439 = vst [vmem:[#allocation11_spill] sm:$0xff] %v15514_v40  ;;  %vm19252_vm8 = vcmp.eq.s32.totalorder %v15514_v40, 1 }
 0x14f   : > { %13036 = vmatmul.mubr.msk.bf16.gmra.mrb[20].mxu1 %vm1462_vm3, %v1339_v61 }
 0x150   : > { %v15516_v41 = vpop.permute.xlu0 %2298 }
 0x151   : > { %19440 = vst [vmem:[#allocation12_spill] sm:$0xff] %v15516_v41  ;;  %v15518_v42 = vpop.permute.xlu1 %2301  ;;  %vm19232_vm9 = vcmp.eq.s32.totalorder %v15516_v41, 1 }
 0x152   : > { %v15436_v1 = vpop.f32.mrb[52].mxu0  ;;  %19441 = vst [vmem:[#allocation13_spill] sm:$0xff] %v15518_v42  ;;  %vm19231_vm10 = vcmp.eq.s32.totalorder %v15518_v42, 1 }
 0x153   : > { %v15438_v2 = vpop.f32.mrb[53].mxu0 }
 0x154   : > { %v15440_v28 = vpop.f32.mrb[54].mxu0  ;;  %v15520_v43 = vpop.permute.xlu0 %2304 }
 0x155   : > { %v15442_v3 = vpop.f32.mrb[55].mxu0  ;;  %19442 = vst [vmem:[#allocation14_spill] sm:$0xff] %v15520_v43  ;;  %v15522_v44 = vpop.permute.xlu1 %2307  ;;  %vm19239_vm11 = vcmp.eq.s32.totalorder %v15520_v43, 1 }
 0x156   : > { %19443 = vst [vmem:[#allocation15_spill] sm:$0xff] %v15522_v44  ;;  %vm19233_vm12 = vcmp.eq.s32.totalorder %v15522_v44, 1 }
 0x158   : > { %v15524_v46 = vpop.permute.xlu0 %2310 }
 0x159   : > { %19444 = vst [vmem:[#allocation16_spill] sm:$0xff] %v15524_v46  ;;  %v15526_v47 = vpop.permute.xlu1 %2313  ;;  %vm19236_vm13 = vcmp.eq.s32.totalorder %v15524_v46, 1 }
 0x15a   : > { %v15446_v4 = vpop.f32.mrb[56].mxu0  ;;  %19445 = vst [vmem:[#allocation17_spill] sm:$0xff] %v15526_v47 }
 0x15b   : > { %v15448_v5 = vpop.f32.mrb[57].mxu0 }
 0x15c   : > { %v15450_v6 = vpop.f32.mrb[58].mxu0  ;;  %v15528_v48 = vpop.permute.xlu0 %2316 }
 0x15d   : > { %v15452_v7 = vpop.f32.mrb[59].mxu0  ;;  %19446 = vst [vmem:[#allocation18_spill] sm:$0xff] %v15528_v48  ;;  %v15530_v49 = vpop.permute.xlu1 %2319 }
 0x15e   : > { %19447 = vst [vmem:[#allocation19_spill] sm:$0xff] %v15530_v49 }
 0x160   : > { %v15532_v50 = vpop.permute.xlu0 %2322 }
 0x161   : > { %19448 = vst [vmem:[#allocation20_spill] sm:$0xff] %v15532_v50  ;;  %v15546_v58 = vpop.permute.xlu1 %2325 }
 0x162   : > { %v15457_v12 = vpop.f32.mrb[60].mxu0  ;;  %19449 = vst [vmem:[#allocation21_spill] sm:$0xff] %v15546_v58 }
 0x163   : > { %v15462_v14 = vpop.f32.mrb[61].mxu0 }
 0x164   : > { %v15465_v15 = vpop.f32.mrb[62].mxu0  ;;  %v15552_v10 = vpop.permute.xlu0 %2328 }
 0x165   : > { %v15467_v16 = vpop.f32.mrb[63].mxu0  ;;  %19450 = vst [vmem:[#allocation22_spill] sm:$0xff] %v15552_v10 }
 0x16a   : > { %v15469_v17 = vpop.f32.mrb[64].mxu0 }
 0x16b   : > { %v15471_v18 = vpop.f32.mrb[65].mxu0 }
 0x16c   : > { %v15478_v20 = vpop.f32.mrb[66].mxu0 }
 0x16d   : > { %v15482_v21 = vpop.f32.mrb[67].mxu0 }
 0x172   : > { %v15484_v22 = vpop.f32.mrb[68].mxu0 }
 0x173   : > { %v15486_v23 = vpop.f32.mrb[69].mxu0 }
 0x174   : > { %v15488_v24 = vpop.f32.mrb[70].mxu0 }
 0x175   : > { %v15490_v25 = vpop.f32.mrb[71].mxu0 }
 0x1ca   : > { %v12993_v51 = vpop.f32.mrb[24].mxu1 }
 0x1cb   : > { %v1882_v53 = vadd.f32 %v12993_v51, %v15426_v60  ;;  %v1873_v54 = vpop.f32.mrb[25].mxu1 }
 0x1cc   : > { %v1874_v56 = vadd.f32 %v1873_v54, %v15428_v62  ;;  %v12994_v57 = vpop.f32.mrb[26].mxu1 }
 0x1cd   : > { %v2073_v59 = vmul.f32 %v15537_v52, %v1882_v53  ;;  %v1885_v61 = vadd.f32 %v12994_v57, %v15430_v0  ;;  %v1876_v63 = vpop.f32.mrb[27].mxu1 }
 0x1ce   : > { %v2071_v9 = vmul.f32 %v15537_v52, %v1874_v56  ;;  %v1877_v60 = vadd.f32 %v1876_v63, %v15432_v26  ;;  %v15563_v56 = vpop.permute.xlu1 %2331 }
 0x1cf   : > { %v2128_v13 = vadd.f32 %v15543_v55, %v2073_v59  ;;  %v2074_v30 = vmul.f32 %v15537_v52, %v1885_v61  ;;  %19451 = vst [vmem:[#allocation23_spill] sm:$0xff] %v15563_v56 }
 0x1d0   : > { %v2126_v62 = vadd.f32 %v15543_v55, %v2071_v9  ;;  %v2072_v31 = vmul.f32 %v15537_v52, %v1877_v60 }
 0x1d1   : > { %v2176_v51 = vmax.f32 %v2128_v13, 0.0  ;;  %v2129_v0 = vadd.f32 %v15543_v55, %v2074_v30  ;;  %v15570_v30 = vpop.permute.xlu0 %2334 }
 0x1d2   : > { %v2174_v53 = vmax.f32 %v2126_v62, 0.0  ;;  %v2127_v26 = vadd.f32 %v15543_v55, %v2072_v31  ;;  %v12997_v54 = vpop.f32.mrb[28].mxu1  ;;  %19452 = vst [vmem:[#allocation24_spill] sm:$0xff] %v15570_v30 }
 0x1d3   : > { %v2177_v57 = vmax.f32 %v2129_v0, 0.0  ;;  %v1898_v59 = vadd.f32 %v12997_v54, %v15436_v1  ;;  %v1889_v61 = vpop.f32.mrb[29].mxu1  ;;  %v2467_v63 = vsel %vm2419_vm14, %v2176_v51, 0.0 }
 0x1d4   : > { %v2175_v9 = vmax.f32 %v2127_v26, 0.0  ;;  %v1890_v60 = vadd.f32 %v1889_v61, %v15438_v2  ;;  %v12998_v13 = vpop.f32.mrb[30].mxu1  ;;  %v2465_v62 = vsel %vm2417_vm2, %v2174_v53, 0.0 }
 0x1d5   : > { %v2468_v31 = vsel %vm2420_vm15, %v2177_v57, 0.0  ;;  %v2077_v1 = vmul.f32 %v15537_v52, %v1898_v59  ;;  %v1901_v0 = vadd.f32 %v12998_v13, %v15440_v28  ;;  %v1892_v54 = vpop.f32.mrb[31].mxu1  ;;  %v15587_v59 = vpop.permute.xlu1 %2337 }
 0x1d6   : > { %v2514_v45 = vpack.c.bf16 %v2468_v31, %v2467_v63  ;;  %v2466_v51 = vsel %vm2418_vm4, %v2175_v9, 0.0  ;;  %v2075_v2 = vmul.f32 %v15537_v52, %v1890_v60  ;;  %v1893_v26 = vadd.f32 %v1892_v54, %v15442_v3  ;;  %19453 = vst [vmem:[#allocation25_spill] sm:$0xff] %v15587_v59 }
 0x1d7   : > { %v2513_v61 = vpack.c.bf16 %v2466_v51, %v2465_v62  ;;  %v2132_v29 = vadd.f32 %v15543_v55, %v2077_v1  ;;  %v2078_v53 = vmul.f32 %v15537_v52, %v1901_v0 }
 0x1d8   : > { %2538 = vst.msk [vmem:[#allocation2 + $0x18] sm:$0xff] %vm1462_vm3, %v2514_v45  ;;  %v2130_v57 = vadd.f32 %v15543_v55, %v2075_v2  ;;  %v2076_v28 = vmul.f32 %v15537_v52, %v1893_v26  ;;  %v15595_v45 = vpop.permute.xlu0 %2340 }
 0x1d9   : > { %2537 = vst.msk [vmem:[#allocation2 + $0x10] sm:$0xff] %vm1462_vm3, %v2513_v61  ;;  %v2180_v63 = vmax.f32 %v2132_v29, 0.0  ;;  %v2133_v9 = vadd.f32 %v15543_v55, %v2078_v53  ;;  %19454 = vst [vmem:[#allocation26_spill] sm:$0xff] %v15595_v45 }
 0x1da   : > { %v2178_v3 = vmax.f32 %v2130_v57, 0.0  ;;  %v2131_v60 = vadd.f32 %v15543_v55, %v2076_v28  ;;  %v13001_v13 = vpop.f32.mrb[32].mxu1 }
 0x1db   : > { %v2181_v62 = vmax.f32 %v2133_v9, 0.0  ;;  %v1914_v31 = vadd.f32 %v13001_v13, %v15446_v4  ;;  %v1905_v1 = vpop.f32.mrb[33].mxu1  ;;  %v2471_v29 = vsel %vm2423_vm7, %v2180_v63, 0.0  ;;  %v15612_v9 = vpop.permute.xlu1 %2343 }
 0x1dc   : > { %v2179_v0 = vmax.f32 %v2131_v60, 0.0  ;;  %v1906_v54 = vadd.f32 %v1905_v1, %v15448_v5  ;;  %v13002_v51 = vpop.f32.mrb[34].mxu1  ;;  %v2469_v2 = vsel %vm19245_vm5, %v2178_v3, 0.0  ;;  %19455 = vst [vmem:[#allocation27_spill] sm:$0xff] %v15612_v9 }
 0x1dd   : > { %v2472_v26 = vsel %vm19252_vm8, %v2181_v62, 0.0  ;;  %v2081_v61 = vmul.f32 %v15537_v52, %v1914_v31  ;;  %v1917_v4 = vadd.f32 %v13002_v51, %v15450_v6  ;;  %v1908_v53 = vpop.f32.mrb[35].mxu1 }
 0x1de   : > { %v2516_v57 = vpack.c.bf16 %v2472_v26, %v2471_v29  ;;  %v2470_v28 = vsel %vm19244_vm6, %v2179_v0, 0.0  ;;  %v2079_v63 = vmul.f32 %v15537_v52, %v1906_v54  ;;  %v1909_v5 = vadd.f32 %v1908_v53, %v15452_v7  ;;  %v15626_v29 = vpop.permute.xlu0 %2346 }
 0x1df   : > { %v2515_v60 = vpack.c.bf16 %v2470_v28, %v2469_v2  ;;  %v2136_v3 = vadd.f32 %v15543_v55, %v2081_v61  ;;  %v2082_v13 = vmul.f32 %v15537_v52, %v1917_v4  ;;  %v15616_v62 = vld [vmem:[#allocation2 + $0x18] sm:$0xff]  ;;  %19456 = vst [vmem:[#allocation28_spill] sm:$0xff] %v15626_v29  ;;  %v3266_v4 = vsel %vm1535_vm1, %v15476_v19, 0 }
 0x1e0   : > { %2540 = vst.msk [vmem:[#allocation2 + $0x28] sm:$0xff] %vm1462_vm3, %v2516_v57  ;;  %v2134_v6 = vadd.f32 %v15543_v55, %v2079_v63  ;;  %v2080_v31 = vmul.f32 %v15537_v52, %v1909_v5  ;;  %v15622_v1 = vld [vmem:[#allocation2 + $0x10] sm:$0xff]  ;;  %v2624_v7 = vrot.slane %v15616_v62, 4  ;;  %v15643_v5 = vld [vmem:[%s19221_s10 + $0x4] sm:$0x3] }
 0x1e1   : > { %2539 = vst.msk [vmem:[#allocation2 + $0x20] sm:$0xff] %vm1462_vm3, %v2515_v60  ;;  %v2184_v0 = vmax.f32 %v2136_v3, 0.0  ;;  %v2137_v54 = vadd.f32 %v15543_v55, %v2082_v13  ;;  %v2622_v51 = vrot.slane %v15622_v1, 4 }
 0x1e2   : > { %v2182_v2 = vmax.f32 %v2134_v6, 0.0  ;;  %v2135_v26 = vadd.f32 %v15543_v55, %v2080_v31  ;;  %v13005_v61 = vpop.f32.mrb[36].mxu1  ;;  %v15652_v6 = vpop.permute.xlu1 %2349 }
 0x1e3   : > { %v2185_v53 = vmax.f32 %v2137_v54, 0.0  ;;  %v1930_v57 = vadd.f32 %v13005_v61, %v15457_v12  ;;  %v1921_v28 = vpop.f32.mrb[37].mxu1  ;;  %v2623_v63 = vsel %vm929_vm0, %v2620_v11, %v2622_v51  ;;  %v2475_v60 = vsel %vm19239_vm11, %v2184_v0, 0.0  ;;  %19457 = vst [vmem:[#allocation29_spill] sm:$0xff] %v15652_v6 }
 0x1e4   : > { %v2183_v3 = vmax.f32 %v2135_v26, 0.0  ;;  %v1922_v19 = vadd.f32 %v1921_v28, %v15462_v14  ;;  %v13006_v13 = vpop.f32.mrb[38].mxu1  ;;  %13042 = vmatmul.mubr.msk.bf16.vlgmr.msra.gmra.mrb[72].mxu0 %vm1462_vm3, %v2623_v63  ;;  %v2625_v12 = vsel %vm929_vm0, %v2622_v51, %v2624_v7  ;;  %v2473_v11 = vsel %vm19232_vm9, %v2182_v2, 0.0  ;;  %v15667_v2 = vpop.permute.xlu0 %2352 }
 0x1e5   : > { %v2476_v31 = vsel %vm19233_vm12, %v2185_v53, 0.0  ;;  %v2085_v0 = vmul.f32 %v15537_v52, %v1930_v57  ;;  %v1933_v54 = vadd.f32 %v13006_v13, %v15465_v15  ;;  %13090 = vmatpush3.bf16.msra.mxu0 %v3266_v4  ;;  %v1924_v14 = vpop.f32.mrb[39].mxu1  ;;  %13045 = vmatprep.mubr.msk.bf16.mxu0 %vm1462_vm3, %v2625_v12  ;;  %19458 = vst [vmem:[#allocation30_spill] sm:$0xff] %v15667_v2  ;;  %vm19238_vm9 = vcmp.eq.s32.totalorder %v15528_v48, 1 }
 0x1e6   : > { %v2518_v26 = vpack.c.bf16 %v2476_v31, %v2475_v60  ;;  %v2474_v51 = vsel %vm19231_vm10, %v2183_v3, 0.0  ;;  %v2083_v61 = vmul.f32 %v15537_v52, %v1922_v19  ;;  %v1925_v28 = vadd.f32 %v1924_v14, %v15467_v16  ;;  %14763 = vmatprep.subr.msk.bf16.mxu0 %vm1535_vm1, %v15643_v5 }
 0x1e7   : > { %v2517_v53 = vpack.c.bf16 %v2474_v51, %v2473_v11  ;;  %v2140_v15 = vadd.f32 %v15543_v55, %v2085_v0  ;;  %v2086_v4 = vmul.f32 %v15537_v52, %v1933_v54  ;;  %v15671_v57 = vld [vmem:[#allocation2 + $0x28] sm:$0xff]  ;;  %vm19235_vm10 = vcmp.eq.s32.totalorder %v15526_v47, 1  ;;  %v15687_v54 = vpop.permute.xlu1 %2355 }
 0x1e8   : > { %2542 = vst.msk [vmem:[#allocation2 + $0x38] sm:$0xff] %vm1462_vm3, %v2518_v26  ;;  %v2138_v63 = vadd.f32 %v15543_v55, %v2083_v61  ;;  %v2084_v60 = vmul.f32 %v15537_v52, %v1925_v28  ;;  %v15676_v3 = vld [vmem:[#allocation2 + $0x20] sm:$0xff]  ;;  %v2628_v16 = vrot.slane %v15671_v57, 4  ;;  %vm19237_vm12 = vcmp.eq.s32.totalorder %v15530_v49, 1  ;;  %19459 = vst [vmem:[#allocation31_spill] sm:$0xff] %v15687_v54 }
 0x1e9   : > { %2541 = vst.msk [vmem:[#allocation2 + $0x30] sm:$0xff] %vm1462_vm3, %v2517_v53  ;;  %v2188_v19 = vmax.f32 %v2140_v15, 0.0  ;;  %v2141_v13 = vadd.f32 %v15543_v55, %v2086_v4  ;;  %v2626_v12 = vrot.slane %v15676_v3, 4  ;;  %vm19247_vm11 = vcmp.eq.s32.totalorder %v15570_v30, 1 }
 0x1ea   : > { %v2186_v11 = vmax.f32 %v2138_v63, 0.0  ;;  %v2139_v31 = vadd.f32 %v15543_v55, %v2084_v60  ;;  %v13009_v0 = vpop.f32.mrb[40].mxu1  ;;  %v15698_v60 = vpop.permute.xlu0 %2358  ;;  %vm19263_vm6 = vcmp.eq.s32.totalorder %v15667_v2, 1  ;;  %vm19261_vm5 = vcmp.eq.s32.totalorder %v15652_v6, 1 }
 0x1eb   : > { %v2189_v14 = vmax.f32 %v2141_v13, 0.0  ;;  %v1946_v26 = vadd.f32 %v13009_v0, %v15469_v17  ;;  %v1937_v51 = vpop.f32.mrb[41].mxu1  ;;  %v2627_v61 = vsel %vm929_vm0, %v2624_v7, %v2626_v12  ;;  %v2479_v28 = vsel %vm19238_vm9, %v2188_v19, 0.0  ;;  %19460 = vst [vmem:[#allocation32_spill] sm:$0xff] %v15698_v60 }
 0x1ec   : > { %v2187_v53 = vmax.f32 %v2139_v31, 0.0  ;;  %v1938_v15 = vadd.f32 %v1937_v51, %v15471_v18  ;;  %v13010_v4 = vpop.f32.mrb[42].mxu1  ;;  %13046 = vmatmul.mubr.msk.bf16.gmra.mrb[76].mxu0 %vm1462_vm3, %v2627_v61  ;;  %v2629_v63 = vsel %vm929_vm0, %v2626_v12, %v2628_v16  ;;  %v2477_v17 = vsel %vm19236_vm13, %v2186_v11, 0.0 }
 0x1ed   : > { %v2480_v13 = vsel %vm19237_vm12, %v2189_v14, 0.0  ;;  %v2089_v7 = vmul.f32 %v15537_v52, %v1946_v26  ;;  %v1949_v19 = vadd.f32 %v13010_v4, %v15478_v20  ;;  %v1940_v31 = vpop.f32.mrb[43].mxu1  ;;  %13049 = vmatprep.mubr.msk.bf16.mxu0 %vm1462_vm3, %v2629_v63  ;;  %vm19242_vm13 = vcmp.eq.s32.totalorder %v15546_v58, 1 }
 0x1ee   : > { %v2520_v18 = vpack.c.bf16 %v2480_v13, %v2479_v28  ;;  %v2478_v0 = vsel %vm19235_vm10, %v2187_v53, 0.0  ;;  %v2087_v12 = vmul.f32 %v15537_v52, %v1938_v15  ;;  %v1941_v51 = vadd.f32 %v1940_v31, %v15482_v21  ;;  %v15722_v21 = vpop.permute.xlu1 %2361 }
 0x1ef   : > { %v2519_v61 = vpack.c.bf16 %v2478_v0, %v2477_v17  ;;  %v2144_v11 = vadd.f32 %v15543_v55, %v2089_v7  ;;  %v2090_v14 = vmul.f32 %v15537_v52, %v1949_v19  ;;  %v15713_v27 = vld [vmem:[#allocation2 + $0x38] sm:$0xff]  ;;  %vm19240_vm10 = vcmp.eq.s32.totalorder %v15532_v50, 1  ;;  %19461 = vst [vmem:[#allocation33_spill] sm:$0xff] %v15722_v21  ;;  %v15731_v19 = vpop.permute.xlu0 %2364 }
 0x1f0   : > { %2544 = vst.msk [vmem:[#allocation2 + $0x48] sm:$0xff] %vm1462_vm3, %v2520_v18  ;;  %v2142_v20 = vadd.f32 %v15543_v55, %v2087_v12  ;;  %v2088_v26 = vmul.f32 %v15537_v52, %v1941_v51  ;;  %v15718_v28 = vld [vmem:[#allocation2 + $0x30] sm:$0xff]  ;;  %v2632_v53 = vrot.slane %v15713_v27, 4  ;;  %vm19243_vm12 = vcmp.eq.s32.totalorder %v15552_v10, 1  ;;  %19462 = vst [vmem:[#allocation34_spill] sm:$0xff] %v15731_v19 }
 0x1f1   : > { %2543 = vst.msk [vmem:[#allocation2 + $0x40] sm:$0xff] %vm1462_vm3, %v2519_v61  ;;  %v2192_v15 = vmax.f32 %v2144_v11, 0.0  ;;  %v2145_v4 = vadd.f32 %v15543_v55, %v2090_v14  ;;  %v2630_v63 = vrot.slane %v15718_v28, 4  ;;  %vm19241_vm9 = vcmp.eq.s32.totalorder %v15563_v56, 1 }
 0x1f2   : > { %v2190_v17 = vmax.f32 %v2142_v20, 0.0  ;;  %v2143_v13 = vadd.f32 %v15543_v55, %v2088_v26  ;;  %v13013_v7 = vpop.f32.mrb[44].mxu1  ;;  %vm19276_vm8 = vcmp.eq.s32.totalorder %v15722_v21, 1 }
 0x1f3   : > { %v2193_v31 = vmax.f32 %v2145_v4, 0.0  ;;  %v1962_v18 = vadd.f32 %v13013_v7, %v15484_v22  ;;  %v1953_v0 = vpop.f32.mrb[45].mxu1  ;;  %v2631_v12 = vsel %vm929_vm0, %v2628_v16, %v2630_v63  ;;  %v2483_v51 = vsel %vm19243_vm12, %v2192_v15, 0.0 }
 0x1f4   : > { %v2191_v61 = vmax.f32 %v2143_v13, 0.0  ;;  %v1954_v11 = vadd.f32 %v1953_v0, %v15486_v23  ;;  %v13014_v14 = vpop.f32.mrb[46].mxu1  ;;  %13050 = vmatmul.mubr.msk.bf16.gmra.mrb[80].mxu0 %vm1462_vm3, %v2631_v12  ;;  %v2633_v20 = vsel %vm929_vm0, %v2630_v63, %v2632_v53  ;;  %v2481_v22 = vsel %vm19240_vm10, %v2190_v17, 0.0  ;;  %v15755_v17 = vpop.permute.xlu1 %2367 }
 0x1f5   : > { %v2484_v16 = vsel %vm19241_vm9, %v2193_v31, 0.0  ;;  %v2093_v26 = vmul.f32 %v15537_v52, %v1962_v18  ;;  %v1965_v15 = vadd.f32 %v13014_v14, %v15488_v24  ;;  %v1956_v4 = vpop.f32.mrb[47].mxu1  ;;  %13053 = vmatprep.mubr.msk.bf16.mxu0 %vm1462_vm3, %v2633_v20  ;;  %vm19250_vm10 = vcmp.eq.s32.totalorder %v15587_v59, 1  ;;  %19463 = vst [vmem:[#allocation35_spill] sm:$0xff] %v15755_v17 }
 0x1f6   : > { %v2522_v23 = vpack.c.bf16 %v2484_v16, %v2483_v51  ;;  %v2482_v13 = vsel %vm19242_vm13, %v2191_v61, 0.0  ;;  %v2091_v7 = vmul.f32 %v15537_v52, %v1954_v11  ;;  %v1957_v63 = vadd.f32 %v1956_v4, %v15490_v25  ;;  %v15769_v11 = vpop.permute.xlu0 %2370 }
 0x1f7   : > { %v2521_v31 = vpack.c.bf16 %v2482_v13, %v2481_v22  ;;  %v2148_v18 = vadd.f32 %v15543_v55, %v2093_v26  ;;  %v2094_v24 = vmul.f32 %v15537_v52, %v1965_v15  ;;  %v15759_v0 = vld [vmem:[#allocation2 + $0x48] sm:$0xff]  ;;  %vm19251_vm9 = vcmp.eq.s32.totalorder %v15595_v45, 1  ;;  %19464 = vst [vmem:[#allocation36_spill] sm:$0xff] %v15769_v11 }
 0x1f8   : > { %2546 = vst.msk [vmem:[#allocation2 + $0x58] sm:$0xff] %vm1462_vm3, %v2522_v23  ;;  %v2146_v12 = vadd.f32 %v15543_v55, %v2091_v7  ;;  %v2092_v51 = vmul.f32 %v15537_v52, %v1957_v63  ;;  %v15765_v25 = vld [vmem:[#allocation2 + $0x40] sm:$0xff]  ;;  %v19246_v61 = vrot.slane %v15759_v0, 4  ;;  %vm19249_vm13 = vcmp.eq.s32.totalorder %v15612_v9, 1 }
 0x1f9   : > { %2545 = vst.msk [vmem:[#allocation2 + $0x50] sm:$0xff] %vm1462_vm3, %v2521_v31  ;;  %v2196_v14 = vmax.f32 %v2148_v18, 0.0  ;;  %v2149_v20 = vadd.f32 %v15543_v55, %v2094_v24  ;;  %v2634_v22 = vrot.slane %v15765_v25, 4  ;;  %vm19262_vm12 = vcmp.eq.s32.totalorder %v15626_v29, 1 }
 0x1fa   : > { %v2194_v16 = vmax.f32 %v2146_v12, 0.0  ;;  %v2147_v26 = vadd.f32 %v15543_v55, %v2092_v51  ;;  %v13017_v15 = vpop.f32.mrb[0].mxu1  ;;  %v19469_v2 = vrot.slane %v15759_v0, 4  ;;  %v19475_v6 = vshll.u32 %v15765_v25, 16 }
 0x1fb   : > { %v2197_v4 = vmax.f32 %v2149_v20, 0.0  ;;  %v2097_v23 = vmul.f32 %v13017_v15, %v15537_v52  ;;  %v1969_v13 = vpop.f32.mrb[1].mxu1  ;;  %v2635_v7 = vsel %vm929_vm0, %v2632_v53, %v2634_v22  ;;  %v2487_v31 = vsel %vm19251_vm9, %v2196_v14, 0.0  ;;  %v15790_v20 = vpop.permute.xlu1 %2373 }
 0x1fc   : > { %v2195_v18 = vmax.f32 %v2147_v26, 0.0  ;;  %v2095_v24 = vmul.f32 %v15537_v52, %v1969_v13  ;;  %v13018_v12 = vpop.f32.mrb[2].mxu1  ;;  %13054 = vmatmul.mubr.msk.bf16.gmra.mrb[84].mxu0 %vm1462_vm3, %v2635_v7  ;;  %v2637_v51 = vsel %vm929_vm0, %v2634_v22, %v19246_v61  ;;  %19465 = vst [vmem:[#allocation37_spill] sm:$0xff] %v15790_v20  ;;  %v2485_v53 = vsel %vm19247_vm11, %v2194_v16, 0.0  ;;  %v15804_v16 = vpop.permute.xlu0 %2376 }
 0x1fd   : > { %v2488_v15 = vsel %vm19249_vm13, %v2197_v4, 0.0  ;;  %v2152_v14 = vadd.f32 %v15543_v55, %v2097_v23  ;;  %v2098_v26 = vmul.f32 %v13018_v12, %v15537_v52  ;;  %v1972_v13 = vpop.f32.mrb[3].mxu1  ;;  %13057 = vmatprep.mubr.msk.bf16.mxu0 %vm1462_vm3, %v2637_v51  ;;  %vm19260_vm11 = vcmp.eq.s32.totalorder %v15687_v54, 1  ;;  %19466 = vst [vmem:[#allocation38_spill] sm:$0xff] %v15804_v16 }
 0x1fe   : > { %v2524_v7 = vpack.c.bf16 %v2488_v15, %v2487_v31  ;;  %v2486_v63 = vsel %vm19250_vm10, %v2195_v18, 0.0  ;;  %v2150_v22 = vadd.f32 %v15543_v55, %v2095_v24  ;;  %v2096_v61 = vmul.f32 %v15537_v52, %v1972_v13 }
 0x1ff   : > { %v2523_v4 = vpack.c.bf16 %v2486_v63, %v2485_v53  ;;  %v2200_v30 = vmax.f32 %v2152_v14, 0.0  ;;  %v2153_v23 = vadd.f32 %v15543_v55, %v2098_v26  ;;  %v15807_v12 = vld [vmem:[#allocation2 + $0x58] sm:$0xff]  ;;  %vm19266_vm13 = vcmp.eq.s32.totalorder %v15731_v19, 1 }
 0x200   : > { %2548 = vst.msk [vmem:[#allocation2 + $0x68] sm:$0xff] %vm1462_vm3, %v2524_v7  ;;  %v2198_v31 = vmax.f32 %v2150_v22, 0.0  ;;  %v2151_v18 = vadd.f32 %v15543_v55, %v2096_v61  ;;  %v15812_v24 = vld [vmem:[#allocation2 + $0x50] sm:$0xff]  ;;  %vm19278_vm10 = vcmp.eq.s32.totalorder %v15698_v60, 1  ;;  %v19467_v14 = vshrl.u32 %v15718_v28, 16  ;;  %v15845_v54 = vpop.permute.xlu0 %2382 }
 0x201   : > { %2547 = vst.msk [vmem:[#allocation2 + $0x60] sm:$0xff] %vm1462_vm3, %v2523_v4  ;;  %v2491_v63 = vsel %vm19263_vm6, %v2200_v30, 0.0  ;;  %v2201_v53 = vmax.f32 %v2153_v23, 0.0  ;;  %v2638_v15 = vrot.slane %v15812_v24, 4  ;;  %vm19277_vm9 = vcmp.eq.s32.totalorder %v15755_v17, 1  ;;  %v15828_v30 = vpop.permute.xlu1 %2379  ;;  %19472 = vst [vmem:[#allocation40_spill] sm:$0xff] %v15845_v54 }
 0x202   : > { %v3025_v26 = vrot.slane %v19467_v14, 3  ;;  %v2489_v61 = vsel %vm19262_vm12, %v2198_v31, 0.0  ;;  %v2199_v13 = vmax.f32 %v2151_v18, 0.0  ;;  %v13021_v7 = vpop.f32.mrb[4].mxu1  ;;  %19468 = vst [vmem:[#allocation39_spill] sm:$0xff] %v15828_v30  ;;  %v19470_v18 = vrot.slane %v15807_v12, 4 }
 0x203   : > { %v2492_v23 = vsel %vm19260_vm11, %v2201_v53, 0.0  ;;  %v2101_v14 = vmul.f32 %v13021_v7, %v15537_v52  ;;  %v1985_v51 = vpop.f32.mrb[5].mxu1  ;;  %v2639_v31 = vsel %vm929_vm0, %v19469_v2, %v2638_v15  ;;  %v19471_v53 = vshll.u32 %v15718_v28, 16 }
 0x204   : > { %v2641_v22 = vsel %vm929_vm0, %v2638_v15, %v19470_v18  ;;  %v2526_v29 = vpack.c.bf16 %v2492_v23, %v2491_v63  ;;  %v2490_v4 = vsel %vm19261_vm5, %v2199_v13, 0.0  ;;  %v2099_v59 = vmul.f32 %v15537_v52, %v1985_v51  ;;  %v13022_v9 = vpop.f32.mrb[6].mxu1  ;;  %13058 = vmatmul.mubr.msk.bf16.gmra.mrb[88].mxu0 %vm1462_vm3, %v2639_v31 }
 0x205   : > { %v3028_v7 = vrot.slane %v19471_v53, 4  ;;  %v2525_v45 = vpack.c.bf16 %v2490_v4, %v2489_v61  ;;  %v2156_v2 = vadd.f32 %v15543_v55, %v2101_v14  ;;  %v2102_v58 = vmul.f32 %v13022_v9, %v15537_v52  ;;  %v1988_v15 = vpop.f32.mrb[7].mxu1  ;;  %13061 = vmatprep.mubr.msk.bf16.mxu0 %vm1462_vm3, %v2641_v22 }
 0x206   : > { %vm2968_vm11 = vsmask.f32 4352  ;;  %2550 = vst.msk [vmem:[#allocation2 + $0x78] sm:$0xff] %vm1462_vm3, %v2526_v29  ;;  %v2154_v51 = vadd.f32 %v15543_v55, %v2099_v59  ;;  %v2100_v63 = vmul.f32 %v15537_v52, %v1988_v15  ;;  %v19473_v13 = vshrl.u32 %v15713_v27, 16 }
 0x207   : > { %v19267_v31 = vshll.u32 %v15713_v27, 16  ;;  %2549 = vst.msk [vmem:[#allocation2 + $0x70] sm:$0xff] %vm1462_vm3, %v2525_v45  ;;  %v2204_v61 = vmax.f32 %v2156_v2, 0.0  ;;  %v2157_v9 = vadd.f32 %v15543_v55, %v2102_v58  ;;  %v15858_v4 = vld [vmem:[#allocation2 + $0x68] sm:$0xff]  ;;  %v19270_v22 = vshrl.u32 %v15765_v25, 16  ;;  %v15870_v58 = vpop.permute.xlu1 %2385 }
 0x208   : > { %v3034_v23 = vrot.slane %v19473_v13, 3  ;;  %vm19279_vm5 = vcmp.eq.s32.totalorder %v15804_v16, 1  ;;  %v2202_v59 = vmax.f32 %v2154_v51, 0.0  ;;  %v2155_v14 = vadd.f32 %v15543_v55, %v2100_v63  ;;  %v15864_v18 = vld [vmem:[#allocation2 + $0x60] sm:$0xff]  ;;  %19474 = vst [vmem:[#allocation41_spill] sm:$0xff] %v15870_v58 }
 0x209   : > { %v2644_v53 = vrot.slane %v15858_v4, 4  ;;  %v15867_v15 = vor.u32 %v3028_v7, %v3025_v26  ;;  %vm2449_vm12 = vcmp.eq.s32.totalorder %v15769_v11, 1  ;;  %v2495_v45 = vsel %vm19266_vm13, %v2204_v61, 0.0  ;;  %v15885_v61 = vpop.permute.xlu0 %2388 }
 0x20a   : > { %v2205_v2 = vmax.f32 %v2157_v9, 0.0  ;;  %v2642_v13 = vrot.slane %v15864_v18, 4  ;;  %v3037_v51 = vrot.slane %v19267_v31, 4  ;;  %vm19288_vm6 = vcmp.eq.s32.totalorder %v15828_v30, 1  ;;  %v13025_v7 = vpop.f32.mrb[8].mxu1  ;;  %19476 = vst [vmem:[#allocation42_spill] sm:$0xff] %v15885_v61 }
 0x20b   : > { %v2493_v63 = vsel %vm19278_vm10, %v2202_v59, 0.0  ;;  %v2203_v26 = vmax.f32 %v2155_v14, 0.0  ;;  %v3043_v29 = vrot.slane %v19270_v22, 3  ;;  %v3046_v19 = vrot.slane %v19475_v6, 4  ;;  %v2001_v50 = vpop.f32.mrb[9].mxu1 }
 0x20c   : > { %vm19287_vm13 = vcmp.eq.s32.totalorder %v15790_v20, 1  ;;  %v2496_v9 = vsel %vm19277_vm9, %v2205_v2, 0.0  ;;  %v2105_v31 = vmul.f32 %v13025_v7, %v15537_v52  ;;  %v19477_v59 = vrot.slane %v15807_v12, 4  ;;  %v13026_v10 = vpop.f32.mrb[10].mxu1 }
 0x20d   : > { %v2645_v60 = vsel %vm929_vm0, %v2642_v13, %v2644_v53  ;;  %v2528_v22 = vpack.c.bf16 %v2496_v9, %v2495_v45  ;;  %v2494_v6 = vsel %vm19276_vm8, %v2203_v26, 0.0  ;;  %v2103_v56 = vmul.f32 %v15537_v52, %v2001_v50  ;;  %v2004_v46 = vpop.f32.mrb[11].mxu1  ;;  %v15926_v9 = vpop.permute.xlu0 %2394 }
 0x20e   : > { %v2643_v14 = vsel %vm929_vm0, %v19477_v59, %v2642_v13  ;;  %v3038_v17 = vor.u32 %v3037_v51, %v3034_v23  ;;  %v2527_v2 = vpack.c.bf16 %v2494_v6, %v2493_v63  ;;  %v2160_v7 = vadd.f32 %v15543_v55, %v2105_v31  ;;  %v15901_v59 = vld [vmem:[#allocation2 + $0x78] sm:$0xff]  ;;  %v15906_v26 = vld [vmem:[#allocation2 + $0x70] sm:$0xff]  ;;  %19479 = vst [vmem:[#allocation44_spill] sm:$0xff] %v15926_v9 }
 0x20f   : > { %13062 = vmatmul.mubr.msk.bf16.gmra.mrb[92].mxu0 %vm1462_vm3, %v2643_v14  ;;  %v2106_v47 = vmul.f32 %v13026_v10, %v15537_v52  ;;  %v3047_v45 = vor.u32 %v3046_v19, %v3043_v29  ;;  %2552 = vst.msk [vmem:[#allocation2 + $0x88] sm:$0xff] %vm1462_vm3, %v2528_v22  ;;  %v2158_v13 = vadd.f32 %v15543_v55, %v2103_v56  ;;  %v19280_v23 = vrot.slane %v15901_v59, 4  ;;  %v15913_v10 = vpop.permute.xlu1 %2391 }
 0x210   : > { %13065 = vmatprep.mubr.msk.bf16.mxu0 %vm1462_vm3, %v2645_v60  ;;  %v2104_v50 = vmul.f32 %v15537_v52, %v2004_v46  ;;  %v15911_v31 = vsel %vm2968_vm11, %v15867_v15, %v3038_v17  ;;  %19478 = vst [vmem:[#allocation43_spill] sm:$0xff] %v15913_v10  ;;  %2551 = vst.msk [vmem:[#allocation2 + $0x80] sm:$0xff] %vm1462_vm3, %v2527_v2  ;;  %v2208_v60 = vmax.f32 %v2160_v7, 0.0  ;;  %v2646_v22 = vrot.slane %v15906_v26, 4 }
 0x211   : > { %v2161_v19 = vadd.f32 %v15543_v55, %v2106_v47  ;;  %v15919_v56 = vsel %vm2968_vm11, %v3038_v17, %v3047_v45  ;;  %vm19293_vm8 = vcmp.eq.s32.totalorder %v15885_v61, 1  ;;  %v2206_v46 = vmax.f32 %v2158_v13, 0.0 }
 0x212   : > { %v2159_v29 = vadd.f32 %v15543_v55, %v2104_v50  ;;  %v19282_v51 = vshrl.u32 %v15759_v0, 16  ;;  %v19284_v63 = vshll.u32 %v15759_v0, 16  ;;  %vm2453_vm9 = vcmp.eq.s32.totalorder %v15845_v54, 1  ;;  %v13029_v13 = vpop.f32.mrb[12].mxu1 }
 0x213   : > { %v2499_v47 = vsel %vm19279_vm5, %v2208_v60, 0.0  ;;  %v2209_v14 = vmax.f32 %v2161_v19, 0.0  ;;  %v2647_v17 = vsel %vm929_vm0, %v2644_v53, %v2646_v22  ;;  %v2649_v6 = vsel %vm929_vm0, %v2646_v22, %v19280_v23  ;;  %v2017_v22 = vpop.f32.mrb[13].mxu1  ;;  %v15951_v21 = vpop.permute.xlu1 %2397 }
 0x214   : > { %vm2456_vm10 = vcmp.eq.s32.totalorder %v15913_v10, 1  ;;  %v2497_v2 = vsel %vm2449_vm12, %v2206_v46, 0.0  ;;  %v2207_v7 = vmax.f32 %v2159_v29, 0.0  ;;  %v3052_v50 = vrot.slane %v19282_v51, 3  ;;  %v13030_v16 = vpop.f32.mrb[14].mxu1  ;;  %19480 = vst [vmem:[#allocation45_spill] sm:$0xff] %v15951_v21 }
 0x215   : > { %v3055_v60 = vrot.slane %v19284_v63, 4  ;;  %vm19297_vm5 = vcmp.eq.s32.totalorder %v15870_v58, 1  ;;  %v2500_v53 = vsel %vm19288_vm6, %v2209_v14, 0.0  ;;  %v2109_v19 = vmul.f32 %v13029_v13, %v15537_v52  ;;  %v2020_v23 = vpop.f32.mrb[15].mxu1 }
 0x216   : > { %v19289_v46 = vshll.u32 %v15812_v24, 16  ;;  %v2530_v29 = vpack.c.bf16 %v2500_v53, %v2499_v47  ;;  %v2498_v11 = vsel %vm19287_vm13, %v2207_v7, 0.0  ;;  %v2107_v51 = vmul.f32 %v15537_v52, %v2017_v22  ;;  %v15956_v47 = vld [vmem:[#allocation2 + $0x88] sm:$0xff] }
 0x217   : > { %13066 = vmatmul.mubr.msk.bf16.gmra.mrb[96].mxu0 %vm1462_vm3, %v2647_v17  ;;  %v3056_v63 = vor.u32 %v3055_v60, %v3052_v50  ;;  %v2529_v14 = vpack.c.bf16 %v2498_v11, %v2497_v2  ;;  %v2164_v13 = vadd.f32 %v15543_v55, %v2109_v19  ;;  %v2110_v30 = vmul.f32 %v13030_v16, %v15537_v52  ;;  %v15963_v60 = vld [vmem:[#allocation2 + $0x80] sm:$0xff]  ;;  %v15969_v2 = vpop.permute.xlu0 %2400 }
 0x218   : > { %13069 = vmatprep.mubr.msk.bf16.mxu0 %vm1462_vm3, %v2649_v6  ;;  %v19481_v7 = vshrl.u32 %v15812_v24, 16  ;;  %2554 = vst.msk [vmem:[#allocation2 + $0x98] sm:$0xff] %vm1462_vm3, %v2530_v29  ;;  %v2162_v17 = vadd.f32 %v15543_v55, %v2107_v51  ;;  %v2108_v50 = vmul.f32 %v15537_v52, %v2020_v23  ;;  %19482 = vst [vmem:[#allocation46_spill] sm:$0xff] %v15969_v2  ;;  %v2650_v22 = vrot.slane %v15963_v60, 4 }
 0x219   : > { %v15967_v16 = vsel %vm2968_vm11, %v3047_v45, %v3056_v63  ;;  %2553 = vst.msk [vmem:[#allocation2 + $0x90] sm:$0xff] %vm1462_vm3, %v2529_v14  ;;  %v2212_v6 = vmax.f32 %v2164_v13, 0.0  ;;  %v2165_v19 = vadd.f32 %v15543_v55, %v2110_v30  ;;  %v3064_v51 = vrot.slane %v19289_v46, 4 }
 0x21a   : > { %v3061_v53 = vrot.slane %v19481_v7, 3  ;;  %vm19310_vm13 = vcmp.eq.s32.totalorder %v15969_v2, 1  ;;  %v2210_v23 = vmax.f32 %v2162_v17, 0.0  ;;  %v2163_v29 = vadd.f32 %v15543_v55, %v2108_v50  ;;  %v13033_v20 = vpop.f32.mrb[16].mxu1 }
 0x21b   : > { %vm19308_vm6 = vcmp.eq.s32.totalorder %v15926_v9, 1  ;;  %v2503_v14 = vsel %vm19293_vm8, %v2212_v6, 0.0  ;;  %v2213_v30 = vmax.f32 %v2165_v19, 0.0  ;;  %v19483_v13 = vrot.slane %v15901_v59, 4  ;;  %v15994_v6 = vpop.permute.xlu1 %2403  ;;  %v2033_v61 = vpop.f32.mrb[17].mxu1 }
 0x21c   : > { %v19484_v46 = vrot.slane %v15956_v47, 4  ;;  %v2501_v50 = vsel %vm2453_vm9, %v2210_v23, 0.0  ;;  %v2211_v45 = vmax.f32 %v2163_v29, 0.0  ;;  %v3065_v7 = vor.u32 %v3064_v51, %v3061_v53  ;;  %19486 = vst [vmem:[#allocation47_spill] sm:$0xff] %v15994_v6  ;;  %v13034_v51 = vpop.f32.mrb[18].mxu1 }
 0x21d   : > { %v2651_v11 = vsel %vm929_vm0, %v19483_v13, %v2650_v22  ;;  %v19485_v49 = vshrl.u32 %v15807_v12, 16  ;;  %vm19307_vm8 = vcmp.eq.s32.totalorder %v15951_v21, 1  ;;  %v2504_v19 = vsel %vm2456_vm10, %v2213_v30, 0.0 }
 0x21e   : > { %v2653_v17 = vsel %vm929_vm0, %v2650_v22, %v19484_v46  ;;  %v2113_v13 = vmul.f32 %v13033_v20, %v15537_v52  ;;  %v19487_v46 = vshll.u32 %v15807_v12, 16  ;;  %v19298_v23 = vshrl.u32 %v15864_v18, 16 }
 0x21f   : > { %v3070_v48 = vrot.slane %v19485_v49, 3  ;;  %v2532_v29 = vpack.c.bf16 %v2504_v19, %v2503_v14  ;;  %v2502_v53 = vsel %vm19297_vm5, %v2211_v45, 0.0  ;;  %v2111_v49 = vmul.f32 %v15537_v52, %v2033_v61  ;;  %13070 = vmatmul.mubr.msk.bf16.gmra.mrb[100].mxu0 %vm1462_vm3, %v2651_v11  ;;  %v16012_v14 = vld [vmem:[#allocation2 + $0x98] sm:$0xff] }
 0x220   : > { %v3073_v22 = vrot.slane %v19487_v46, 4  ;;  %v16007_v54 = vsel %vm2968_vm11, %v3056_v63, %v3065_v7  ;;  %v2531_v30 = vpack.c.bf16 %v2502_v53, %v2501_v50  ;;  %v2168_v20 = vadd.f32 %v15543_v55, %v2113_v13  ;;  %v2036_v46 = vpop.f32.mrb[19].mxu1  ;;  %13073 = vmatprep.mubr.msk.bf16.mxu0 %vm1462_vm3, %v2653_v17  ;;  %v16017_v45 = vld [vmem:[#allocation2 + $0x90] sm:$0xff] }
 0x221   : > { %v2114_v10 = vmul.f32 %v13034_v51, %v15537_v52  ;;  %2556 = vst.msk [vmem:[#allocation2 + $0xa8] sm:$0xff] %vm1462_vm3, %v2532_v29  ;;  %v2166_v61 = vadd.f32 %v15543_v55, %v2111_v49  ;;  %v2112_v11 = vmul.f32 %v15537_v52, %v2036_v46  ;;  %v19304_v63 = vrot.slane %v16012_v14, 4  ;;  %v16032_v46 = vpop.permute.xlu0 %2406 }
 0x222   : > { %v3074_v19 = vor.u32 %v3073_v22, %v3070_v48  ;;  %v3079_v50 = vrot.slane %v19298_v23, 3  ;;  %2555 = vst.msk [vmem:[#allocation2 + $0xa0] sm:$0xff] %vm1462_vm3, %v2531_v30  ;;  %v2216_v13 = vmax.f32 %v2168_v20, 0.0  ;;  %v2654_v48 = vrot.slane %v16017_v45, 4  ;;  %19488 = vst [vmem:[#allocation48_spill] sm:$0xff] %v16032_v46  ;;  %v16034_v30 = vpop.permute.xlu1 %2409  ;;  %v13037_v49 = vpop.f32.mrb[20].mxu1 }
 0x223   : > { %v2169_v17 = vadd.f32 %v15543_v55, %v2114_v10  ;;  %v2214_v29 = vmax.f32 %v2166_v61, 0.0  ;;  %v2167_v53 = vadd.f32 %v15543_v55, %v2112_v11  ;;  %vm19309_vm5 = vcmp.eq.s32.totalorder %v15994_v6, 1  ;;  %19489 = vst [vmem:[#allocation49_spill] sm:$0xff] %v16034_v30  ;;  %v2049_v2 = vpop.f32.mrb[21].mxu1 }
 0x224   : > { %v16026_v22 = vsel %vm2968_vm11, %v3065_v7, %v3074_v19  ;;  %v2507_v10 = vsel %vm19310_vm13, %v2216_v13, 0.0  ;;  %v19490_v7 = vrot.slane %v15956_v47, 4  ;;  %v2657_v51 = vsel %vm929_vm0, %v2654_v48, %v19304_v63  ;;  %v13038_v63 = vpop.f32.mrb[22].mxu1 }
 0x225   : > { %v2217_v20 = vmax.f32 %v2169_v17, 0.0  ;;  %v2505_v11 = vsel %vm19308_vm6, %v2214_v29, 0.0  ;;  %v2215_v23 = vmax.f32 %v2167_v53, 0.0  ;;  %v19491_v58 = vshll.u32 %v15864_v18, 16  ;;  %v2052_v44 = vpop.f32.mrb[23].mxu1 }
 0x226   : > { %v2655_v61 = vsel %vm929_vm0, %v19490_v7, %v2654_v48  ;;  %v2117_v17 = vmul.f32 %v13037_v49, %v15537_v52  ;;  %v19492_v7 = vshrl.u32 %v15858_v4, 16  ;;  %v19311_v29 = vshll.u32 %v15858_v4, 16 }
 0x227   : > { %v3082_v42 = vrot.slane %v19491_v58, 4  ;;  %v2508_v13 = vsel %vm19309_vm5, %v2217_v20, 0.0  ;;  %v2506_v9 = vsel %vm19307_vm8, %v2215_v23, 0.0  ;;  %v2115_v48 = vmul.f32 %v15537_v52, %v2049_v2  ;;  %13074 = vmatmul.mubr.msk.bf16.gmra.mrb[104].mxu0 %vm1462_vm3, %v2655_v61 }
 0x228   : > { %v3088_v41 = vrot.slane %v19492_v7, 3  ;;  %v2534_v53 = vpack.c.bf16 %v2508_v13, %v2507_v10  ;;  %v2533_v6 = vpack.c.bf16 %v2506_v9, %v2505_v11  ;;  %v2172_v20 = vadd.f32 %v15543_v55, %v2117_v17  ;;  %13077 = vmatprep.mubr.msk.bf16.mxu0 %vm1462_vm3, %v2657_v51  ;;  %v16061_v7 = vld [vmem:[#allocation2 + $0xa8] sm:$0xff] }
 0x229   : > { %v3083_v58 = vor.u32 %v3082_v42, %v3079_v50  ;;  %v2118_v49 = vmul.f32 %v13038_v63, %v15537_v52  ;;  %v3091_v10 = vrot.slane %v19311_v29, 4  ;;  %v2170_v2 = vadd.f32 %v15543_v55, %v2115_v48  ;;  %v16068_v42 = vld [vmem:[#allocation2 + $0xa0] sm:$0xff]  ;;  %v16073_v63 = vpop.permute.xlu0 %2412  ;;  %v16075_v50 = vpop.permute.xlu1 %2415 }
 0x22a   : > { %2558 = vst.msk [vmem:[#allocation2 + $0xb8] sm:$0xff] %vm1462_vm3, %v2534_v53  ;;  %v2116_v23 = vmul.f32 %v15537_v52, %v2052_v44  ;;  %19493 = vst [vmem:[#allocation50_spill] sm:$0xff] %v16073_v63  ;;  %v2220_v51 = vmax.f32 %v2172_v20, 0.0  ;;  %v2658_v11 = vrot.slane %v16068_v42, 4  ;;  %v2660_v52 = vrot.slane %v16061_v7, 4 }
 0x22b   : > { %v16071_v9 = vsel %vm2968_vm11, %v3074_v19, %v3083_v58  ;;  %19494 = vst [vmem:[#allocation51_spill] sm:$0xff] %v16075_v50  ;;  %2557 = vst.msk [vmem:[#allocation2 + $0xb0] sm:$0xff] %vm1462_vm3, %v2533_v6  ;;  %v2173_v61 = vadd.f32 %v15543_v55, %v2118_v49  ;;  %v16080_v13 = vor.u32 %v3091_v10, %v3088_v41  ;;  %v2218_v17 = vmax.f32 %v2170_v2, 0.0  ;;  %v2564_v49 = vld [vmem:[#allocation2] sm:$0xf8] }
 0x22c   : > { %v2171_v44 = vadd.f32 %v15543_v55, %v2116_v23  ;;  %vm19327_vm8 = vcmp.eq.s32.totalorder %v16032_v46, 1  ;;  %vm2463_vm6 = vcmp.eq.s32.totalorder %v16073_v63, 1  ;;  %vm19329_vm5 = vcmp.eq.s32.totalorder %v16075_v50, 1 }
 0x22d   : > { %v2221_v19 = vmax.f32 %v2173_v61, 0.0  ;;  %v16089_v53 = vsel %vm2968_vm11, %v3083_v58, %v16080_v13  ;;  %vm19320_vm13 = vcmp.eq.s32.totalorder %v16034_v30, 1  ;;  %v2511_v41 = vsel %vm2463_vm6, %v2220_v51, 0.0 }
 0x22e   : > { %v2219_v6 = vmax.f32 %v2171_v44, 0.0  ;;  %v19495_v48 = vrot.slane %v16012_v14, 4  ;;  %v2509_v10 = vsel %vm19327_vm8, %v2218_v17, 0.0  ;;  %v2661_v23 = vsel %vm929_vm0, %v2658_v11, %v2660_v52 }
 0x22f   : > { %v2512_v55 = vsel %vm19329_vm5, %v2221_v19, 0.0  ;;  %v2970_v19 = vshrl.u32 %v2564_v49, 16  ;;  %v19505_v50 = vshll.u32 %v15671_v57, 16  ;;  %v19513_v39 = vshrl.u32 %v15759_v0, 16 }
 0x230   : > { %v2659_v20 = vsel %vm929_vm0, %v19495_v48, %v2658_v11  ;;  %v2536_v2 = vpack.c.bf16 %v2512_v55, %v2511_v41  ;;  %v2510_v58 = vsel %vm19320_vm13, %v2219_v6, 0.0  ;;  %v2973_v48 = vshll.u32 %v2564_v49, 16 }
 0x231   : > { %13078 = vmatmul.mubr.msk.bf16.gmra.mrb[108].mxu0 %vm1462_vm3, %v2659_v20  ;;  %v2535_v51 = vpack.c.bf16 %v2510_v58, %v2509_v10  ;;  %v16106_v61 = vld [vmem:[#allocation2 + $0xb8] sm:$0xff]  ;;  %v19496_v6 = vshrl.u32 %v15454_v8, 16  ;;  %v19497_v11 = vshll.u32 %v15454_v8, 16  ;;  %v19498_v20 = vshrl.u32 %v15616_v62, 16 }
 0x232   : > { %13081 = vmatprep.mubr.msk.bf16.mxu0 %vm1462_vm3, %v2661_v23  ;;  %2560 = vst.msk [vmem:[#allocation2 + $0xc8] sm:$0xff] %vm1462_vm3, %v2536_v2  ;;  %v16109_v44 = vld [vmem:[#allocation2 + $0xb0] sm:$0xff]  ;;  %v2664_v41 = vrot.slane %v16106_v61, 4  ;;  %v2972_v23 = vrot.slane %v2970_v19, 3  ;;  %v19499_v49 = vshrl.u32 %v15622_v1, 16  ;;  %v19500_v19 = vshll.u32 %v15622_v1, 16 }
 0x233   : > { %2559 = vst.msk [vmem:[#allocation2 + $0xc0] sm:$0xff] %vm1462_vm3, %v2535_v51  ;;  %v2662_v17 = vrot.slane %v16109_v44, 4  ;;  %v2975_v51 = vrot.slane %v2973_v48, 4  ;;  %v2980_v30 = vrot.slane %v19496_v6, 3  ;;  %v2983_v55 = vrot.slane %v19497_v11, 4 }
 0x234   : > { %v2998_v46 = vrot.slane %v19498_v20, 3  ;;  %v2989_v58 = vrot.slane %v19499_v49, 3  ;;  %v2992_v48 = vrot.slane %v19500_v19, 4  ;;  %v19502_v8 = vshrl.u32 %v15676_v3, 16 }
 0x235   : > { %v2663_v29 = vsel %vm929_vm0, %v2660_v52, %v2662_v17  ;;  %v2665_v2 = vsel %vm929_vm0, %v2662_v17, %v2664_v41  ;;  %v19501_v52 = vshll.u32 %v15616_v62, 16  ;;  %v19503_v11 = vshll.u32 %v15676_v3, 16 }
 0x236   : > { %v3007_v6 = vrot.slane %v19502_v8, 3  ;;  %v3019_v49 = vrot.slane %v19505_v50, 4  ;;  %v2976_v19 = vor.u32 %v2975_v51, %v2972_v23  ;;  %v2993_v43 = vor.u32 %v2992_v48, %v2989_v58 }
 0x237   : > { %v3001_v10 = vrot.slane %v19501_v52, 4  ;;  %v3010_v20 = vrot.slane %v19503_v11, 4  ;;  %v2984_v52 = vor.u32 %v2983_v55, %v2980_v30  ;;  %v3679_v50 = vsel %vm1535_vm1, %v15643_v5, 0 }
 0x238   : > { %v16173_v5 = vshrl.u32 %v15901_v59, 16  ;;  %vm3496_vm13 = vsmask.f32 3328  ;;  %v16182_v58 = vshll.u32 %v15963_v60, 16  ;;  %v16188_v51 = vshll.u32 %v15956_v47, 16 }
 0x239   : > { %13082 = vmatmul.mubr.msk.bf16.gmra.mrb[112].mxu0 %vm1462_vm3, %v2663_v29  ;;  %v19504_v29 = vshrl.u32 %v15671_v57, 16  ;;  %v3011_v38 = vor.u32 %v3010_v20, %v3007_v6  ;;  %v2985_v8 = vsel %vm2968_vm11, %v2976_v19, %v2984_v52  ;;  %v2994_v23 = vsel %vm2968_vm11, %v2984_v52, %v2993_v43 }
 0x23a   : > { %13085 = vmatprep.mubr.msk.bf16.mxu0 %vm1462_vm3, %v2665_v2  ;;  %v16146_v63 = vld [vmem:[#allocation2 + $0xc0] sm:$0xf]  ;;  %v3002_v2 = vor.u32 %v3001_v10, %v2998_v46  ;;  %v16176_v10 = vshll.u32 %v15901_v59, 16  ;;  %v16194_v48 = vshll.u32 %v16017_v45, 16  ;;  %v16197_v59 = vshrl.u32 %v16012_v14, 16 }
 0x23b   : > { %v3016_v17 = vrot.slane %v19504_v29, 3  ;;  %v2666_v21 = vrot.slane %v16146_v63, 4  ;;  %v16200_v6 = vshll.u32 %v16012_v14, 16  ;;  %v16206_v20 = vshll.u32 %v16068_v42, 16 }
 0x23c   : > { %v3003_v30 = vsel %vm2968_vm11, %v2993_v43, %v3002_v2  ;;  %v16160_v46 = vsel %vm2968_vm11, %v3002_v2, %v3011_v38  ;;  %v16179_v43 = vshrl.u32 %v15963_v60, 16  ;;  %v16203_v60 = vshrl.u32 %v16068_v42, 16 }
 0x23d   : > { %v16149_v37 = vor.u32 %v3019_v49, %v3016_v17  ;;  %v2667_v11 = vsel %vm929_vm0, %v2664_v41, %v2666_v21  ;;  %v16167_v21 = vshrl.u32 %v15906_v26, 16  ;;  %v16170_v41 = vshll.u32 %v15906_v26, 16 }
 0x23e   : > { %v16191_v26 = vshrl.u32 %v16017_v45, 16  ;;  %v19506_v29 = vshrl.u32 %v15718_v28, 16  ;;  %v16214_v45 = vshll.u32 %v16061_v7, 16  ;;  %v16217_v49 = vshrl.u32 %v16109_v44, 16 }
 0x23f   : > { %v16164_v55 = vsel %vm2968_vm11, %v3011_v38, %v16149_v37  ;;  %v16185_v38 = vshrl.u32 %v15956_v47, 16  ;;  %v16209_v47 = vshrl.u32 %v16061_v7, 16  ;;  %v19507_v14 = vshll.u32 %v15718_v28, 16 }
 0x240   : > { %v3525_v17 = vrot.slane %v19506_v29, 4  ;;  %v19508_v52 = vshrl.u32 %v15713_v27, 16  ;;  %v16224_v42 = vshll.u32 %v16109_v44, 16  ;;  %v19509_v7 = vshll.u32 %v15713_v27, 16 }
 0x241   : > { %13086 = vmatmul.mubr.msk.bf16.gmra.mrb[116].mxu0 %vm1462_vm3, %v2667_v11  ;;  %v3526_v19 = vrot.slane %v19507_v14, 5  ;;  %v19510_v29 = vshrl.u32 %v15765_v25, 16  ;;  %v19511_v28 = vshll.u32 %v15765_v25, 16  ;;  %v3537_v35 = vrot.slane %v19513_v39, 4 }
 0x242   : > { %13091 = vmatprep.mubr.msk.bf16.mxu0 %vm1462_vm3, %v2985_v8  ;;  %v3529_v2 = vrot.slane %v19508_v52, 4  ;;  %v16229_v8 = vld [vmem:[%s19221_s10 + $0x6] sm:$0x3]  ;;  %v3530_v11 = vrot.slane %v19509_v7, 5  ;;  %v16239_v52 = vshrl.u32 %v16106_v61, 16  ;;  %v19514_v33 = vshll.u32 %v15759_v0, 16 }
 0x243   : > { %v3533_v40 = vrot.slane %v19510_v29, 4  ;;  %v3534_v14 = vrot.slane %v19511_v28, 5  ;;  %v16241_v44 = vor.u32 %v3526_v19, %v3525_v17  ;;  %v19515_v25 = vshrl.u32 %v15812_v24, 16 }
 0x244   : > { %19512 = vst [vmem:[#allocation52_spill] sm:$0xff] %v16239_v52  ;;  %v3538_v27 = vrot.slane %v19514_v33, 5  ;;  %v3531_v7 = vor.u32 %v3530_v11, %v3529_v2  ;;  %v16253_v17 = vshll.u32 %v16106_v61, 16  ;;  %v19517_v33 = vshrl.u32 %v15807_v12, 16 }
 0x245   : > { %v3535_v29 = vor.u32 %v3534_v14, %v3533_v40  ;;  %v3541_v28 = vrot.slane %v19515_v25, 4  ;;  %v19519_v61 = vshrl.u32 %v15864_v18, 16  ;;  %v19520_v14 = vshll.u32 %v15864_v18, 16 }
 0x246   : > { %v3539_v39 = vor.u32 %v3538_v27, %v3537_v35  ;;  %v3545_v0 = vrot.slane %v19517_v33, 4  ;;  %v16263_v40 = vsel %vm3496_vm13, %v16241_v44, %v3531_v7  ;;  %v3561_v18 = vrot.slane %v16173_v5, 4 }
 0x247   : > { %v3549_v2 = vrot.slane %v19519_v61, 4  ;;  %v3550_v27 = vrot.slane %v19520_v14, 5  ;;  %v3566_v14 = vrot.slane %v16182_v58, 5  ;;  %v3589_v34 = vrot.slane %v16217_v49, 4 }
 0x248   : > { %v16271_v11 = vsel %vm3496_vm13, %v3535_v29, %v3539_v39  ;;  %vm19356_vm8 = vsmask.f32 256  ;;  %vm4879_vm5 = vsmask.f32 7424 }
 0x249   : > { %13092 = vmatmul.mubr.msk.bf16.vlgmr.msra.gmra.mrb[72].mxu0 %vm1462_vm3, %v2994_v23  ;;  %v19516_v23 = vshll.u32 %v15812_v24, 16  ;;  %v16266_v24 = vsel %vm3496_vm13, %v3531_v7, %v3535_v29  ;;  %v19522_v7 = vshll.u32 %v15858_v4, 16 }
 0x24a   : > { %13140 = vmatpush3.bf16.msra.mxu0 %v3679_v50  ;;  %13095 = vmatprep.mubr.msk.bf16.mxu0 %vm1462_vm3, %v3003_v30  ;;  %v19518_v50 = vshll.u32 %v15807_v12, 16  ;;  %v19521_v12 = vshrl.u32 %v15858_v4, 16 }
 0x24b   : > { %v3542_v36 = vrot.slane %v19516_v23, 5  ;;  %14764 = vmatprep.subr.msk.bf16.mxu0 %vm1535_vm1, %v16229_v8  ;;  %v3554_v33 = vrot.slane %v19522_v7, 5 }
 0x24c   : > { %v3546_v30 = vrot.slane %v19518_v50, 5  ;;  %v3553_v25 = vrot.slane %v19521_v12, 4  ;;  %v3562_v50 = vrot.slane %v16176_v10, 5 }
 0x24d   : > { %v3543_v19 = vor.u32 %v3542_v36, %v3541_v28  ;;  %v3557_v36 = vrot.slane %v16167_v21, 4  ;;  %v3558_v28 = vrot.slane %v16170_v41, 5 }
 0x24e   : > { %v3547_v35 = vor.u32 %v3546_v30, %v3545_v0  ;;  %v3551_v0 = vor.u32 %v3550_v27, %v3549_v2  ;;  %v3555_v30 = vor.u32 %v3554_v33, %v3553_v25  ;;  %v3563_v12 = vor.u32 %v3562_v50, %v3561_v18 }
 0x24f   : > { %v16278_v23 = vsel %vm3496_vm13, %v3539_v39, %v3543_v19  ;;  %v3559_v61 = vor.u32 %v3558_v28, %v3557_v36  ;;  %v3565_v39 = vrot.slane %v16179_v43, 4  ;;  %v3570_v2 = vrot.slane %v16188_v51, 5 }
 0x250   : > { %v16285_v29 = vsel %vm3496_vm13, %v3543_v19, %v3547_v35  ;;  %v16294_v4 = vsel %vm3496_vm13, %v3547_v35, %v3551_v0  ;;  %v3569_v19 = vrot.slane %v16185_v38, 4  ;;  %v16301_v27 = vsel %vm3496_vm13, %v3551_v0, %v3555_v30 }
 0x251   : > { %19523 = vst [vmem:[#allocation53_spill] sm:$0xff] %v16285_v29  ;;  %13096 = vmatmul.mubr.msk.bf16.gmra.mrb[76].mxu0 %vm1462_vm3, %v16160_v46  ;;  %19524 = vst [vmem:[#allocation54_spill] sm:$0xff] %v16294_v4  ;;  %v16304_v25 = vsel %vm3496_vm13, %v3555_v30, %v3559_v61  ;;  %v3567_v7 = vor.u32 %v3566_v14, %v3565_v39  ;;  %v3573_v46 = vrot.slane %v16191_v26, 4  ;;  %v3574_v36 = vrot.slane %v16194_v48, 5 }
 0x252   : > { %13099 = vmatprep.mubr.msk.bf16.mxu0 %vm1462_vm3, %v16164_v55  ;;  %19525 = vst [vmem:[#allocation55_spill] sm:$0xff] %v16301_v27  ;;  %19526 = vst [vmem:[#allocation56_spill] sm:$0xff] %v16304_v25  ;;  %v16308_v35 = vsel %vm3496_vm13, %v3559_v61, %v3563_v12  ;;  %v3571_v33 = vor.u32 %v3570_v2, %v3569_v19  ;;  %v3577_v28 = vrot.slane %v16197_v59, 4  ;;  %v3578_v55 = vrot.slane %v16200_v6, 5 }
 0x253   : > { %19527 = vst [vmem:[#allocation57_spill] sm:$0xff] %v16308_v35  ;;  %v16313_v18 = vsel %vm3496_vm13, %v3563_v12, %v3567_v7  ;;  %v3581_v0 = vrot.slane %v16203_v60, 4  ;;  %v3582_v50 = vrot.slane %v16206_v20, 5  ;;  %v3575_v39 = vor.u32 %v3574_v36, %v3573_v46 }
 0x254   : > { %19528 = vst [vmem:[#allocation58_spill] sm:$0xff] %v16313_v18  ;;  %v16319_v30 = vsel %vm3496_vm13, %v3567_v7, %v3571_v33  ;;  %v3585_v61 = vrot.slane %v16209_v47, 4  ;;  %v3586_v14 = vrot.slane %v16214_v45, 5  ;;  %v3579_v19 = vor.u32 %v3578_v55, %v3577_v28 }
 0x255   : > { %19529 = vst [vmem:[#allocation59_spill] sm:$0xff] %v16319_v30  ;;  %v3583_v2 = vor.u32 %v3582_v50, %v3581_v0  ;;  %v3590_v12 = vrot.slane %v16224_v42, 5  ;;  %v16326_v18 = vsel %vm3496_vm13, %v3571_v33, %v3575_v39  ;;  %v3593_v25 = vrot.slane %v16239_v52, 4 }
 0x256   : > { %19530 = vst [vmem:[#allocation60_spill] sm:$0xff] %v16326_v18  ;;  %v3587_v35 = vor.u32 %v3586_v14, %v3585_v61  ;;  %v3594_v7 = vrot.slane %v16253_v17, 5  ;;  %v3030_v46 = vsel %vm2968_vm11, %v16149_v37, %v15867_v15  ;;  %v16334_v36 = vsel %vm3496_vm13, %v3575_v39, %v3579_v19  ;;  %v16361_v15 = vld [vmem:[#allocation2 + $0x10] sm:$0xff] }
 0x257   : > { %19531 = vst [vmem:[#allocation61_spill] sm:$0xff] %v16334_v36  ;;  %v16337_v28 = vsel %vm3496_vm13, %v3579_v19, %v3583_v2  ;;  %v3591_v55 = vor.u32 %v3590_v12, %v3589_v34  ;;  %v4085_v34 = vrot.slane %v16167_v21, 7  ;;  %19537 = vst [vmem:[#allocation67_spill] sm:$0xff] %v16361_v15  ;;  %v3097_v61 = vrot.slane %v16167_v21, 3  ;;  %v16376_v19 = vld [vmem:[#allocation2 + $0x18] sm:$0xff] }
 0x258   : > { %19532 = vst [vmem:[#allocation62_spill] sm:$0xff] %v16337_v28  ;;  %v16341_v33 = vsel %vm3496_vm13, %v3583_v2, %v3587_v35  ;;  %v16343_v0 = vor.u32 %v3594_v7, %v3593_v25  ;;  %v4101_v25 = vrot.slane %v16179_v43, 7  ;;  %19539 = vst [vmem:[#allocation69_spill] sm:$0xff] %v16376_v19  ;;  %v4125_v2 = vrot.slane %v16197_v59, 7 }
 0x259   : > { %13100 = vmatmul.mubr.msk.bf16.gmra.mrb[80].mxu0 %vm1462_vm3, %v3030_v46  ;;  %19533 = vst [vmem:[#allocation63_spill] sm:$0xff] %v16341_v33  ;;  %v16348_v50 = vsel %vm3496_vm13, %v3587_v35, %v3591_v55  ;;  %v16368_v35 = vor.u32 %v4085_v34, %v16170_v41 }
 0x25a   : > { %19534 = vst [vmem:[#allocation64_spill] sm:$0xff] %v16343_v0  ;;  %13103 = vmatprep.mubr.msk.bf16.mxu0 %vm1462_vm3, %v15911_v31  ;;  %19535 = vst [vmem:[#allocation65_spill] sm:$0xff] %v16348_v50  ;;  %v16352_v37 = vsel %vm3496_vm13, %v3591_v55, %v16343_v0  ;;  %v4093_v31 = vrot.slane %v16173_v5, 7  ;;  %v4104_v39 = vor.u32 %v4101_v25, %v16182_v58  ;;  %v4133_v55 = vrot.slane %v16203_v60, 7 }
 0x25b   : > { %19536 = vst [vmem:[#allocation66_spill] sm:$0xff] %v16352_v37  ;;  %19538 = vst [vmem:[#allocation68_spill] sm:$0xff] %v16368_v35  ;;  %v4128_v14 = vor.u32 %v4125_v2, %v16200_v6  ;;  %v4141_v35 = vrot.slane %v16209_v47, 7  ;;  %v4149_v0 = vrot.slane %v16217_v49, 7  ;;  %v3106_v37 = vrot.slane %v16173_v5, 3 }
 0x25c   : > { %v16384_v7 = vsel %vm19356_vm8, %v4093_v31, %v4104_v39  ;;  %v3100_v39 = vrot.slane %v16170_v41, 4  ;;  %v19548_v5 = vshll.u32 %v16361_v15, 16 }
 0x25d   : > { %19541 = vst [vmem:[#allocation71_spill] sm:$0xff] %v16384_v7 }
 0x261   : > { %13104 = vmatmul.mubr.msk.bf16.gmra.mrb[84].mxu0 %vm1462_vm3, %v15919_v56  ;;  %v4109_v56 = vrot.slane %v16185_v38, 7 }
 0x262   : > { %13107 = vmatprep.mubr.msk.bf16.mxu0 %vm1462_vm3, %v15967_v16  ;;  %v4096_v16 = vor.u32 %v4093_v31, %v16176_v10  ;;  %v4136_v31 = vor.u32 %v4133_v55, %v16206_v20 }
 0x264   : > { %v16381_v12 = vsel %vm19356_vm8, %v4085_v34, %v4096_v16  ;;  %v19330_v16 = vrot.slane %v16239_v52, 7 }
 0x265   : > { %19540 = vst [vmem:[#allocation70_spill] sm:$0xff] %v16381_v12 }
 0x266   : > { %v4160_v41 = vor.u32 %v19330_v16, %v16253_v17  ;;  %v19550_v16 = vshll.u32 %v16376_v19, 16 }
 0x269   : > { %13108 = vmatmul.mubr.msk.bf16.gmra.mrb[88].mxu0 %vm1462_vm3, %v16007_v54  ;;  %v4117_v54 = vrot.slane %v16191_v26, 7 }
 0x26a   : > { %13111 = vmatprep.mubr.msk.bf16.mxu0 %vm1462_vm3, %v16026_v22  ;;  %v4112_v22 = vor.u32 %v4109_v56, %v16188_v51 }
 0x26b   : > { %v4120_v46 = vor.u32 %v4117_v54, %v16194_v48 }
 0x26c   : > { %v16389_v21 = vsel %vm19356_vm8, %v4101_v25, %v4112_v22  ;;  %v16402_v25 = vsel %vm19356_vm8, %v4117_v54, %v4128_v14  ;;  %v4144_v22 = vor.u32 %v4141_v35, %v16214_v45  ;;  %v19332_v54 = vshrl.u32 %v16361_v15, 16 }
 0x26d   : > { %19542 = vst [vmem:[#allocation72_spill] sm:$0xff] %v16389_v21  ;;  %v16396_v34 = vsel %vm19356_vm8, %v4109_v56, %v4120_v46  ;;  %19544 = vst [vmem:[#allocation74_spill] sm:$0xff] %v16402_v25  ;;  %v4152_v21 = vor.u32 %v4149_v0, %v16224_v42  ;;  %v3109_v56 = vrot.slane %v16176_v10, 4  ;;  %v16411_v46 = vsel %vm19356_vm8, %v4125_v2, %v4136_v31 }
 0x26e   : > { %19543 = vst [vmem:[#allocation73_spill] sm:$0xff] %v16396_v34  ;;  %19545 = vst [vmem:[#allocation75_spill] sm:$0xff] %v16411_v46  ;;  %v16420_v14 = vsel %vm19356_vm8, %v4133_v55, %v4144_v22  ;;  %v4885_v10 = vrot.slane %v19548_v5, 1  ;;  %v19331_v2 = vshrl.u32 %v16376_v19, 16  ;;  %v16429_v31 = vsel %vm19356_vm8, %v4149_v0, %v4160_v41 }
 0x26f   : > { %19546 = vst [vmem:[#allocation76_spill] sm:$0xff] %v16420_v14  ;;  %19549 = vst [vmem:[#allocation78_spill] sm:$0xff] %v16429_v31  ;;  %v3101_v46 = vor.u32 %v3100_v39, %v3097_v61  ;;  %v3110_v22 = vor.u32 %v3109_v56, %v3106_v37  ;;  %v3115_v41 = vrot.slane %v16179_v43, 3  ;;  %v3118_v5 = vrot.slane %v16182_v58, 4 }
 0x270   : > { %v4886_v55 = vor.u32 %v4885_v10, %v19332_v54  ;;  %v3124_v37 = vrot.slane %v16185_v38, 3  ;;  %v3136_v43 = vrot.slane %v16194_v48, 4  ;;  %v3145_v38 = vrot.slane %v16200_v6, 4 }
 0x271   : > { %13112 = vmatmul.mubr.msk.bf16.gmra.mrb[92].mxu0 %vm1462_vm3, %v16071_v9  ;;  %v16423_v9 = vsel %vm19356_vm8, %v4141_v35, %v4152_v21  ;;  %v3102_v0 = vsel %vm2968_vm11, %v16080_v13, %v3101_v46  ;;  %v3111_v61 = vsel %vm2968_vm11, %v3101_v46, %v3110_v22  ;;  %v3119_v39 = vor.u32 %v3118_v5, %v3115_v41 }
 0x272   : > { %13115 = vmatprep.mubr.msk.bf16.mxu0 %vm1462_vm3, %v16089_v53  ;;  %19547 = vst [vmem:[#allocation77_spill] sm:$0xff] %v16423_v9  ;;  %v4890_v53 = vrot.slane %v19550_v16, 1  ;;  %v3127_v16 = vrot.slane %v16188_v51, 4  ;;  %v3133_v13 = vrot.slane %v16191_v26, 3  ;;  %v3142_v46 = vrot.slane %v16197_v59, 3 }
 0x273   : > { %v3120_v10 = vsel %vm2968_vm11, %v3110_v22, %v3119_v39  ;;  %v3151_v22 = vrot.slane %v16203_v60, 3  ;;  %v3154_v26 = vrot.slane %v16206_v20, 4  ;;  %v3160_v48 = vrot.slane %v16209_v47, 3 }
 0x274   : > { %v16437_v35 = vor.u32 %v4890_v53, %v19331_v2  ;;  %v16440_v21 = vsel %vm4879_vm5, %v4886_v55, %v4890_v53  ;;  %v3128_v56 = vor.u32 %v3127_v16, %v3124_v37  ;;  %v3137_v51 = vor.u32 %v3136_v43, %v3133_v13  ;;  %v16479_v13 = vld [vmem:[#allocation2 + $0x70] sm:$0xff] }
 0x275   : > { %19552 = vst [vmem:[#allocation80_spill] sm:$0xff] %v16440_v21  ;;  %v3146_v53 = vor.u32 %v3145_v38, %v3142_v46  ;;  %v3163_v59 = vrot.slane %v16214_v45, 4  ;;  %v3169_v6 = vrot.slane %v16217_v49, 3  ;;  %v3172_v41 = vrot.slane %v16224_v42, 4  ;;  %19553 = vst [vmem:[#allocation81_spill] sm:$0xff] %v16479_v13  ;;  %v16488_v46 = vld [vmem:[#allocation2 + $0x80] sm:$0xff] }
 0x276   : > { %19551 = vst [vmem:[#allocation79_spill] sm:$0xff] %v16437_v35  ;;  %v3129_v58 = vsel %vm2968_vm11, %v3119_v39, %v3128_v56  ;;  %v3138_v55 = vsel %vm2968_vm11, %v3128_v56, %v3137_v51  ;;  %v3178_v5 = vrot.slane %v16239_v52, 3  ;;  %v3181_v60 = vrot.slane %v16253_v17, 4  ;;  %v16562_v35 = vld [vmem:[#allocation2 + $0xb8] sm:$0xff] }
 0x277   : > { %v3185_v20 = vshrl.u32 %v16146_v63, 16  ;;  %v3188_v47 = vshll.u32 %v16146_v63, 16  ;;  %v3155_v39 = vor.u32 %v3154_v26, %v3151_v22  ;;  %v3164_v56 = vor.u32 %v3163_v59, %v3160_v48  ;;  %v16500_v48 = vld [vmem:[#allocation2 + $0x88] sm:$0xff]  ;;  %19555 = vst [vmem:[#allocation82_spill] sm:$0xff] %v16562_v35 }
 0x278   : > { %v3173_v45 = vor.u32 %v3172_v41, %v3169_v6  ;;  %v16498_v26 = vshrl.u32 %v16479_v13, 16  ;;  %v16510_v6 = vshll.u32 %v16479_v13, 16  ;;  %v16583_v15 = vshll.u32 %v16562_v35, 16 }
 0x279   : > { %13116 = vmatmul.mubr.msk.bf16.gmra.mrb[96].mxu0 %vm1462_vm3, %v3102_v0  ;;  %v3147_v0 = vsel %vm2968_vm11, %v3137_v51, %v3146_v53  ;;  %v16475_v49 = vrot.slane %v3185_v20, 3  ;;  %v16477_v42 = vrot.slane %v3188_v47, 4  ;;  %v3156_v63 = vsel %vm2968_vm11, %v3146_v53, %v3155_v39 }
 0x27a   : > { %13119 = vmatprep.mubr.msk.bf16.mxu0 %vm1462_vm3, %v3111_v61  ;;  %v14840_v61 = vld [vmem:[#allocation2] sm:$0xf0]  ;;  %v3165_v38 = vsel %vm2968_vm11, %v3155_v39, %v3164_v56  ;;  %v3174_v51 = vsel %vm2968_vm11, %v3164_v56, %v3173_v45  ;;  %v16533_v39 = vshll.u32 %v16500_v48, 16  ;;  %v16536_v56 = vshrl.u32 %v16500_v48, 16  ;;  %19558 = vst [vmem:[#allocation85_spill] sm:$0xff] %v16583_v15 }
 0x27b   : > { %v3498_v37 = vshrl.u32 %v14840_v61, 16  ;;  %v3501_v16 = vshll.u32 %v14840_v61, 16  ;;  %v16525_v61 = vshll.u32 %v16488_v46, 16  ;;  %v5552_v2 = vrot.slane %v16498_v26, 3 }
 0x27c   : > { %v5555_v21 = vrot.slane %v16510_v6, 4  ;;  %v5579_v19 = vrot.slane %v16536_v56, 3  ;;  %v5582_v33 = vrot.slane %v16533_v39, 4  ;;  %v16589_v36 = vshrl.u32 %v16562_v35, 16 }
 0x27d   : > { %v16481_v43 = vrot.slane %v3498_v37, 4  ;;  %v16483_v17 = vrot.slane %v3501_v16, 5  ;;  %v16528_v37 = vshrl.u32 %v16488_v46, 16  ;;  %v16530_v16 = vld [vmem:[#allocation2 + $0xa8] sm:$0xff]  ;;  %v5573_v12 = vrot.slane %v16525_v61, 4 }
 0x27e   : > { %v16560_v59 = vshll.u32 %v16530_v16, 16  ;;  %v16567_v31 = vshrl.u32 %v16530_v16, 16  ;;  %v16577_v7 = vor.u32 %v5555_v21, %v5552_v2  ;;  %19559 = vst [vmem:[#allocation86_spill] sm:$0xff] %v16589_v36  ;;  %v5583_v30 = vor.u32 %v5582_v33, %v5579_v19 }
 0x27f   : > { %v3504_v20 = vor.u32 %v16483_v17, %v16481_v43  ;;  %v16544_v17 = vld [vmem:[#allocation2 + $0xb0] sm:$0xff]  ;;  %v5570_v25 = vrot.slane %v16528_v37, 3 }
 0x280   : > { %19556 = vst [vmem:[#allocation83_spill] sm:$0xff] %v16567_v31  ;;  %v16570_v9 = vshll.u32 %v16544_v17, 16  ;;  %v16575_v34 = vshrl.u32 %v16544_v17, 16  ;;  %19557 = vst [vmem:[#allocation84_spill] sm:$0xff] %v16577_v7 }
 0x281   : > { %13120 = vmatmul.mubr.msk.bf16.gmra.mrb[100].mxu0 %vm1462_vm3, %v3120_v10  ;;  %v16473_v10 = vor.u32 %v3181_v60, %v3178_v5  ;;  %v16515_v5 = vld [vmem:[#allocation2 + $0x98] sm:$0xff]  ;;  %v16517_v60 = vld [vmem:[#allocation2 + $0xa0] sm:$0xff]  ;;  %v5574_v2 = vor.u32 %v5573_v12, %v5570_v25  ;;  %v5615_v12 = vrot.slane %v16567_v31, 3 }
 0x282   : > { %13123 = vmatprep.mubr.msk.bf16.mxu0 %vm1462_vm3, %v3129_v58  ;;  %v16485_v58 = vld [vmem:[#allocation2 + $0x78] sm:$0xff]  ;;  %v16557_v54 = vshrl.u32 %v16517_v60, 16  ;;  %v5624_v33 = vrot.slane %v16575_v34, 3 }
 0x283   : > { %v3183_v53 = vsel %vm2968_vm11, %v3173_v45, %v16473_v10  ;;  %v16513_v41 = vshrl.u32 %v16485_v58, 16  ;;  %v16522_v47 = vshll.u32 %v16485_v58, 16  ;;  %v16605_v25 = vsel %vm2968_vm11, %v5574_v2, %v5583_v30 }
 0x284   : > { %19562 = vst [vmem:[#allocation89_spill] sm:$0xff] %v16605_v25 }
 0x285   : > { %v5561_v52 = vrot.slane %v16513_v41, 3  ;;  %v5564_v14 = vrot.slane %v16522_v47, 4 }
 0x287   : > { %v5565_v50 = vor.u32 %v5564_v14, %v5561_v52  ;;  %v5606_v14 = vrot.slane %v16557_v54, 3 }
 0x289   : > { %13124 = vmatmul.mubr.msk.bf16.gmra.mrb[104].mxu0 %vm1462_vm3, %v3138_v55  ;;  %v19554_v55 = vshrl.u32 %v15622_v1, 16  ;;  %v16600_v27 = vsel %vm2968_vm11, %v5565_v50, %v5574_v2 }
 0x28a   : > { %13127 = vmatprep.mubr.msk.bf16.mxu0 %vm1462_vm3, %v3147_v0  ;;  %v16502_v0 = vld [vmem:[#allocation2 + $0x90] sm:$0xff]  ;;  %19561 = vst [vmem:[#allocation88_spill] sm:$0xff] %v16600_v27 }
 0x28b   : > { %v16495_v22 = vrot.slane %v19554_v55, 4  ;;  %v16539_v45 = vshll.u32 %v16502_v0, 16  ;;  %v16542_v43 = vshrl.u32 %v16502_v0, 16  ;;  %v16553_v55 = vshll.u32 %v16517_v60, 16 }
 0x28d   : > { %v5588_v28 = vrot.slane %v16542_v43, 3  ;;  %v5591_v21 = vrot.slane %v16539_v45, 4  ;;  %v5609_v4 = vrot.slane %v16553_v55, 4 }
 0x291   : > { %13128 = vmatmul.mubr.msk.bf16.gmra.mrb[108].mxu0 %vm1462_vm3, %v3156_v63  ;;  %v16547_v63 = vshll.u32 %v16515_v5, 16 }
 0x292   : > { %13131 = vmatprep.mubr.msk.bf16.mxu0 %vm1462_vm3, %v3165_v38  ;;  %v16550_v38 = vshrl.u32 %v16515_v5, 16 }
 0x293   : > { %v5600_v52 = vrot.slane %v16547_v63, 4 }
 0x294   : > { %v5597_v18 = vrot.slane %v16550_v38, 3 }
 0x296   : > { %v5601_v29 = vor.u32 %v5600_v52, %v5597_v18  ;;  %v5636_v18 = vrot.slane %v16583_v15, 4  ;;  %v19565_v52 = vor.u32 %v16477_v42, %v16475_v49 }
 0x299   : > { %13132 = vmatmul.mubr.msk.bf16.gmra.mrb[112].mxu0 %vm1462_vm3, %v3174_v51  ;;  %v16595_v51 = vsel %vm2968_vm11, %v16577_v7, %v5565_v50  ;;  %v5618_v7 = vrot.slane %v16560_v59, 4  ;;  %v5627_v50 = vrot.slane %v16570_v9, 4 }
 0x29a   : > { %13135 = vmatprep.mubr.msk.bf16.mxu0 %vm1462_vm3, %v3183_v53  ;;  %19560 = vst [vmem:[#allocation87_spill] sm:$0xff] %v16595_v51  ;;  %v5592_v53 = vor.u32 %v5591_v21, %v5588_v28  ;;  %v5610_v51 = vor.u32 %v5609_v4, %v5606_v14  ;;  %v5633_v28 = vrot.slane %v16589_v36, 3  ;;  %v3508_v21 = vsel %vm3496_vm13, %v3504_v20, %v15498_v32 }
 0x29b   : > { %v5619_v2 = vor.u32 %v5618_v7, %v5615_v12  ;;  %v19566_v4 = vshll.u32 %v15622_v1, 16  ;;  %v5628_v25 = vor.u32 %v5627_v50, %v5624_v33  ;;  %v19568_v20 = vshrl.u32 %v15616_v62, 16 }
 0x29c   : > { %v16610_v19 = vsel %vm2968_vm11, %v5583_v30, %v5592_v53  ;;  %v16617_v27 = vsel %vm2968_vm11, %v5592_v53, %v5601_v29  ;;  %v3192_v30 = vsel %vm2968_vm11, %v16473_v10, %v19565_v52  ;;  %v19569_v53 = vshll.u32 %v15616_v62, 16 }
 0x29d   : > { %19563 = vst [vmem:[#allocation90_spill] sm:$0xff] %v16610_v19  ;;  %19564 = vst [vmem:[#allocation91_spill] sm:$0xff] %v16617_v27  ;;  %v3510_v14 = vrot.slane %v19566_v4, 5  ;;  %v16628_v19 = vsel %vm2968_vm11, %v5601_v29, %v5610_v51  ;;  %v3513_v7 = vrot.slane %v19568_v20, 4  ;;  %v16636_v49 = vsel %vm2968_vm11, %v5610_v51, %v5619_v2  ;;  %v19620_v27 = vld [vmem:[#allocation68_spill] sm:$0xff] }
 0x29e   : > { %19567 = vst [vmem:[#allocation92_spill] sm:$0xff] %v16628_v19  ;;  %v3514_v12 = vrot.slane %v19569_v53, 5  ;;  %19570 = vst [vmem:[#allocation93_spill] sm:$0xff] %v16636_v49  ;;  %v16638_v42 = vor.u32 %v5636_v18, %v5633_v28  ;;  %v16642_v1 = vsel %vm2968_vm11, %v5619_v2, %v5628_v25  ;;  %v19574_v62 = vshrl.u32 %v15676_v3, 16 }
 0x29f   : > { %19572 = vst [vmem:[#allocation95_spill] sm:$0xff] %v16642_v1  ;;  %v3511_v10 = vor.u32 %v3510_v14, %v16495_v22  ;;  %v19575_v51 = vshll.u32 %v15676_v3, 16  ;;  %v4251_v28 = vsel %vm1535_vm1, %v16229_v8, 0  ;;  %v19577_v18 = vshll.u32 %v15671_v57, 16  ;;  %v16664_v22 = vld [vmem:[%s19221_s10 + $0x8] sm:$0x3] }
 0x2a0   : > { %19571 = vst [vmem:[#allocation94_spill] sm:$0xff] %v16638_v42  ;;  %v16646_v29 = vsel %vm2968_vm11, %v5628_v25, %v16638_v42  ;;  %v3515_v33 = vor.u32 %v3514_v12, %v3513_v7  ;;  %v3517_v50 = vrot.slane %v19574_v62, 4  ;;  %v19340_v8 = vrot.slane %v16479_v13, 4 }
 0x2a1   : > { %13136 = vmatmul.mubr.msk.bf16.gmra.mrb[116].mxu0 %vm1462_vm3, %v3192_v30  ;;  %19573 = vst [vmem:[#allocation96_spill] sm:$0xff] %v16646_v29  ;;  %v3518_v52 = vrot.slane %v19575_v51, 5  ;;  %v3522_v30 = vrot.slane %v19577_v18, 5  ;;  %v3512_v25 = vsel %vm3496_vm13, %v15498_v32, %v3511_v10  ;;  %v6074_v4 = vrot.slane %v16485_v58, 4 }
 0x2a2   : > { %13141 = vmatprep.mubr.msk.bf16.mxu0 %vm1462_vm3, %v3508_v21  ;;  %v19576_v21 = vshrl.u32 %v15671_v57, 16  ;;  %v3516_v3 = vsel %vm3496_vm13, %v3511_v10, %v3515_v33  ;;  %v6076_v14 = vrot.slane %v16488_v46, 4  ;;  %v6078_v32 = vrot.slane %v16500_v48, 4 }
 0x2a3   : > { %v3519_v57 = vor.u32 %v3518_v52, %v3517_v50  ;;  %v16678_v7 = vsel %vm929_vm0, %v19340_v8, %v6074_v4  ;;  %v6080_v53 = vrot.slane %v16502_v0, 4  ;;  %v6082_v58 = vrot.slane %v16515_v5, 4 }
 0x2a4   : > { %v3521_v2 = vrot.slane %v19576_v21, 4  ;;  %19578 = vst [vmem:[#allocation97_spill] sm:$0xff] %v16678_v7  ;;  %v16683_v12 = vsel %vm929_vm0, %v6074_v4, %v6076_v14  ;;  %v16686_v46 = vsel %vm929_vm0, %v6076_v14, %v6078_v32  ;;  %v6084_v48 = vrot.slane %v16517_v60, 4 }
 0x2a5   : > { %19579 = vst [vmem:[#allocation98_spill] sm:$0xff] %v16683_v12  ;;  %19580 = vst [vmem:[#allocation99_spill] sm:$0xff] %v16686_v46  ;;  %v6086_v10 = vrot.slane %v16530_v16, 4  ;;  %v16691_v62 = vsel %vm929_vm0, %v6078_v32, %v6080_v53  ;;  %v16694_v50 = vsel %vm929_vm0, %v6080_v53, %v6082_v58  ;;  %v6088_v0 = vrot.slane %v16544_v17, 4  ;;  %v16917_v46 = vld [vmem:[#allocation2 + $0x60] sm:$0xff] }
 0x2a6   : > { %v3523_v20 = vor.u32 %v3522_v30, %v3521_v2  ;;  %19581 = vst [vmem:[#allocation100_spill] sm:$0xff] %v16691_v62  ;;  %19582 = vst [vmem:[#allocation101_spill] sm:$0xff] %v16694_v50  ;;  %v19339_v5 = vrot.slane %v16562_v35, 4  ;;  %v16699_v51 = vsel %vm929_vm0, %v6082_v58, %v6084_v48  ;;  %v16721_v2 = vld [vmem:[#allocation2 + $0xd0] sm:$0xff]  ;;  %v6499_v18 = vrot.slane %v16498_v26, 4  ;;  %v16911_v50 = vld [vmem:[#allocation2 + $0x58] sm:$0xff] }
 0x2a7   : > { %19583 = vst [vmem:[#allocation102_spill] sm:$0xff] %v16699_v51  ;;  %v16702_v52 = vsel %vm929_vm0, %v6084_v48, %v6086_v10  ;;  %v16705_v60 = vsel %vm929_vm0, %v6086_v10, %v6088_v0  ;;  %19587 = vst [vmem:[#allocation106_spill] sm:$0xff] %v16721_v2  ;;  %v6503_v30 = vrot.slane %v16513_v41, 4  ;;  %v6507_v4 = vrot.slane %v16528_v37, 4 }
 0x2a8   : > { %19584 = vst [vmem:[#allocation103_spill] sm:$0xff] %v16702_v52  ;;  %19585 = vst [vmem:[#allocation104_spill] sm:$0xff] %v16705_v60  ;;  %v16710_v16 = vsel %vm929_vm0, %v6088_v0, %v19339_v5  ;;  %v3524_v17 = vsel %vm3496_vm13, %v3519_v57, %v3523_v20  ;;  %v3528_v21 = vsel %vm3496_vm13, %v3523_v20, %v16241_v44  ;;  %v19342_v44 = vshrl.u32 %v16721_v2, 16 }
 0x2a9   : > { %13142 = vmatmul.mubr.msk.bf16.vlgmr.msra.gmra.mrb[72].mxu0 %vm1462_vm3, %v3512_v25  ;;  %19586 = vst [vmem:[#allocation105_spill] sm:$0xff] %v16710_v16  ;;  %v6504_v25 = vrot.slane %v16522_v47, 5  ;;  %v6508_v14 = vrot.slane %v16525_v61, 5  ;;  %v19341_v32 = vshll.u32 %v16721_v2, 16  ;;  %v6512_v20 = vrot.slane %v16533_v39, 5  ;;  %v16893_v16 = vld [vmem:[#allocation2 + $0x50] sm:$0xff] }
 0x2aa   : > { %13190 = vmatpush3.bf16.msra.mxu0 %v4251_v28  ;;  %13145 = vmatprep.mubr.msk.bf16.mxu0 %vm1462_vm3, %v3516_v3  ;;  %v3520_v28 = vsel %vm3496_vm13, %v3515_v33, %v3519_v57  ;;  %v6500_v33 = vrot.slane %v16510_v6, 5  ;;  %v6515_v53 = vrot.slane %v16542_v43, 4  ;;  %v6516_v58 = vrot.slane %v16539_v45, 5  ;;  %v16935_v2 = vld [vmem:[#allocation2 + $0x68] sm:$0xff] }
 0x2ab   : > { %14765 = vmatprep.subr.msk.bf16.mxu0 %vm1535_vm1, %v16664_v22  ;;  %v6505_v57 = vor.u32 %v6504_v25, %v6503_v30  ;;  %v6509_v10 = vor.u32 %v6508_v14, %v6507_v4  ;;  %v6519_v0 = vrot.slane %v16550_v38, 4  ;;  %v6527_v5 = vrot.slane %v16567_v31, 4 }
 0x2ac   : > { %v16727_v3 = vor.u32 %v6500_v33, %v6499_v18  ;;  %v6523_v18 = vrot.slane %v16557_v54, 4  ;;  %v6524_v33 = vrot.slane %v16553_v55, 5  ;;  %v6528_v4 = vrot.slane %v16560_v59, 5 }
 0x2ad   : > { %v16748_v30 = vsel %vm3496_vm13, %v6505_v57, %v6509_v10  ;;  %v16920_v12 = vshll.u32 %v16893_v16, 16  ;;  %v16939_v42 = vshll.u32 %v16911_v50, 16  ;;  %v16942_v29 = vshll.u32 %v16917_v46, 16 }
 0x2ae   : > { %19588 = vst [vmem:[#allocation107_spill] sm:$0xff] %v16727_v3  ;;  %v16739_v48 = vsel %vm3496_vm13, %v16727_v3, %v6505_v57  ;;  %19590 = vst [vmem:[#allocation109_spill] sm:$0xff] %v16748_v30  ;;  %v16887_v3 = vld [vmem:[#allocation2 + $0x48] sm:$0xff]  ;;  %v16955_v1 = vshll.u32 %v16935_v2, 16 }
 0x2af   : > { %19589 = vst [vmem:[#allocation108_spill] sm:$0xff] %v16739_v48  ;;  %v16915_v62 = vshll.u32 %v16887_v3, 16 }
 0x2b1   : > { %13146 = vmatmul.mubr.msk.bf16.gmra.mrb[76].mxu0 %vm1462_vm3, %v3520_v28  ;;  %v6520_v28 = vrot.slane %v16547_v63, 5 }
 0x2b2   : > { %13149 = vmatprep.mubr.msk.bf16.mxu0 %vm1462_vm3, %v3524_v17 }
 0x2b3   : > { %v6521_v25 = vor.u32 %v6520_v28, %v6519_v0  ;;  %v6535_v0 = vrot.slane %v16589_v36, 4 }
 0x2b9   : > { %13150 = vmatmul.mubr.msk.bf16.gmra.mrb[80].mxu0 %vm1462_vm3, %v3528_v21  ;;  %v6517_v21 = vor.u32 %v6516_v58, %v6515_v53  ;;  %v6529_v53 = vor.u32 %v6528_v4, %v6527_v5  ;;  %v6532_v58 = vrot.slane %v16570_v9, 5  ;;  %v6548_v5 = vrot.slane %v19341_v32, 5  ;;  %v19611_v32 = vld [vmem:[#allocation65_spill] sm:$0xff] }
 0x2ba   : > { %13153 = vmatprep.mubr.msk.bf16.mxu0 %vm1462_vm3, %v16263_v40  ;;  %v6511_v40 = vrot.slane %v16536_v56, 4 }
 0x2bb   : > { %v16762_v57 = vsel %vm3496_vm13, %v6517_v21, %v6521_v25 }
 0x2bc   : > { %v6513_v17 = vor.u32 %v6512_v20, %v6511_v40  ;;  %v6525_v20 = vor.u32 %v6524_v33, %v6523_v18  ;;  %19593 = vst [vmem:[#allocation112_spill] sm:$0xff] %v16762_v57 }
 0x2be   : > { %v16755_v14 = vsel %vm3496_vm13, %v6509_v10, %v6513_v17  ;;  %v16758_v40 = vsel %vm3496_vm13, %v6513_v17, %v6517_v21  ;;  %v16767_v28 = vsel %vm3496_vm13, %v6521_v25, %v6525_v20  ;;  %v16771_v10 = vsel %vm3496_vm13, %v6525_v20, %v6529_v53  ;;  %v19600_v20 = vld [vmem:[#allocation53_spill] sm:$0xff] }
 0x2bf   : > { %19591 = vst [vmem:[#allocation110_spill] sm:$0xff] %v16755_v14  ;;  %19592 = vst [vmem:[#allocation111_spill] sm:$0xff] %v16758_v40  ;;  %v6547_v21 = vrot.slane %v19342_v44, 4  ;;  %v16861_v40 = vld [vmem:[#allocation2 + $0x38] sm:$0xff] }
 0x2c0   : > { %19594 = vst [vmem:[#allocation113_spill] sm:$0xff] %v16767_v28  ;;  %19595 = vst [vmem:[#allocation114_spill] sm:$0xff] %v16771_v10  ;;  %v16856_v28 = vld [vmem:[%s19221_s10 + $0xa] sm:$0x3]  ;;  %v16891_v35 = vshll.u32 %v16861_v40, 16 }
 0x2c1   : > { %13154 = vmatmul.mubr.msk.bf16.gmra.mrb[84].mxu0 %vm1462_vm3, %v16266_v24  ;;  %v6531_v24 = vrot.slane %v16575_v34, 4  ;;  %v16786_v4 = vor.u32 %v6548_v5, %v6547_v21  ;;  %v19608_v21 = vld [vmem:[#allocation61_spill] sm:$0xff]  ;;  %v19609_v5 = vld [vmem:[#allocation62_spill] sm:$0xff] }
 0x2c2   : > { %13157 = vmatprep.mubr.msk.bf16.mxu0 %vm1462_vm3, %v16271_v11  ;;  %v6536_v11 = vrot.slane %v16583_v15, 5 }
 0x2c3   : > { %v6533_v17 = vor.u32 %v6532_v58, %v6531_v24  ;;  %19599 = vst [vmem:[#allocation118_spill] sm:$0xff] %v16786_v4  ;;  %v19601_v24 = vld [vmem:[#allocation54_spill] sm:$0xff]  ;;  %v19602_v58 = vld [vmem:[#allocation55_spill] sm:$0xff] }
 0x2c4   : > { %v16773_v18 = vor.u32 %v6536_v11, %v6535_v0  ;;  %v19604_v0 = vld [vmem:[#allocation57_spill] sm:$0xff]  ;;  %v19605_v11 = vld [vmem:[#allocation58_spill] sm:$0xff] }
 0x2c5   : > { %v16780_v33 = vsel %vm3496_vm13, %v6529_v53, %v6533_v17  ;;  %v19603_v53 = vld [vmem:[#allocation56_spill] sm:$0xff] }
 0x2c6   : > { %19596 = vst [vmem:[#allocation115_spill] sm:$0xff] %v16773_v18  ;;  %19597 = vst [vmem:[#allocation116_spill] sm:$0xff] %v16780_v33  ;;  %v16784_v25 = vsel %vm3496_vm13, %v6533_v17, %v16773_v18  ;;  %v19606_v17 = vld [vmem:[#allocation59_spill] sm:$0xff] }
 0x2c7   : > { %19598 = vst [vmem:[#allocation117_spill] sm:$0xff] %v16784_v25 }
 0x2c9   : > { %13158 = vmatmul.mubr.msk.bf16.gmra.mrb[88].mxu0 %vm1462_vm3, %v16278_v23  ;;  %v19607_v23 = vld [vmem:[#allocation60_spill] sm:$0xff] }
 0x2ca   : > { %13161 = vmatprep.mubr.msk.bf16.mxu0 %vm1462_vm3, %v19600_v20  ;;  %v3493_v20 = vld [vmem:[#allocation2 + $0xc0] sm:$0x1f] }
 0x2d1   : > { %13162 = vmatmul.mubr.msk.bf16.gmra.mrb[92].mxu0 %vm1462_vm3, %v19601_v24  ;;  %v19610_v24 = vld [vmem:[#allocation63_spill] sm:$0xff] }
 0x2d2   : > { %13165 = vmatprep.mubr.msk.bf16.mxu0 %vm1462_vm3, %v19602_v58  ;;  %v3598_v58 = vshrl.u32 %v3493_v20, 16 }
 0x2d9   : > { %13166 = vmatmul.mubr.msk.bf16.gmra.mrb[96].mxu0 %vm1462_vm3, %v19603_v53  ;;  %v3601_v53 = vshll.u32 %v3493_v20, 16 }
 0x2da   : > { %13169 = vmatprep.mubr.msk.bf16.mxu0 %vm1462_vm3, %v19604_v0  ;;  %v3954_v0 = vld [vmem:[#allocation2 + $0x8] sm:$0x80] }
 0x2db   : > { %v3603_v8 = vrot.slane %v3601_v53, 5  ;;  %v19616_v53 = vld [vmem:[#allocation64_spill] sm:$0xff] }
 0x2e1   : > { %13170 = vmatmul.mubr.msk.bf16.gmra.mrb[100].mxu0 %vm1462_vm3, %v19605_v11  ;;  %v3600_v11 = vrot.slane %v3598_v58, 4 }
 0x2e2   : > { %13173 = vmatprep.mubr.msk.bf16.mxu0 %vm1462_vm3, %v19606_v17  ;;  %v3983_v17 = vshrl.u32 %v3954_v0, 16  ;;  %v19617_v0 = vld [vmem:[#allocation69_spill] sm:$0xff] }
 0x2e3   : > { %v3604_v18 = vor.u32 %v3603_v8, %v3600_v11  ;;  %v19618_v33 = vshrl.u32 %v19617_v0, 16  ;;  %v16832_v8 = vld [vmem:[#allocation2 + $0x28] sm:$0xff]  ;;  %v16835_v11 = vld [vmem:[#allocation2 + $0x30] sm:$0xff] }
 0x2e4   : > { %v3985_v25 = vrot.slane %v3983_v17, 7 }
 0x2e5   : > { %v3997_v10 = vrot.slane %v19618_v33, 7  ;;  %v16843_v33 = vshrl.u32 %v16832_v8, 16 }
 0x2e9   : > { %13174 = vmatmul.mubr.msk.bf16.gmra.mrb[104].mxu0 %vm1462_vm3, %v19607_v23  ;;  %v19612_v23 = vld [vmem:[#allocation67_spill] sm:$0xff] }
 0x2ea   : > { %13177 = vmatprep.mubr.msk.bf16.mxu0 %vm1462_vm3, %v19608_v21  ;;  %v19613_v44 = vshrl.u32 %v19612_v23, 16  ;;  %v19614_v21 = vld [vmem:[#allocation66_spill] sm:$0xff] }
 0x2ec   : > { %v3989_v4 = vrot.slane %v19613_v44, 7 }
 0x2f1   : > { %13178 = vmatmul.mubr.msk.bf16.gmra.mrb[108].mxu0 %vm1462_vm3, %v19609_v5  ;;  %v16818_v5 = vld [vmem:[#allocation2 + $0x20] sm:$0xff] }
 0x2f2   : > { %13181 = vmatprep.mubr.msk.bf16.mxu0 %vm1462_vm3, %v19610_v24  ;;  %v19615_v24 = vshll.u32 %v19612_v23, 16  ;;  %v16823_v58 = vshrl.u32 %v16818_v5, 16  ;;  %v16838_v17 = vshll.u32 %v16818_v5, 16 }
 0x2f4   : > { %v3992_v20 = vor.u32 %v19615_v24, %v3989_v4 }
 0x2f6   : > { %v3993_v44 = vsel %vm19356_vm8, %v3985_v25, %v3992_v20  ;;  %v16847_v25 = vshrl.u32 %v16835_v11, 16  ;;  %v4577_v20 = vsel %vm1535_vm1, %v16664_v22, 0  ;;  %v16865_v22 = vshll.u32 %v16832_v8, 16 }
 0x2f8   : > { %v4021_v57 = vrot.slane %v16847_v25, 7 }
 0x2f9   : > { %13182 = vmatmul.mubr.msk.bf16.gmra.mrb[112].mxu0 %vm1462_vm3, %v19611_v32  ;;  %v3605_v32 = vsel %vm3496_vm13, %v19616_v53, %v3604_v18  ;;  %v19619_v18 = vshll.u32 %v19617_v0, 16 }
 0x2fa   : > { %13185 = vmatprep.mubr.msk.bf16.mxu0 %vm1462_vm3, %v19614_v21  ;;  %v4005_v21 = vrot.slane %v16823_v58, 7 }
 0x2fb   : > { %v4000_v24 = vor.u32 %v19619_v18, %v3997_v10 }
 0x2fc   : > { %v4008_v53 = vor.u32 %v16838_v17, %v4005_v21 }
 0x2fe   : > { %v4009_v18 = vsel %vm19356_vm8, %v3997_v10, %v4008_v53  ;;  %v16876_v53 = vshrl.u32 %v16861_v40, 16 }
 0x300   : > { %v4029_v14 = vrot.slane %v16876_v53, 7 }
 0x301   : > { %13186 = vmatmul.mubr.msk.bf16.gmra.mrb[116].mxu0 %vm1462_vm3, %v3605_v32  ;;  %v4001_v32 = vsel %vm19356_vm8, %v3989_v4, %v4000_v24  ;;  %v16867_v4 = vld [vmem:[#allocation2 + $0x40] sm:$0xff]  ;;  %v16870_v24 = vshll.u32 %v16835_v11, 16 }
 0x302   : > { %13191 = vmatprep.mubr.msk.bf16.mxu0 %vm1462_vm3, %v3993_v44  ;;  %v4013_v44 = vrot.slane %v16843_v33, 7  ;;  %v16896_v60 = vshll.u32 %v16867_v4, 16 }
 0x304   : > { %v4016_v10 = vor.u32 %v16865_v22, %v4013_v44 }
 0x309   : > { %13192 = vmatmul.mubr.msk.bf16.vlgmr.msra.gmra.mrb[72].mxu0 %vm1462_vm3, %v4001_v32  ;;  %v16880_v32 = vshrl.u32 %v16867_v4, 16 }
 0x30a   : > { %13240 = vmatpush3.bf16.msra.mxu0 %v4577_v20  ;;  %13195 = vmatprep.mubr.msk.bf16.mxu0 %vm1462_vm3, %v4009_v18  ;;  %v4024_v20 = vor.u32 %v16870_v24, %v4021_v57  ;;  %v4017_v18 = vsel %vm19356_vm8, %v4005_v21, %v4016_v10  ;;  %v4032_v21 = vor.u32 %v16891_v35, %v4029_v14  ;;  %v16900_v10 = vshrl.u32 %v16887_v3, 16 }
 0x30b   : > { %14766 = vmatprep.subr.msk.bf16.mxu0 %vm1535_vm1, %v16856_v28  ;;  %v4037_v48 = vrot.slane %v16880_v32, 7 }
 0x30c   : > { %v4025_v30 = vsel %vm19356_vm8, %v4013_v44, %v4024_v20  ;;  %v16904_v20 = vshrl.u32 %v16893_v16, 16 }
 0x30d   : > { %v4040_v44 = vor.u32 %v16896_v60, %v4037_v48 }
 0x30e   : > { %v4053_v51 = vrot.slane %v16904_v20, 7 }
 0x30f   : > { %v4041_v52 = vsel %vm19356_vm8, %v4029_v14, %v4040_v44  ;;  %v16928_v44 = vshrl.u32 %v16917_v46, 16 }
 0x310   : > { %v4056_v14 = vor.u32 %v16920_v12, %v4053_v51 }
 0x311   : > { %13196 = vmatmul.mubr.msk.bf16.gmra.mrb[76].mxu0 %vm1462_vm3, %v4017_v18  ;;  %v4045_v18 = vrot.slane %v16900_v10, 7  ;;  %v4069_v13 = vrot.slane %v16928_v44, 7 }
 0x312   : > { %13199 = vmatprep.mubr.msk.bf16.mxu0 %vm1462_vm3, %v4025_v30  ;;  %v4033_v30 = vsel %vm19356_vm8, %v4021_v57, %v4032_v21  ;;  %v16924_v21 = vshrl.u32 %v16911_v50, 16 }
 0x313   : > { %v4048_v57 = vor.u32 %v16915_v62, %v4045_v18  ;;  %v4057_v7 = vsel %vm19356_vm8, %v4045_v18, %v4056_v14 }
 0x319   : > { %13200 = vmatmul.mubr.msk.bf16.gmra.mrb[80].mxu0 %vm1462_vm3, %v4033_v30  ;;  %v4061_v30 = vrot.slane %v16924_v21, 7 }
 0x31a   : > { %13203 = vmatprep.mubr.msk.bf16.mxu0 %vm1462_vm3, %v4041_v52  ;;  %v4049_v52 = vsel %vm19356_vm8, %v4037_v48, %v4048_v57  ;;  %v16946_v57 = vshrl.u32 %v16935_v2, 16 }
 0x31b   : > { %v4064_v48 = vor.u32 %v16939_v42, %v4061_v30 }
 0x31c   : > { %v4077_v14 = vrot.slane %v16946_v57, 7 }
 0x31d   : > { %v4065_v18 = vsel %vm19356_vm8, %v4053_v51, %v4064_v48  ;;  %v19621_v48 = vld [vmem:[#allocation70_spill] sm:$0xff] }
 0x31e   : > { %v4080_v49 = vor.u32 %v16955_v1, %v4077_v14  ;;  %v4089_v51 = vsel %vm19356_vm8, %v4077_v14, %v19620_v27  ;;  %v16975_v27 = vld [vmem:[#allocation2 + $0xc0] sm:$0xff] }
 0x31f   : > { %v19628_v14 = vld [vmem:[#allocation76_spill] sm:$0xff] }
 0x320   : > { %v4081_v19 = vsel %vm19356_vm8, %v4069_v13, %v4080_v49  ;;  %v16978_v49 = vshrl.u32 %v16975_v27, 16 }
 0x321   : > { %13204 = vmatmul.mubr.msk.bf16.gmra.mrb[84].mxu0 %vm1462_vm3, %v4049_v52  ;;  %v4072_v52 = vor.u32 %v16942_v29, %v4069_v13  ;;  %v19625_v13 = vld [vmem:[#allocation74_spill] sm:$0xff] }
 0x322   : > { %13207 = vmatprep.mubr.msk.bf16.mxu0 %vm1462_vm3, %v4057_v7  ;;  %19627 = vst [vmem:[#allocation53_spill] sm:$0xff] %v16978_v49 }
 0x323   : > { %v4073_v7 = vsel %vm19356_vm8, %v4061_v30, %v4072_v52  ;;  %v19622_v30 = vld [vmem:[#allocation71_spill] sm:$0xff]  ;;  %v19623_v52 = vld [vmem:[#allocation72_spill] sm:$0xff] }
 0x329   : > { %13208 = vmatmul.mubr.msk.bf16.gmra.mrb[88].mxu0 %vm1462_vm3, %v4065_v18  ;;  %v19624_v18 = vld [vmem:[#allocation73_spill] sm:$0xff] }
 0x32a   : > { %13211 = vmatprep.mubr.msk.bf16.mxu0 %vm1462_vm3, %v4073_v7  ;;  %v4165_v7 = vrot.slane %v16978_v49, 7 }
 0x331   : > { %13212 = vmatmul.mubr.msk.bf16.gmra.mrb[92].mxu0 %vm1462_vm3, %v4081_v19  ;;  %v19626_v19 = vld [vmem:[#allocation75_spill] sm:$0xff] }
 0x332   : > { %13215 = vmatprep.mubr.msk.bf16.mxu0 %vm1462_vm3, %v4089_v51  ;;  %v16983_v51 = vld [vmem:[#allocation2 + $0xc8] sm:$0xff] }
 0x339   : > { %13216 = vmatmul.mubr.msk.bf16.gmra.mrb[96].mxu0 %vm1462_vm3, %v19621_v48  ;;  %v19629_v48 = vld [vmem:[#allocation77_spill] sm:$0xff] }
 0x33a   : > { %13219 = vmatprep.mubr.msk.bf16.mxu0 %vm1462_vm3, %v19622_v30  ;;  %v16988_v30 = vshll.u32 %v16975_v27, 16 }
 0x341   : > { %13220 = vmatmul.mubr.msk.bf16.gmra.mrb[100].mxu0 %vm1462_vm3, %v19623_v52  ;;  %v16991_v52 = vshrl.u32 %v16983_v51, 16 }
 0x342   : > { %13223 = vmatprep.mubr.msk.bf16.mxu0 %vm1462_vm3, %v19624_v18  ;;  %v4168_v18 = vor.u32 %v16988_v30, %v4165_v7 }
 0x349   : > { %13224 = vmatmul.mubr.msk.bf16.gmra.mrb[104].mxu0 %vm1462_vm3, %v19625_v13  ;;  %v4173_v13 = vrot.slane %v16991_v52, 7 }
 0x34a   : > { %13227 = vmatprep.mubr.msk.bf16.mxu0 %vm1462_vm3, %v19626_v19  ;;  %v19630_v19 = vld [vmem:[#allocation78_spill] sm:$0xff] }
 0x351   : > { %13228 = vmatmul.mubr.msk.bf16.gmra.mrb[108].mxu0 %vm1462_vm3, %v19628_v14  ;;  %v19631_v14 = vld [vmem:[#allocation52_spill] sm:$0xff] }
 0x352   : > { %13231 = vmatprep.mubr.msk.bf16.mxu0 %vm1462_vm3, %v19629_v48  ;;  %v19632_v36 = vrot.slane %v19631_v14, 7  ;;  %v17002_v48 = vshll.u32 %v16983_v51, 16  ;;  %v14850_v14 = vld [vmem:[#allocation2 + $0xb8] sm:$0xff] }
 0x354   : > { %v4169_v49 = vsel %vm19356_vm8, %v19632_v36, %v4168_v18  ;;  %v4176_v15 = vor.u32 %v17002_v48, %v4173_v13  ;;  %v12059_v36 = vld [vmem:[%s19221_s10 + $0xc] sm:$0x3]  ;;  %v14849_v13 = vld [vmem:[#allocation2 + $0xb0] sm:$0xff] }
 0x355   : > { %v14848_v18 = vld [vmem:[#allocation2 + $0xa8] sm:$0xff] }
 0x356   : > { %v4177_v31 = vsel %vm19356_vm8, %v4165_v7, %v4176_v15  ;;  %v14841_v15 = vld [vmem:[#allocation2 + $0x70] sm:$0xff]  ;;  %v14847_v7 = vld [vmem:[#allocation2 + $0xa0] sm:$0xff]  ;;  %vm2562_vm8 = vcmask 27648  }
 0x359   : > { %13232 = vmatmul.mubr.msk.bf16.gmra.mrb[112].mxu0 %vm1462_vm3, %v19630_v19  ;;  %v5149_v19 = vsel %vm1535_vm1, %v16856_v28, 0  ;;  %v14843_v28 = vld [vmem:[#allocation2 + $0x80] sm:$0xff] }
 0x35a   : > { %13235 = vmatprep.mubr.msk.bf16.mxu0 %vm1462_vm3, %v4169_v49  ;;  %v14846_v49 = vld [vmem:[#allocation2 + $0x98] sm:$0xff] }
 0x361   : > { %13236 = vmatmul.mubr.msk.bf16.gmra.mrb[116].mxu0 %vm1462_vm3, %v4177_v31  ;;  %v14842_v31 = vld [vmem:[#allocation2 + $0x78] sm:$0xff] }
 0x362   : > { %13241 = vmatprep.mubr.msk.bf16.mxu0 %vm1462_vm3, %v19612_v23  ;;  %v14844_v23 = vld [vmem:[#allocation2 + $0x88] sm:$0xff] }
 0x369   : > { %13242 = vmatmul.mubr.msk.bf16.vlgmr.msra.gmra.mrb[72].mxu0 %vm1462_vm3, %v19617_v0  ;;  %v14845_v0 = vld [vmem:[#allocation2 + $0x90] sm:$0xff] }
 0x36a   : > { %13290 = vmatpush3.bf16.msra.mxu0 %v5149_v19  ;;  %13245 = vmatprep.mubr.msk.bf16.mxu0 %vm1462_vm3, %v16818_v5  ;;  %v4898_v19 = vrot.slane %v16838_v17, 1 }
 0x36b   : > { %14767 = vmatprep.subr.msk.bf16.mxu0 %vm1535_vm1, %v12059_v36 }
 0x371   : > { %13246 = vmatmul.mubr.msk.bf16.gmra.mrb[76].mxu0 %vm1462_vm3, %v16832_v8 }
 0x372   : > { %13249 = vmatprep.mubr.msk.bf16.mxu0 %vm1462_vm3, %v16835_v11 }
 0x379   : > { %13250 = vmatmul.mubr.msk.bf16.gmra.mrb[80].mxu0 %vm1462_vm3, %v16861_v40 }
 0x37a   : > { %13253 = vmatprep.mubr.msk.bf16.mxu0 %vm1462_vm3, %v16867_v4 }
 0x381   : > { %13254 = vmatmul.mubr.msk.bf16.gmra.mrb[84].mxu0 %vm1462_vm3, %v16887_v3 }
 0x382   : > { %13257 = vmatprep.mubr.msk.bf16.mxu0 %vm1462_vm3, %v16893_v16 }
 0x389   : > { %13258 = vmatmul.mubr.msk.bf16.gmra.mrb[88].mxu0 %vm1462_vm3, %v16911_v50 }
 0x38a   : > { %13261 = vmatprep.mubr.msk.bf16.mxu0 %vm1462_vm3, %v16917_v46 }
 0x391   : > { %13262 = vmatmul.mubr.msk.bf16.gmra.mrb[92].mxu0 %vm1462_vm3, %v16935_v2 }
 0x392   : > { %13265 = vmatprep.mubr.msk.bf16.mxu0 %vm1462_vm3, %v14841_v15  ;;  %v19633_v15 = vld [vmem:[#allocation80_spill] sm:$0xff] }
 0x399   : > { %13266 = vmatmul.mubr.msk.bf16.gmra.mrb[96].mxu0 %vm1462_vm3, %v14842_v31  ;;  %v4902_v31 = vor.u32 %v4898_v19, %v16823_v58 }
 0x39a   : > { %13269 = vmatprep.mubr.msk.bf16.mxu0 %vm1462_vm3, %v14843_v28  ;;  %v5748_v28 = vsel %vm1535_vm1, %v12059_v36, 0 }
 0x3a1   : > { %13270 = vmatmul.mubr.msk.bf16.gmra.mrb[100].mxu0 %vm1462_vm3, %v14844_v23  ;;  %v4906_v23 = vrot.slane %v16865_v22, 1 }
 0x3a2   : > { %13273 = vmatprep.mubr.msk.bf16.mxu0 %vm1462_vm3, %v14845_v0  ;;  %v19634_v0 = vld [vmem:[#allocation79_spill] sm:$0xff] }
 0x3a9   : > { %13274 = vmatmul.mubr.msk.bf16.gmra.mrb[104].mxu0 %vm1462_vm3, %v14846_v49  ;;  %v4899_v49 = vsel %vm4879_vm5, %v19634_v0, %v4898_v19  ;;  %v4922_v19 = vrot.slane %v16891_v35, 1  ;;  %v4930_v0 = vrot.slane %v16896_v60, 1 }
 0x3aa   : > { %13277 = vmatprep.mubr.msk.bf16.mxu0 %vm1462_vm3, %v14847_v7  ;;  %v17062_v7 = vld [vmem:[%s19221_s10 + $0xe] sm:$0x3] }
 0x3b1   : > { %13278 = vmatmul.mubr.msk.bf16.gmra.mrb[108].mxu0 %vm1462_vm3, %v14848_v18  ;;  %v4907_v18 = vsel %vm4879_vm5, %v4902_v31, %v4906_v23 }
 0x3b2   : > { %13281 = vmatprep.mubr.msk.bf16.mxu0 %vm1462_vm3, %v14849_v13  ;;  %v4914_v13 = vrot.slane %v16870_v24, 1 }
 0x3b4   : > { %v4918_v36 = vor.u32 %v4914_v13, %v16847_v25 }
 0x3b6   : > { %v4923_v31 = vsel %vm4879_vm5, %v4918_v36, %v4922_v19 }
 0x3b9   : > { %13282 = vmatmul.mubr.msk.bf16.gmra.mrb[112].mxu0 %vm1462_vm3, %v14850_v14  ;;  %v4910_v14 = vor.u32 %v4906_v23, %v16843_v33 }
 0x3ba   : > { %13285 = vmatprep.mubr.msk.bf16.mxu0 %vm1462_vm3, %v16975_v27 }
 0x3c1   : > { %13286 = vmatmul.mubr.msk.bf16.gmra.mrb[116].mxu0 %vm1462_vm3, %v16983_v51 }
 0x3c2   : > { %13291 = vmatprep.mubr.msk.bf16.mxu0 %vm1462_vm3, %v19633_v15  ;;  %v4915_v15 = vsel %vm4879_vm5, %v4910_v14, %v4914_v13  ;;  %v4946_v14 = vrot.slane %v16920_v12, 1 }
 0x3c4   : > { %v4950_v36 = vor.u32 %v4946_v14, %v16904_v20 }
 0x3c9   : > { %13292 = vmatmul.mubr.msk.bf16.vlgmr.msra.gmra.mrb[72].mxu0 %vm1462_vm3, %v4899_v49  ;;  %v4926_v49 = vor.u32 %v4922_v19, %v16876_v53 }
 0x3ca   : > { %13340 = vmatpush3.bf16.msra.mxu0 %v5748_v28  ;;  %13295 = vmatprep.mubr.msk.bf16.mxu0 %vm1462_vm3, %v4907_v18  ;;  %v4934_v28 = vor.u32 %v4930_v0, %v16880_v32  ;;  %v4938_v18 = vrot.slane %v16915_v62, 1 }
 0x3cb   : > { %14768 = vmatprep.subr.msk.bf16.mxu0 %vm1535_vm1, %v17062_v7  ;;  %v4931_v23 = vsel %vm4879_vm5, %v4926_v49, %v4930_v0  ;;  %v4962_v49 = vrot.slane %v16942_v29, 1 }
 0x3cc   : > { %v4939_v13 = vsel %vm4879_vm5, %v4934_v28, %v4938_v18 }
 0x3cd   : > { %v4966_v28 = vor.u32 %v4962_v49, %v16928_v44 }
 0x3d1   : > { %13296 = vmatmul.mubr.msk.bf16.gmra.mrb[76].mxu0 %vm1462_vm3, %v4915_v15  ;;  %v4942_v15 = vor.u32 %v4938_v18, %v16900_v10 }
 0x3d2   : > { %13299 = vmatprep.mubr.msk.bf16.mxu0 %vm1462_vm3, %v4923_v31  ;;  %v4954_v31 = vrot.slane %v16939_v42, 1 }
 0x3d3   : > { %v4947_v19 = vsel %vm4879_vm5, %v4942_v15, %v4946_v14  ;;  %v4978_v15 = vrot.slane %v16510_v6, 1 }
 0x3d4   : > { %v4955_v0 = vsel %vm4879_vm5, %v4950_v36, %v4954_v31 }
 0x3d5   : > { %v4982_v36 = vor.u32 %v16498_v26, %v4978_v15  ;;  %v5002_v26 = vrot.slane %v16533_v39, 1  ;;  %v5018_v39 = vrot.slane %v16547_v63, 1 }
 0x3d9   : > { %13300 = vmatmul.mubr.msk.bf16.gmra.mrb[80].mxu0 %vm1462_vm3, %v4931_v23  ;;  %v4958_v23 = vor.u32 %v4954_v31, %v16924_v21 }
 0x3da   : > { %13303 = vmatprep.mubr.msk.bf16.mxu0 %vm1462_vm3, %v4939_v13  ;;  %v4970_v13 = vrot.slane %v16955_v1, 1 }
 0x3db   : > { %v4963_v18 = vsel %vm4879_vm5, %v4958_v23, %v4962_v49  ;;  %v4994_v23 = vrot.slane %v16525_v61, 1  ;;  %v19635_v61 = vmov 0  }
 0x3dc   : > { %v4971_v14 = vsel %vm4879_vm5, %v4966_v28, %v4970_v13  ;;  %2563 = vst.msk [vmem:[#allocation2 + $0xd8] sm:$0xf] %vm2562_vm8, %v19635_v61  ;;  %7165 = vst.msk [vmem:[#allocation3 + $0xd8] sm:$0xf] %vm2562_vm8, %v19635_v61 }
 0x3dd   : > { %v4998_v6 = vor.u32 %v16528_v37, %v4994_v23 }
 0x3e1   : > { %13304 = vmatmul.mubr.msk.bf16.gmra.mrb[84].mxu0 %vm1462_vm3, %v4947_v19  ;;  %v4974_v19 = vor.u32 %v4970_v13, %v16946_v57 }
 0x3e2   : > { %13307 = vmatprep.mubr.msk.bf16.mxu0 %vm1462_vm3, %v4955_v0  ;;  %v4986_v0 = vrot.slane %v16522_v47, 1  ;;  %v5003_v47 = vsel %vm4879_vm5, %v4998_v6, %v5002_v26  ;;  %v5058_v6 = vrot.slane %v16988_v30, 1 }
 0x3e3   : > { %v4979_v31 = vsel %vm4879_vm5, %v4974_v19, %v4978_v15  ;;  %v5022_v19 = vor.u32 %v16550_v38, %v5018_v39 }
 0x3e4   : > { %v4987_v49 = vsel %vm4879_vm5, %v4982_v36, %v4986_v0  ;;  %v4990_v28 = vor.u32 %v16513_v41, %v4986_v0  ;;  %v5006_v41 = vor.u32 %v16536_v56, %v5002_v26  ;;  %v5042_v0 = vrot.slane %v16570_v9, 1  ;;  %v19638_v9 = vld [vmem:[#allocation53_spill] sm:$0xff] }
 0x3e5   : > { %v5062_v26 = vor.u32 %v5058_v6, %v19638_v9 }
 0x3e6   : > { %v4995_v13 = vsel %vm4879_vm5, %v4990_v28, %v4994_v23  ;;  %v19637_v23 = vld [vmem:[#allocation85_spill] sm:$0xff]  ;;  %v5424_v28 = vld [vmem:[#allocation2 + $0x18] sm:$0xf8] }
 0x3e7   : > { %v5452_v61 = vshrl.u32 %v5424_v28, 16 }
 0x3e9   : > { %13308 = vmatmul.mubr.msk.bf16.gmra.mrb[88].mxu0 %vm1462_vm3, %v4963_v18  ;;  %v5010_v18 = vrot.slane %v16539_v45, 1  ;;  %v5026_v45 = vrot.slane %v16553_v55, 1  ;;  %v5046_v55 = vor.u32 %v16575_v34, %v5042_v0 }
 0x3ea   : > { %13311 = vmatprep.mubr.msk.bf16.mxu0 %vm1462_vm3, %v4971_v14 }
 0x3eb   : > { %v5014_v37 = vor.u32 %v16542_v43, %v5010_v18  ;;  %v5011_v14 = vsel %vm4879_vm5, %v5006_v41, %v5010_v18  ;;  %v5030_v36 = vor.u32 %v16557_v54, %v5026_v45  ;;  %v5034_v43 = vrot.slane %v16560_v59, 1 }
 0x3ec   : > { %v5027_v56 = vsel %vm4879_vm5, %v5022_v19, %v5026_v45  ;;  %v5050_v54 = vrot.slane %v19637_v23, 1  ;;  %v5066_v18 = vrot.slane %v17002_v48, 1  ;;  %v5465_v45 = vrot.slane %v16838_v17, 4 }
 0x3ed   : > { %v5019_v15 = vsel %vm4879_vm5, %v5014_v37, %v5018_v39  ;;  %v5035_v63 = vsel %vm4879_vm5, %v5030_v36, %v5034_v43  ;;  %v5455_v37 = vshll.u32 %v5424_v28, 16  ;;  %v5454_v36 = vrot.slane %v5452_v61, 3 }
 0x3ee   : > { %v5051_v59 = vsel %vm4879_vm5, %v5046_v55, %v5050_v54  ;;  %v6173_v28 = vsel %vm1535_vm1, %v17062_v7, 0  ;;  %v5498_v61 = vrot.slane %v16880_v32, 3 }
 0x3ef   : > { %v5457_v19 = vrot.slane %v5455_v37, 4  ;;  %v5501_v37 = vrot.slane %v16896_v60, 4 }
 0x3f1   : > { %13312 = vmatmul.mubr.msk.bf16.gmra.mrb[92].mxu0 %vm1462_vm3, %v4979_v31  ;;  %v19636_v31 = vld [vmem:[#allocation83_spill] sm:$0xff] }
 0x3f2   : > { %13315 = vmatprep.mubr.msk.bf16.mxu0 %vm1462_vm3, %v4987_v49  ;;  %v5038_v49 = vor.u32 %v19636_v31, %v5034_v43  ;;  %v5070_v43 = vor.u32 %v5066_v18, %v16991_v52  ;;  %v5471_v31 = vrot.slane %v16843_v33, 3 }
 0x3f4   : > { %v5043_v38 = vsel %vm4879_vm5, %v5038_v49, %v5042_v0  ;;  %v5458_v0 = vor.u32 %v5457_v19, %v5454_v36  ;;  %v5474_v49 = vrot.slane %v16865_v22, 4  ;;  %v5516_v36 = vrot.slane %v16904_v20, 3 }
 0x3f5   : > { %v5519_v19 = vrot.slane %v16920_v12, 4 }
 0x3f9   : > { %13316 = vmatmul.mubr.msk.bf16.gmra.mrb[96].mxu0 %vm1462_vm3, %v4995_v13  ;;  %v4876_v13 = vld [vmem:[#allocation2 + $0xd0] sm:$0x1] }
 0x3fa   : > { %13319 = vmatprep.mubr.msk.bf16.mxu0 %vm1462_vm3, %v5003_v47  ;;  %v19639_v47 = vld [vmem:[#allocation86_spill] sm:$0xff]  ;;  %v5072_v39 = vshll.u32 %v4876_v13, 16  ;;  %v5489_v13 = vrot.slane %v16876_v53, 3 }
 0x3fb   : > { %v5054_v34 = vor.u32 %v19639_v47, %v5050_v54  ;;  %v5480_v54 = vrot.slane %v16847_v25, 3  ;;  %v5492_v47 = vrot.slane %v16891_v35, 4 }
 0x3fd   : > { %v5059_v41 = vsel %vm4879_vm5, %v5054_v34, %v5058_v6  ;;  %v17170_v34 = vld [vmem:[%s19221_s10 + $0x10] sm:$0x3]  ;;  %v5493_v7 = vor.u32 %v5492_v47, %v5489_v13 }
 0x401   : > { %13320 = vmatmul.mubr.msk.bf16.gmra.mrb[100].mxu0 %vm1462_vm3, %v5011_v14  ;;  %v5067_v14 = vsel %vm4879_vm5, %v5062_v26, %v5066_v18 }
 0x402   : > { %13323 = vmatprep.mubr.msk.bf16.mxu0 %vm1462_vm3, %v5019_v15  ;;  %v5462_v15 = vrot.slane %v16823_v58, 3 }
 0x409   : > { %13324 = vmatmul.mubr.msk.bf16.gmra.mrb[104].mxu0 %vm1462_vm3, %v5027_v56  ;;  %v5074_v56 = vrot.slane %v5072_v39, 1 }
 0x40a   : > { %13327 = vmatprep.mubr.msk.bf16.mxu0 %vm1462_vm3, %v5035_v63  ;;  %v5466_v63 = vor.u32 %v5465_v45, %v5462_v15  ;;  %v5510_v15 = vrot.slane %v16915_v62, 4 }
 0x40b   : > { %v5075_v55 = vsel %vm4879_vm5, %v5070_v43, %v5074_v56  ;;  %v5520_v56 = vor.u32 %v5519_v19, %v5516_v36  ;;  %v5642_v36 = vrot.slane %v19638_v9, 3  ;;  %v5645_v19 = vrot.slane %v16988_v30, 4 }
 0x40c   : > { %v5467_v23 = vsel %vm2968_vm11, %v5458_v0, %v5466_v63  ;;  %v5525_v0 = vrot.slane %v16924_v21, 3 }
 0x411   : > { %13328 = vmatmul.mubr.msk.bf16.gmra.mrb[108].mxu0 %vm1462_vm3, %v5043_v38  ;;  %v5483_v38 = vrot.slane %v16870_v24, 4 }
 0x412   : > { %13331 = vmatprep.mubr.msk.bf16.mxu0 %vm1462_vm3, %v5051_v59  ;;  %v5475_v59 = vor.u32 %v5474_v49, %v5471_v31  ;;  %v5534_v49 = vrot.slane %v16928_v44, 3 }
 0x413   : > { %v5484_v6 = vor.u32 %v5483_v38, %v5480_v54 }
 0x414   : > { %v5476_v26 = vsel %vm2968_vm11, %v5466_v63, %v5475_v59 }
 0x415   : > { %v5485_v18 = vsel %vm2968_vm11, %v5475_v59, %v5484_v6  ;;  %v5494_v39 = vsel %vm2968_vm11, %v5484_v6, %v5493_v7  ;;  %v5543_v6 = vrot.slane %v16946_v57, 3 }
 0x419   : > { %13332 = vmatmul.mubr.msk.bf16.gmra.mrb[112].mxu0 %vm1462_vm3, %v5059_v41  ;;  %v5502_v41 = vor.u32 %v5501_v37, %v5498_v61  ;;  %v19641_v37 = vld [vmem:[#allocation87_spill] sm:$0xff] }
 0x41a   : > { %13335 = vmatprep.mubr.msk.bf16.mxu0 %vm1462_vm3, %v5067_v14  ;;  %v5507_v14 = vrot.slane %v16900_v10, 3 }
 0x41b   : > { %v5503_v45 = vsel %vm2968_vm11, %v5493_v7, %v5502_v41  ;;  %v19642_v7 = vld [vmem:[#allocation88_spill] sm:$0xff] }
 0x41c   : > { %v5511_v43 = vor.u32 %v5510_v15, %v5507_v14  ;;  %v19645_v14 = vld [vmem:[#allocation91_spill] sm:$0xff]  ;;  %v19646_v15 = vld [vmem:[#allocation92_spill] sm:$0xff] }
 0x41e   : > { %v5512_v63 = vsel %vm2968_vm11, %v5502_v41, %v5511_v43  ;;  %v5521_v31 = vsel %vm2968_vm11, %v5511_v43, %v5520_v56  ;;  %v19643_v41 = vld [vmem:[#allocation89_spill] sm:$0xff]  ;;  %v19648_v43 = vld [vmem:[#allocation95_spill] sm:$0xff] }
 0x421   : > { %13336 = vmatmul.mubr.msk.bf16.gmra.mrb[116].mxu0 %vm1462_vm3, %v5075_v55  ;;  %v5528_v55 = vrot.slane %v16939_v42, 4 }
 0x422   : > { %13341 = vmatprep.mubr.msk.bf16.mxu0 %vm1462_vm3, %v5467_v23  ;;  %v5537_v23 = vrot.slane %v16942_v29, 4 }
 0x423   : > { %v5529_v54 = vor.u32 %v5528_v55, %v5525_v0  ;;  %v5651_v0 = vrot.slane %v16991_v52, 3  ;;  %v5654_v55 = vrot.slane %v17002_v48, 4 }
 0x424   : > { %v5538_v38 = vor.u32 %v5537_v23, %v5534_v49  ;;  %v19650_v49 = vld [vmem:[#allocation94_spill] sm:$0xff] }
 0x425   : > { %v5530_v59 = vsel %vm2968_vm11, %v5520_v56, %v5529_v54  ;;  %v5646_v56 = vor.u32 %v5645_v19, %v5642_v36 }
 0x427   : > { %v5647_v23 = vsel %vm2968_vm11, %v19650_v49, %v5646_v56  ;;  %v6060_v49 = vrot.slane %v16867_v4, 4  ;;  %v6066_v4 = vrot.slane %v16911_v50, 4 }
 0x429   : > { %13342 = vmatmul.mubr.msk.bf16.vlgmr.msra.gmra.mrb[72].mxu0 %vm1462_vm3, %v5476_v26  ;;  %v5539_v26 = vsel %vm2968_vm11, %v5529_v54, %v5538_v38  ;;  %v19651_v54 = vld [vmem:[#allocation106_spill] sm:$0xff] }
 0x42a   : > { %13390 = vmatpush3.bf16.msra.mxu0 %v6173_v28  ;;  %13345 = vmatprep.mubr.msk.bf16.mxu0 %vm1462_vm3, %v5485_v18  ;;  %v5546_v28 = vrot.slane %v16955_v1, 4  ;;  %v19640_v18 = vld [vmem:[#allocation84_spill] sm:$0xff] }
 0x42b   : > { %14769 = vmatprep.subr.msk.bf16.mxu0 %vm1535_vm1, %v17170_v34 }
 0x42c   : > { %v5547_v13 = vor.u32 %v5546_v28, %v5543_v6  ;;  %v19653_v6 = vshll.u32 %v19651_v54, 16 }
 0x42e   : > { %v5548_v47 = vsel %vm2968_vm11, %v5538_v38, %v5547_v13  ;;  %v5557_v61 = vsel %vm2968_vm11, %v5547_v13, %v19640_v18  ;;  %v19652_v38 = vshrl.u32 %v19651_v54, 16  ;;  %v5663_v28 = vrot.slane %v19653_v6, 4 }
 0x431   : > { %13346 = vmatmul.mubr.msk.bf16.gmra.mrb[76].mxu0 %vm1462_vm3, %v5494_v39  ;;  %v19644_v39 = vld [vmem:[#allocation90_spill] sm:$0xff] }
 0x432   : > { %13349 = vmatprep.mubr.msk.bf16.mxu0 %vm1462_vm3, %v5503_v45  ;;  %v19647_v45 = vld [vmem:[#allocation93_spill] sm:$0xff] }
 0x439   : > { %13350 = vmatmul.mubr.msk.bf16.gmra.mrb[80].mxu0 %vm1462_vm3, %v5512_v63  ;;  %v17224_v63 = vld [vmem:[#allocation2 + $0xd8] sm:$0xf] }
 0x43a   : > { %13353 = vmatprep.mubr.msk.bf16.mxu0 %vm1462_vm3, %v5521_v31  ;;  %v19649_v31 = vld [vmem:[#allocation96_spill] sm:$0xff]  ;;  %v5670_v13 = vshll.u32 %v17224_v63, 16 }
 0x441   : > { %13354 = vmatmul.mubr.msk.bf16.gmra.mrb[84].mxu0 %vm1462_vm3, %v5530_v59  ;;  %v5660_v59 = vrot.slane %v19652_v38, 3 }
 0x442   : > { %13357 = vmatprep.mubr.msk.bf16.mxu0 %vm1462_vm3, %v5539_v26  ;;  %v5667_v26 = vshrl.u32 %v17224_v63, 16 }
 0x443   : > { %v5664_v18 = vor.u32 %v5663_v28, %v5660_v59  ;;  %v6068_v59 = vrot.slane %v16917_v46, 4  ;;  %v19656_v46 = vld [vmem:[#allocation97_spill] sm:$0xff] }
 0x449   : > { %13358 = vmatmul.mubr.msk.bf16.gmra.mrb[88].mxu0 %vm1462_vm3, %v5548_v47  ;;  %v5655_v47 = vor.u32 %v5654_v55, %v5651_v0  ;;  %v6633_v0 = vsel %vm1535_vm1, %v17170_v34, 0  ;;  %v6062_v34 = vrot.slane %v16887_v3, 4  ;;  %v6069_v3 = vsel %vm929_vm0, %v6066_v4, %v6068_v59 }
 0x44a   : > { %13361 = vmatprep.mubr.msk.bf16.mxu0 %vm1462_vm3, %v5557_v61  ;;  %v5669_v61 = vrot.slane %v5667_v26, 3  ;;  %v19654_v26 = vld [vmem:[#allocation81_spill] sm:$0xff] }
 0x44b   : > { %v6063_v38 = vsel %vm929_vm0, %v6060_v49, %v6062_v34 }
 0x451   : > { %13362 = vmatmul.mubr.msk.bf16.gmra.mrb[92].mxu0 %vm1462_vm3, %v19641_v37  ;;  %v5672_v37 = vrot.slane %v5670_v13, 4  ;;  %v19655_v13 = vrot.slane %v19654_v26, 4 }
 0x452   : > { %13365 = vmatprep.mubr.msk.bf16.mxu0 %vm1462_vm3, %v19642_v7  ;;  %v5656_v7 = vsel %vm2968_vm11, %v5646_v56, %v5655_v47  ;;  %v6056_v56 = vrot.slane %v16835_v11, 4 }
 0x459   : > { %13366 = vmatmul.mubr.msk.bf16.gmra.mrb[96].mxu0 %vm1462_vm3, %v19643_v41  ;;  %v5665_v41 = vsel %vm2968_vm11, %v5655_v47, %v5664_v18  ;;  %v19657_v47 = vld [vmem:[#allocation98_spill] sm:$0xff] }
 0x45a   : > { %13369 = vmatprep.mubr.msk.bf16.mxu0 %vm1462_vm3, %v19644_v39  ;;  %v5673_v39 = vor.u32 %v5672_v37, %v5669_v61  ;;  %v19660_v61 = vld [vmem:[#allocation101_spill] sm:$0xff]  ;;  %v12136_v37 = vld [vmem:[%s19224_s13 + $0x2] sm:$0x3] }
 0x45b   : > { %14770 = vmatprep.subr.msk.bf16.mxu1 %vm1535_vm1, %v12136_v37 }
 0x461   : > { %13370 = vmatmul.mubr.msk.bf16.gmra.mrb[100].mxu0 %vm1462_vm3, %v19645_v14  ;;  %v17243_v14 = vld [vmem:[#allocation2 + $0x18] sm:$0xf0] }
 0x462   : > { %13373 = vmatprep.mubr.msk.bf16.mxu0 %vm1462_vm3, %v19646_v15  ;;  %v6052_v15 = vrot.slane %v16818_v5, 4  ;;  %v6051_v36 = vrot.slane %v17243_v14, 4 }
 0x464   : > { %v6053_v19 = vsel %vm929_vm0, %v6051_v36, %v6052_v15  ;;  %v19664_v36 = vld [vmem:[#allocation105_spill] sm:$0xff] }
 0x469   : > { %13374 = vmatmul.mubr.msk.bf16.gmra.mrb[104].mxu0 %vm1462_vm3, %v19647_v45  ;;  %v5674_v45 = vsel %vm2968_vm11, %v5664_v18, %v5673_v39  ;;  %v19658_v18 = vld [vmem:[#allocation99_spill] sm:$0xff] }
 0x46a   : > { %13377 = vmatprep.mubr.msk.bf16.mxu0 %vm1462_vm3, %v19648_v43  ;;  %v6054_v43 = vrot.slane %v16832_v8, 4  ;;  %v19662_v39 = vld [vmem:[#allocation103_spill] sm:$0xff] }
 0x46c   : > { %v6055_v55 = vsel %vm929_vm0, %v6052_v15, %v6054_v43  ;;  %v6057_v5 = vsel %vm929_vm0, %v6054_v43, %v6056_v56  ;;  %v19663_v15 = vld [vmem:[#allocation104_spill] sm:$0xff] }
 0x471   : > { %13378 = vmatmul.mubr.msk.bf16.gmra.mrb[108].mxu0 %vm1462_vm3, %v19649_v31  ;;  %v6058_v31 = vrot.slane %v16861_v40, 4 }
 0x472   : > { %13381 = vmatprep.mubr.msk.bf16.mxu0 %vm1462_vm3, %v5647_v23  ;;  %v6064_v23 = vrot.slane %v16893_v16, 4  ;;  %v6070_v16 = vrot.slane %v16935_v2, 4  ;;  %v19659_v2 = vld [vmem:[#allocation100_spill] sm:$0xff] }
 0x473   : > { %v6059_v8 = vsel %vm929_vm0, %v6056_v56, %v6058_v31  ;;  %v6061_v11 = vsel %vm929_vm0, %v6058_v31, %v6060_v49  ;;  %v6455_v31 = vshll.u32 %v17243_v14, 16 }
 0x474   : > { %v6065_v40 = vsel %vm929_vm0, %v6062_v34, %v6064_v23  ;;  %v6067_v6 = vsel %vm929_vm0, %v6064_v23, %v6066_v4  ;;  %v6071_v28 = vsel %vm929_vm0, %v6068_v59, %v6070_v16  ;;  %v6073_v50 = vsel %vm929_vm0, %v6070_v16, %v19655_v13 }
 0x475   : > { %v6464_v4 = vrot.slane %v16865_v22, 5  ;;  %v6468_v59 = vrot.slane %v16870_v24, 5  ;;  %v6471_v16 = vrot.slane %v16876_v53, 4  ;;  %v6480_v53 = vrot.slane %v16915_v62, 5 }
 0x479   : > { %13382 = vmatmul.mubr.msk.bf16.gmra.mrb[112].mxu0 %vm1462_vm3, %v5656_v7  ;;  %v19661_v7 = vld [vmem:[#allocation102_spill] sm:$0xff] }
 0x47a   : > { %13385 = vmatprep.mubr.msk.bf16.mxu0 %vm1462_vm3, %v5665_v41  ;;  %v7342_v41 = vsel %vm1535_vm1, %v12136_v37, 0 }
 0x47b   : > { %13490 = vmatpush3.bf16.msra.mxu1 %v7342_v41  ;;  %v6495_v41 = vrot.slane %v16946_v57, 4  ;;  %v19670_v57 = vld [vmem:[#allocation110_spill] sm:$0xff] }
 0x481   : > { %13386 = vmatmul.mubr.msk.bf16.gmra.mrb[116].mxu0 %vm1462_vm3, %v5674_v45  ;;  %v6092_v45 = vrot.slane %v16975_v27, 4 }
 0x482   : > { %13391 = vmatprep.mubr.msk.bf16.mxu0 %vm1462_vm3, %v6053_v19  ;;  %v19665_v19 = vld [vmem:[#allocation82_spill] sm:$0xff] }
 0x483   : > { %v19666_v43 = vrot.slane %v19665_v19, 4  ;;  %v19672_v19 = vld [vmem:[#allocation112_spill] sm:$0xff] }
 0x485   : > { %v6093_v56 = vsel %vm929_vm0, %v19666_v43, %v6092_v45  ;;  %v19673_v43 = vld [vmem:[#allocation113_spill] sm:$0xff] }
 0x489   : > { %13392 = vmatmul.mubr.msk.bf16.vlgmr.msra.gmra.mrb[72].mxu0 %vm1462_vm3, %v6055_v55  ;;  %v6096_v55 = vrot.slane %v19651_v54, 4  ;;  %v6457_v54 = vrot.slane %v6455_v31, 5 }
 0x48a   : > { %13440 = vmatpush3.bf16.msra.mxu0 %v6633_v0  ;;  %13395 = vmatprep.mubr.msk.bf16.mxu0 %vm1462_vm3, %v6057_v5  ;;  %v6094_v0 = vrot.slane %v16983_v51, 4  ;;  %v6452_v5 = vshrl.u32 %v17243_v14, 16  ;;  %v6098_v51 = vrot.slane %v17224_v63, 4 }
 0x48c   : > { %v6095_v49 = vsel %vm929_vm0, %v6092_v45, %v6094_v0  ;;  %v6097_v27 = vsel %vm929_vm0, %v6094_v0, %v6096_v55  ;;  %v6454_v34 = vrot.slane %v6452_v5, 4  ;;  %v19668_v45 = vld [vmem:[#allocation108_spill] sm:$0xff]  ;;  %v6539_v0 = vrot.slane %v19638_v9, 4 }
 0x48d   : > { %v19675_v5 = vld [vmem:[#allocation116_spill] sm:$0xff] }
 0x48e   : > { %v6458_v14 = vor.u32 %v6457_v54, %v6454_v34 }
 0x491   : > { %13396 = vmatmul.mubr.msk.bf16.gmra.mrb[76].mxu0 %vm1462_vm3, %v6059_v8  ;;  %v6459_v8 = vrot.slane %v16823_v58, 4 }
 0x492   : > { %13399 = vmatprep.mubr.msk.bf16.mxu0 %vm1462_vm3, %v6061_v11  ;;  %v6460_v11 = vrot.slane %v16838_v17, 5  ;;  %v6467_v17 = vrot.slane %v16847_v25, 4  ;;  %v6476_v25 = vrot.slane %v16896_v60, 5 }
 0x494   : > { %v6461_v23 = vor.u32 %v6460_v11, %v6459_v8  ;;  %v6544_v8 = vrot.slane %v17002_v48, 5  ;;  %v19676_v11 = vld [vmem:[#allocation117_spill] sm:$0xff] }
 0x496   : > { %v6462_v58 = vsel %vm3496_vm13, %v6458_v14, %v6461_v23 }
 0x499   : > { %13400 = vmatmul.mubr.msk.bf16.gmra.mrb[80].mxu0 %vm1462_vm3, %v6063_v38  ;;  %v6099_v38 = vsel %vm929_vm0, %v6096_v55, %v6098_v51  ;;  %v6540_v55 = vrot.slane %v16988_v30, 5  ;;  %v19677_v51 = vld [vmem:[#allocation115_spill] sm:$0xff] }
 0x49a   : > { %13403 = vmatprep.mubr.msk.bf16.mxu0 %vm1462_vm3, %v6065_v40  ;;  %v6463_v40 = vrot.slane %v16843_v33, 4  ;;  %v6472_v33 = vrot.slane %v16891_v35, 5 }
 0x49b   : > { %v6541_v31 = vor.u32 %v6540_v55, %v6539_v0 }
 0x49c   : > { %v6465_v63 = vor.u32 %v6464_v4, %v6463_v40  ;;  %v6473_v24 = vor.u32 %v6472_v33, %v6471_v16  ;;  %v17416_v16 = vld [vmem:[%s19222_s11] ss:$0 sm:$0xff] }
 0x49d   : > { %v6542_v34 = vsel %vm3496_vm13, %v19677_v51, %v6541_v31 }
 0x4a1   : > { %13404 = vmatmul.mubr.msk.bf16.gmra.mrb[84].mxu0 %vm1462_vm3, %v6067_v6  ;;  %v6469_v6 = vor.u32 %v6468_v59, %v6467_v17  ;;  %v7192_v17 = vld [vmem:[#allocation3] sm:$0xf0]  ;;  %v17404_v59 = vld [vmem:[%s19224_s13] sm:$0x3] }
 0x4a2   : > { %13407 = vmatprep.mubr.msk.bf16.mxu0 %vm1462_vm3, %v6069_v3  ;;  %v6466_v3 = vsel %vm3496_vm13, %v6461_v23, %v6465_v63  ;;  %14771 = vmatprep.subr.msk.bf16.mxu1 %vm1535_vm1, %v17404_v59 }
 0x4a3   : > { %v6470_v22 = vsel %vm3496_vm13, %v6465_v63, %v6469_v6  ;;  %v6474_v13 = vsel %vm3496_vm13, %v6469_v6, %v6473_v24  ;;  %v7220_v63 = vrot.slane %v7192_v17, 4 }
 0x4a9   : > { %13408 = vmatmul.mubr.msk.bf16.gmra.mrb[88].mxu0 %vm1462_vm3, %v6071_v28  ;;  %v6475_v28 = vrot.slane %v16880_v32, 4  ;;  %v6484_v32 = vrot.slane %v16920_v12, 5 }
 0x4aa   : > { %13411 = vmatprep.mubr.msk.bf16.mxu0 %vm1462_vm3, %v6073_v50  ;;  %v6479_v50 = vrot.slane %v16900_v10, 4  ;;  %v6488_v10 = vrot.slane %v16939_v42, 5 }
 0x4ab   : > { %v6477_v26 = vor.u32 %v6476_v25, %v6475_v28 }
 0x4ac   : > { %v6481_v60 = vor.u32 %v6480_v53, %v6479_v50 }
 0x4ad   : > { %v6478_v35 = vsel %vm3496_vm13, %v6473_v24, %v6477_v26 }
 0x4b1   : > { %13412 = vmatmul.mubr.msk.bf16.gmra.mrb[92].mxu0 %vm1462_vm3, %v19656_v46  ;;  %v6483_v46 = vrot.slane %v16904_v20, 4  ;;  %v6492_v20 = vrot.slane %v16942_v29, 5  ;;  %v19667_v29 = vld [vmem:[#allocation107_spill] sm:$0xff] }
 0x4b2   : > { %13415 = vmatprep.mubr.msk.bf16.mxu0 %vm1462_vm3, %v19657_v47 }
 0x4b3   : > { %v6485_v47 = vor.u32 %v6484_v32, %v6483_v46 }
 0x4b5   : > { %v6486_v62 = vsel %vm3496_vm13, %v6481_v60, %v6485_v47 }
 0x4b9   : > { %13416 = vmatmul.mubr.msk.bf16.gmra.mrb[96].mxu0 %vm1462_vm3, %v19658_v18  ;;  %v6482_v18 = vsel %vm3496_vm13, %v6477_v26, %v6481_v60 }
 0x4ba   : > { %13419 = vmatprep.mubr.msk.bf16.mxu0 %vm1462_vm3, %v19659_v2  ;;  %v6487_v2 = vrot.slane %v16924_v21, 4  ;;  %v6496_v21 = vrot.slane %v16955_v1, 5  ;;  %v19669_v1 = vld [vmem:[#allocation109_spill] sm:$0xff] }
 0x4bc   : > { %v6489_v12 = vor.u32 %v6488_v10, %v6487_v2 }
 0x4c1   : > { %13420 = vmatmul.mubr.msk.bf16.gmra.mrb[100].mxu0 %vm1462_vm3, %v19660_v61  ;;  %v6491_v61 = vrot.slane %v16928_v44, 4 }
 0x4c2   : > { %13423 = vmatprep.mubr.msk.bf16.mxu0 %vm1462_vm3, %v19661_v7  ;;  %v6490_v7 = vsel %vm3496_vm13, %v6485_v47, %v6489_v12 }
 0x4c3   : > { %v6493_v37 = vor.u32 %v6492_v20, %v6491_v61 }
 0x4c5   : > { %v6494_v42 = vsel %vm3496_vm13, %v6489_v12, %v6493_v37 }
 0x4c9   : > { %13424 = vmatmul.mubr.msk.bf16.gmra.mrb[104].mxu0 %vm1462_vm3, %v19662_v39  ;;  %v6497_v39 = vor.u32 %v6496_v21, %v6495_v41 }
 0x4ca   : > { %13427 = vmatprep.mubr.msk.bf16.mxu0 %vm1462_vm3, %v19663_v15 }
 0x4cb   : > { %v6498_v44 = vsel %vm3496_vm13, %v6493_v37, %v6497_v39  ;;  %v6502_v15 = vsel %vm3496_vm13, %v6497_v39, %v19667_v29 }
 0x4d1   : > { %13428 = vmatmul.mubr.msk.bf16.gmra.mrb[108].mxu0 %vm1462_vm3, %v19664_v36  ;;  %v19671_v36 = vld [vmem:[#allocation111_spill] sm:$0xff] }
 0x4d2   : > { %13431 = vmatprep.mubr.msk.bf16.mxu0 %vm1462_vm3, %v6093_v56  ;;  %v19674_v56 = vld [vmem:[#allocation114_spill] sm:$0xff] }
 0x4d9   : > { %13432 = vmatmul.mubr.msk.bf16.gmra.mrb[112].mxu0 %vm1462_vm3, %v6095_v49  ;;  %v6448_v49 = vld [vmem:[#allocation2 + $0xd8] sm:$0x1f] }
 0x4da   : > { %13435 = vmatprep.mubr.msk.bf16.mxu0 %vm1462_vm3, %v6097_v27  ;;  %v6543_v27 = vrot.slane %v16991_v52, 4  ;;  %v6552_v9 = vshrl.u32 %v6448_v49, 16  ;;  %v6555_v54 = vshll.u32 %v6448_v49, 16  ;;  %v19678_v52 = vld [vmem:[#allocation118_spill] sm:$0xff] }
 0x4dc   : > { %v6545_v30 = vor.u32 %v6544_v8, %v6543_v27  ;;  %v6554_v23 = vrot.slane %v6552_v9, 4 }
 0x4de   : > { %v6546_v14 = vsel %vm3496_vm13, %v6541_v31, %v6545_v30  ;;  %v6550_v48 = vsel %vm3496_vm13, %v6545_v30, %v19678_v52 }
 0x4e1   : > { %13436 = vmatmul.mubr.msk.bf16.gmra.mrb[116].mxu0 %vm1462_vm3, %v6099_v38  ;;  %v6557_v38 = vrot.slane %v6555_v54, 5 }
 0x4e2   : > { %13441 = vmatprep.mubr.msk.bf16.mxu0 %vm1462_vm3, %v6462_v58  ;;  %v17399_v58 = vld [vmem:[#allocation3 + $0x8] sm:$0xff] }
 0x4e3   : > { %v6558_v40 = vor.u32 %v6557_v38, %v6554_v23  ;;  %v7221_v6 = vrot.slane %v17399_v58, 4  ;;  %v19686_v23 = vld [vmem:[#allocation8_spill] sm:$0xff] }
 0x4e5   : > { %v6559_v4 = vsel %vm3496_vm13, %v19678_v52, %v6558_v40  ;;  %v19688_v52 = vld [vmem:[#allocation9_spill] sm:$0xff] }
 0x4e9   : > { %13442 = vmatmul.mubr.msk.bf16.vlgmr.msra.gmra.mrb[72].mxu0 %vm1462_vm3, %v6466_v3  ;;  %v7222_v3 = vsel %vm929_vm0, %v7220_v63, %v7221_v6 }
 0x4ea   : > { %13445 = vmatprep.mubr.msk.bf16.mxu0 %vm1462_vm3, %v6470_v22  ;;  %13491 = vmatprep.mubr.msk.bf16.mxu1 %vm1462_vm3, %v7222_v3  ;;  %v17421_v22 = vld [vmem:[%s19223_s12] ss:$0 sm:$0xff] }
 0x4f1   : > { %13446 = vmatmul.mubr.msk.bf16.gmra.mrb[76].mxu0 %vm1462_vm3, %v6474_v13 }
 0x4f2   : > { %13449 = vmatprep.mubr.msk.bf16.mxu0 %vm1462_vm3, %v6478_v35 }
 0x4f9   : > { %13450 = vmatmul.mubr.msk.bf16.gmra.mrb[80].mxu0 %vm1462_vm3, %v6482_v18 }
 0x4fa   : > { %13453 = vmatprep.mubr.msk.bf16.mxu0 %vm1462_vm3, %v6486_v62 }
 0x501   : > { %13454 = vmatmul.mubr.msk.bf16.gmra.mrb[84].mxu0 %vm1462_vm3, %v6490_v7 }
 0x502   : > { %13457 = vmatprep.mubr.msk.bf16.mxu0 %vm1462_vm3, %v6494_v42 }
 0x509   : > { %13458 = vmatmul.mubr.msk.bf16.gmra.mrb[88].mxu0 %vm1462_vm3, %v6498_v44 }
 0x50a   : > { %13461 = vmatprep.mubr.msk.bf16.mxu0 %vm1462_vm3, %v6502_v15 }
 0x511   : > { %13462 = vmatmul.mubr.msk.bf16.gmra.mrb[92].mxu0 %vm1462_vm3, %v19668_v45 }
 0x512   : > { %13465 = vmatprep.mubr.msk.bf16.mxu0 %vm1462_vm3, %v19669_v1 }
 0x519   : > { %13466 = vmatmul.mubr.msk.bf16.gmra.mrb[96].mxu0 %vm1462_vm3, %v19670_v57 }
 0x51a   : > { %13469 = vmatprep.mubr.msk.bf16.mxu0 %vm1462_vm3, %v19671_v36 }
 0x521   : > { %13470 = vmatmul.mubr.msk.bf16.gmra.mrb[100].mxu0 %vm1462_vm3, %v19672_v19 }
 0x522   : > { %13473 = vmatprep.mubr.msk.bf16.mxu0 %vm1462_vm3, %v19673_v43 }
 0x529   : > { %13474 = vmatmul.mubr.msk.bf16.gmra.mrb[104].mxu0 %vm1462_vm3, %v19674_v56 }
 0x52a   : > { %13477 = vmatprep.mubr.msk.bf16.mxu0 %vm1462_vm3, %v19675_v5 }
 0x531   : > { %13478 = vmatmul.mubr.msk.bf16.gmra.mrb[108].mxu0 %vm1462_vm3, %v19676_v11 }
 0x532   : > { %13481 = vmatprep.mubr.msk.bf16.mxu0 %vm1462_vm3, %v6542_v34  ;;  %v19684_v34 = vld [vmem:[#allocation11_spill] sm:$0xff] }
 0x539   : > { %13482 = vmatmul.mubr.msk.bf16.gmra.mrb[112].mxu0 %vm1462_vm3, %v6546_v14 }
 0x53a   : > { %13485 = vmatprep.mubr.msk.bf16.mxu0 %vm1462_vm3, %v6550_v48 }
 0x541   : > { %13486 = vmatmul.mubr.msk.bf16.gmra.mrb[116].mxu0 %vm1462_vm3, %v6559_v4 }
 0x5bc   : > { %v13443_v33 = vpop.f32.mrb[72].mxu0 }
 0x5bd   : > { %v6917_v28 = vmul.f32 %v13443_v33, %v17416_v16  ;;  %v6669_v25 = vpop.f32.mrb[73].mxu0 }
 0x5be   : > { %v6915_v24 = vmul.f32 %v17416_v16, %v6669_v25  ;;  %v13444_v26 = vpop.f32.mrb[74].mxu0 }
 0x5bf   : > { %v6972_v13 = vadd.f32 %v17421_v22, %v6917_v28  ;;  %v6918_v50 = vmul.f32 %v13444_v26, %v17416_v16  ;;  %v6672_v53 = vpop.f32.mrb[75].mxu0 }
 0x5c0   : > { %v6970_v35 = vadd.f32 %v17421_v22, %v6915_v24  ;;  %v6916_v46 = vmul.f32 %v17416_v16, %v6672_v53 }
 0x5c1   : > { %v7020_v32 = vmax.f32 %v6972_v13, 0.0  ;;  %v6973_v60 = vadd.f32 %v17421_v22, %v6918_v50 }
 0x5c2   : > { %v7018_v47 = vmax.f32 %v6970_v35, 0.0  ;;  %v6971_v18 = vadd.f32 %v17421_v22, %v6916_v46 }
 0x5c3   : > { %v7021_v2 = vmax.f32 %v6973_v60, 0.0  ;;  %v7070_v20 = vsel %vm2419_vm14, %v7020_v32, 0.0  ;;  %vm19685_vm14 = vcmp.eq.s32.totalorder %v19684_v34, 1  ;;  %v7866_v60 = vsel %vm1535_vm1, %v17404_v59, 0  ;;  %v19692_v59 = vld [vmem:[#allocation15_spill] sm:$0xff] }
 0x5c4   : > { %v7019_v10 = vmax.f32 %v6971_v18, 0.0  ;;  %v13447_v62 = vpop.f32.mrb[76].mxu0  ;;  %v7068_v42 = vsel %vm2417_vm2, %v7018_v47, 0.0  ;;  %vm19689_vm2 = vcmp.eq.s32.totalorder %v19688_v52, 1 }
 0x5c5   : > { %v7071_v37 = vsel %vm2420_vm15, %v7021_v2, 0.0  ;;  %v6921_v7 = vmul.f32 %v13447_v62, %v17416_v16  ;;  %v6685_v41 = vpop.f32.mrb[77].mxu0  ;;  %vm19687_vm15 = vcmp.eq.s32.totalorder %v19686_v23, 1 }
 0x5c6   : > { %v7117_v39 = vpack.c.bf16 %v7071_v37, %v7070_v20  ;;  %v7069_v29 = vsel %vm2418_vm4, %v7019_v10, 0.0  ;;  %v6919_v15 = vmul.f32 %v17416_v16, %v6685_v41  ;;  %v13448_v45 = vpop.f32.mrb[78].mxu0  ;;  %v17482_v10 = vld [vmem:[%s19224_s13 + $0x4] sm:$0x3]  ;;  %v19690_v20 = vld [vmem:[#allocation14_spill] sm:$0xff] }
 0x5c7   : > { %v7116_v1 = vpack.c.bf16 %v7069_v29, %v7068_v42  ;;  %v6976_v57 = vadd.f32 %v17421_v22, %v6921_v7  ;;  %v6922_v36 = vmul.f32 %v13448_v45, %v17416_v16  ;;  %v6688_v19 = vpop.f32.mrb[79].mxu0  ;;  %vm19691_vm4 = vcmp.eq.s32.totalorder %v19690_v20, 1  ;;  %v19694_v41 = vld [vmem:[#allocation12_spill] sm:$0xff] }
 0x5c8   : > { %7141 = vst.msk [vmem:[#allocation3 + $0x18] sm:$0xff] %vm1462_vm3, %v7117_v39  ;;  %v6974_v43 = vadd.f32 %v17421_v22, %v6919_v15  ;;  %v6920_v56 = vmul.f32 %v17416_v16, %v6688_v19  ;;  %vm19695_vm8 = vcmp.eq.s32.totalorder %v19694_v41, 1  ;;  %v19696_v39 = vld [vmem:[#allocation13_spill] sm:$0xff]  ;;  %v19706_v41 = vld [vmem:[#allocation22_spill] sm:$0xff] }
 0x5c9   : > { %7140 = vst.msk [vmem:[#allocation3 + $0x10] sm:$0xff] %vm1462_vm3, %v7116_v1  ;;  %v7024_v0 = vmax.f32 %v6976_v57, 0.0  ;;  %v6977_v55 = vadd.f32 %v17421_v22, %v6922_v36 }
 0x5ca   : > { %v7022_v5 = vmax.f32 %v6974_v43, 0.0  ;;  %v6975_v31 = vadd.f32 %v17421_v22, %v6920_v56 }
 0x5cb   : > { %v7025_v49 = vmax.f32 %v6977_v55, 0.0  ;;  %v7074_v51 = vsel %vm2423_vm7, %v7024_v0, 0.0  ;;  %vm19693_vm7 = vcmp.eq.s32.totalorder %v19692_v59, 1 }
 0x5cc   : > { %v7023_v27 = vmax.f32 %v6975_v31, 0.0  ;;  %v13451_v8 = vpop.f32.mrb[80].mxu0  ;;  %v7072_v38 = vsel %vm19687_vm15, %v7022_v5, 0.0 }
 0x5cd   : > { %v7075_v9 = vsel %vm19685_vm14, %v7025_v49, 0.0  ;;  %v6925_v54 = vmul.f32 %v13451_v8, %v17416_v16  ;;  %v6701_v30 = vpop.f32.mrb[81].mxu0  ;;  %vm19697_vm14 = vcmp.eq.s32.totalorder %v19696_v39, 1 }
 0x5ce   : > { %v7119_v14 = vpack.c.bf16 %v7075_v9, %v7074_v51  ;;  %v7073_v48 = vsel %vm19689_vm2, %v7023_v27, 0.0  ;;  %v6923_v40 = vmul.f32 %v17416_v16, %v6701_v30  ;;  %v13452_v4 = vpop.f32.mrb[82].mxu0  ;;  %v19698_v30 = vld [vmem:[#allocation18_spill] sm:$0xff] }
 0x5cf   : > { %v7118_v17 = vpack.c.bf16 %v7073_v48, %v7072_v38  ;;  %v6980_v63 = vadd.f32 %v17421_v22, %v6925_v54  ;;  %v6926_v3 = vmul.f32 %v13452_v4, %v17416_v16  ;;  %v6704_v33 = vpop.f32.mrb[83].mxu0  ;;  %v17461_v28 = vld [vmem:[#allocation3 + $0x18] sm:$0xff]  ;;  %vm19699_vm15 = vcmp.eq.s32.totalorder %v19698_v30, 1 }
 0x5d0   : > { %7143 = vst.msk [vmem:[#allocation3 + $0x28] sm:$0xff] %vm1462_vm3, %v7119_v14  ;;  %v6978_v25 = vadd.f32 %v17421_v22, %v6923_v40  ;;  %v6924_v24 = vmul.f32 %v17416_v16, %v6704_v33  ;;  %v17466_v26 = vld [vmem:[#allocation3 + $0x10] sm:$0xff]  ;;  %v7225_v13 = vrot.slane %v17461_v28, 4  ;;  %v19700_v38 = vld [vmem:[#allocation19_spill] sm:$0xff]  ;;  %v19702_v40 = vld [vmem:[#allocation16_spill] sm:$0xff] }
 0x5d1   : > { %7142 = vst.msk [vmem:[#allocation3 + $0x20] sm:$0xff] %vm1462_vm3, %v7118_v17  ;;  %v7028_v50 = vmax.f32 %v6980_v63, 0.0  ;;  %v6981_v53 = vadd.f32 %v17421_v22, %v6926_v3  ;;  %v7223_v35 = vrot.slane %v17466_v26, 4  ;;  %vm19701_vm2 = vcmp.eq.s32.totalorder %v19700_v38, 1  ;;  %v19704_v63 = vld [vmem:[#allocation17_spill] sm:$0xff] }
 0x5d2   : > { %v7026_v46 = vmax.f32 %v6978_v25, 0.0  ;;  %v6979_v32 = vadd.f32 %v17421_v22, %v6924_v24 }
 0x5d3   : > { %v7029_v47 = vmax.f32 %v6981_v53, 0.0  ;;  %v7224_v18 = vsel %vm929_vm0, %v7221_v6, %v7223_v35  ;;  %v7226_v2 = vsel %vm929_vm0, %v7223_v35, %v7225_v13  ;;  %v7078_v12 = vsel %vm19691_vm4, %v7028_v50, 0.0 }
 0x5d4   : > { %v7027_v62 = vmax.f32 %v6979_v32, 0.0  ;;  %v13455_v61 = vpop.f32.mrb[84].mxu0  ;;  %13492 = vmatmul.mubr.msk.bf16.vlgmr.msra.gmra.mrb[48].mxu1 %vm1462_vm3, %v7224_v18  ;;  %v7076_v21 = vsel %vm19695_vm8, %v7026_v46, 0.0  ;;  %vm19703_vm4 = vcmp.eq.s32.totalorder %v19702_v40, 1  ;;  %vm19707_vm8 = vcmp.eq.s32.totalorder %v19706_v41, 1 }
 0x5d5   : > { %v7079_v37 = vsel %vm19693_vm7, %v7029_v47, 0.0  ;;  %v6929_v7 = vmul.f32 %v13455_v61, %v17416_v16  ;;  %13540 = vmatpush3.bf16.msra.mxu1 %v7866_v60  ;;  %v6717_v6 = vpop.f32.mrb[85].mxu0  ;;  %13495 = vmatprep.mubr.msk.bf16.mxu1 %vm1462_vm3, %v7226_v2  ;;  %vm19705_vm7 = vcmp.eq.s32.totalorder %v19704_v63, 1 }
 0x5d6   : > { %v7121_v42 = vpack.c.bf16 %v7079_v37, %v7078_v12  ;;  %v7077_v44 = vsel %vm19697_vm14, %v7027_v62, 0.0  ;;  %v6927_v29 = vmul.f32 %v17416_v16, %v6717_v6  ;;  %v13456_v15 = vpop.f32.mrb[86].mxu0  ;;  %14772 = vmatprep.subr.msk.bf16.mxu1 %vm1535_vm1, %v17482_v10 }
 0x5d7   : > { %v7120_v45 = vpack.c.bf16 %v7077_v44, %v7076_v21  ;;  %v6984_v1 = vadd.f32 %v17421_v22, %v6929_v7  ;;  %v6930_v57 = vmul.f32 %v13456_v15, %v17416_v16  ;;  %v6720_v36 = vpop.f32.mrb[87].mxu0  ;;  %v17500_v19 = vld [vmem:[#allocation3 + $0x28] sm:$0xff]  ;;  %v19710_v15 = vld [vmem:[#allocation20_spill] sm:$0xff] }
 0x5d8   : > { %7145 = vst.msk [vmem:[#allocation3 + $0x38] sm:$0xff] %vm1462_vm3, %v7121_v42  ;;  %v6982_v43 = vadd.f32 %v17421_v22, %v6927_v29  ;;  %v6928_v56 = vmul.f32 %v17416_v16, %v6720_v36  ;;  %v17505_v0 = vld [vmem:[#allocation3 + $0x20] sm:$0xff]  ;;  %v7229_v55 = vrot.slane %v17500_v19, 4  ;;  %v19708_v42 = vld [vmem:[#allocation23_spill] sm:$0xff] }
 0x5d9   : > { %7144 = vst.msk [vmem:[#allocation3 + $0x30] sm:$0xff] %vm1462_vm3, %v7120_v45  ;;  %v7032_v5 = vmax.f32 %v6984_v1, 0.0  ;;  %v6985_v31 = vadd.f32 %v17421_v22, %v6930_v57  ;;  %v7227_v49 = vrot.slane %v17505_v0, 4  ;;  %vm19709_vm14 = vcmp.eq.s32.totalorder %v19708_v42, 1  ;;  %v19712_v57 = vld [vmem:[#allocation21_spill] sm:$0xff] }
 0x5da   : > { %v7030_v27 = vmax.f32 %v6982_v43, 0.0  ;;  %v6983_v8 = vadd.f32 %v17421_v22, %v6928_v56 }
 0x5db   : > { %v7033_v11 = vmax.f32 %v6985_v31, 0.0  ;;  %v7228_v51 = vsel %vm929_vm0, %v7225_v13, %v7227_v49  ;;  %v7230_v34 = vsel %vm929_vm0, %v7227_v49, %v7229_v55  ;;  %v7082_v23 = vsel %vm19699_vm15, %v7032_v5, 0.0 }
 0x5dc   : > { %v7031_v9 = vmax.f32 %v6983_v8, 0.0  ;;  %v13459_v54 = vpop.f32.mrb[88].mxu0  ;;  %13496 = vmatmul.mubr.msk.bf16.gmra.mrb[52].mxu1 %vm1462_vm3, %v7228_v51  ;;  %v7080_v4 = vsel %vm19703_vm4, %v7030_v27, 0.0  ;;  %vm19711_vm15 = vcmp.eq.s32.totalorder %v19710_v15, 1 }
 0x5dd   : > { %v7083_v14 = vsel %vm19701_vm2, %v7033_v11, 0.0  ;;  %v6933_v52 = vmul.f32 %v13459_v54, %v17416_v16  ;;  %v6733_v48 = vpop.f32.mrb[89].mxu0  ;;  %13499 = vmatprep.mubr.msk.bf16.mxu1 %vm1462_vm3, %v7230_v34  ;;  %vm19713_vm2 = vcmp.eq.s32.totalorder %v19712_v57, 1 }
 0x5de   : > { %v7123_v17 = vpack.c.bf16 %v7083_v14, %v7082_v23  ;;  %v7081_v3 = vsel %vm19705_vm7, %v7031_v9, 0.0  ;;  %v6931_v33 = vmul.f32 %v17416_v16, %v6733_v48  ;;  %v13460_v25 = vpop.f32.mrb[90].mxu0 }
 0x5df   : > { %v7122_v24 = vpack.c.bf16 %v7081_v3, %v7080_v4  ;;  %v6988_v13 = vadd.f32 %v17421_v22, %v6933_v52  ;;  %v6934_v50 = vmul.f32 %v13460_v25, %v17416_v16  ;;  %v6736_v53 = vpop.f32.mrb[91].mxu0  ;;  %v17528_v35 = vld [vmem:[#allocation3 + $0x38] sm:$0xff] }
 0x5e0   : > { %7147 = vst.msk [vmem:[#allocation3 + $0x48] sm:$0xff] %vm1462_vm3, %v7123_v17  ;;  %v6986_v46 = vadd.f32 %v17421_v22, %v6931_v33  ;;  %v6932_v32 = vmul.f32 %v17416_v16, %v6736_v53  ;;  %v17533_v60 = vld [vmem:[#allocation3 + $0x30] sm:$0xff]  ;;  %v7233_v47 = vrot.slane %v17528_v35, 4  ;;  %v19716_v3 = vld [vmem:[#allocation27_spill] sm:$0xff] }
 0x5e1   : > { %7146 = vst.msk [vmem:[#allocation3 + $0x40] sm:$0xff] %vm1462_vm3, %v7122_v24  ;;  %v7036_v18 = vmax.f32 %v6988_v13, 0.0  ;;  %v6989_v2 = vadd.f32 %v17421_v22, %v6934_v50  ;;  %v7231_v62 = vrot.slane %v17533_v60, 4  ;;  %v19714_v17 = vld [vmem:[#allocation26_spill] sm:$0xff]  ;;  %vm19717_vm7 = vcmp.eq.s32.totalorder %v19716_v3, 1  ;;  %v19718_v13 = vld [vmem:[#allocation24_spill] sm:$0xff] }
 0x5e2   : > { %v7034_v61 = vmax.f32 %v6986_v46, 0.0  ;;  %v6987_v20 = vadd.f32 %v17421_v22, %v6932_v32  ;;  %vm19715_vm4 = vcmp.eq.s32.totalorder %v19714_v17, 1  ;;  %v19720_v46 = vld [vmem:[#allocation25_spill] sm:$0xff] }
 0x5e3   : > { %v7037_v12 = vmax.f32 %v6989_v2, 0.0  ;;  %v7232_v59 = vsel %vm929_vm0, %v7229_v55, %v7231_v62  ;;  %v7234_v37 = vsel %vm929_vm0, %v7231_v62, %v7233_v47  ;;  %v7086_v21 = vsel %vm19707_vm8, %v7036_v18, 0.0 }
 0x5e4   : > { %v7035_v7 = vmax.f32 %v6987_v20, 0.0  ;;  %v13463_v6 = vpop.f32.mrb[92].mxu0  ;;  %13500 = vmatmul.mubr.msk.bf16.gmra.mrb[56].mxu1 %vm1462_vm3, %v7232_v59  ;;  %v7084_v45 = vsel %vm19711_vm15, %v7034_v61, 0.0  ;;  %vm19719_vm8 = vcmp.eq.s32.totalorder %v19718_v13, 1 }
 0x5e5   : > { %v7087_v39 = vsel %vm19709_vm14, %v7037_v12, 0.0  ;;  %v6937_v44 = vmul.f32 %v13463_v6, %v17416_v16  ;;  %v6749_v29 = vpop.f32.mrb[93].mxu0  ;;  %13503 = vmatprep.mubr.msk.bf16.mxu1 %vm1462_vm3, %v7234_v37  ;;  %vm19721_vm14 = vcmp.eq.s32.totalorder %v19720_v46, 1 }
 0x5e6   : > { %v7125_v1 = vpack.c.bf16 %v7087_v39, %v7086_v21  ;;  %v7085_v36 = vsel %vm19713_vm2, %v7035_v7, 0.0  ;;  %v6935_v43 = vmul.f32 %v17416_v16, %v6749_v29  ;;  %v13464_v56 = vpop.f32.mrb[94].mxu0 }
 0x5e7   : > { %v7124_v55 = vpack.c.bf16 %v7085_v36, %v7084_v45  ;;  %v6992_v5 = vadd.f32 %v17421_v22, %v6937_v44  ;;  %v6938_v31 = vmul.f32 %v13464_v56, %v17416_v16  ;;  %v6752_v49 = vpop.f32.mrb[95].mxu0  ;;  %v17556_v27 = vld [vmem:[#allocation3 + $0x48] sm:$0xff]  ;;  %v19722_v36 = vld [vmem:[#allocation30_spill] sm:$0xff]  ;;  %v19724_v56 = vld [vmem:[#allocation28_spill] sm:$0xff] }
 0x5e8   : > { %7149 = vst.msk [vmem:[#allocation3 + $0x58] sm:$0xff] %vm1462_vm3, %v7125_v1  ;;  %v6990_v8 = vadd.f32 %v17421_v22, %v6935_v43  ;;  %v6936_v11 = vmul.f32 %v17416_v16, %v6752_v49  ;;  %v17561_v51 = vld [vmem:[#allocation3 + $0x40] sm:$0xff]  ;;  %v7237_v34 = vrot.slane %v17556_v27, 4  ;;  %v7650_v29 = vshrl.u32 %v17556_v27, 16 }
 0x5e9   : > { %7148 = vst.msk [vmem:[#allocation3 + $0x50] sm:$0xff] %vm1462_vm3, %v7124_v55  ;;  %v7040_v9 = vmax.f32 %v6992_v5, 0.0  ;;  %v6993_v54 = vadd.f32 %v17421_v22, %v6938_v31  ;;  %v7235_v30 = vrot.slane %v17561_v51, 4  ;;  %v7653_v15 = vshll.u32 %v17556_v27, 16 }
 0x5ea   : > { %v7038_v23 = vmax.f32 %v6990_v8, 0.0  ;;  %v6991_v38 = vadd.f32 %v17421_v22, %v6936_v11  ;;  %vm19723_vm15 = vcmp.eq.s32.totalorder %v19722_v36, 1  ;;  %vm19725_vm2 = vcmp.eq.s32.totalorder %v19724_v56, 1  ;;  %v19726_v8 = vld [vmem:[#allocation31_spill] sm:$0xff] }
 0x5eb   : > { %v7041_v14 = vmax.f32 %v6993_v54, 0.0  ;;  %v7236_v52 = vsel %vm929_vm0, %v7233_v47, %v7235_v30  ;;  %v7238_v48 = vsel %vm929_vm0, %v7235_v30, %v7237_v34  ;;  %v7090_v63 = vsel %vm19715_vm4, %v7040_v9, 0.0 }
 0x5ec   : > { %v7039_v40 = vmax.f32 %v6991_v38, 0.0  ;;  %v13467_v4 = vpop.f32.mrb[96].mxu0  ;;  %13504 = vmatmul.mubr.msk.bf16.gmra.mrb[60].mxu1 %vm1462_vm3, %v7236_v52  ;;  %v7088_v50 = vsel %vm19719_vm8, %v7038_v23, 0.0  ;;  %v7652_v49 = vrot.slane %v7650_v29, 3  ;;  %vm19727_vm4 = vcmp.eq.s32.totalorder %v19726_v8, 1  ;;  %v19728_v38 = vld [vmem:[#allocation29_spill] sm:$0xff] }
 0x5ed   : > { %v7091_v33 = vsel %vm19717_vm7, %v7041_v14, 0.0  ;;  %v6941_v25 = vmul.f32 %v13467_v4, %v17416_v16  ;;  %v6765_v24 = vpop.f32.mrb[97].mxu0  ;;  %13507 = vmatprep.mubr.msk.bf16.mxu1 %vm1462_vm3, %v7238_v48  ;;  %v7655_v54 = vrot.slane %v7653_v15, 4  ;;  %vm19729_vm7 = vcmp.eq.s32.totalorder %v19728_v38, 1  ;;  %v19736_v8 = vld [vmem:[#allocation33_spill] sm:$0xff] }
 0x5ee   : > { %v7127_v53 = vpack.c.bf16 %v7091_v33, %v7090_v63  ;;  %v7089_v32 = vsel %vm19721_vm14, %v7039_v40, 0.0  ;;  %v6939_v47 = vmul.f32 %v17416_v16, %v6765_v24  ;;  %v13468_v18 = vpop.f32.mrb[98].mxu0 }
 0x5ef   : > { %v7126_v2 = vpack.c.bf16 %v7089_v32, %v7088_v50  ;;  %v6996_v62 = vadd.f32 %v17421_v22, %v6941_v25  ;;  %v6942_v61 = vmul.f32 %v13468_v18, %v17416_v16  ;;  %v6768_v20 = vpop.f32.mrb[99].mxu0  ;;  %v17584_v12 = vld [vmem:[#allocation3 + $0x58] sm:$0xff]  ;;  %v17633_v18 = vor.u32 %v7655_v54, %v7652_v49 }
 0x5f0   : > { %7151 = vst.msk [vmem:[#allocation3 + $0x68] sm:$0xff] %vm1462_vm3, %v7127_v53  ;;  %v6994_v59 = vadd.f32 %v17421_v22, %v6939_v47  ;;  %v6940_v37 = vmul.f32 %v17416_v16, %v6768_v20  ;;  %v17589_v7 = vld [vmem:[#allocation3 + $0x50] sm:$0xff]  ;;  %v7241_v6 = vrot.slane %v17584_v12, 4  ;;  %v7668_v20 = vshrl.u32 %v17584_v12, 16 }
 0x5f1   : > { %7150 = vst.msk [vmem:[#allocation3 + $0x60] sm:$0xff] %vm1462_vm3, %v7126_v2  ;;  %v7044_v41 = vmax.f32 %v6996_v62, 0.0  ;;  %v6997_v21 = vadd.f32 %v17421_v22, %v6942_v61  ;;  %v7239_v42 = vrot.slane %v17589_v7, 4  ;;  %v7659_v30 = vshrl.u32 %v17589_v7, 16 }
 0x5f2   : > { %v7042_v39 = vmax.f32 %v6994_v59, 0.0  ;;  %v6995_v44 = vadd.f32 %v17421_v22, %v6940_v37  ;;  %v7662_v40 = vshll.u32 %v17589_v7, 16  ;;  %v19730_v59 = vld [vmem:[#allocation34_spill] sm:$0xff]  ;;  %v7670_v36 = vrot.slane %v7668_v20, 3 }
 0x5f3   : > { %v7045_v45 = vmax.f32 %v6997_v21, 0.0  ;;  %v7240_v1 = vsel %vm929_vm0, %v7237_v34, %v7239_v42  ;;  %v7242_v57 = vsel %vm929_vm0, %v7239_v42, %v7241_v6  ;;  %v7094_v43 = vsel %vm19723_vm15, %v7044_v41, 0.0 }
 0x5f4   : > { %v7092_v55 = vsel %vm19725_vm2, %v7042_v39, 0.0  ;;  %v7043_v5 = vmax.f32 %v6995_v44, 0.0  ;;  %v13471_v31 = vpop.f32.mrb[100].mxu0  ;;  %13508 = vmatmul.mubr.msk.bf16.gmra.mrb[64].mxu1 %vm1462_vm3, %v7240_v1  ;;  %v7661_v53 = vrot.slane %v7659_v30, 3  ;;  %v7664_v61 = vrot.slane %v7662_v40, 4  ;;  %v19732_v39 = vld [vmem:[#allocation32_spill] sm:$0xff] }
 0x5f5   : > { %v7095_v11 = vsel %vm19727_vm4, %v7045_v45, 0.0  ;;  %v6945_v34 = vmul.f32 %v13471_v31, %v17416_v16  ;;  %v6781_v9 = vpop.f32.mrb[101].mxu0  ;;  %13511 = vmatprep.mubr.msk.bf16.mxu1 %vm1462_vm3, %v7242_v57  ;;  %vm19731_vm8 = vcmp.eq.s32.totalorder %v19730_v59, 1  ;;  %vm19733_vm14 = vcmp.eq.s32.totalorder %v19732_v39, 1 }
 0x5f6   : > { %v7129_v23 = vpack.c.bf16 %v7095_v11, %v7094_v43  ;;  %v7093_v14 = vsel %vm19729_vm7, %v7043_v5, 0.0  ;;  %v6943_v52 = vmul.f32 %v17416_v16, %v6781_v9  ;;  %v13472_v48 = vpop.f32.mrb[102].mxu0  ;;  %v7665_v57 = vor.u32 %v7664_v61, %v7661_v53  ;;  %v19734_v43 = vld [vmem:[#allocation35_spill] sm:$0xff] }
 0x5f7   : > { %v7128_v4 = vpack.c.bf16 %v7093_v14, %v7092_v55  ;;  %v7000_v17 = vadd.f32 %v17421_v22, %v6945_v34  ;;  %v6946_v63 = vmul.f32 %v13472_v48, %v17416_v16  ;;  %v6784_v3 = vpop.f32.mrb[103].mxu0  ;;  %v17620_v33 = vld [vmem:[#allocation3 + $0x68] sm:$0xff]  ;;  %vm19735_vm15 = vcmp.eq.s32.totalorder %v19734_v43, 1 }
 0x5f8   : > { %7153 = vst.msk [vmem:[#allocation3 + $0x78] sm:$0xff] %vm1462_vm3, %v7129_v23  ;;  %v6998_v25 = vadd.f32 %v17421_v22, %v6943_v52  ;;  %v6944_v24 = vmul.f32 %v17416_v16, %v6784_v3  ;;  %v17625_v13 = vld [vmem:[#allocation3 + $0x60] sm:$0xff]  ;;  %v7245_v50 = vrot.slane %v17620_v33, 4  ;;  %vm19737_vm2 = vcmp.eq.s32.totalorder %v19736_v8, 1 }
 0x5f9   : > { %7152 = vst.msk [vmem:[#allocation3 + $0x70] sm:$0xff] %vm1462_vm3, %v7128_v4  ;;  %v7048_v46 = vmax.f32 %v7000_v17, 0.0  ;;  %v7001_v32 = vadd.f32 %v17421_v22, %v6946_v63  ;;  %v7243_v47 = vrot.slane %v17625_v13, 4  ;;  %v7677_v31 = vshrl.u32 %v17625_v13, 16 }
 0x5fa   : > { %v7046_v2 = vmax.f32 %v6998_v25, 0.0  ;;  %v6999_v62 = vadd.f32 %v17421_v22, %v6944_v24  ;;  %v17659_v54 = vsel %vm2968_vm11, %v17633_v18, %v7665_v57  ;;  %v7680_v61 = vshll.u32 %v17625_v13, 16 }
 0x5fb   : > { %v7098_v37 = vsel %vm19731_vm8, %v7048_v46, 0.0  ;;  %v7049_v41 = vmax.f32 %v7001_v32, 0.0  ;;  %v7244_v21 = vsel %vm929_vm0, %v7241_v6, %v7243_v47  ;;  %v7246_v42 = vsel %vm929_vm0, %v7243_v47, %v7245_v50 }
 0x5fc   : > { %v7096_v44 = vsel %vm19733_vm14, %v7046_v2, 0.0  ;;  %v7047_v45 = vmax.f32 %v6999_v62, 0.0  ;;  %v13475_v1 = vpop.f32.mrb[104].mxu0  ;;  %13512 = vmatmul.mubr.msk.bf16.gmra.mrb[68].mxu1 %vm1462_vm3, %v7244_v21  ;;  %v7671_v6 = vshll.u32 %v17584_v12, 16  ;;  %v7679_v24 = vrot.slane %v7677_v31, 3 }
 0x5fd   : > { %v7099_v56 = vsel %vm19735_vm15, %v7049_v41, 0.0  ;;  %v6949_v55 = vmul.f32 %v13475_v1, %v17416_v16  ;;  %v6797_v5 = vpop.f32.mrb[105].mxu0  ;;  %13515 = vmatprep.mubr.msk.bf16.mxu1 %vm1462_vm3, %v7246_v42  ;;  %v7686_v59 = vshrl.u32 %v17620_v33, 16  ;;  %v8148_v7 = vrot.slane %v7677_v31, 4 }
 0x5fe   : > { %v7131_v49 = vpack.c.bf16 %v7099_v56, %v7098_v37  ;;  %v7097_v11 = vsel %vm19737_vm2, %v7047_v45, 0.0  ;;  %v6947_v34 = vmul.f32 %v17416_v16, %v6797_v5  ;;  %v13476_v9 = vpop.f32.mrb[106].mxu0  ;;  %v7673_v4 = vrot.slane %v7671_v6, 4  ;;  %v19738_v37 = vld [vmem:[#allocation38_spill] sm:$0xff] }
 0x5ff   : > { %v7130_v23 = vpack.c.bf16 %v7097_v11, %v7096_v44  ;;  %v7004_v38 = vadd.f32 %v17421_v22, %v6949_v55  ;;  %v6950_v14 = vmul.f32 %v13476_v9, %v17416_v16  ;;  %v6800_v52 = vpop.f32.mrb[107].mxu0  ;;  %v17663_v48 = vld [vmem:[#allocation3 + $0x78] sm:$0xff]  ;;  %vm19739_vm4 = vcmp.eq.s32.totalorder %v19738_v37, 1  ;;  %v19743_v9 = vld [vmem:[#allocation37_spill] sm:$0xff] }
 0x600   : > { %7155 = vst.msk [vmem:[#allocation3 + $0x88] sm:$0xff] %vm1462_vm3, %v7131_v49  ;;  %v7002_v17 = vadd.f32 %v17421_v22, %v6947_v34  ;;  %v6948_v63 = vmul.f32 %v17416_v16, %v6800_v52  ;;  %v17670_v3 = vld [vmem:[#allocation3 + $0x70] sm:$0xff]  ;;  %v7249_v25 = vrot.slane %v17663_v48, 4  ;;  %v7674_v47 = vor.u32 %v7673_v4, %v7670_v36  ;;  %v19741_v55 = vld [vmem:[#allocation39_spill] sm:$0xff] }
 0x601   : > { %7154 = vst.msk [vmem:[#allocation3 + $0x80] sm:$0xff] %vm1462_vm3, %v7130_v23  ;;  %v7052_v53 = vmax.f32 %v7004_v38, 0.0  ;;  %v7005_v46 = vadd.f32 %v17421_v22, %v6950_v14  ;;  %v7247_v32 = vrot.slane %v17670_v3, 4  ;;  %v7682_v56 = vrot.slane %v7680_v61, 4 }
 0x602   : > { %v7050_v2 = vmax.f32 %v7002_v17, 0.0  ;;  %v7003_v62 = vadd.f32 %v17421_v22, %v6948_v63  ;;  %v17689_v43 = vsel %vm2968_vm11, %v7665_v57, %v7674_v47  ;;  %vm19742_vm7 = vcmp.eq.s32.totalorder %v19741_v55, 1 }
 0x603   : > { %v7102_v41 = vsel %vm19739_vm4, %v7052_v53, 0.0  ;;  %v7053_v21 = vmax.f32 %v7005_v46, 0.0  ;;  %v7248_v42 = vsel %vm929_vm0, %v7245_v50, %v7247_v32  ;;  %v7250_v39 = vsel %vm929_vm0, %v7247_v32, %v7249_v25 }
 0x604   : > { %v7100_v45 = vsel %vm2449_vm12, %v7050_v2, 0.0  ;;  %v7051_v1 = vmax.f32 %v7003_v62, 0.0  ;;  %v13479_v36 = vpop.f32.mrb[108].mxu0  ;;  %13516 = vmatmul.mubr.msk.bf16.gmra.mrb[72].mxu1 %vm1462_vm3, %v7248_v42  ;;  %v7688_v8 = vrot.slane %v7686_v59, 3  ;;  %v7689_v11 = vshll.u32 %v17620_v33, 16  ;;  %v17918_v33 = vld [vmem:[#allocation3 + $0x10] sm:$0xff] }
 0x605   : > { %v7103_v5 = vsel %vm19742_vm7, %v7053_v21, 0.0  ;;  %v6953_v50 = vmul.f32 %v13479_v36, %v17416_v16  ;;  %v6813_v49 = vpop.f32.mrb[109].mxu0  ;;  %13519 = vmatprep.mubr.msk.bf16.mxu1 %vm1462_vm3, %v7250_v39  ;;  %vm19744_vm12 = vcmp.eq.s32.totalorder %v19743_v9, 1  ;;  %v7683_v14 = vor.u32 %v7682_v56, %v7679_v24  ;;  %19767 = vst [vmem:[#allocation55_spill] sm:$0xff] %v17918_v33 }
 0x606   : > { %v7133_v34 = vpack.c.bf16 %v7103_v5, %v7102_v41  ;;  %v7101_v57 = vsel %vm19744_vm12, %v7051_v1, 0.0  ;;  %v6951_v23 = vmul.f32 %v17416_v16, %v6813_v49  ;;  %v13480_v38 = vpop.f32.mrb[110].mxu0  ;;  %v7691_v46 = vrot.slane %v7689_v11, 4 }
 0x607   : > { %v7132_v52 = vpack.c.bf16 %v7101_v57, %v7100_v45  ;;  %v7008_v4 = vadd.f32 %v17421_v22, %v6953_v50  ;;  %v6954_v17 = vmul.f32 %v13480_v38, %v17416_v16  ;;  %v6816_v63 = vpop.f32.mrb[111].mxu0  ;;  %v17705_v53 = vld [vmem:[#allocation3 + $0x88] sm:$0xff]  ;;  %v17716_v37 = vsel %vm2968_vm11, %v7674_v47, %v7683_v14  ;;  %v19745_v50 = vld [vmem:[#allocation42_spill] sm:$0xff] }
 0x608   : > { %7157 = vst.msk [vmem:[#allocation3 + $0x98] sm:$0xff] %vm1462_vm3, %v7133_v34  ;;  %v7006_v32 = vadd.f32 %v17421_v22, %v6951_v23  ;;  %v6952_v2 = vmul.f32 %v17416_v16, %v6816_v63  ;;  %v17712_v62 = vld [vmem:[#allocation3 + $0x80] sm:$0xff]  ;;  %v7253_v24 = vrot.slane %v17705_v53, 4  ;;  %v17721_v39 = vor.u32 %v7691_v46, %v7688_v8 }
 0x609   : > { %7156 = vst.msk [vmem:[#allocation3 + $0x90] sm:$0xff] %vm1462_vm3, %v7132_v52  ;;  %v7056_v41 = vmax.f32 %v7008_v4, 0.0  ;;  %v7009_v21 = vadd.f32 %v17421_v22, %v6954_v17  ;;  %v7251_v42 = vrot.slane %v17712_v62, 4  ;;  %vm19746_vm8 = vcmp.eq.s32.totalorder %v19745_v50, 1  ;;  %v19749_v52 = vld [vmem:[#allocation41_spill] sm:$0xff] }
 0x60a   : > { %v7054_v44 = vmax.f32 %v7006_v32, 0.0  ;;  %v7007_v45 = vadd.f32 %v17421_v22, %v6952_v2  ;;  %v17729_v5 = vsel %vm2968_vm11, %v7683_v14, %v17721_v39  ;;  %vm19750_vm14 = vcmp.eq.s32.totalorder %v19749_v52, 1 }
 0x60b   : > { %v7057_v1 = vmax.f32 %v7009_v21, 0.0  ;;  %v7252_v36 = vsel %vm929_vm0, %v7249_v25, %v7251_v42  ;;  %v7254_v56 = vsel %vm929_vm0, %v7251_v42, %v7253_v24  ;;  %v7106_v49 = vsel %vm19746_vm8, %v7056_v41, 0.0 }
 0x60c   : > { %v7055_v55 = vmax.f32 %v7007_v45, 0.0  ;;  %v13483_v47 = vpop.f32.mrb[112].mxu0  ;;  %13520 = vmatmul.mubr.msk.bf16.gmra.mrb[76].mxu1 %vm1462_vm3, %v7252_v36  ;;  %v7104_v23 = vsel %vm2453_vm9, %v7054_v44, 0.0  ;;  %v19367_v31 = vshrl.u32 %v17528_v35, 16  ;;  %v19366_v13 = vshll.u32 %v17528_v35, 16 }
 0x60d   : > { %v7107_v34 = vsel %vm2456_vm10, %v7057_v1, 0.0  ;;  %v6957_v9 = vmul.f32 %v13483_v47, %v17416_v16  ;;  %v6829_v57 = vpop.f32.mrb[113].mxu0  ;;  %13523 = vmatprep.mubr.msk.bf16.mxu1 %vm1462_vm3, %v7254_v56 }
 0x60e   : > { %v7135_v38 = vpack.c.bf16 %v7107_v34, %v7106_v49  ;;  %v7105_v4 = vsel %vm19750_vm14, %v7055_v55, 0.0  ;;  %v6955_v14 = vmul.f32 %v17416_v16, %v6829_v57  ;;  %v13484_v17 = vpop.f32.mrb[114].mxu0  ;;  %v19751_v57 = vld [vmem:[#allocation46_spill] sm:$0xff] }
 0x60f   : > { %v7134_v63 = vpack.c.bf16 %v7105_v4, %v7104_v23  ;;  %v7012_v46 = vadd.f32 %v17421_v22, %v6957_v9  ;;  %v6958_v32 = vmul.f32 %v13484_v17, %v17416_v16  ;;  %v6832_v2 = vpop.f32.mrb[115].mxu0  ;;  %v17744_v41 = vld [vmem:[#allocation3 + $0x98] sm:$0xff]  ;;  %vm19752_vm9 = vcmp.eq.s32.totalorder %v19751_v57, 1 }
 0x610   : > { %7159 = vst.msk [vmem:[#allocation3 + $0xa8] sm:$0xff] %vm1462_vm3, %v7135_v38  ;;  %v7010_v21 = vadd.f32 %v17421_v22, %v6955_v14  ;;  %v6956_v42 = vmul.f32 %v17416_v16, %v6832_v2  ;;  %v17749_v44 = vld [vmem:[#allocation3 + $0x90] sm:$0xff]  ;;  %v7257_v45 = vrot.slane %v17744_v41, 4  ;;  %v19753_v23 = vld [vmem:[#allocation47_spill] sm:$0xff]  ;;  %v19755_v14 = vld [vmem:[#allocation44_spill] sm:$0xff] }
 0x611   : > { %7158 = vst.msk [vmem:[#allocation3 + $0xa0] sm:$0xff] %vm1462_vm3, %v7134_v63  ;;  %v7060_v1 = vmax.f32 %v7012_v46, 0.0  ;;  %v7013_v36 = vadd.f32 %v17421_v22, %v6958_v32  ;;  %v7255_v56 = vrot.slane %v17749_v44, 4  ;;  %vm19754_vm10 = vcmp.eq.s32.totalorder %v19753_v23, 1  ;;  %v19757_v63 = vld [vmem:[#allocation45_spill] sm:$0xff] }
 0x612   : > { %v7058_v55 = vmax.f32 %v7010_v21, 0.0  ;;  %v7011_v47 = vadd.f32 %v17421_v22, %v6956_v42  ;;  %vm19756_vm15 = vcmp.eq.s32.totalorder %v19755_v14, 1  ;;  %vm19758_vm2 = vcmp.eq.s32.totalorder %v19757_v63, 1  ;;  %v7166_v23 = vld [vmem:[#allocation3] sm:$0xf8] }
 0x613   : > { %v7061_v50 = vmax.f32 %v7013_v36, 0.0  ;;  %v7256_v49 = vsel %vm929_vm0, %v7253_v24, %v7255_v56  ;;  %v7258_v8 = vsel %vm929_vm0, %v7255_v56, %v7257_v45  ;;  %v7110_v25 = vsel %vm19752_vm9, %v7060_v1, 0.0 }
 0x614   : > { %v7059_v34 = vmax.f32 %v7011_v47, 0.0  ;;  %v13487_v9 = vpop.f32.mrb[116].mxu0  ;;  %13524 = vmatmul.mubr.msk.bf16.gmra.mrb[80].mxu1 %vm1462_vm3, %v7256_v49  ;;  %v7108_v24 = vsel %vm19756_vm15, %v7058_v55, 0.0  ;;  %v19376_v14 = vshll.u32 %v17466_v26, 16 }
 0x615   : > { %v7111_v38 = vsel %vm19754_vm10, %v7061_v50, 0.0  ;;  %v6961_v52 = vmul.f32 %v13487_v9, %v17416_v16  ;;  %v6845_v4 = vpop.f32.mrb[117].mxu0  ;;  %13527 = vmatprep.mubr.msk.bf16.mxu1 %vm1462_vm3, %v7258_v8 }
 0x616   : > { %v7137_v17 = vpack.c.bf16 %v7111_v38, %v7110_v25  ;;  %v7109_v46 = vsel %vm19758_vm2, %v7059_v34, 0.0  ;;  %v6959_v32 = vmul.f32 %v17416_v16, %v6845_v4  ;;  %v13488_v2 = vpop.f32.mrb[118].mxu0 }
 0x617   : > { %v7136_v21 = vpack.c.bf16 %v7109_v46, %v7108_v24  ;;  %v7016_v42 = vadd.f32 %v17421_v22, %v6961_v52  ;;  %v6962_v1 = vmul.f32 %v13488_v2, %v17416_v16  ;;  %v6848_v36 = vpop.f32.mrb[119].mxu0  ;;  %v17772_v56 = vld [vmem:[#allocation3 + $0xa8] sm:$0xff]  ;;  %v7570_v46 = vshrl.u32 %v7166_v23, 16 }
 0x618   : > { %7161 = vst.msk [vmem:[#allocation3 + $0xb8] sm:$0xff] %vm1462_vm3, %v7137_v17  ;;  %v7014_v47 = vadd.f32 %v17421_v22, %v6959_v32  ;;  %v6960_v55 = vmul.f32 %v17416_v16, %v6848_v36  ;;  %v17777_v50 = vld [vmem:[#allocation3 + $0xa0] sm:$0xff]  ;;  %v7261_v49 = vrot.slane %v17772_v56, 4  ;;  %v19760_v17 = vld [vmem:[#allocation51_spill] sm:$0xff] }
 0x619   : > { %7160 = vst.msk [vmem:[#allocation3 + $0xb0] sm:$0xff] %vm1462_vm3, %v7136_v21  ;;  %v7064_v8 = vmax.f32 %v7016_v42, 0.0  ;;  %v7017_v34 = vadd.f32 %v17421_v22, %v6962_v1  ;;  %v7259_v9 = vrot.slane %v17777_v50, 4  ;;  %vm19761_vm4 = vcmp.eq.s32.totalorder %v19760_v17, 1  ;;  %v19762_v32 = vld [vmem:[#allocation48_spill] sm:$0xff]  ;;  %v19764_v21 = vld [vmem:[#allocation49_spill] sm:$0xff] }
 0x61a   : > { %v7062_v57 = vmax.f32 %v7014_v47, 0.0  ;;  %v7015_v25 = vadd.f32 %v17421_v22, %v6960_v55  ;;  %vm19763_vm7 = vcmp.eq.s32.totalorder %v19762_v32, 1  ;;  %vm19765_vm12 = vcmp.eq.s32.totalorder %v19764_v21, 1 }
 0x61b   : > { %v7065_v38 = vmax.f32 %v7017_v34, 0.0  ;;  %v7260_v52 = vsel %vm929_vm0, %v7257_v45, %v7259_v9  ;;  %v7262_v16 = vsel %vm929_vm0, %v7259_v9, %v7261_v49  ;;  %v7114_v24 = vsel %vm2463_vm6, %v7064_v8, 0.0 }
 0x61c   : > { %v7063_v4 = vmax.f32 %v7015_v25, 0.0  ;;  %13528 = vmatmul.mubr.msk.bf16.gmra.mrb[84].mxu1 %vm1462_vm3, %v7260_v52  ;;  %v7112_v22 = vsel %vm19763_vm7, %v7062_v57, 0.0  ;;  %v7573_v42 = vshll.u32 %v7166_v23, 16  ;;  %v19380_v8 = vshrl.u32 %v17399_v58, 16 }
 0x61d   : > { %v7115_v63 = vsel %vm19761_vm4, %v7065_v38, 0.0  ;;  %13531 = vmatprep.mubr.msk.bf16.mxu1 %vm1462_vm3, %v7262_v16  ;;  %v19378_v34 = vshll.u32 %v17399_v58, 16  ;;  %v7572_v57 = vrot.slane %v7570_v46, 3  ;;  %v19374_v46 = vshll.u32 %v17461_v28, 16 }
 0x61e   : > { %v7139_v2 = vpack.c.bf16 %v7115_v63, %v7114_v24  ;;  %v7113_v45 = vsel %vm19765_vm12, %v7063_v4, 0.0  ;;  %v7575_v25 = vrot.slane %v7573_v42, 4  ;;  %v7580_v52 = vrot.slane %v19380_v8, 3 }
 0x61f   : > { %v7138_v1 = vpack.c.bf16 %v7113_v45, %v7112_v22  ;;  %v17796_v36 = vld [vmem:[#allocation3 + $0xb8] sm:$0xff]  ;;  %v7583_v16 = vrot.slane %v19378_v34, 4  ;;  %v19377_v4 = vshrl.u32 %v17466_v26, 16  ;;  %v19375_v63 = vshrl.u32 %v17461_v28, 16 }
 0x620   : > { %7163 = vst.msk [vmem:[#allocation3 + $0xc8] sm:$0xff] %vm1462_vm3, %v7139_v2  ;;  %v17799_v47 = vld [vmem:[#allocation3 + $0xb0] sm:$0xff]  ;;  %v7265_v55 = vrot.slane %v17796_v36, 4  ;;  %v7576_v24 = vor.u32 %v7575_v25, %v7572_v57  ;;  %v7592_v2 = vrot.slane %v19376_v14, 4  ;;  %v19373_v57 = vshrl.u32 %v17505_v0, 16 }
 0x621   : > { %7162 = vst.msk [vmem:[#allocation3 + $0xc0] sm:$0xff] %vm1462_vm3, %v7138_v1  ;;  %v7263_v9 = vrot.slane %v17799_v47, 4  ;;  %v7589_v22 = vrot.slane %v19377_v4, 3  ;;  %v7598_v42 = vrot.slane %v19375_v63, 3  ;;  %v7601_v1 = vrot.slane %v19374_v46, 4 }
 0x622   : > { %v19372_v25 = vshll.u32 %v17505_v0, 16  ;;  %v18076_v63 = vshrl.u32 %v17796_v36, 16  ;;  %v18079_v14 = vshll.u32 %v17796_v36, 16  ;;  %vm19853_vm6 = vsmask.f32 256 }
 0x623   : > { %v7264_v23 = vsel %vm929_vm0, %v7261_v49, %v7263_v9  ;;  %v7266_v38 = vsel %vm929_vm0, %v7263_v9, %v7265_v55  ;;  %v7584_v49 = vor.u32 %v7583_v16, %v7580_v52  ;;  %v7593_v9 = vor.u32 %v7592_v2, %v7589_v22  ;;  %vm19855_vm8 = vmmov %vm19853_vm6 }
 0x624   : > { %13532 = vmatmul.mubr.msk.bf16.gmra.mrb[88].mxu1 %vm1462_vm3, %v7264_v23  ;;  %v19371_v23 = vshrl.u32 %v17500_v19, 16  ;;  %v8278_v16 = vsel %vm1535_vm1, %v17482_v10, 0  ;;  %v8136_v2 = vrot.slane %v7650_v29, 4  ;;  %v8137_v10 = vrot.slane %v7653_v15, 5  ;;  %19783 = vst [vmem:[#allocation71_spill] sm:$0xff] %v18076_v63  ;;  %19784 = vst [vmem:[#allocation72_spill] sm:$0xff] %v18079_v14 }
 0x625   : > { %13535 = vmatprep.mubr.msk.bf16.mxu1 %vm1462_vm3, %v7266_v38  ;;  %v7585_v21 = vsel %vm2968_vm11, %v7576_v24, %v7584_v49  ;;  %v19357_v38 = vshll.u32 %v17500_v19, 16  ;;  %v7594_v52 = vsel %vm2968_vm11, %v7584_v49, %v7593_v9  ;;  %v7607_v24 = vrot.slane %v19373_v57, 3  ;;  %v17853_v49 = vld [vmem:[%s19224_s13 + $0x6] sm:$0x3]  ;;  %vm19856_vm14 = vmmov %vm19853_vm6 }
 0x626   : > { %v7616_v22 = vrot.slane %v19371_v23, 3  ;;  %v17868_v27 = vor.u32 %v8137_v10, %v8136_v2  ;;  %v7637_v10 = vrot.slane %v19366_v13, 4  ;;  %v18063_v23 = vshrl.u32 %v17799_v47, 16  ;;  %vm19857_vm9 = vmmov %vm19853_vm6 }
 0x627   : > { %v7778_v36 = vrot.slane %v18076_v63, 3  ;;  %vm19858_vm10 = vmmov %vm19853_vm6 }
 0x628   : > { %v17816_v17 = vld [vmem:[#allocation3 + $0xc0] sm:$0xf]  ;;  %19780 = vst [vmem:[#allocation69_spill] sm:$0xff] %v18063_v23  ;;  %v7769_v4 = vrot.slane %v18063_v23, 3  ;;  %vm19859_vm15 = vmmov %vm19853_vm6 }
 0x629   : > { %v7267_v32 = vrot.slane %v17816_v17, 4  ;;  %vm19860_vm2 = vmmov %vm19853_vm6 }
 0x62a   : > { %vm19861_vm4 = vmmov %vm19860_vm2 }
 0x62b   : > { %v7268_v45 = vsel %vm929_vm0, %v7265_v55, %v7267_v32  ;;  %v7602_v55 = vor.u32 %v7601_v1, %v7598_v42  ;;  %v7610_v32 = vrot.slane %v19372_v25, 4  ;;  %v8141_v42 = vrot.slane %v7662_v40, 5  ;;  %vm19862_vm7 = vmmov %vm19860_vm2 }
 0x62c   : > { %13536 = vmatmul.mubr.msk.bf16.gmra.mrb[92].mxu1 %vm1462_vm3, %v7268_v45  ;;  %v8140_v45 = vrot.slane %v7659_v30, 4  ;;  %v8144_v1 = vrot.slane %v7668_v20, 4  ;;  %v8149_v30 = vrot.slane %v7680_v61, 5  ;;  %vm19863_vm12 = vmmov %vm19860_vm2 }
 0x62d   : > { %13541 = vmatprep.mubr.msk.bf16.mxu1 %vm1462_vm3, %v7585_v21  ;;  %v7619_v21 = vrot.slane %v19357_v38, 4  ;;  %v7603_v29 = vsel %vm2968_vm11, %v7593_v9, %v7602_v55  ;;  %v8145_v38 = vrot.slane %v7671_v6, 5  ;;  %v7611_v40 = vor.u32 %v7610_v32, %v7607_v24 }
 0x62e   : > { %v8142_v15 = vor.u32 %v8141_v42, %v8140_v45  ;;  %v19370_v9 = vshrl.u32 %v17533_v60, 16  ;;  %v19369_v6 = vshll.u32 %v17533_v60, 16  ;;  %v8152_v45 = vrot.slane %v7686_v59, 4 }
 0x62f   : > { %v8146_v12 = vor.u32 %v8145_v38, %v8144_v1  ;;  %v7620_v20 = vor.u32 %v7619_v21, %v7616_v22  ;;  %v7612_v38 = vsel %vm2968_vm11, %v7602_v55, %v7611_v40  ;;  %v7634_v21 = vrot.slane %v19367_v31, 3 }
 0x630   : > { %v7625_v22 = vrot.slane %v19370_v9, 3  ;;  %v7628_v2 = vrot.slane %v19369_v6, 4  ;;  %v8153_v55 = vrot.slane %v7689_v11, 5  ;;  %v19365_v1 = vshrl.u32 %v17561_v51, 16 }
 0x631   : > { %v17885_v61 = vsel %vm3496_vm13, %v8142_v15, %v8146_v12  ;;  %v7621_v32 = vsel %vm2968_vm11, %v7611_v40, %v7620_v20  ;;  %v7707_v40 = vshll.u32 %v17663_v48, 16 }
 0x632   : > { %v17906_v42 = vor.u32 %v8153_v55, %v8152_v45  ;;  %v17936_v45 = vshrl.u32 %v17705_v53, 16  ;;  %v7725_v55 = vshll.u32 %v17705_v53, 16 }
 0x634   : > { %13542 = vmatmul.mubr.msk.bf16.vlgmr.msra.gmra.mrb[48].mxu1 %vm1462_vm3, %v7594_v52  ;;  %v17880_v52 = vsel %vm3496_vm13, %v17868_v27, %v8142_v15  ;;  %v19358_v15 = vshll.u32 %v17561_v51, 16  ;;  %19769 = vst [vmem:[#allocation57_spill] sm:$0xff] %v17936_v45 }
 0x635   : > { %13590 = vmatpush3.bf16.msra.mxu1 %v8278_v16  ;;  %13545 = vmatprep.mubr.msk.bf16.mxu1 %vm1462_vm3, %v7603_v29  ;;  %v8150_v16 = vor.u32 %v8149_v30, %v8148_v7  ;;  %v7629_v29 = vor.u32 %v7628_v2, %v7625_v22  ;;  %v7638_v7 = vor.u32 %v7637_v10, %v7634_v21  ;;  %v17911_v30 = vshrl.u32 %v17663_v48, 16 }
 0x636   : > { %14773 = vmatprep.subr.msk.bf16.mxu1 %vm1535_vm1, %v17853_v49  ;;  %v19359_v2 = vshll.u32 %v17918_v33, 16 }
 0x637   : > { %v17888_v24 = vsel %vm3496_vm13, %v8146_v12, %v8150_v16  ;;  %19766 = vst [vmem:[#allocation54_spill] sm:$0xff] %v17911_v30  ;;  %v17916_v59 = vsel %vm3496_vm13, %v8150_v16, %v17906_v42  ;;  %v7630_v11 = vsel %vm2968_vm11, %v7620_v20, %v7629_v29  ;;  %v7643_v12 = vrot.slane %v19365_v1, 3 }
 0x638   : > { %v7639_v48 = vsel %vm2968_vm11, %v7629_v29, %v7638_v7  ;;  %v8160_v22 = vrot.slane %v17911_v30, 4  ;;  %v8161_v16 = vrot.slane %v7707_v40, 5  ;;  %v9482_v29 = vrot.slane %v19359_v2, 1 }
 0x63a   : > { %v17932_v20 = vor.u32 %v8161_v16, %v8160_v22  ;;  %v8169_v16 = vrot.slane %v7725_v55, 5 }
 0x63c   : > { %13546 = vmatmul.mubr.msk.bf16.gmra.mrb[52].mxu1 %vm1462_vm3, %v7612_v38  ;;  %v7646_v38 = vrot.slane %v19358_v15, 4 }
 0x63d   : > { %13549 = vmatprep.mubr.msk.bf16.mxu1 %vm1462_vm3, %v7621_v32  ;;  %v17925_v32 = vld [vmem:[#allocation3 + $0x18] sm:$0xff] }
 0x63e   : > { %19768 = vst [vmem:[#allocation56_spill] sm:$0xff] %v17925_v32  ;;  %v19360_v21 = vshll.u32 %v17925_v32, 16  ;;  %v7647_v10 = vor.u32 %v7646_v38, %v7643_v12  ;;  %v19361_v15 = vshrl.u32 %v17925_v32, 16  ;;  %v8168_v38 = vrot.slane %v17936_v45, 4 }
 0x640   : > { %v7648_v22 = vsel %vm2968_vm11, %v7638_v7, %v7647_v10  ;;  %v7657_v53 = vsel %vm2968_vm11, %v7647_v10, %v17633_v18  ;;  %v17958_v7 = vor.u32 %v8169_v16, %v8168_v38  ;;  %v17968_v18 = vshrl.u32 %v17744_v41, 16 }
 0x641   : > { %v7743_v10 = vshll.u32 %v17744_v41, 16  ;;  %v17980_v38 = vshrl.u32 %v17670_v3, 16  ;;  %v17983_v16 = vshll.u32 %v17670_v3, 16 }
 0x642   : > { %19773 = vst [vmem:[#allocation61_spill] sm:$0xff] %v17968_v18  ;;  %v19368_v3 = vrot.slane %v17968_v18, 7 }
 0x644   : > { %13550 = vmatmul.mubr.msk.bf16.gmra.mrb[56].mxu1 %vm1462_vm3, %v7630_v11  ;;  %v19363_v11 = vshrl.u32 %v17918_v33, 16  ;;  %v18005_v1 = vor.u32 %v19368_v3, %v7743_v10  ;;  %v18016_v3 = vshrl.u32 %v17749_v44, 16 }
 0x645   : > { %13553 = vmatprep.mubr.msk.bf16.mxu1 %vm1462_vm3, %v7639_v48  ;;  %v9487_v48 = vrot.slane %v19360_v21, 1  ;;  %v19362_v21 = vrot.slane %v17911_v30, 7 }
 0x646   : > { %v9483_v12 = vor.u32 %v9482_v29, %v19363_v11  ;;  %v17998_v11 = vshrl.u32 %v17712_v62, 16  ;;  %19775 = vst [vmem:[#allocation63_spill] sm:$0xff] %v18005_v1  ;;  %v7733_v6 = vrot.slane %v18016_v3, 3 }
 0x647   : > { %v17954_v2 = vor.u32 %v9487_v48, %v19361_v15  ;;  %v8177_v15 = vrot.slane %v7743_v10, 5 }
 0x648   : > { %v17961_v29 = vsel %vm4879_vm5, %v9483_v12, %v9487_v48  ;;  %v19364_v48 = vrot.slane %v17936_v45, 7  ;;  %v7715_v13 = vrot.slane %v17998_v11, 3 }
 0x649   : > { %19770 = vst [vmem:[#allocation58_spill] sm:$0xff] %v17954_v2  ;;  %19771 = vst [vmem:[#allocation59_spill] sm:$0xff] %v17961_v29  ;;  %v7785_v29 = vshrl.u32 %v17816_v17, 16 }
 0x64a   : > { %v17987_v41 = vor.u32 %v19364_v48, %v7725_v55  ;;  %v18001_v48 = vshll.u32 %v17712_v62, 16  ;;  %v7727_v62 = vrot.slane %v7725_v55, 4 }
 0x64b   : > { %v7787_v1 = vrot.slane %v7785_v29, 3 }
 0x64c   : > { %13554 = vmatmul.mubr.msk.bf16.gmra.mrb[60].mxu1 %vm1462_vm3, %v7648_v22  ;;  %v17965_v22 = vor.u32 %v19362_v21, %v7707_v40  ;;  %19774 = vst [vmem:[#allocation62_spill] sm:$0xff] %v17987_v41  ;;  %v7700_v21 = vrot.slane %v17983_v16, 4 }
 0x64d   : > { %13557 = vmatprep.mubr.msk.bf16.mxu1 %vm1462_vm3, %v7657_v53  ;;  %v8176_v53 = vrot.slane %v17968_v18, 4 }
 0x64e   : > { %19772 = vst [vmem:[#allocation60_spill] sm:$0xff] %v17965_v22 }
 0x64f   : > { %v17977_v12 = vor.u32 %v8177_v15, %v8176_v53  ;;  %v7709_v15 = vrot.slane %v7707_v40, 4 }
 0x654   : > { %13558 = vmatmul.mubr.msk.bf16.gmra.mrb[64].mxu1 %vm1462_vm3, %v17659_v54  ;;  %v7697_v54 = vrot.slane %v17980_v38, 3 }
 0x655   : > { %13561 = vmatprep.mubr.msk.bf16.mxu1 %vm1462_vm3, %v17689_v43  ;;  %v7706_v43 = vrot.slane %v17911_v30, 3 }
 0x656   : > { %v7701_v53 = vor.u32 %v7700_v21, %v7697_v54  ;;  %v7724_v54 = vrot.slane %v17936_v45, 3 }
 0x658   : > { %v7702_v40 = vsel %vm2968_vm11, %v17721_v39, %v7701_v53  ;;  %v7728_v39 = vor.u32 %v7727_v62, %v7724_v54  ;;  %v18035_v54 = vshrl.u32 %v17772_v56, 16  ;;  %v18038_v62 = vshll.u32 %v17772_v56, 16 }
 0x65a   : > { %19776 = vst [vmem:[#allocation65_spill] sm:$0xff] %v18035_v54  ;;  %19777 = vst [vmem:[#allocation67_spill] sm:$0xff] %v18038_v62  ;;  %v7760_v56 = vrot.slane %v18035_v54, 3 }
 0x65c   : > { %13562 = vmatmul.mubr.msk.bf16.gmra.mrb[68].mxu1 %vm1462_vm3, %v17716_v37  ;;  %v7710_v37 = vor.u32 %v7709_v15, %v7706_v43  ;;  %v18019_v43 = vshll.u32 %v17749_v44, 16  ;;  %v18029_v44 = vshrl.u32 %v17777_v50, 16 }
 0x65d   : > { %13565 = vmatprep.mubr.msk.bf16.mxu1 %vm1462_vm3, %v17729_v5  ;;  %v7718_v5 = vrot.slane %v18001_v48, 4 }
 0x65e   : > { %v7711_v21 = vsel %vm2968_vm11, %v7701_v53, %v7710_v37  ;;  %v7742_v53 = vrot.slane %v17968_v18, 3  ;;  %v19787_v18 = vshll.u32 %v17399_v58, 16 }
 0x65f   : > { %v7719_v31 = vor.u32 %v7718_v5, %v7715_v13  ;;  %v7745_v13 = vrot.slane %v7743_v10, 4 }
 0x661   : > { %v7720_v15 = vsel %vm2968_vm11, %v7710_v37, %v7719_v31  ;;  %v7729_v55 = vsel %vm2968_vm11, %v7719_v31, %v7728_v39  ;;  %v7746_v37 = vor.u32 %v7745_v13, %v7742_v53  ;;  %v18040_v31 = vld [vmem:[#allocation3 + $0xc8] sm:$0xff]  ;;  %v7763_v53 = vrot.slane %v18038_v62, 4 }
 0x662   : > { %19778 = vst [vmem:[#allocation66_spill] sm:$0xff] %v18040_v31 }
 0x664   : > { %13566 = vmatmul.mubr.msk.bf16.gmra.mrb[72].mxu1 %vm1462_vm3, %v7702_v40  ;;  %v7736_v40 = vrot.slane %v18019_v43, 4 }
 0x665   : > { %13569 = vmatprep.mubr.msk.bf16.mxu1 %vm1462_vm3, %v7711_v21  ;;  %v18032_v21 = vshll.u32 %v17777_v50, 16  ;;  %v18048_v50 = vshll.u32 %v18040_v31, 16 }
 0x666   : > { %v7737_v5 = vor.u32 %v7736_v40, %v7733_v6  ;;  %v18045_v40 = vld [vmem:[#allocation3 + $0xc0] sm:$0xff] }
 0x667   : > { %v7754_v6 = vrot.slane %v18032_v21, 4  ;;  %19779 = vst [vmem:[#allocation64_spill] sm:$0xff] %v18045_v40  ;;  %v18055_v13 = vshll.u32 %v18045_v40, 16  ;;  %v9663_v9 = vrot.slane %v18048_v50, 1 }
 0x668   : > { %v7738_v10 = vsel %vm2968_vm11, %v7728_v39, %v7737_v5  ;;  %v18059_v39 = vshrl.u32 %v18040_v31, 16  ;;  %v18103_v31 = vld [vmem:[#allocation3 + $0xb0] sm:$0xff] }
 0x669   : > { %v19379_v25 = vrot.slane %v18055_v13, 1 }
 0x66a   : > { %v18073_v46 = vor.u32 %v9663_v9, %v18059_v39  ;;  %v10248_v54 = vrot.slane %v18059_v39, 3 }
 0x66c   : > { %13570 = vmatmul.mubr.msk.bf16.gmra.mrb[76].mxu1 %vm1462_vm3, %v7720_v15  ;;  %v7751_v15 = vrot.slane %v18029_v44, 3  ;;  %19782 = vst [vmem:[#allocation70_spill] sm:$0xff] %v18073_v46 }
 0x66d   : > { %13573 = vmatprep.mubr.msk.bf16.mxu1 %vm1462_vm3, %v7729_v55  ;;  %v7747_v55 = vsel %vm2968_vm11, %v7737_v5, %v7746_v37  ;;  %v18069_v5 = vshrl.u32 %v18045_v40, 16 }
 0x66e   : > { %v7755_v57 = vor.u32 %v7754_v6, %v7751_v15 }
 0x670   : > { %v7756_v6 = vsel %vm2968_vm11, %v7746_v37, %v7755_v57  ;;  %v7788_v37 = vshll.u32 %v17816_v17, 16 }
 0x674   : > { %13574 = vmatmul.mubr.msk.bf16.gmra.mrb[80].mxu1 %vm1462_vm3, %v7738_v10  ;;  %v18066_v10 = vshll.u32 %v17799_v47, 16  ;;  %v9659_v47 = vor.u32 %v19379_v25, %v18069_v5  ;;  %v14851_v25 = vld [vmem:[#allocation3] sm:$0xf0] }
 0x675   : > { %13577 = vmatprep.mubr.msk.bf16.mxu1 %vm1462_vm3, %v7747_v55  ;;  %v7764_v55 = vor.u32 %v7763_v53, %v7760_v56  ;;  %v7781_v53 = vrot.slane %v18079_v14, 4  ;;  %v8097_v8 = vshrl.u32 %v14851_v25, 16  ;;  %v8100_v46 = vshll.u32 %v14851_v25, 16 }
 0x676   : > { %19781 = vst [vmem:[#allocation68_spill] sm:$0xff] %v18066_v10  ;;  %v7772_v34 = vrot.slane %v18066_v10, 4  ;;  %v18087_v15 = vsel %vm4879_vm5, %v9659_v47, %v9663_v9  ;;  %v18096_v9 = vld [vmem:[#allocation3 + $0xa0] sm:$0xff]  ;;  %v18099_v47 = vld [vmem:[#allocation3 + $0xa8] sm:$0xff]  ;;  %v8105_v25 = vrot.slane %v19787_v18, 5 }
 0x677   : > { %19785 = vst [vmem:[#allocation73_spill] sm:$0xff] %v18087_v15  ;;  %v7765_v56 = vsel %vm2968_vm11, %v7755_v57, %v7764_v55  ;;  %v19786_v57 = vshrl.u32 %v17399_v58, 16  ;;  %v8099_v40 = vrot.slane %v8097_v8, 4  ;;  %v18120_v8 = vshll.u32 %v18099_v47, 16 }
 0x678   : > { %v7773_v2 = vor.u32 %v7772_v34, %v7769_v4  ;;  %v18108_v34 = vshrl.u32 %v18096_v9, 16  ;;  %v18110_v4 = vld [vmem:[#allocation3 + $0xb8] sm:$0xff]  ;;  %v18123_v58 = vshll.u32 %v18103_v31, 16 }
 0x679   : > { %v8104_v15 = vrot.slane %v19786_v57, 4  ;;  %19789 = vst [vmem:[#allocation75_spill] sm:$0xff] %v18110_v4  ;;  %v7790_v57 = vrot.slane %v7788_v37, 4  ;;  %19792 = vst [vmem:[#allocation78_spill] sm:$0xff] %v18120_v8  ;;  %v18131_v18 = vshll.u32 %v18110_v4, 16  ;;  %v19797_v37 = vshrl.u32 %v17466_v26, 16 }
 0x67a   : > { %19788 = vst [vmem:[#allocation74_spill] sm:$0xff] %v18108_v34  ;;  %v7774_v17 = vsel %vm2968_vm11, %v7764_v55, %v7773_v2  ;;  %19793 = vst [vmem:[#allocation52_spill] sm:$0xff] %v18123_v58  ;;  %v18134_v55 = vshrl.u32 %v18110_v4, 16  ;;  %v10203_v41 = vrot.slane %v18108_v34, 3  ;;  %v10215_v33 = vrot.slane %v18120_v8, 4 }
 0x67b   : > { %19795 = vst [vmem:[#allocation79_spill] sm:$0xff] %v18131_v18  ;;  %v8108_v45 = vrot.slane %v19797_v37, 4  ;;  %v8106_v22 = vor.u32 %v8105_v25, %v8104_v15  ;;  %v10224_v63 = vrot.slane %v18123_v58, 4  ;;  %v10239_v25 = vrot.slane %v18069_v5, 3 }
 0x67c   : > { %13578 = vmatmul.mubr.msk.bf16.gmra.mrb[84].mxu1 %vm1462_vm3, %v7756_v6  ;;  %v7782_v6 = vor.u32 %v7781_v53, %v7778_v36  ;;  %v18114_v36 = vshll.u32 %v18096_v9, 16  ;;  %v18117_v53 = vshrl.u32 %v18099_v47, 16  ;;  %19796 = vst [vmem:[#allocation83_spill] sm:$0xff] %v18134_v55  ;;  %v10230_v37 = vrot.slane %v18134_v55, 3 }
 0x67d   : > { %13581 = vmatprep.mubr.msk.bf16.mxu1 %vm1462_vm3, %v7765_v56  ;;  %v8102_v56 = vrot.slane %v8100_v46, 5  ;;  %v18126_v46 = vshrl.u32 %v18103_v31, 16 }
 0x67e   : > { %19790 = vst [vmem:[#allocation76_spill] sm:$0xff] %v18114_v36  ;;  %19791 = vst [vmem:[#allocation77_spill] sm:$0xff] %v18117_v53  ;;  %v7783_v29 = vsel %vm2968_vm11, %v7773_v2, %v7782_v6  ;;  %v10206_v32 = vrot.slane %v18114_v36, 4  ;;  %v7791_v2 = vor.u32 %v7790_v57, %v7787_v1  ;;  %v10242_v1 = vrot.slane %v18055_v13, 4 }
 0x67f   : > { %19794 = vst [vmem:[#allocation80_spill] sm:$0xff] %v18126_v46  ;;  %v8103_v30 = vor.u32 %v8102_v56, %v8099_v40  ;;  %v10221_v14 = vrot.slane %v18126_v46, 3  ;;  %v10233_v40 = vrot.slane %v18131_v18, 4 }
 0x680   : > { %v18147_v23 = vor.u32 %v10206_v32, %v10203_v41  ;;  %v7792_v32 = vsel %vm2968_vm11, %v7782_v6, %v7791_v2 }
 0x681   : > { %v10225_v56 = vor.u32 %v10224_v63, %v10221_v14  ;;  %v8107_v57 = vsel %vm3496_vm13, %v8103_v30, %v8106_v22  ;;  %v10234_v62 = vor.u32 %v10233_v40, %v10230_v37  ;;  %v10243_v14 = vor.u32 %v10242_v1, %v10239_v25  ;;  %v18182_v25 = vld [vmem:[#allocation3 + $0x70] sm:$0xff] }
 0x682   : > { %19799 = vst [vmem:[#allocation85_spill] sm:$0xff] %v18147_v23  ;;  %v19802_v63 = vshrl.u32 %v17461_v28, 16 }
 0x683   : > { %v18170_v37 = vsel %vm2968_vm11, %v10225_v56, %v10234_v62  ;;  %v18176_v2 = vsel %vm2968_vm11, %v10234_v62, %v10243_v14  ;;  %v8849_v62 = vsel %vm1535_vm1, %v17853_v49, 0 }
 0x684   : > { %13582 = vmatmul.mubr.msk.bf16.gmra.mrb[88].mxu1 %vm1462_vm3, %v7774_v17  ;;  %v10212_v17 = vrot.slane %v18117_v53, 3  ;;  %v8112_v30 = vrot.slane %v19802_v63, 4  ;;  %19804 = vst [vmem:[#allocation84_spill] sm:$0xff] %v18170_v37  ;;  %19806 = vst [vmem:[#allocation88_spill] sm:$0xff] %v18176_v2 }
 0x685   : > { %13585 = vmatprep.mubr.msk.bf16.mxu1 %vm1462_vm3, %v7783_v29  ;;  %v19798_v29 = vshll.u32 %v17466_v26, 16  ;;  %v10251_v26 = vrot.slane %v18048_v50, 4 }
 0x686   : > { %v10216_v15 = vor.u32 %v10215_v33, %v10212_v17  ;;  %v19803_v17 = vshll.u32 %v17461_v28, 16  ;;  %v18184_v28 = vld [vmem:[#allocation3 + $0x78] sm:$0xff] }
 0x687   : > { %v8109_v10 = vrot.slane %v19798_v29, 5  ;;  %v18172_v6 = vor.u32 %v10251_v26, %v10248_v54  ;;  %19808 = vst [vmem:[#allocation90_spill] sm:$0xff] %v18184_v28  ;;  %v18190_v54 = vld [vmem:[#allocation3 + $0x90] sm:$0xff]  ;;  %v10671_v49 = vrot.slane %v18184_v28, 4 }
 0x688   : > { %v18159_v41 = vsel %vm2968_vm11, %v18147_v23, %v10216_v15  ;;  %v18162_v33 = vsel %vm2968_vm11, %v10216_v15, %v10225_v56  ;;  %v8113_v29 = vrot.slane %v19803_v17, 5  ;;  %v18188_v56 = vld [vmem:[#allocation3 + $0x88] sm:$0xff]  ;;  %19811 = vst [vmem:[#allocation93_spill] sm:$0xff] %v18190_v54  ;;  %v19815_v17 = vshrl.u32 %v17500_v19, 16  ;;  %v18468_v23 = vld [vmem:[#allocation3 + $0x58] sm:$0xff] }
 0x689   : > { %19800 = vst [vmem:[#allocation53_spill] sm:$0xff] %v18159_v41  ;;  %19801 = vst [vmem:[#allocation86_spill] sm:$0xff] %v18162_v33  ;;  %v18180_v40 = vsel %vm2968_vm11, %v10243_v14, %v18172_v6  ;;  %v8110_v15 = vor.u32 %v8109_v10, %v8108_v45  ;;  %v19813_v14 = vshll.u32 %v17505_v0, 16  ;;  %v18198_v10 = vld [vmem:[#allocation3 + $0x98] sm:$0xff] }
 0x68a   : > { %19805 = vst [vmem:[#allocation87_spill] sm:$0xff] %v18172_v6  ;;  %19807 = vst [vmem:[#allocation89_spill] sm:$0xff] %v18180_v40  ;;  %v8114_v1 = vor.u32 %v8113_v29, %v8112_v30  ;;  %v8120_v29 = vrot.slane %v19815_v17, 4  ;;  %v18207_v6 = vld [vmem:[%s19224_s13 + $0x8] sm:$0x3]  ;;  %v10677_v17 = vrot.slane %v18190_v54, 4 }
 0x68b   : > { %19810 = vst [vmem:[#allocation92_spill] sm:$0xff] %v18188_v56  ;;  %v8117_v45 = vrot.slane %v19813_v14, 5  ;;  %19814 = vst [vmem:[#allocation95_spill] sm:$0xff] %v18198_v10  ;;  %v8111_v30 = vsel %vm3496_vm13, %v8106_v22, %v8110_v15  ;;  %v19816_v14 = vshll.u32 %v17500_v19, 16  ;;  %v10675_v22 = vrot.slane %v18188_v56, 4 }
 0x68c   : > { %13586 = vmatmul.mubr.msk.bf16.gmra.mrb[92].mxu1 %vm1462_vm3, %v7792_v32  ;;  %v18186_v32 = vld [vmem:[#allocation3 + $0x80] sm:$0xff]  ;;  %v19817_v40 = vrot.slane %v18182_v25, 4  ;;  %v10681_v19 = vrot.slane %v18096_v9, 4  ;;  %v19404_v9 = vrot.slane %v18110_v4, 4 }
 0x68d   : > { %13591 = vmatprep.mubr.msk.bf16.mxu1 %vm1462_vm3, %v8107_v57  ;;  %19809 = vst [vmem:[#allocation91_spill] sm:$0xff] %v18186_v32  ;;  %v19812_v57 = vshrl.u32 %v17505_v0, 16  ;;  %v8115_v0 = vsel %vm3496_vm13, %v8110_v15, %v8114_v1  ;;  %v8121_v63 = vrot.slane %v19816_v14, 5  ;;  %v10679_v15 = vrot.slane %v18198_v10, 4 }
 0x68e   : > { %v18221_v2 = vsel %vm929_vm0, %v19817_v40, %v10671_v49  ;;  %v10685_v40 = vrot.slane %v18103_v31, 4  ;;  %v8683_v10 = vrot.slane %v17980_v38, 7 }
 0x68f   : > { %v8116_v26 = vrot.slane %v19812_v57, 4  ;;  %v10673_v57 = vrot.slane %v18186_v32, 4  ;;  %19818 = vst [vmem:[#allocation96_spill] sm:$0xff] %v18221_v2  ;;  %v8122_v2 = vor.u32 %v8121_v63, %v8120_v29  ;;  %v19829_v29 = vshrl.u32 %v17528_v35, 16 }
 0x690   : > { %v18254_v31 = vsel %vm929_vm0, %v10685_v40, %v19404_v9  ;;  %v19831_v9 = vshrl.u32 %v17561_v51, 16  ;;  %v8686_v32 = vor.u32 %v8683_v10, %v17983_v16 }
 0x691   : > { %v18224_v37 = vsel %vm929_vm0, %v10671_v49, %v10673_v57  ;;  %v8118_v14 = vor.u32 %v8117_v45, %v8116_v26  ;;  %v18239_v49 = vsel %vm929_vm0, %v10677_v17, %v10679_v15  ;;  %19826 = vst [vmem:[#allocation101_spill] sm:$0xff] %v18254_v31  ;;  %v19827_v26 = vshrl.u32 %v17533_v60, 16 }
 0x692   : > { %19819 = vst [vmem:[#allocation94_spill] sm:$0xff] %v18224_v37  ;;  %19822 = vst [vmem:[#allocation97_spill] sm:$0xff] %v18239_v49  ;;  %v18242_v37 = vsel %vm929_vm0, %v10679_v15, %v10681_v19  ;;  %v18444_v49 = vld [vmem:[#allocation3 + $0x48] sm:$0xff] }
 0x693   : > { %19823 = vst [vmem:[#allocation98_spill] sm:$0xff] %v18242_v37  ;;  %v8124_v45 = vrot.slane %v19827_v26, 4  ;;  %v8123_v63 = vsel %vm3496_vm13, %v8118_v14, %v8122_v2  ;;  %v8132_v26 = vrot.slane %v19831_v9, 4  ;;  %v11121_v9 = vrot.slane %v18114_v36, 5 }
 0x694   : > { %13592 = vmatmul.mubr.msk.bf16.vlgmr.msra.gmra.mrb[48].mxu1 %vm1462_vm3, %v8111_v30  ;;  %v18231_v30 = vsel %vm929_vm0, %v10673_v57, %v10675_v22 }
 0x695   : > { %13640 = vmatpush3.bf16.msra.mxu1 %v8849_v62  ;;  %13595 = vmatprep.mubr.msk.bf16.mxu1 %vm1462_vm3, %v8115_v0  ;;  %19820 = vst [vmem:[#allocation106_spill] sm:$0xff] %v18231_v30  ;;  %v18234_v62 = vsel %vm929_vm0, %v10675_v22, %v10677_v17  ;;  %v10683_v0 = vrot.slane %v18099_v47, 4  ;;  %v8119_v47 = vsel %vm3496_vm13, %v8114_v1, %v8118_v14  ;;  %v19828_v17 = vshll.u32 %v17533_v60, 16  ;;  %v18450_v30 = vld [vmem:[#allocation3 + $0x50] sm:$0xff] }
 0x696   : > { %14774 = vmatprep.subr.msk.bf16.mxu1 %vm1535_vm1, %v18207_v6  ;;  %19821 = vst [vmem:[#allocation81_spill] sm:$0xff] %v18234_v62  ;;  %v19832_v60 = vshll.u32 %v17561_v51, 16  ;;  %v11124_v51 = vrot.slane %v18117_v53, 4  ;;  %v18477_v53 = vshll.u32 %v18450_v30, 16 }
 0x697   : > { %v18246_v57 = vsel %vm929_vm0, %v10681_v19, %v10683_v0  ;;  %v18249_v22 = vsel %vm929_vm0, %v10683_v0, %v10685_v40  ;;  %v8125_v15 = vrot.slane %v19828_v17, 5  ;;  %v8128_v19 = vrot.slane %v19829_v29, 4  ;;  %v18276_v29 = vld [vmem:[#allocation3 + $0xd0] sm:$0xff] }
 0x698   : > { %19824 = vst [vmem:[#allocation99_spill] sm:$0xff] %v18246_v57  ;;  %19825 = vst [vmem:[#allocation100_spill] sm:$0xff] %v18249_v22  ;;  %v19830_v0 = vshll.u32 %v17528_v35, 16  ;;  %v8133_v17 = vrot.slane %v19832_v60, 5 }
 0x699   : > { %v8126_v40 = vor.u32 %v8125_v15, %v8124_v45  ;;  %19833 = vst [vmem:[#allocation102_spill] sm:$0xff] %v18276_v29  ;;  %v11120_v45 = vrot.slane %v18108_v34, 4  ;;  %v19407_v15 = vshrl.u32 %v18276_v29, 16  ;;  %v18496_v34 = vshll.u32 %v18468_v23, 16 }
 0x69a   : > { %v8129_v4 = vrot.slane %v19830_v0, 5  ;;  %v8134_v35 = vor.u32 %v8133_v17, %v8132_v26  ;;  %v19406_v0 = vshll.u32 %v18276_v29, 16  ;;  %v11132_v26 = vrot.slane %v18134_v55, 4 }
 0x69b   : > { %v11136_v17 = vrot.slane %v18069_v5, 4  ;;  %v18472_v55 = vshll.u32 %v18444_v49, 16 }
 0x69c   : > { %13596 = vmatmul.mubr.msk.bf16.gmra.mrb[52].mxu1 %vm1462_vm3, %v8119_v47  ;;  %v8130_v1 = vor.u32 %v8129_v4, %v8128_v19  ;;  %v8127_v47 = vsel %vm3496_vm13, %v8122_v2, %v8126_v40  ;;  %v8139_v2 = vsel %vm3496_vm13, %v8134_v35, %v17868_v27  ;;  %v11128_v19 = vrot.slane %v18126_v46, 4 }
 0x69d   : > { %13599 = vmatprep.mubr.msk.bf16.mxu1 %vm1462_vm3, %v8123_v63  ;;  %v11125_v63 = vrot.slane %v18120_v8, 5  ;;  %v11133_v27 = vrot.slane %v18131_v18, 5  ;;  %v18474_v18 = vld [vmem:[#allocation3 + $0x60] sm:$0xff]  ;;  %v18492_v8 = vld [vmem:[#allocation3 + $0x68] sm:$0xff] }
 0x69e   : > { %v8131_v14 = vsel %vm3496_vm13, %v8126_v40, %v8130_v1  ;;  %v8135_v4 = vsel %vm3496_vm13, %v8130_v1, %v8134_v35  ;;  %v18289_v40 = vor.u32 %v11121_v9, %v11120_v45  ;;  %v11129_v1 = vrot.slane %v18123_v58, 5 }
 0x69f   : > { %v11126_v60 = vor.u32 %v11125_v63, %v11124_v51  ;;  %v11140_v35 = vrot.slane %v18059_v39, 4  ;;  %v11141_v9 = vrot.slane %v18048_v50, 5  ;;  %v18499_v36 = vshll.u32 %v18474_v18, 16 }
 0x6a0   : > { %19834 = vst [vmem:[#allocation103_spill] sm:$0xff] %v18289_v40  ;;  %v18513_v54 = vshll.u32 %v18492_v8, 16 }
 0x6a1   : > { %v18300_v45 = vsel %vm3496_vm13, %v18289_v40, %v11126_v60  ;;  %v11142_v31 = vor.u32 %v11141_v9, %v11140_v35  ;;  %v8165_v35 = vrot.slane %v18001_v48, 5  ;;  %v8173_v9 = vrot.slane %v18019_v43, 5 }
 0x6a2   : > { %19835 = vst [vmem:[#allocation104_spill] sm:$0xff] %v18300_v45  ;;  %v18418_v45 = vld [vmem:[#allocation3 + $0x38] sm:$0xff] }
 0x6a3   : > { %v18448_v62 = vshll.u32 %v18418_v45, 16 }
 0x6a4   : > { %13600 = vmatmul.mubr.msk.bf16.gmra.mrb[56].mxu1 %vm1462_vm3, %v8127_v47  ;;  %v11130_v47 = vor.u32 %v11129_v1, %v11128_v19  ;;  %v11145_v19 = vrot.slane %v19406_v0, 5  ;;  %v19847_v0 = vld [vmem:[#allocation72_spill] sm:$0xff] }
 0x6a5   : > { %13603 = vmatprep.mubr.msk.bf16.mxu1 %vm1462_vm3, %v8131_v14  ;;  %v11137_v14 = vrot.slane %v18055_v13, 5 }
 0x6a6   : > { %v18306_v51 = vsel %vm3496_vm13, %v11126_v60, %v11130_v47 }
 0x6a7   : > { %19836 = vst [vmem:[#allocation105_spill] sm:$0xff] %v18306_v51  ;;  %v11138_v63 = vor.u32 %v11137_v14, %v11136_v17  ;;  %v8156_v17 = vrot.slane %v17980_v38, 4 }
 0x6ac   : > { %13604 = vmatmul.mubr.msk.bf16.gmra.mrb[60].mxu1 %vm1462_vm3, %v8135_v4  ;;  %v11134_v4 = vor.u32 %v11133_v27, %v11132_v26  ;;  %v18319_v27 = vsel %vm3496_vm13, %v11138_v63, %v11142_v31 }
 0x6ad   : > { %13607 = vmatprep.mubr.msk.bf16.mxu1 %vm1462_vm3, %v8139_v2  ;;  %v11144_v2 = vrot.slane %v19407_v15, 4  ;;  %19840 = vst [vmem:[#allocation109_spill] sm:$0xff] %v18319_v27  ;;  %v8193_v15 = vrot.slane %v19847_v0, 5 }
 0x6ae   : > { %v18311_v1 = vsel %vm3496_vm13, %v11130_v47, %v11134_v4  ;;  %v18314_v40 = vsel %vm3496_vm13, %v11134_v4, %v11138_v63  ;;  %v8157_v47 = vrot.slane %v17983_v16, 5 }
 0x6af   : > { %19837 = vst [vmem:[#allocation82_spill] sm:$0xff] %v18311_v1  ;;  %19838 = vst [vmem:[#allocation107_spill] sm:$0xff] %v18314_v40  ;;  %v18316_v26 = vor.u32 %v11145_v19, %v11144_v2  ;;  %v8180_v19 = vrot.slane %v18029_v44, 4  ;;  %v19848_v40 = vld [vmem:[#allocation55_spill] sm:$0xff] }
 0x6b0   : > { %v8158_v14 = vor.u32 %v8157_v47, %v8156_v17  ;;  %v8181_v17 = vrot.slane %v18032_v21, 5  ;;  %v19842_v47 = vld [vmem:[#allocation65_spill] sm:$0xff]  ;;  %v19849_v1 = vshrl.u32 %v19848_v40, 16 }
 0x6b1   : > { %19839 = vst [vmem:[#allocation108_spill] sm:$0xff] %v18316_v26  ;;  %v18325_v60 = vsel %vm3496_vm13, %v11142_v31, %v18316_v26  ;;  %v8164_v31 = vrot.slane %v17998_v11, 4  ;;  %v8093_v26 = vld [vmem:[#allocation3 + $0xc0] sm:$0x1f] }
 0x6b2   : > { %19841 = vst [vmem:[#allocation110_spill] sm:$0xff] %v18325_v60  ;;  %v8587_v51 = vrot.slane %v19849_v1, 7 }
 0x6b3   : > { %v8166_v4 = vor.u32 %v8165_v35, %v8164_v31  ;;  %v8182_v35 = vor.u32 %v8181_v17, %v8180_v19  ;;  %v8197_v17 = vshrl.u32 %v8093_v26, 16 }
 0x6b4   : > { %13608 = vmatmul.mubr.msk.bf16.gmra.mrb[64].mxu1 %vm1462_vm3, %v17880_v52  ;;  %v8159_v52 = vsel %vm3496_vm13, %v17906_v42, %v8158_v14 }
 0x6b5   : > { %13611 = vmatprep.mubr.msk.bf16.mxu1 %vm1462_vm3, %v17885_v61  ;;  %v8163_v61 = vsel %vm3496_vm13, %v8158_v14, %v17932_v20  ;;  %v8171_v42 = vsel %vm3496_vm13, %v8166_v4, %v17958_v7  ;;  %v8184_v14 = vrot.slane %v19842_v47, 4  ;;  %v8199_v60 = vrot.slane %v8197_v17, 4  ;;  %v19851_v17 = vld [vmem:[#allocation56_spill] sm:$0xff] }
 0x6bc   : > { %13612 = vmatmul.mubr.msk.bf16.gmra.mrb[68].mxu1 %vm1462_vm3, %v17888_v24  ;;  %v8167_v24 = vsel %vm3496_vm13, %v17932_v20, %v8166_v4  ;;  %v19844_v4 = vld [vmem:[#allocation69_spill] sm:$0xff] }
 0x6bd   : > { %13615 = vmatprep.mubr.msk.bf16.mxu1 %vm1462_vm3, %v17916_v59  ;;  %v8172_v59 = vrot.slane %v18016_v3, 4 }
 0x6bf   : > { %v8174_v2 = vor.u32 %v8173_v9, %v8172_v59  ;;  %v19845_v59 = vld [vmem:[#allocation68_spill] sm:$0xff] }
 0x6c0   : > { %v8189_v9 = vrot.slane %v19845_v59, 5 }
 0x6c1   : > { %v8175_v63 = vsel %vm3496_vm13, %v17958_v7, %v8174_v2  ;;  %v8179_v20 = vsel %vm3496_vm13, %v8174_v2, %v17977_v12  ;;  %v8183_v7 = vsel %vm3496_vm13, %v17977_v12, %v8182_v35  ;;  %v19846_v2 = vld [vmem:[#allocation71_spill] sm:$0xff]  ;;  %v8553_v12 = vld [vmem:[#allocation3 + $0x8] sm:$0x80] }
 0x6c4   : > { %13616 = vmatmul.mubr.msk.bf16.gmra.mrb[72].mxu1 %vm1462_vm3, %v8159_v52  ;;  %v19843_v52 = vld [vmem:[#allocation67_spill] sm:$0xff] }
 0x6c5   : > { %13619 = vmatprep.mubr.msk.bf16.mxu1 %vm1462_vm3, %v8163_v61  ;;  %v8185_v31 = vrot.slane %v19843_v52, 5 }
 0x6c7   : > { %v8186_v61 = vor.u32 %v8185_v31, %v8184_v14 }
 0x6cc   : > { %13620 = vmatmul.mubr.msk.bf16.gmra.mrb[76].mxu1 %vm1462_vm3, %v8167_v24  ;;  %v8188_v24 = vrot.slane %v19844_v4, 4 }
 0x6cd   : > { %13623 = vmatprep.mubr.msk.bf16.mxu1 %vm1462_vm3, %v8171_v42  ;;  %v8187_v42 = vsel %vm3496_vm13, %v8182_v35, %v8186_v61 }
 0x6ce   : > { %v8190_v19 = vor.u32 %v8189_v9, %v8188_v24 }
 0x6d0   : > { %v8191_v31 = vsel %vm3496_vm13, %v8186_v61, %v8190_v19 }
 0x6d4   : > { %13624 = vmatmul.mubr.msk.bf16.gmra.mrb[80].mxu1 %vm1462_vm3, %v8175_v63  ;;  %v8192_v63 = vrot.slane %v19846_v2, 4 }
 0x6d5   : > { %13627 = vmatprep.mubr.msk.bf16.mxu1 %vm1462_vm3, %v8179_v20  ;;  %v8200_v20 = vshll.u32 %v8093_v26, 16 }
 0x6d6   : > { %v8194_v14 = vor.u32 %v8193_v15, %v8192_v63  ;;  %v19850_v15 = vshll.u32 %v19848_v40, 16 }
 0x6d7   : > { %v8202_v27 = vrot.slane %v8200_v20, 5 }
 0x6d8   : > { %v8195_v35 = vsel %vm3496_vm13, %v8190_v19, %v8194_v14  ;;  %v8590_v9 = vor.u32 %v19850_v15, %v8587_v51  ;;  %v19852_v19 = vshrl.u32 %v19851_v17, 16  ;;  %v9175_v15 = vsel %vm1535_vm1, %v18207_v6, 0 }
 0x6d9   : > { %v8203_v24 = vor.u32 %v8202_v27, %v8199_v60  ;;  %v18392_v27 = vld [vmem:[#allocation3 + $0x30] sm:$0xff] }
 0x6da   : > { %v8595_v20 = vrot.slane %v19852_v19, 7  ;;  %v18413_v19 = vld [vmem:[%s19224_s13 + $0xa] sm:$0x3] }
 0x6db   : > { %v8204_v63 = vsel %vm3496_vm13, %v8194_v14, %v8203_v24  ;;  %v19854_v14 = vshll.u32 %v19851_v17, 16 }
 0x6dc   : > { %13628 = vmatmul.mubr.msk.bf16.gmra.mrb[84].mxu1 %vm1462_vm3, %v8183_v7  ;;  %v8581_v7 = vshrl.u32 %v8553_v12, 16 }
 0x6dd   : > { %13631 = vmatprep.mubr.msk.bf16.mxu1 %vm1462_vm3, %v8187_v42  ;;  %v18376_v42 = vld [vmem:[#allocation3 + $0x20] sm:$0xff] }
 0x6de   : > { %v8583_v26 = vrot.slane %v8581_v7, 7  ;;  %v18381_v61 = vshrl.u32 %v18376_v42, 16  ;;  %v18395_v60 = vshll.u32 %v18376_v42, 16 }
 0x6e0   : > { %v8591_v1 = vsel %vm19853_vm6, %v8583_v26, %v8590_v9  ;;  %v8603_v12 = vrot.slane %v18381_v61, 7  ;;  %v18404_v26 = vshrl.u32 %v18392_v27, 16  ;;  %vm19864_vm6 = vmmov %vm19860_vm2 }
 0x6e2   : > { %v8606_v24 = vor.u32 %v18395_v60, %v8603_v12 }
 0x6e4   : > { %13632 = vmatmul.mubr.msk.bf16.gmra.mrb[88].mxu1 %vm1462_vm3, %v8191_v31  ;;  %v18389_v31 = vld [vmem:[#allocation3 + $0x28] sm:$0xff] }
 0x6e5   : > { %13635 = vmatprep.mubr.msk.bf16.mxu1 %vm1462_vm3, %v8195_v35  ;;  %v8598_v35 = vor.u32 %v19854_v14, %v8595_v20  ;;  %v18400_v7 = vshrl.u32 %v18389_v31, 16  ;;  %v8619_v14 = vrot.slane %v18404_v26, 7  ;;  %v18422_v6 = vshll.u32 %v18389_v31, 16 }
 0x6e7   : > { %v8599_v9 = vsel %vm19855_vm8, %v8587_v51, %v8598_v35  ;;  %v18424_v51 = vld [vmem:[#allocation3 + $0x40] sm:$0xff]  ;;  %v18427_v35 = vshll.u32 %v18392_v27, 16  ;;  %vm19865_vm8 = vmmov %vm19860_vm2 }
 0x6e8   : > { %v18453_v29 = vshll.u32 %v18424_v51, 16 }
 0x6ec   : > { %13636 = vmatmul.mubr.msk.bf16.gmra.mrb[92].mxu1 %vm1462_vm3, %v8204_v63  ;;  %v8611_v63 = vrot.slane %v18400_v7, 7 }
 0x6ed   : > { %13641 = vmatprep.mubr.msk.bf16.mxu1 %vm1462_vm3, %v8591_v1  ;;  %v8607_v1 = vsel %vm19856_vm14, %v8595_v20, %v8606_v24  ;;  %v18433_v24 = vshrl.u32 %v18418_v45, 16  ;;  %vm19866_vm14 = vmmov %vm19860_vm2 }
 0x6ee   : > { %v8614_v20 = vor.u32 %v18422_v6, %v8611_v63 }
 0x6ef   : > { %v8627_v22 = vrot.slane %v18433_v24, 7 }
 0x6f4   : > { %13642 = vmatmul.mubr.msk.bf16.vlgmr.msra.gmra.mrb[48].mxu1 %vm1462_vm3, %v8599_v9  ;;  %v18437_v9 = vshrl.u32 %v18424_v51, 16 }
 0x6f5   : > { %13690 = vmatpush3.bf16.msra.mxu1 %v9175_v15  ;;  %13645 = vmatprep.mubr.msk.bf16.mxu1 %vm1462_vm3, %v8607_v1  ;;  %v8622_v15 = vor.u32 %v18427_v35, %v8619_v14  ;;  %v8615_v1 = vsel %vm19857_vm9, %v8603_v12, %v8614_v20  ;;  %v8630_v12 = vor.u32 %v18448_v62, %v8627_v22  ;;  %v18457_v20 = vshrl.u32 %v18444_v49, 16  ;;  %vm19868_vm9 = vmmov %vm19860_vm2 }
 0x6f6   : > { %14775 = vmatprep.subr.msk.bf16.mxu1 %vm1535_vm1, %v18413_v19  ;;  %v8635_v37 = vrot.slane %v18437_v9, 7 }
 0x6f7   : > { %v8623_v57 = vsel %vm19858_vm10, %v8611_v63, %v8622_v15  ;;  %v18461_v15 = vshrl.u32 %v18450_v30, 16  ;;  %vm19871_vm10 = vmmov %vm19860_vm2 }
 0x6f8   : > { %v8638_v63 = vor.u32 %v18453_v29, %v8635_v37 }
 0x6f9   : > { %v8651_v41 = vrot.slane %v18461_v15, 7 }
 0x6fa   : > { %v8639_v33 = vsel %vm19860_vm2, %v8627_v22, %v8638_v63  ;;  %v18485_v63 = vshrl.u32 %v18474_v18, 16 }
 0x6fb   : > { %v8654_v22 = vor.u32 %v18477_v53, %v8651_v41 }
 0x6fc   : > { %13646 = vmatmul.mubr.msk.bf16.gmra.mrb[52].mxu1 %vm1462_vm3, %v8615_v1  ;;  %v8643_v1 = vrot.slane %v18457_v20, 7  ;;  %v8667_v58 = vrot.slane %v18485_v63, 7 }
 0x6fd   : > { %13649 = vmatprep.mubr.msk.bf16.mxu1 %vm1462_vm3, %v8623_v57  ;;  %v8631_v57 = vsel %vm19859_vm15, %v8619_v14, %v8630_v12  ;;  %v18481_v12 = vshrl.u32 %v18468_v23, 16  ;;  %vm19873_vm15 = vmmov %vm19860_vm2 }
 0x6fe   : > { %v8646_v14 = vor.u32 %v18472_v55, %v8643_v1  ;;  %v8655_v46 = vsel %vm19862_vm7, %v8643_v1, %v8654_v22  ;;  %vm19880_vm7 = vmmov %vm19860_vm2 }
 0x704   : > { %13650 = vmatmul.mubr.msk.bf16.gmra.mrb[56].mxu1 %vm1462_vm3, %v8631_v57  ;;  %v8659_v57 = vrot.slane %v18481_v12, 7 }
 0x705   : > { %13653 = vmatprep.mubr.msk.bf16.mxu1 %vm1462_vm3, %v8639_v33  ;;  %v8647_v33 = vsel %vm19861_vm4, %v8635_v37, %v8646_v14  ;;  %v18503_v14 = vshrl.u32 %v18492_v8, 16  ;;  %vm19877_vm4 = vmmov %vm19860_vm2 }
 0x706   : > { %v8662_v37 = vor.u32 %v18496_v34, %v8659_v57 }
 0x707   : > { %v8675_v22 = vrot.slane %v18503_v14, 7 }
 0x708   : > { %v8663_v1 = vsel %vm19863_vm12, %v8651_v41, %v8662_v37  ;;  %v8699_v37 = vrot.slane %v17998_v11, 7  ;;  %v19872_v11 = vld [vmem:[#allocation62_spill] sm:$0xff]  ;;  %vm19881_vm12 = vmmov %vm19860_vm2 }
 0x709   : > { %v8678_v56 = vor.u32 %v18513_v54, %v8675_v22  ;;  %v8687_v41 = vsel %vm19866_vm14, %v8675_v22, %v8686_v32  ;;  %v8731_v22 = vrot.slane %v18029_v44, 7  ;;  %vm19884_vm14 = vmmov %vm19860_vm2 }
 0x70a   : > { %v8702_v38 = vor.u32 %v8699_v37, %v18001_v48  ;;  %v8711_v32 = vsel %vm19873_vm15, %v8699_v37, %v19872_v11  ;;  %v19874_v48 = vld [vmem:[#allocation57_spill] sm:$0xff] }
 0x70b   : > { %v8679_v28 = vsel %vm19865_vm8, %v8667_v58, %v8678_v56  ;;  %v19875_v56 = vrot.slane %v19874_v48, 7  ;;  %v19878_v37 = vld [vmem:[#allocation61_spill] sm:$0xff]  ;;  %vm19883_vm8 = vmmov %vm19860_vm2  ;;  %v14857_v48 = vld [vmem:[#allocation3 + $0x98] sm:$0xff] }
 0x70c   : > { %13654 = vmatmul.mubr.msk.bf16.gmra.mrb[60].mxu1 %vm1462_vm3, %v8647_v33  ;;  %v8670_v33 = vor.u32 %v18499_v36, %v8667_v58  ;;  %v8715_v58 = vrot.slane %v18016_v3, 7  ;;  %v19876_v3 = vld [vmem:[#allocation63_spill] sm:$0xff] }
 0x70d   : > { %13657 = vmatprep.mubr.msk.bf16.mxu1 %vm1462_vm3, %v8655_v46 }
 0x70e   : > { %v8671_v46 = vsel %vm19864_vm6, %v8659_v57, %v8670_v33  ;;  %v19867_v57 = vld [vmem:[#allocation60_spill] sm:$0xff]  ;;  %vm19882_vm6 = vmmov %vm19860_vm2 }
 0x70f   : > { %v8695_v33 = vsel %vm19868_vm9, %v8683_v10, %v19867_v57  ;;  %v19879_v57 = vrot.slane %v19878_v37, 7  ;;  %vm19885_vm9 = vmmov %vm19860_vm2  ;;  %v19888_v37 = vld [vmem:[#allocation59_spill] sm:$0xff] }
 0x714   : > { %13658 = vmatmul.mubr.msk.bf16.gmra.mrb[64].mxu1 %vm1462_vm3, %v8663_v1  ;;  %v19869_v1 = vld [vmem:[#allocation54_spill] sm:$0xff] }
 0x715   : > { %13661 = vmatprep.mubr.msk.bf16.mxu1 %vm1462_vm3, %v8671_v46  ;;  %v19870_v46 = vrot.slane %v19869_v1, 7  ;;  %v8747_v1 = vrot.slane %v19844_v4, 7 }
 0x717   : > { %v8703_v16 = vsel %vm19871_vm10, %v19870_v46, %v8702_v38  ;;  %v8727_v38 = vsel %vm19877_vm4, %v8715_v58, %v19876_v3  ;;  %v8750_v46 = vor.u32 %v8747_v1, %v19845_v59  ;;  %v8771_v59 = vrot.slane %v18059_v39, 7  ;;  %v12285_v39 = vld [vmem:[%s19224_s13 + $0xc] sm:$0x3]  ;;  %v19886_v3 = vld [vmem:[#allocation64_spill] sm:$0xff] }
 0x719   : > { %v8774_v11 = vor.u32 %v18048_v50, %v8771_v59  ;;  %v14852_v50 = vld [vmem:[#allocation3 + $0x70] sm:$0xff] }
 0x71c   : > { %13662 = vmatmul.mubr.msk.bf16.gmra.mrb[68].mxu1 %vm1462_vm3, %v8679_v28  ;;  %v8718_v28 = vor.u32 %v8715_v58, %v18019_v43  ;;  %v8739_v43 = vrot.slane %v19842_v47, 7  ;;  %v8763_v58 = vrot.slane %v18069_v5, 7 }
 0x71d   : > { %13665 = vmatprep.mubr.msk.bf16.mxu1 %vm1462_vm3, %v8687_v41  ;;  %v8734_v41 = vor.u32 %v8731_v22, %v18032_v21 }
 0x71e   : > { %v8719_v10 = vsel %vm19860_vm2, %v19875_v56, %v8718_v28  ;;  %v8742_v44 = vor.u32 %v8739_v43, %v19843_v52  ;;  %v8751_v47 = vsel %vm19882_vm6, %v8739_v43, %v8750_v46  ;;  %v8766_v28 = vor.u32 %v18055_v13, %v8763_v58  ;;  %v14858_v56 = vld [vmem:[#allocation3 + $0xa0] sm:$0xff] }
 0x71f   : > { %v8775_v5 = vsel %vm19885_vm9, %v8763_v58, %v8774_v11  ;;  %v9495_v43 = vrot.slane %v18395_v60, 1 }
 0x720   : > { %v8743_v21 = vsel %vm19881_vm12, %v8731_v22, %v8742_v44  ;;  %v14860_v22 = vld [vmem:[#allocation3 + $0xb0] sm:$0xff] }
 0x721   : > { %v19889_v44 = vld [vmem:[#allocation58_spill] sm:$0xff] }
 0x722   : > { %v9496_v46 = vsel %vm4879_vm5, %v19889_v44, %v9495_v43 }
 0x724   : > { %13666 = vmatmul.mubr.msk.bf16.gmra.mrb[72].mxu1 %vm1462_vm3, %v8695_v33  ;;  %v8735_v33 = vsel %vm19880_vm7, %v19879_v57, %v8734_v41  ;;  %v14861_v41 = vld [vmem:[#allocation3 + $0xb8] sm:$0xff]  ;;  %v9499_v57 = vor.u32 %v9495_v43, %v18381_v61 }
 0x725   : > { %13669 = vmatprep.mubr.msk.bf16.mxu1 %vm1462_vm3, %v8703_v16  ;;  %v8755_v16 = vrot.slane %v19846_v2, 7 }
 0x727   : > { %v8758_v4 = vor.u32 %v8755_v16, %v19847_v0  ;;  %v8767_v2 = vsel %vm19884_vm14, %v8755_v16, %v8766_v28  ;;  %v9746_v0 = vsel %vm1535_vm1, %v18413_v19, 0  ;;  %v14855_v19 = vld [vmem:[#allocation3 + $0x88] sm:$0xff]  ;;  %v9519_v28 = vrot.slane %v18448_v62, 1 }
 0x729   : > { %v8759_v52 = vsel %vm19883_vm8, %v8747_v1, %v8758_v4  ;;  %v9503_v1 = vrot.slane %v18422_v6, 1 }
 0x72b   : > { %v9504_v16 = vsel %vm4879_vm5, %v9499_v57, %v9503_v1  ;;  %v9507_v4 = vor.u32 %v9503_v1, %v18400_v7  ;;  %v19890_v1 = vld [vmem:[#allocation90_spill] sm:$0xff] }
 0x72c   : > { %13670 = vmatmul.mubr.msk.bf16.gmra.mrb[76].mxu1 %vm1462_vm3, %v8711_v32  ;;  %v14856_v32 = vld [vmem:[#allocation3 + $0x90] sm:$0xff]  ;;  %v18670_v44 = vshll.u32 %v19890_v1, 16 }
 0x72d   : > { %13673 = vmatprep.mubr.msk.bf16.mxu1 %vm1462_vm3, %v8719_v10  ;;  %v14859_v10 = vld [vmem:[#allocation3 + $0xa8] sm:$0xff] }
 0x734   : > { %13674 = vmatmul.mubr.msk.bf16.gmra.mrb[80].mxu1 %vm1462_vm3, %v8727_v38  ;;  %v19887_v38 = vld [vmem:[#allocation66_spill] sm:$0xff] }
 0x735   : > { %13677 = vmatprep.mubr.msk.bf16.mxu1 %vm1462_vm3, %v8735_v33  ;;  %v10345_v33 = vsel %vm1535_vm1, %v12285_v39, 0 }
 0x73c   : > { %13678 = vmatmul.mubr.msk.bf16.gmra.mrb[84].mxu1 %vm1462_vm3, %v8743_v21  ;;  %v18623_v21 = vld [vmem:[%s19224_s13 + $0xe] sm:$0x3] }
 0x73d   : > { %13681 = vmatprep.mubr.msk.bf16.mxu1 %vm1462_vm3, %v8751_v47  ;;  %v9511_v47 = vrot.slane %v18427_v35, 1 }
 0x73f   : > { %v9515_v58 = vor.u32 %v9511_v47, %v18404_v26 }
 0x741   : > { %v9520_v59 = vsel %vm4879_vm5, %v9515_v58, %v9519_v28 }
 0x744   : > { %13682 = vmatmul.mubr.msk.bf16.gmra.mrb[88].mxu1 %vm1462_vm3, %v8759_v52  ;;  %v9512_v52 = vsel %vm4879_vm5, %v9507_v4, %v9511_v47  ;;  %v9583_v4 = vrot.slane %v18670_v44, 1 }
 0x745   : > { %13685 = vmatprep.mubr.msk.bf16.mxu1 %vm1462_vm3, %v8767_v2  ;;  %v9527_v2 = vrot.slane %v18453_v29, 1 }
 0x747   : > { %v9531_v11 = vor.u32 %v9527_v2, %v18437_v9 }
 0x74c   : > { %13686 = vmatmul.mubr.msk.bf16.gmra.mrb[92].mxu1 %vm1462_vm3, %v8775_v5  ;;  %v9523_v5 = vor.u32 %v9519_v28, %v18433_v24 }
 0x74d   : > { %13691 = vmatprep.mubr.msk.bf16.mxu1 %vm1462_vm3, %v19848_v40  ;;  %v14853_v40 = vld [vmem:[#allocation3 + $0x78] sm:$0xff] }
 0x754   : > { %13692 = vmatmul.mubr.msk.bf16.vlgmr.msra.gmra.mrb[48].mxu1 %vm1462_vm3, %v19851_v17  ;;  %v14854_v17 = vld [vmem:[#allocation3 + $0x80] sm:$0xff] }
 0x755   : > { %13740 = vmatpush3.bf16.msra.mxu1 %v9746_v0  ;;  %13695 = vmatprep.mubr.msk.bf16.mxu1 %vm1462_vm3, %v18376_v42  ;;  %v9535_v0 = vrot.slane %v18472_v55, 1 }
 0x756   : > { %14776 = vmatprep.subr.msk.bf16.mxu1 %vm1535_vm1, %v12285_v39  ;;  %v9528_v39 = vsel %vm4879_vm5, %v9523_v5, %v9527_v2 }
 0x75c   : > { %13696 = vmatmul.mubr.msk.bf16.gmra.mrb[52].mxu1 %vm1462_vm3, %v18389_v31 }
 0x75d   : > { %13699 = vmatprep.mubr.msk.bf16.mxu1 %vm1462_vm3, %v18392_v27 }
 0x764   : > { %13700 = vmatmul.mubr.msk.bf16.gmra.mrb[56].mxu1 %vm1462_vm3, %v18418_v45 }
 0x765   : > { %13703 = vmatprep.mubr.msk.bf16.mxu1 %vm1462_vm3, %v18424_v51 }
 0x76c   : > { %13704 = vmatmul.mubr.msk.bf16.gmra.mrb[60].mxu1 %vm1462_vm3, %v18444_v49 }
 0x76d   : > { %13707 = vmatprep.mubr.msk.bf16.mxu1 %vm1462_vm3, %v18450_v30 }
 0x774   : > { %13708 = vmatmul.mubr.msk.bf16.gmra.mrb[64].mxu1 %vm1462_vm3, %v18468_v23 }
 0x775   : > { %13711 = vmatprep.mubr.msk.bf16.mxu1 %vm1462_vm3, %v18474_v18 }
 0x77c   : > { %13712 = vmatmul.mubr.msk.bf16.gmra.mrb[68].mxu1 %vm1462_vm3, %v18492_v8 }
 0x77d   : > { %13715 = vmatprep.mubr.msk.bf16.mxu1 %vm1462_vm3, %v14852_v50  ;;  %v9536_v50 = vsel %vm4879_vm5, %v9531_v11, %v9535_v0  ;;  %v19892_v11 = vld [vmem:[#allocation92_spill] sm:$0xff] }
 0x77e   : > { %v18687_v5 = vshll.u32 %v19892_v11, 16 }
 0x784   : > { %13716 = vmatmul.mubr.msk.bf16.gmra.mrb[72].mxu1 %vm1462_vm3, %v14853_v40  ;;  %v9543_v40 = vrot.slane %v18477_v53, 1 }
 0x785   : > { %13719 = vmatprep.mubr.msk.bf16.mxu1 %vm1462_vm3, %v14854_v17 }
 0x786   : > { %v9547_v17 = vor.u32 %v9543_v40, %v18461_v15 }
 0x78c   : > { %13720 = vmatmul.mubr.msk.bf16.gmra.mrb[76].mxu1 %vm1462_vm3, %v14855_v19  ;;  %v9539_v19 = vor.u32 %v9535_v0, %v18457_v20  ;;  %v18690_v0 = vshrl.u32 %v19890_v1, 16 }
 0x78d   : > { %13723 = vmatprep.mubr.msk.bf16.mxu1 %vm1462_vm3, %v14856_v32  ;;  %v9551_v32 = vrot.slane %v18496_v34, 1 }
 0x794   : > { %13724 = vmatmul.mubr.msk.bf16.gmra.mrb[80].mxu1 %vm1462_vm3, %v14857_v48  ;;  %v9544_v48 = vsel %vm4879_vm5, %v9539_v19, %v9543_v40  ;;  %v9599_v19 = vrot.slane %v18687_v5, 1 }
 0x795   : > { %13727 = vmatprep.mubr.msk.bf16.mxu1 %vm1462_vm3, %v14858_v56  ;;  %v9552_v56 = vsel %vm4879_vm5, %v9547_v17, %v9551_v32  ;;  %v9587_v17 = vor.u32 %v18690_v0, %v9583_v4 }
 0x79c   : > { %13728 = vmatmul.mubr.msk.bf16.gmra.mrb[84].mxu1 %vm1462_vm3, %v14859_v10  ;;  %v9559_v10 = vrot.slane %v18499_v36, 1 }
 0x79d   : > { %13731 = vmatprep.mubr.msk.bf16.mxu1 %vm1462_vm3, %v14860_v22 }
 0x79e   : > { %v9563_v22 = vor.u32 %v9559_v10, %v18485_v63 }
 0x7a4   : > { %13732 = vmatmul.mubr.msk.bf16.gmra.mrb[88].mxu1 %vm1462_vm3, %v14861_v41  ;;  %v18657_v41 = vshll.u32 %v18182_v25, 16 }
 0x7a5   : > { %13735 = vmatprep.mubr.msk.bf16.mxu1 %vm1462_vm3, %v19886_v3  ;;  %v9555_v3 = vor.u32 %v9551_v32, %v18481_v12 }
 0x7a6   : > { %v9575_v57 = vrot.slane %v18657_v41, 1 }
 0x7a7   : > { %v9560_v43 = vsel %vm4879_vm5, %v9555_v3, %v9559_v10 }
 0x7ac   : > { %13736 = vmatmul.mubr.msk.bf16.gmra.mrb[92].mxu1 %vm1462_vm3, %v19887_v38  ;;  %v9567_v38 = vrot.slane %v18513_v54, 1 }
 0x7ad   : > { %13741 = vmatprep.mubr.msk.bf16.mxu1 %vm1462_vm3, %v19888_v37 }
 0x7ae   : > { %v9568_v37 = vsel %vm4879_vm5, %v9563_v22, %v9567_v38  ;;  %v9571_v58 = vor.u32 %v9567_v38, %v18503_v14  ;;  %v19894_v22 = vld [vmem:[#allocation95_spill] sm:$0xff]  ;;  %v18710_v38 = vshrl.u32 %v19892_v11, 16  ;;  %v19897_v11 = vld [vmem:[#allocation78_spill] sm:$0xff] }
 0x7af   : > { %v18707_v3 = vshll.u32 %v19894_v22, 16 }
 0x7b0   : > { %v9576_v28 = vsel %vm4879_vm5, %v9571_v58, %v9575_v57 }
 0x7b4   : > { %13742 = vmatmul.mubr.msk.bf16.vlgmr.msra.gmra.mrb[48].mxu1 %vm1462_vm3, %v9496_v46 }
 0x7b5   : > { %13790 = vmatpush3.bf16.msra.mxu1 %v10345_v33  ;;  %13745 = vmatprep.mubr.msk.bf16.mxu1 %vm1462_vm3, %v9504_v16  ;;  %v18667_v33 = vshrl.u32 %v18182_v25, 16  ;;  %v19891_v16 = vld [vmem:[#allocation91_spill] sm:$0xff] }
 0x7b6   : > { %14777 = vmatprep.subr.msk.bf16.mxu1 %vm1535_vm1, %v18623_v21  ;;  %v18674_v47 = vshll.u32 %v19891_v16, 16  ;;  %v18684_v2 = vshrl.u32 %v19891_v16, 16  ;;  %v19895_v16 = vld [vmem:[#allocation76_spill] sm:$0xff] }
 0x7b7   : > { %v9579_v46 = vor.u32 %v18667_v33, %v9575_v57  ;;  %v9615_v57 = vrot.slane %v18707_v3, 1  ;;  %v9623_v58 = vrot.slane %v19895_v16, 1  ;;  %v10021_v16 = vld [vmem:[#allocation3 + $0x18] sm:$0xf8] }
 0x7bc   : > { %13746 = vmatmul.mubr.msk.bf16.gmra.mrb[52].mxu1 %vm1462_vm3, %v9512_v52  ;;  %v9584_v52 = vsel %vm4879_vm5, %v9579_v46, %v9583_v4  ;;  %v18721_v4 = vshrl.u32 %v19894_v22, 16  ;;  %v19900_v22 = vld [vmem:[#allocation77_spill] sm:$0xff] }
 0x7bd   : > { %13749 = vmatprep.mubr.msk.bf16.mxu1 %vm1462_vm3, %v9520_v59  ;;  %v9591_v59 = vrot.slane %v18674_v47, 1 }
 0x7bf   : > { %v9592_v32 = vsel %vm4879_vm5, %v9587_v17, %v9591_v59 }
 0x7c4   : > { %13750 = vmatmul.mubr.msk.bf16.gmra.mrb[56].mxu1 %vm1462_vm3, %v9528_v39  ;;  %v9595_v39 = vor.u32 %v18684_v2, %v9591_v59  ;;  %v9619_v59 = vor.u32 %v18721_v4, %v9615_v57 }
 0x7c5   : > { %13753 = vmatprep.mubr.msk.bf16.mxu1 %vm1462_vm3, %v9536_v50  ;;  %v19893_v50 = vld [vmem:[#allocation93_spill] sm:$0xff] }
 0x7c6   : > { %v18694_v40 = vshll.u32 %v19893_v50, 16  ;;  %v18704_v10 = vshrl.u32 %v19893_v50, 16  ;;  %v9624_v50 = vsel %vm4879_vm5, %v9619_v59, %v9623_v58  ;;  %v10049_v59 = vshrl.u32 %v10021_v16, 16 }
 0x7cc   : > { %13754 = vmatmul.mubr.msk.bf16.gmra.mrb[60].mxu1 %vm1462_vm3, %v9544_v48  ;;  %v9600_v48 = vsel %vm4879_vm5, %v9595_v39, %v9599_v19  ;;  %v9631_v39 = vrot.slane %v19897_v11, 1  ;;  %v10052_v11 = vshll.u32 %v10021_v16, 16  ;;  %v10071_v16 = vrot.slane %v18422_v6, 4 }
 0x7cd   : > { %13757 = vmatprep.mubr.msk.bf16.mxu1 %vm1462_vm3, %v9552_v56  ;;  %v9607_v56 = vrot.slane %v18694_v40, 1 }
 0x7d4   : > { %13758 = vmatmul.mubr.msk.bf16.gmra.mrb[64].mxu1 %vm1462_vm3, %v9560_v43  ;;  %v9611_v43 = vor.u32 %v18704_v10, %v9607_v56 }
 0x7d5   : > { %13761 = vmatprep.mubr.msk.bf16.mxu1 %vm1462_vm3, %v9568_v37  ;;  %v9603_v37 = vor.u32 %v18710_v38, %v9599_v19  ;;  %v19898_v19 = vld [vmem:[#allocation52_spill] sm:$0xff] }
 0x7d6   : > { %v9616_v46 = vsel %vm4879_vm5, %v9611_v43, %v9615_v57  ;;  %v9635_v43 = vor.u32 %v19900_v22, %v9631_v39  ;;  %v10054_v22 = vrot.slane %v10052_v11, 4 }
 0x7d7   : > { %v9608_v1 = vsel %vm4879_vm5, %v9603_v37, %v9607_v56  ;;  %v19901_v37 = vld [vmem:[#allocation79_spill] sm:$0xff] }
 0x7dc   : > { %13762 = vmatmul.mubr.msk.bf16.gmra.mrb[68].mxu1 %vm1462_vm3, %v9576_v28  ;;  %v19896_v28 = vld [vmem:[#allocation74_spill] sm:$0xff] }
 0x7dd   : > { %13765 = vmatprep.mubr.msk.bf16.mxu1 %vm1462_vm3, %v9584_v52  ;;  %v9627_v52 = vor.u32 %v19896_v28, %v9623_v58  ;;  %v9474_v58 = vld [vmem:[#allocation3 + $0xd0] sm:$0x1]  ;;  %v19902_v28 = vld [vmem:[#allocation83_spill] sm:$0xff] }
 0x7df   : > { %v9632_v17 = vsel %vm4879_vm5, %v9627_v52, %v9631_v39 }
 0x7e4   : > { %13766 = vmatmul.mubr.msk.bf16.gmra.mrb[72].mxu1 %vm1462_vm3, %v9592_v32  ;;  %v9639_v32 = vrot.slane %v19898_v19, 1  ;;  %v10059_v19 = vrot.slane %v18381_v61, 3 }
 0x7e5   : > { %13769 = vmatprep.mubr.msk.bf16.mxu1 %vm1462_vm3, %v9600_v48  ;;  %v19899_v48 = vld [vmem:[#allocation80_spill] sm:$0xff] }
 0x7e6   : > { %v9643_v56 = vor.u32 %v19899_v48, %v9639_v32  ;;  %v9640_v57 = vsel %vm4879_vm5, %v9635_v43, %v9639_v32  ;;  %v10062_v32 = vrot.slane %v18395_v60, 4  ;;  %v19904_v48 = vld [vmem:[#allocation73_spill] sm:$0xff] }
 0x7ec   : > { %13770 = vmatmul.mubr.msk.bf16.gmra.mrb[76].mxu1 %vm1462_vm3, %v9608_v1  ;;  %v9647_v1 = vrot.slane %v19901_v37, 1  ;;  %v10063_v37 = vor.u32 %v10062_v32, %v10059_v19  ;;  %v10089_v19 = vrot.slane %v18448_v62, 4  ;;  %v18764_v32 = vld [vmem:[%s19224_s13 + $0x10] sm:$0x3] }
 0x7ed   : > { %13773 = vmatprep.mubr.msk.bf16.mxu1 %vm1462_vm3, %v9616_v46 }
 0x7ee   : > { %v9648_v46 = vsel %vm4879_vm5, %v9643_v56, %v9647_v1  ;;  %v9651_v52 = vor.u32 %v19902_v28, %v9647_v1  ;;  %v10051_v56 = vrot.slane %v10049_v59, 3  ;;  %v10077_v28 = vrot.slane %v18404_v26, 3 }
 0x7f0   : > { %v10055_v1 = vor.u32 %v10054_v22, %v10051_v56  ;;  %v10095_v56 = vrot.slane %v18437_v9, 3  ;;  %v10098_v22 = vrot.slane %v18453_v29, 4 }
 0x7f4   : > { %13774 = vmatmul.mubr.msk.bf16.gmra.mrb[80].mxu1 %vm1462_vm3, %v9624_v50  ;;  %v19903_v50 = vrot.slane %v18055_v13, 1 }
 0x7f5   : > { %13777 = vmatprep.mubr.msk.bf16.mxu1 %vm1462_vm3, %v9632_v17  ;;  %v9669_v17 = vshll.u32 %v9474_v58, 16  ;;  %v10064_v58 = vsel %vm2968_vm11, %v10055_v1, %v10063_v37  ;;  %v10104_v1 = vrot.slane %v18457_v20, 3 }
 0x7f6   : > { %v9656_v39 = vsel %vm4879_vm5, %v9651_v52, %v19903_v50  ;;  %v10080_v52 = vrot.slane %v18427_v35, 4  ;;  %v10770_v50 = vsel %vm1535_vm1, %v18623_v21, 0 }
 0x7f7   : > { %v9671_v43 = vrot.slane %v9669_v17, 1  ;;  %v10086_v17 = vrot.slane %v18433_v24, 3 }
 0x7f8   : > { %v10081_v11 = vor.u32 %v10080_v52, %v10077_v28 }
 0x7f9   : > { %v10090_v21 = vor.u32 %v10089_v19, %v10086_v17  ;;  %v10134_v17 = vrot.slane %v18499_v36, 4 }
 0x7fc   : > { %13778 = vmatmul.mubr.msk.bf16.gmra.mrb[84].mxu1 %vm1462_vm3, %v9640_v57  ;;  %v19905_v57 = vld [vmem:[#allocation70_spill] sm:$0xff] }
 0x7fd   : > { %13781 = vmatprep.mubr.msk.bf16.mxu1 %vm1462_vm3, %v9648_v46  ;;  %v9672_v13 = vsel %vm4879_vm5, %v19905_v57, %v9671_v43  ;;  %v10068_v46 = vrot.slane %v18400_v7, 3  ;;  %v10099_v43 = vor.u32 %v10098_v22, %v10095_v56  ;;  %v10107_v57 = vrot.slane %v18472_v55, 4 }
 0x7fe   : > { %v10140_v22 = vrot.slane %v18503_v14, 3 }
 0x7ff   : > { %v10072_v59 = vor.u32 %v10071_v16, %v10068_v46  ;;  %v10113_v46 = vrot.slane %v18461_v15, 3  ;;  %v10116_v16 = vrot.slane %v18477_v53, 4 }
 0x801   : > { %v10117_v28 = vor.u32 %v10116_v16, %v10113_v46  ;;  %v10158_v16 = vrot.slane %v18690_v0, 3 }
 0x804   : > { %13782 = vmatmul.mubr.msk.bf16.gmra.mrb[88].mxu1 %vm1462_vm3, %v9656_v39  ;;  %v10073_v39 = vsel %vm2968_vm11, %v10063_v37, %v10072_v59  ;;  %v10091_v37 = vsel %vm2968_vm11, %v10081_v11, %v10090_v21 }
 0x805   : > { %13785 = vmatprep.mubr.msk.bf16.mxu1 %vm1462_vm3, %v19904_v48  ;;  %v10082_v48 = vsel %vm2968_vm11, %v10072_v59, %v10081_v11  ;;  %v10122_v59 = vrot.slane %v18481_v12, 3  ;;  %v10125_v11 = vrot.slane %v18496_v34, 4 }
 0x807   : > { %v10126_v19 = vor.u32 %v10125_v11, %v10122_v59  ;;  %v10170_v59 = vrot.slane %v18674_v47, 4 }
 0x809   : > { %v10127_v56 = vsel %vm2968_vm11, %v10117_v28, %v10126_v19 }
 0x80c   : > { %13786 = vmatmul.mubr.msk.bf16.gmra.mrb[92].mxu1 %vm1462_vm3, %v9672_v13  ;;  %v10100_v13 = vsel %vm2968_vm11, %v10090_v21, %v10099_v43  ;;  %v10143_v21 = vrot.slane %v18513_v54, 4 }
 0x80d   : > { %13791 = vmatprep.mubr.msk.bf16.mxu1 %vm1462_vm3, %v10064_v58  ;;  %v10108_v58 = vor.u32 %v10107_v57, %v10104_v1  ;;  %v10152_v1 = vrot.slane %v18657_v41, 4 }
 0x80e   : > { %v10144_v57 = vor.u32 %v10143_v21, %v10140_v22  ;;  %v10188_v22 = vrot.slane %v18694_v40, 4 }
 0x80f   : > { %v10109_v52 = vsel %vm2968_vm11, %v10099_v43, %v10108_v58 }
 0x814   : > { %13792 = vmatmul.mubr.msk.bf16.vlgmr.msra.gmra.mrb[48].mxu1 %vm1462_vm3, %v10073_v39  ;;  %v10131_v39 = vrot.slane %v18485_v63, 3 }
 0x815   : > { %13840 = vmatpush3.bf16.msra.mxu1 %v10770_v50  ;;  %13795 = vmatprep.mubr.msk.bf16.mxu1 %vm1462_vm3, %v10082_v48  ;;  %v10118_v50 = vsel %vm2968_vm11, %v10108_v58, %v10117_v28  ;;  %v10161_v58 = vrot.slane %v18670_v44, 4 }
 0x816   : > { %14778 = vmatprep.subr.msk.bf16.mxu1 %vm1535_vm1, %v18764_v32  ;;  %v10135_v48 = vor.u32 %v10134_v17, %v10131_v39  ;;  %v10176_v17 = vrot.slane %v18710_v38, 3 }
 0x817   : > { %v10162_v11 = vor.u32 %v10161_v58, %v10158_v16  ;;  %v19906_v58 = vld [vmem:[#allocation85_spill] sm:$0xff] }
 0x818   : > { %v10136_v43 = vsel %vm2968_vm11, %v10126_v19, %v10135_v48  ;;  %v10145_v46 = vsel %vm2968_vm11, %v10135_v48, %v10144_v57  ;;  %v10179_v19 = vrot.slane %v18687_v5, 4 }
 0x81a   : > { %v10180_v21 = vor.u32 %v10179_v19, %v10176_v17 }
 0x81c   : > { %13796 = vmatmul.mubr.msk.bf16.gmra.mrb[52].mxu1 %vm1462_vm3, %v10091_v37  ;;  %v10149_v37 = vrot.slane %v18667_v33, 3 }
 0x81d   : > { %13799 = vmatprep.mubr.msk.bf16.mxu1 %vm1462_vm3, %v10100_v13 }
 0x81e   : > { %v10153_v13 = vor.u32 %v10152_v1, %v10149_v37  ;;  %v10194_v1 = vrot.slane %v18721_v4, 3 }
 0x820   : > { %v10154_v28 = vsel %vm2968_vm11, %v10144_v57, %v10153_v13  ;;  %v10163_v39 = vsel %vm2968_vm11, %v10153_v13, %v10162_v11  ;;  %v10197_v57 = vrot.slane %v18707_v3, 4 }
 0x824   : > { %13800 = vmatmul.mubr.msk.bf16.gmra.mrb[56].mxu1 %vm1462_vm3, %v10109_v52  ;;  %v10167_v52 = vrot.slane %v18684_v2, 3 }
 0x825   : > { %13803 = vmatprep.mubr.msk.bf16.mxu1 %vm1462_vm3, %v10118_v50 }
 0x826   : > { %v10171_v50 = vor.u32 %v10170_v59, %v10167_v52  ;;  %v19907_v52 = vld [vmem:[#allocation53_spill] sm:$0xff]  ;;  %v19908_v59 = vld [vmem:[#allocation86_spill] sm:$0xff] }
 0x828   : > { %v10172_v48 = vsel %vm2968_vm11, %v10162_v11, %v10171_v50  ;;  %v10181_v37 = vsel %vm2968_vm11, %v10171_v50, %v10180_v21  ;;  %v18828_v11 = vld [vmem:[#allocation3 + $0xd8] sm:$0xf]  ;;  %v19909_v50 = vld [vmem:[#allocation84_spill] sm:$0xff] }
 0x82c   : > { %13804 = vmatmul.mubr.msk.bf16.gmra.mrb[60].mxu1 %vm1462_vm3, %v10127_v56  ;;  %v10185_v56 = vrot.slane %v18704_v10, 3 }
 0x82d   : > { %13807 = vmatprep.mubr.msk.bf16.mxu1 %vm1462_vm3, %v10136_v43 }
 0x82e   : > { %v10189_v43 = vor.u32 %v10188_v22, %v10185_v56  ;;  %v19913_v22 = vld [vmem:[#allocation88_spill] sm:$0xff] }
 0x830   : > { %v10190_v13 = vsel %vm2968_vm11, %v10180_v21, %v10189_v43  ;;  %v10264_v21 = vshrl.u32 %v18828_v11, 16 }
 0x834   : > { %13808 = vmatmul.mubr.msk.bf16.gmra.mrb[64].mxu1 %vm1462_vm3, %v10145_v46  ;;  %v10198_v46 = vor.u32 %v10197_v57, %v10194_v1  ;;  %v10266_v1 = vrot.slane %v10264_v21, 3  ;;  %v10655_v21 = vrot.slane %v18418_v45, 4 }
 0x835   : > { %13811 = vmatprep.mubr.msk.bf16.mxu1 %vm1462_vm3, %v10154_v28 }
 0x836   : > { %v10199_v16 = vsel %vm2968_vm11, %v10189_v43, %v10198_v46  ;;  %v10208_v28 = vsel %vm2968_vm11, %v10198_v46, %v19906_v58  ;;  %v10267_v43 = vshll.u32 %v18828_v11, 16  ;;  %v19915_v46 = vld [vmem:[#allocation87_spill] sm:$0xff] }
 0x838   : > { %v10269_v57 = vrot.slane %v10267_v43, 4  ;;  %v10657_v43 = vrot.slane %v18424_v51, 4  ;;  %v10663_v51 = vrot.slane %v18468_v23, 4 }
 0x83a   : > { %v10270_v58 = vor.u32 %v10269_v57, %v10266_v1  ;;  %v10665_v57 = vrot.slane %v18474_v18, 4  ;;  %v19917_v18 = vld [vmem:[#allocation96_spill] sm:$0xff] }
 0x83c   : > { %13812 = vmatmul.mubr.msk.bf16.gmra.mrb[68].mxu1 %vm1462_vm3, %v10163_v39  ;;  %v19910_v39 = vld [vmem:[#allocation102_spill] sm:$0xff] }
 0x83d   : > { %13815 = vmatprep.mubr.msk.bf16.mxu1 %vm1462_vm3, %v10172_v48  ;;  %v19911_v17 = vshrl.u32 %v19910_v39, 16  ;;  %v19912_v48 = vshll.u32 %v19910_v39, 16 }
 0x83f   : > { %v10257_v19 = vrot.slane %v19911_v17, 3  ;;  %v10260_v56 = vrot.slane %v19912_v48, 4  ;;  %v10653_v48 = vrot.slane %v18392_v27, 4  ;;  %v10658_v27 = vsel %vm929_vm0, %v10655_v21, %v10657_v43 }
 0x844   : > { %13816 = vmatmul.mubr.msk.bf16.gmra.mrb[72].mxu1 %vm1462_vm3, %v10181_v37  ;;  %v10261_v37 = vor.u32 %v10260_v56, %v10257_v19  ;;  %v10651_v19 = vrot.slane %v18389_v31, 4  ;;  %v11230_v56 = vsel %vm1535_vm1, %v18764_v32, 0  ;;  %v10656_v31 = vsel %vm929_vm0, %v10653_v48, %v10655_v21 }
 0x845   : > { %13819 = vmatprep.mubr.msk.bf16.mxu1 %vm1462_vm3, %v10190_v13  ;;  %v19914_v13 = vld [vmem:[#allocation89_spill] sm:$0xff]  ;;  %v10659_v32 = vrot.slane %v18444_v49, 4  ;;  %v10666_v49 = vsel %vm929_vm0, %v10663_v51, %v10665_v57 }
 0x847   : > { %v10660_v1 = vsel %vm929_vm0, %v10657_v43, %v10659_v32  ;;  %v14863_v43 = vld [vmem:[#allocation3 + $0xc8] sm:$0xff] }
 0x84c   : > { %13820 = vmatmul.mubr.msk.bf16.gmra.mrb[76].mxu1 %vm1462_vm3, %v10199_v16  ;;  %v10262_v16 = vsel %vm2968_vm11, %v19915_v46, %v10261_v37 }
 0x84d   : > { %13823 = vmatprep.mubr.msk.bf16.mxu1 %vm1462_vm3, %v10208_v28  ;;  %v18845_v28 = vld [vmem:[#allocation3 + $0x18] sm:$0xf0] }
 0x854   : > { %13824 = vmatmul.mubr.msk.bf16.gmra.mrb[80].mxu1 %vm1462_vm3, %v19907_v52  ;;  %v10649_v52 = vrot.slane %v18376_v42, 4  ;;  %v10654_v42 = vsel %vm929_vm0, %v10651_v19, %v10653_v48 }
 0x855   : > { %13827 = vmatprep.mubr.msk.bf16.mxu1 %vm1462_vm3, %v19908_v59  ;;  %v10271_v59 = vsel %vm2968_vm11, %v10261_v37, %v10270_v58  ;;  %v10661_v37 = vrot.slane %v18450_v30, 4  ;;  %v10667_v30 = vrot.slane %v18492_v8, 4  ;;  %v19918_v58 = vld [vmem:[#allocation94_spill] sm:$0xff]  ;;  %v19920_v8 = vld [vmem:[#allocation81_spill] sm:$0xff] }
 0x857   : > { %v10662_v45 = vsel %vm929_vm0, %v10659_v32, %v10661_v37  ;;  %v10668_v46 = vsel %vm929_vm0, %v10665_v57, %v10667_v30  ;;  %v11049_v32 = vshrl.u32 %v18845_v28, 16  ;;  %v11057_v57 = vrot.slane %v18395_v60, 5 }
 0x858   : > { %v11064_v60 = vrot.slane %v18404_v26, 4  ;;  %v11073_v26 = vrot.slane %v18453_v29, 5 }
 0x85c   : > { %13828 = vmatmul.mubr.msk.bf16.gmra.mrb[84].mxu1 %vm1462_vm3, %v19909_v50  ;;  %v10648_v50 = vrot.slane %v18845_v28, 4 }
 0x85d   : > { %13831 = vmatprep.mubr.msk.bf16.mxu1 %vm1462_vm3, %v19913_v22  ;;  %v10652_v22 = vsel %vm929_vm0, %v10649_v52, %v10651_v19  ;;  %v14862_v19 = vld [vmem:[#allocation3 + $0xc0] sm:$0xff] }
 0x85e   : > { %v10650_v17 = vsel %vm929_vm0, %v10648_v50, %v10649_v52  ;;  %v19919_v52 = vld [vmem:[#allocation106_spill] sm:$0xff]  ;;  %v19923_v50 = vld [vmem:[#allocation99_spill] sm:$0xff]  ;;  %v10689_v48 = vrot.slane %v14862_v19, 4  ;;  %v11080_v19 = vrot.slane %v18461_v15, 4  ;;  %v11089_v15 = vrot.slane %v18499_v36, 5 }
 0x864   : > { %13832 = vmatmul.mubr.msk.bf16.gmra.mrb[88].mxu1 %vm1462_vm3, %v19914_v13  ;;  %v10664_v13 = vsel %vm929_vm0, %v10661_v37, %v10663_v51  ;;  %v11052_v37 = vshll.u32 %v18845_v28, 16  ;;  %v11056_v51 = vrot.slane %v18381_v61, 4 }
 0x865   : > { %13835 = vmatprep.mubr.msk.bf16.mxu1 %vm1462_vm3, %v10262_v16  ;;  %v19916_v16 = vrot.slane %v18182_v25, 4  ;;  %v19922_v25 = vld [vmem:[#allocation98_spill] sm:$0xff] }
 0x867   : > { %v10670_v23 = vsel %vm929_vm0, %v10667_v30, %v19916_v16  ;;  %v11058_v30 = vor.u32 %v11057_v57, %v11056_v51  ;;  %v11060_v16 = vrot.slane %v18400_v7, 4  ;;  %v11069_v7 = vrot.slane %v18448_v62, 5 }
 0x86c   : > { %13836 = vmatmul.mubr.msk.bf16.gmra.mrb[92].mxu1 %vm1462_vm3, %v10271_v59  ;;  %v19921_v59 = vld [vmem:[#allocation97_spill] sm:$0xff] }
 0x86d   : > { %13841 = vmatprep.mubr.msk.bf16.mxu1 %vm1462_vm3, %v10650_v17  ;;  %v19924_v17 = vld [vmem:[#allocation100_spill] sm:$0xff] }
 0x874   : > { %13842 = vmatmul.mubr.msk.bf16.vlgmr.msra.gmra.mrb[48].mxu1 %vm1462_vm3, %v10652_v22  ;;  %v19926_v22 = vld [vmem:[#allocation75_spill] sm:$0xff] }
 0x875   : > { %13890 = vmatpush3.bf16.msra.mxu1 %v11230_v56  ;;  %13845 = vmatprep.mubr.msk.bf16.mxu1 %vm1462_vm3, %v10654_v42  ;;  %v19925_v56 = vld [vmem:[#allocation101_spill] sm:$0xff]  ;;  %v19927_v42 = vrot.slane %v19926_v22, 4  ;;  %v11084_v22 = vrot.slane %v18481_v12, 4  ;;  %v11093_v12 = vrot.slane %v18513_v54, 5 }
 0x877   : > { %v10690_v21 = vsel %vm929_vm0, %v19927_v42, %v10689_v48  ;;  %v11088_v42 = vrot.slane %v18485_v63, 4  ;;  %v11097_v63 = vrot.slane %v18657_v41, 5 }
 0x87c   : > { %13846 = vmatmul.mubr.msk.bf16.gmra.mrb[52].mxu1 %vm1462_vm3, %v10656_v31  ;;  %v10691_v31 = vrot.slane %v14863_v43, 4 }
 0x87d   : > { %13849 = vmatprep.mubr.msk.bf16.mxu1 %vm1462_vm3, %v10658_v27  ;;  %v10693_v27 = vrot.slane %v19910_v39, 4  ;;  %v11054_v39 = vrot.slane %v11052_v37, 5 }
 0x884   : > { %13850 = vmatmul.mubr.msk.bf16.gmra.mrb[56].mxu1 %vm1462_vm3, %v10660_v1  ;;  %v10692_v1 = vsel %vm929_vm0, %v10689_v48, %v10691_v31 }
 0x885   : > { %13853 = vmatprep.mubr.msk.bf16.mxu1 %vm1462_vm3, %v10662_v45  ;;  %v10694_v45 = vsel %vm929_vm0, %v10691_v31, %v10693_v27  ;;  %v11092_v31 = vrot.slane %v18503_v14, 4  ;;  %v11101_v14 = vrot.slane %v18670_v44, 5 }
 0x887   : > { %v11094_v36 = vor.u32 %v11093_v12, %v11092_v31 }
 0x88c   : > { %13854 = vmatmul.mubr.msk.bf16.gmra.mrb[60].mxu1 %vm1462_vm3, %v10664_v13  ;;  %v10695_v13 = vrot.slane %v18828_v11, 4 }
 0x88d   : > { %13857 = vmatprep.mubr.msk.bf16.mxu1 %vm1462_vm3, %v10666_v49  ;;  %v11051_v49 = vrot.slane %v11049_v32, 4 }
 0x88f   : > { %v11055_v28 = vor.u32 %v11054_v39, %v11051_v49  ;;  %v11112_v49 = vrot.slane %v18704_v10, 4 }
 0x891   : > { %v11059_v61 = vsel %vm3496_vm13, %v11055_v28, %v11058_v30 }
 0x894   : > { %13858 = vmatmul.mubr.msk.bf16.gmra.mrb[64].mxu1 %vm1462_vm3, %v10668_v46  ;;  %v10696_v46 = vsel %vm929_vm0, %v10693_v27, %v10695_v13  ;;  %v11096_v27 = vrot.slane %v18667_v33, 4  ;;  %v11105_v33 = vrot.slane %v18674_v47, 5  ;;  %v11108_v13 = vrot.slane %v18710_v38, 4 }
 0x895   : > { %13861 = vmatprep.mubr.msk.bf16.mxu1 %vm1462_vm3, %v10670_v23  ;;  %v11061_v23 = vrot.slane %v18422_v6, 5  ;;  %v11117_v38 = vrot.slane %v18707_v3, 5  ;;  %v19930_v3 = vld [vmem:[#allocation105_spill] sm:$0xff] }
 0x896   : > { %v11098_v32 = vor.u32 %v11097_v63, %v11096_v27 }
 0x897   : > { %v11062_v11 = vor.u32 %v11061_v23, %v11060_v16  ;;  %v19929_v23 = vld [vmem:[#allocation104_spill] sm:$0xff] }
 0x898   : > { %v11099_v54 = vsel %vm3496_vm13, %v11094_v36, %v11098_v32 }
 0x89c   : > { %13862 = vmatmul.mubr.msk.bf16.gmra.mrb[68].mxu1 %vm1462_vm3, %v19917_v18  ;;  %v11065_v18 = vrot.slane %v18427_v35, 5 }
 0x89d   : > { %13865 = vmatprep.mubr.msk.bf16.mxu1 %vm1462_vm3, %v19918_v58 }
 0x89e   : > { %v11066_v58 = vor.u32 %v11065_v18, %v11064_v60  ;;  %v19932_v60 = vld [vmem:[#allocation107_spill] sm:$0xff] }
 0x8a0   : > { %v11067_v6 = vsel %vm3496_vm13, %v11062_v11, %v11066_v58 }
 0x8a4   : > { %13866 = vmatmul.mubr.msk.bf16.gmra.mrb[72].mxu1 %vm1462_vm3, %v19919_v52  ;;  %v11063_v52 = vsel %vm3496_vm13, %v11058_v30, %v11062_v11 }
 0x8a5   : > { %13869 = vmatprep.mubr.msk.bf16.mxu1 %vm1462_vm3, %v19920_v8  ;;  %v11068_v8 = vrot.slane %v18433_v24, 4  ;;  %v11077_v24 = vrot.slane %v18472_v55, 5 }
 0x8a7   : > { %v11070_v35 = vor.u32 %v11069_v7, %v11068_v8  ;;  %v19933_v8 = vld [vmem:[#allocation109_spill] sm:$0xff]  ;;  %v19934_v7 = vld [vmem:[#allocation110_spill] sm:$0xff] }
 0x8ac   : > { %13870 = vmatmul.mubr.msk.bf16.gmra.mrb[76].mxu1 %vm1462_vm3, %v19921_v59  ;;  %v11072_v59 = vrot.slane %v18437_v9, 4  ;;  %v11081_v9 = vrot.slane %v18477_v53, 5 }
 0x8ad   : > { %13873 = vmatprep.mubr.msk.bf16.mxu1 %vm1462_vm3, %v19922_v25 }
 0x8ae   : > { %v11074_v25 = vor.u32 %v11073_v26, %v11072_v59  ;;  %v11082_v48 = vor.u32 %v11081_v9, %v11080_v19  ;;  %v19935_v59 = vld [vmem:[#allocation108_spill] sm:$0xff] }
 0x8b0   : > { %v11075_v62 = vsel %vm3496_vm13, %v11070_v35, %v11074_v25 }
 0x8b4   : > { %13874 = vmatmul.mubr.msk.bf16.gmra.mrb[80].mxu1 %vm1462_vm3, %v19923_v50  ;;  %v11071_v50 = vsel %vm3496_vm13, %v11066_v58, %v11070_v35  ;;  %v19003_v35 = vld [vmem:[%s19225_s14] ss:$0 sm:$0xff] }
 0x8b5   : > { %13877 = vmatprep.mubr.msk.bf16.mxu1 %vm1462_vm3, %v19924_v17  ;;  %v11076_v17 = vrot.slane %v18457_v20, 4  ;;  %v11085_v20 = vrot.slane %v18496_v34, 5 }
 0x8b7   : > { %v11078_v29 = vor.u32 %v11077_v24, %v11076_v17  ;;  %v11086_v53 = vor.u32 %v11085_v20, %v11084_v22 }
 0x8b9   : > { %v11083_v55 = vsel %vm3496_vm13, %v11078_v29, %v11082_v48  ;;  %v11087_v43 = vsel %vm3496_vm13, %v11082_v48, %v11086_v53 }
 0x8bc   : > { %13878 = vmatmul.mubr.msk.bf16.gmra.mrb[84].mxu1 %vm1462_vm3, %v19925_v56  ;;  %v11079_v56 = vsel %vm3496_vm13, %v11074_v25, %v11078_v29 }
 0x8bd   : > { %13881 = vmatprep.mubr.msk.bf16.mxu1 %vm1462_vm3, %v10690_v21  ;;  %v11090_v21 = vor.u32 %v11089_v15, %v11088_v42 }
 0x8bf   : > { %v11091_v34 = vsel %vm3496_vm13, %v11086_v53, %v11090_v21  ;;  %v11095_v37 = vsel %vm3496_vm13, %v11090_v21, %v11094_v36 }
 0x8c4   : > { %13882 = vmatmul.mubr.msk.bf16.gmra.mrb[88].mxu1 %vm1462_vm3, %v10692_v1  ;;  %v11100_v1 = vrot.slane %v18690_v0, 4  ;;  %v11109_v0 = vrot.slane %v18687_v5, 5 }
 0x8c5   : > { %13885 = vmatprep.mubr.msk.bf16.mxu1 %vm1462_vm3, %v10694_v45  ;;  %v11104_v45 = vrot.slane %v18684_v2, 4  ;;  %v11113_v2 = vrot.slane %v18694_v40, 5  ;;  %v19928_v40 = vld [vmem:[#allocation103_spill] sm:$0xff] }
 0x8c6   : > { %v11102_v41 = vor.u32 %v11101_v14, %v11100_v1  ;;  %v11110_v47 = vor.u32 %v11109_v0, %v11108_v13 }
 0x8c7   : > { %v11106_v51 = vor.u32 %v11105_v33, %v11104_v45  ;;  %v11114_v39 = vor.u32 %v11113_v2, %v11112_v49 }
 0x8c8   : > { %v11103_v57 = vsel %vm3496_vm13, %v11098_v32, %v11102_v41 }
 0x8c9   : > { %v11107_v44 = vsel %vm3496_vm13, %v11102_v41, %v11106_v51  ;;  %v11111_v30 = vsel %vm3496_vm13, %v11106_v51, %v11110_v47  ;;  %v11115_v5 = vsel %vm3496_vm13, %v11110_v47, %v11114_v39 }
 0x8cc   : > { %13886 = vmatmul.mubr.msk.bf16.gmra.mrb[92].mxu1 %vm1462_vm3, %v10696_v46  ;;  %v11116_v46 = vrot.slane %v18721_v4, 4  ;;  %v11045_v4 = vld [vmem:[#allocation3 + $0xd8] sm:$0x1f] }
 0x8cd   : > { %13891 = vmatprep.mubr.msk.bf16.mxu1 %vm1462_vm3, %v11059_v61  ;;  %v19931_v61 = vld [vmem:[#allocation82_spill] sm:$0xff]  ;;  %v11149_v18 = vshrl.u32 %v11045_v4, 16  ;;  %v11152_v11 = vshll.u32 %v11045_v4, 16 }
 0x8ce   : > { %v11118_v28 = vor.u32 %v11117_v38, %v11116_v46 }
 0x8cf   : > { %v11151_v58 = vrot.slane %v11149_v18, 4 }
 0x8d0   : > { %v11119_v10 = vsel %vm3496_vm13, %v11114_v39, %v11118_v28  ;;  %v11123_v16 = vsel %vm3496_vm13, %v11118_v28, %v19928_v40 }
 0x8d4   : > { %13892 = vmatmul.mubr.msk.bf16.vlgmr.msra.gmra.mrb[48].mxu1 %vm1462_vm3, %v11063_v52  ;;  %v11154_v52 = vrot.slane %v11152_v11, 5 }
 0x8d5   : > { %13895 = vmatprep.mubr.msk.bf16.mxu1 %vm1462_vm3, %v11067_v6 }
 0x8d6   : > { %v11155_v6 = vor.u32 %v11154_v52, %v11151_v58 }
 0x8d8   : > { %v11156_v26 = vsel %vm3496_vm13, %v19935_v59, %v11155_v6 }
 0x8dc   : > { %13896 = vmatmul.mubr.msk.bf16.gmra.mrb[52].mxu1 %vm1462_vm3, %v11071_v50  ;;  %v19009_v50 = vld [vmem:[%s19226_s15] ss:$0 sm:$0xff] }
 0x8dd   : > { %13899 = vmatprep.mubr.msk.bf16.mxu1 %vm1462_vm3, %v11075_v62 }
 0x8e4   : > { %13900 = vmatmul.mubr.msk.bf16.gmra.mrb[56].mxu1 %vm1462_vm3, %v11079_v56 }
 0x8e5   : > { %13903 = vmatprep.mubr.msk.bf16.mxu1 %vm1462_vm3, %v11083_v55 }
 0x8ec   : > { %13904 = vmatmul.mubr.msk.bf16.gmra.mrb[60].mxu1 %vm1462_vm3, %v11087_v43 }
 0x8ed   : > { %13907 = vmatprep.mubr.msk.bf16.mxu1 %vm1462_vm3, %v11091_v34 }
 0x8f4   : > { %13908 = vmatmul.mubr.msk.bf16.gmra.mrb[64].mxu1 %vm1462_vm3, %v11095_v37 }
 0x8f5   : > { %13911 = vmatprep.mubr.msk.bf16.mxu1 %vm1462_vm3, %v11099_v54 }
 0x8fc   : > { %13912 = vmatmul.mubr.msk.bf16.gmra.mrb[68].mxu1 %vm1462_vm3, %v11103_v57 }
 0x8fd   : > { %13915 = vmatprep.mubr.msk.bf16.mxu1 %vm1462_vm3, %v11107_v44 }
 0x904   : > { %13916 = vmatmul.mubr.msk.bf16.gmra.mrb[72].mxu1 %vm1462_vm3, %v11111_v30 }
 0x905   : > { %13919 = vmatprep.mubr.msk.bf16.mxu1 %vm1462_vm3, %v11115_v5 }
 0x90c   : > { %13920 = vmatmul.mubr.msk.bf16.gmra.mrb[76].mxu1 %vm1462_vm3, %v11119_v10 }
 0x90d   : > { %13923 = vmatprep.mubr.msk.bf16.mxu1 %vm1462_vm3, %v11123_v16 }
 0x914   : > { %13924 = vmatmul.mubr.msk.bf16.gmra.mrb[80].mxu1 %vm1462_vm3, %v19929_v23 }
 0x915   : > { %13927 = vmatprep.mubr.msk.bf16.mxu1 %vm1462_vm3, %v19930_v3 }
 0x91c   : > { %13928 = vmatmul.mubr.msk.bf16.gmra.mrb[84].mxu1 %vm1462_vm3, %v19931_v61 }
 0x91d   : > { %13931 = vmatprep.mubr.msk.bf16.mxu1 %vm1462_vm3, %v19932_v60 }
 0x924   : > { %13932 = vmatmul.mubr.msk.bf16.gmra.mrb[88].mxu1 %vm1462_vm3, %v19933_v8 }
 0x925   : > { %13935 = vmatprep.mubr.msk.bf16.mxu1 %vm1462_vm3, %v19934_v7 }
 0x92c   : > { %13936 = vmatmul.mubr.msk.bf16.gmra.mrb[92].mxu1 %vm1462_vm3, %v11156_v26 }
 0x9a7   : > { %v13893_v25 = vpop.f32.mrb[48].mxu1 }
 0x9a8   : > { %v11514_v17 = vmul.f32 %v13893_v25, %v19003_v35  ;;  %v11266_v24 = vpop.f32.mrb[49].mxu1 }
 0x9a9   : > { %v11512_v62 = vmul.f32 %v19003_v35, %v11266_v24  ;;  %v13894_v19 = vpop.f32.mrb[50].mxu1 }
 0x9aa   : > { %v11569_v9 = vadd.f32 %v19009_v50, %v11514_v17  ;;  %v11515_v29 = vmul.f32 %v13894_v19, %v19003_v35  ;;  %v11269_v48 = vpop.f32.mrb[51].mxu1 }
 0x9ab   : > { %v11567_v56 = vadd.f32 %v19009_v50, %v11512_v62  ;;  %v11513_v22 = vmul.f32 %v19003_v35, %v11269_v48 }
 0x9ac   : > { %v11617_v20 = vmax.f32 %v11569_v9, 0.0  ;;  %v11570_v55 = vadd.f32 %v19009_v50, %v11515_v29 }
 0x9ad   : > { %v11615_v42 = vmax.f32 %v11567_v56, 0.0  ;;  %v11568_v15 = vadd.f32 %v19009_v50, %v11513_v22 }
 0x9ae   : > { %11665 = vst.msk [vmem:[%s19018_s22 + $0x10] sm:$0xff] %vm1462_vm3, %v11617_v20  ;;  %v11618_v53 = vmax.f32 %v11570_v55, 0.0 }
 0x9af   : > { %11663 = vst.msk [vmem:[%s19018_s22] sm:$0xff] %vm1462_vm3, %v11615_v42  ;;  %v11616_v21 = vmax.f32 %v11568_v15, 0.0  ;;  %v13897_v43 = vpop.f32.mrb[52].mxu1 }
 0x9b0   : > { %11666 = vst.msk [vmem:[%s19018_s22 + $0x18] sm:$0xff] %vm1462_vm3, %v11618_v53  ;;  %v11518_v31 = vmul.f32 %v13897_v43, %v19003_v35  ;;  %v11282_v12 = vpop.f32.mrb[53].mxu1 }
 0x9b1   : > { %11664 = vst.msk [vmem:[%s19018_s22 + $0x8] sm:$0xff] %vm1462_vm3, %v11616_v21  ;;  %v11516_v34 = vmul.f32 %v19003_v35, %v11282_v12  ;;  %v13898_v27 = vpop.f32.mrb[54].mxu1 }
 0x9b2   : > { %v11573_v63 = vadd.f32 %v19009_v50, %v11518_v31  ;;  %v11519_v36 = vmul.f32 %v13898_v27, %v19003_v35  ;;  %v11285_v32 = vpop.f32.mrb[55].mxu1 }
 0x9b3   : > { %v11571_v37 = vadd.f32 %v19009_v50, %v11516_v34  ;;  %v11517_v1 = vmul.f32 %v19003_v35, %v11285_v32 }
 0x9b4   : > { %v11621_v14 = vmax.f32 %v11573_v63, 0.0  ;;  %v11574_v54 = vadd.f32 %v19009_v50, %v11519_v36 }
 0x9b5   : > { %v11619_v45 = vmax.f32 %v11571_v37, 0.0  ;;  %v11572_v33 = vadd.f32 %v19009_v50, %v11517_v1 }
 0x9b6   : > { %11669 = vst.msk [vmem:[%s19018_s22 + $0x30] sm:$0xff] %vm1462_vm3, %v11621_v14  ;;  %v11622_v41 = vmax.f32 %v11574_v54, 0.0 }
 0x9b7   : > { %11667 = vst.msk [vmem:[%s19018_s22 + $0x20] sm:$0xff] %vm1462_vm3, %v11619_v45  ;;  %v11620_v51 = vmax.f32 %v11572_v33, 0.0  ;;  %v13901_v57 = vpop.f32.mrb[56].mxu1 }
 0x9b8   : > { %11670 = vst.msk [vmem:[%s19018_s22 + $0x38] sm:$0xff] %vm1462_vm3, %v11622_v41  ;;  %v11522_v13 = vmul.f32 %v13901_v57, %v19003_v35  ;;  %v11298_v0 = vpop.f32.mrb[57].mxu1 }
 0x9b9   : > { %11668 = vst.msk [vmem:[%s19018_s22 + $0x28] sm:$0xff] %vm1462_vm3, %v11620_v51  ;;  %v11520_v44 = vmul.f32 %v19003_v35, %v11298_v0  ;;  %v13902_v49 = vpop.f32.mrb[58].mxu1 }
 0x9ba   : > { %v11577_v2 = vadd.f32 %v19009_v50, %v11522_v13  ;;  %v11523_v47 = vmul.f32 %v13902_v49, %v19003_v35  ;;  %v11301_v39 = vpop.f32.mrb[59].mxu1 }
 0x9bb   : > { %v11575_v30 = vadd.f32 %v19009_v50, %v11520_v44  ;;  %v11521_v46 = vmul.f32 %v19003_v35, %v11301_v39 }
 0x9bc   : > { %v11625_v38 = vmax.f32 %v11577_v2, 0.0  ;;  %v11578_v5 = vadd.f32 %v19009_v50, %v11523_v47 }
 0x9bd   : > { %v11623_v28 = vmax.f32 %v11575_v30, 0.0  ;;  %v11576_v10 = vadd.f32 %v19009_v50, %v11521_v46 }
 0x9be   : > { %11673 = vst.msk [vmem:[%s19018_s22 + $0x50] sm:$0xff] %vm1462_vm3, %v11625_v38  ;;  %v11626_v40 = vmax.f32 %v11578_v5, 0.0 }
 0x9bf   : > { %11671 = vst.msk [vmem:[%s19018_s22 + $0x40] sm:$0xff] %vm1462_vm3, %v11623_v28  ;;  %v11624_v16 = vmax.f32 %v11576_v10, 0.0  ;;  %v13905_v23 = vpop.f32.mrb[60].mxu1 }
 0x9c0   : > { %11674 = vst.msk [vmem:[%s19018_s22 + $0x58] sm:$0xff] %vm1462_vm3, %v11626_v40  ;;  %v11526_v3 = vmul.f32 %v13905_v23, %v19003_v35  ;;  %v11314_v4 = vpop.f32.mrb[61].mxu1 }
 0x9c1   : > { %11672 = vst.msk [vmem:[%s19018_s22 + $0x48] sm:$0xff] %vm1462_vm3, %v11624_v16  ;;  %v11524_v61 = vmul.f32 %v19003_v35, %v11314_v4  ;;  %v13906_v60 = vpop.f32.mrb[62].mxu1 }
 0x9c2   : > { %v11581_v18 = vadd.f32 %v19009_v50, %v11526_v3  ;;  %v11527_v11 = vmul.f32 %v13906_v60, %v19003_v35  ;;  %v11317_v58 = vpop.f32.mrb[63].mxu1 }
 0x9c3   : > { %v11579_v52 = vadd.f32 %v19009_v50, %v11524_v61  ;;  %v11525_v8 = vmul.f32 %v19003_v35, %v11317_v58 }
 0x9c4   : > { %v11629_v7 = vmax.f32 %v11581_v18, 0.0  ;;  %v11582_v6 = vadd.f32 %v19009_v50, %v11527_v11 }
 0x9c5   : > { %v11627_v59 = vmax.f32 %v11579_v52, 0.0  ;;  %v11580_v26 = vadd.f32 %v19009_v50, %v11525_v8 }
 0x9c6   : > { %11677 = vst.msk [vmem:[%s19018_s22 + $0x70] sm:$0xff] %vm1462_vm3, %v11629_v7  ;;  %v11630_v25 = vmax.f32 %v11582_v6, 0.0 }
 0x9c7   : > { %11675 = vst.msk [vmem:[%s19018_s22 + $0x60] sm:$0xff] %vm1462_vm3, %v11627_v59  ;;  %v11628_v17 = vmax.f32 %v11580_v26, 0.0  ;;  %v13909_v24 = vpop.f32.mrb[64].mxu1 }
 0x9c8   : > { %11678 = vst.msk [vmem:[%s19018_s22 + $0x78] sm:$0xff] %vm1462_vm3, %v11630_v25  ;;  %v11530_v62 = vmul.f32 %v13909_v24, %v19003_v35  ;;  %v11330_v19 = vpop.f32.mrb[65].mxu1 }
 0x9c9   : > { %11676 = vst.msk [vmem:[%s19018_s22 + $0x68] sm:$0xff] %vm1462_vm3, %v11628_v17  ;;  %v11528_v9 = vmul.f32 %v19003_v35, %v11330_v19  ;;  %v13910_v29 = vpop.f32.mrb[66].mxu1 }
 0x9ca   : > { %v11585_v48 = vadd.f32 %v19009_v50, %v11530_v62  ;;  %v11531_v56 = vmul.f32 %v13910_v29, %v19003_v35  ;;  %v11333_v22 = vpop.f32.mrb[67].mxu1 }
 0x9cb   : > { %v11583_v20 = vadd.f32 %v19009_v50, %v11528_v9  ;;  %v11529_v55 = vmul.f32 %v19003_v35, %v11333_v22 }
 0x9cc   : > { %v11633_v42 = vmax.f32 %v11585_v48, 0.0  ;;  %v11586_v15 = vadd.f32 %v19009_v50, %v11531_v56 }
 0x9cd   : > { %v11631_v53 = vmax.f32 %v11583_v20, 0.0  ;;  %v11584_v21 = vadd.f32 %v19009_v50, %v11529_v55 }
 0x9ce   : > { %11681 = vst.msk [vmem:[%s19018_s22 + $0x90] sm:$0xff] %vm1462_vm3, %v11633_v42  ;;  %v11634_v43 = vmax.f32 %v11586_v15, 0.0 }
 0x9cf   : > { %11679 = vst.msk [vmem:[%s19018_s22 + $0x80] sm:$0xff] %vm1462_vm3, %v11631_v53  ;;  %v11632_v31 = vmax.f32 %v11584_v21, 0.0  ;;  %v13913_v12 = vpop.f32.mrb[68].mxu1 }
 0x9d0   : > { %11682 = vst.msk [vmem:[%s19018_s22 + $0x98] sm:$0xff] %vm1462_vm3, %v11634_v43  ;;  %v11534_v34 = vmul.f32 %v13913_v12, %v19003_v35  ;;  %v11346_v27 = vpop.f32.mrb[69].mxu1 }
 0x9d1   : > { %11680 = vst.msk [vmem:[%s19018_s22 + $0x88] sm:$0xff] %vm1462_vm3, %v11632_v31  ;;  %v11532_v63 = vmul.f32 %v19003_v35, %v11346_v27  ;;  %v13914_v36 = vpop.f32.mrb[70].mxu1 }
 0x9d2   : > { %v11589_v32 = vadd.f32 %v19009_v50, %v11534_v34  ;;  %v11535_v37 = vmul.f32 %v13914_v36, %v19003_v35  ;;  %v11349_v1 = vpop.f32.mrb[71].mxu1 }
 0x9d3   : > { %v11587_v14 = vadd.f32 %v19009_v50, %v11532_v63  ;;  %v11533_v54 = vmul.f32 %v19003_v35, %v11349_v1 }
 0x9d4   : > { %v11637_v45 = vmax.f32 %v11589_v32, 0.0  ;;  %v11590_v33 = vadd.f32 %v19009_v50, %v11535_v37 }
 0x9d5   : > { %v11635_v41 = vmax.f32 %v11587_v14, 0.0  ;;  %v11588_v51 = vadd.f32 %v19009_v50, %v11533_v54 }
 0x9d6   : > { %11685 = vst.msk [vmem:[%s19018_s22 + $0xb0] sm:$0xff] %vm1462_vm3, %v11637_v45  ;;  %v11638_v57 = vmax.f32 %v11590_v33, 0.0 }
 0x9d7   : > { %11683 = vst.msk [vmem:[%s19018_s22 + $0xa0] sm:$0xff] %vm1462_vm3, %v11635_v41  ;;  %v11636_v13 = vmax.f32 %v11588_v51, 0.0  ;;  %v13917_v0 = vpop.f32.mrb[72].mxu1 }
 0x9d8   : > { %11686 = vst.msk [vmem:[%s19018_s22 + $0xb8] sm:$0xff] %vm1462_vm3, %v11638_v57  ;;  %v11538_v44 = vmul.f32 %v13917_v0, %v19003_v35  ;;  %v11362_v49 = vpop.f32.mrb[73].mxu1 }
 0x9d9   : > { %11684 = vst.msk [vmem:[%s19018_s22 + $0xa8] sm:$0xff] %vm1462_vm3, %v11636_v13  ;;  %v11536_v2 = vmul.f32 %v19003_v35, %v11362_v49  ;;  %v13918_v47 = vpop.f32.mrb[74].mxu1 }
 0x9da   : > { %v11593_v39 = vadd.f32 %v19009_v50, %v11538_v44  ;;  %v11539_v30 = vmul.f32 %v13918_v47, %v19003_v35  ;;  %v11365_v46 = vpop.f32.mrb[75].mxu1 }
 0x9db   : > { %v11591_v38 = vadd.f32 %v19009_v50, %v11536_v2  ;;  %v11537_v5 = vmul.f32 %v19003_v35, %v11365_v46 }
 0x9dc   : > { %v11641_v28 = vmax.f32 %v11593_v39, 0.0  ;;  %v11594_v10 = vadd.f32 %v19009_v50, %v11539_v30 }
 0x9dd   : > { %v11639_v40 = vmax.f32 %v11591_v38, 0.0  ;;  %v11592_v16 = vadd.f32 %v19009_v50, %v11537_v5 }
 0x9de   : > { %11689 = vst.msk [vmem:[%s19018_s22 + $0xd0] sm:$0xff] %vm1462_vm3, %v11641_v28  ;;  %v11642_v23 = vmax.f32 %v11594_v10, 0.0 }
 0x9df   : > { %11687 = vst.msk [vmem:[%s19018_s22 + $0xc0] sm:$0xff] %vm1462_vm3, %v11639_v40  ;;  %v11640_v3 = vmax.f32 %v11592_v16, 0.0  ;;  %v13921_v4 = vpop.f32.mrb[76].mxu1 }
 0x9e0   : > { %11690 = vst.msk [vmem:[%s19018_s22 + $0xd8] sm:$0xff] %vm1462_vm3, %v11642_v23  ;;  %v11542_v61 = vmul.f32 %v13921_v4, %v19003_v35  ;;  %v11378_v60 = vpop.f32.mrb[77].mxu1 }
 0x9e1   : > { %11688 = vst.msk [vmem:[%s19018_s22 + $0xc8] sm:$0xff] %vm1462_vm3, %v11640_v3  ;;  %v11540_v18 = vmul.f32 %v19003_v35, %v11378_v60  ;;  %v13922_v11 = vpop.f32.mrb[78].mxu1 }
 0x9e2   : > { %v11597_v58 = vadd.f32 %v19009_v50, %v11542_v61  ;;  %v11543_v52 = vmul.f32 %v13922_v11, %v19003_v35  ;;  %v11381_v8 = vpop.f32.mrb[79].mxu1 }
 0x9e3   : > { %v11595_v7 = vadd.f32 %v19009_v50, %v11540_v18  ;;  %v11541_v6 = vmul.f32 %v19003_v35, %v11381_v8 }
 0x9e4   : > { %v11645_v59 = vmax.f32 %v11597_v58, 0.0  ;;  %v11598_v26 = vadd.f32 %v19009_v50, %v11543_v52 }
 0x9e5   : > { %v11643_v25 = vmax.f32 %v11595_v7, 0.0  ;;  %v11596_v17 = vadd.f32 %v19009_v50, %v11541_v6 }
 0x9e6   : > { %11693 = vst.msk [vmem:[%s19018_s22 + $0xf0] sm:$0xff] %vm1462_vm3, %v11645_v59  ;;  %v11646_v24 = vmax.f32 %v11598_v26, 0.0 }
 0x9e7   : > { %11691 = vst.msk [vmem:[%s19018_s22 + $0xe0] sm:$0xff] %vm1462_vm3, %v11643_v25  ;;  %v11644_v62 = vmax.f32 %v11596_v17, 0.0  ;;  %v13925_v19 = vpop.f32.mrb[80].mxu1 }
 0x9e8   : > { %11694 = vst.msk [vmem:[%s19018_s22 + $0xf8] sm:$0xff] %vm1462_vm3, %v11646_v24  ;;  %v11546_v9 = vmul.f32 %v13925_v19, %v19003_v35  ;;  %v11394_v29 = vpop.f32.mrb[81].mxu1 }
 0x9e9   : > { %11692 = vst.msk [vmem:[%s19018_s22 + $0xe8] sm:$0xff] %vm1462_vm3, %v11644_v62  ;;  %v11544_v48 = vmul.f32 %v19003_v35, %v11394_v29  ;;  %v13926_v56 = vpop.f32.mrb[82].mxu1 }
 0x9ea   : > { %v11601_v22 = vadd.f32 %v19009_v50, %v11546_v9  ;;  %v11547_v20 = vmul.f32 %v13926_v56, %v19003_v35  ;;  %v11397_v55 = vpop.f32.mrb[83].mxu1 }
 0x9eb   : > { %v11599_v42 = vadd.f32 %v19009_v50, %v11544_v48  ;;  %v11545_v15 = vmul.f32 %v19003_v35, %v11397_v55 }
 0x9ec   : > { %v11649_v53 = vmax.f32 %v11601_v22, 0.0  ;;  %v11602_v21 = vadd.f32 %v19009_v50, %v11547_v20 }
 0x9ed   : > { %v11647_v43 = vmax.f32 %v11599_v42, 0.0  ;;  %v11600_v31 = vadd.f32 %v19009_v50, %v11545_v15 }
 0x9ee   : > { %11697 = vst.msk [vmem:[%s19018_s22 + $0x110] sm:$0xff] %vm1462_vm3, %v11649_v53  ;;  %v11650_v12 = vmax.f32 %v11602_v21, 0.0 }
 0x9ef   : > { %11695 = vst.msk [vmem:[%s19018_s22 + $0x100] sm:$0xff] %vm1462_vm3, %v11647_v43  ;;  %v11648_v34 = vmax.f32 %v11600_v31, 0.0  ;;  %v13929_v27 = vpop.f32.mrb[84].mxu1 }
 0x9f0   : > { %11698 = vst.msk [vmem:[%s19018_s22 + $0x118] sm:$0xff] %vm1462_vm3, %v11650_v12  ;;  %v11550_v63 = vmul.f32 %v13929_v27, %v19003_v35  ;;  %v11410_v36 = vpop.f32.mrb[85].mxu1 }
 0x9f1   : > { %11696 = vst.msk [vmem:[%s19018_s22 + $0x108] sm:$0xff] %vm1462_vm3, %v11648_v34  ;;  %v11548_v32 = vmul.f32 %v19003_v35, %v11410_v36  ;;  %v13930_v37 = vpop.f32.mrb[86].mxu1 }
 0x9f2   : > { %v11605_v1 = vadd.f32 %v19009_v50, %v11550_v63  ;;  %v11551_v14 = vmul.f32 %v13930_v37, %v19003_v35  ;;  %v11413_v54 = vpop.f32.mrb[87].mxu1 }
 0x9f3   : > { %v11603_v45 = vadd.f32 %v19009_v50, %v11548_v32  ;;  %v11549_v33 = vmul.f32 %v19003_v35, %v11413_v54 }
 0x9f4   : > { %v11653_v41 = vmax.f32 %v11605_v1, 0.0  ;;  %v11606_v51 = vadd.f32 %v19009_v50, %v11551_v14 }
 0x9f5   : > { %v11651_v57 = vmax.f32 %v11603_v45, 0.0  ;;  %v11604_v13 = vadd.f32 %v19009_v50, %v11549_v33 }
 0x9f6   : > { %11701 = vst.msk [vmem:[%s19018_s22 + $0x130] sm:$0xff] %vm1462_vm3, %v11653_v41  ;;  %v11654_v0 = vmax.f32 %v11606_v51, 0.0 }
 0x9f7   : > { %11699 = vst.msk [vmem:[%s19018_s22 + $0x120] sm:$0xff] %vm1462_vm3, %v11651_v57  ;;  %v11652_v44 = vmax.f32 %v11604_v13, 0.0  ;;  %v13933_v49 = vpop.f32.mrb[88].mxu1 }
 0x9f8   : > { %11702 = vst.msk [vmem:[%s19018_s22 + $0x138] sm:$0xff] %vm1462_vm3, %v11654_v0  ;;  %v11554_v2 = vmul.f32 %v13933_v49, %v19003_v35  ;;  %v11426_v47 = vpop.f32.mrb[89].mxu1 }
 0x9f9   : > { %11700 = vst.msk [vmem:[%s19018_s22 + $0x128] sm:$0xff] %vm1462_vm3, %v11652_v44  ;;  %v11552_v39 = vmul.f32 %v19003_v35, %v11426_v47  ;;  %v13934_v30 = vpop.f32.mrb[90].mxu1 }
 0x9fa   : > { %v11609_v46 = vadd.f32 %v19009_v50, %v11554_v2  ;;  %v11555_v38 = vmul.f32 %v13934_v30, %v19003_v35  ;;  %v11429_v5 = vpop.f32.mrb[91].mxu1 }
 0x9fb   : > { %v11607_v28 = vadd.f32 %v19009_v50, %v11552_v39  ;;  %v11553_v10 = vmul.f32 %v19003_v35, %v11429_v5 }
 0x9fc   : > { %v11657_v40 = vmax.f32 %v11609_v46, 0.0  ;;  %v11610_v16 = vadd.f32 %v19009_v50, %v11555_v38 }
 0x9fd   : > { %v11655_v23 = vmax.f32 %v11607_v28, 0.0  ;;  %v11608_v3 = vadd.f32 %v19009_v50, %v11553_v10 }
 0x9fe   : > { %11705 = vst.msk [vmem:[%s19018_s22 + $0x150] sm:$0xff] %vm1462_vm3, %v11657_v40  ;;  %v11658_v4 = vmax.f32 %v11610_v16, 0.0 }
 0x9ff   : > { %11703 = vst.msk [vmem:[%s19018_s22 + $0x140] sm:$0xff] %vm1462_vm3, %v11655_v23  ;;  %v11656_v61 = vmax.f32 %v11608_v3, 0.0  ;;  %v13937_v60 = vpop.f32.mrb[92].mxu1 }
 0xa00   : > { %11706 = vst.msk [vmem:[%s19018_s22 + $0x158] sm:$0xff] %vm1462_vm3, %v11658_v4  ;;  %v11558_v18 = vmul.f32 %v13937_v60, %v19003_v35  ;;  %v11442_v11 = vpop.f32.mrb[93].mxu1 }
 0xa01   : > { %11704 = vst.msk [vmem:[%s19018_s22 + $0x148] sm:$0xff] %vm1462_vm3, %v11656_v61  ;;  %v11556_v58 = vmul.f32 %v19003_v35, %v11442_v11  ;;  %v13938_v52 = vpop.f32.mrb[94].mxu1 }
 0xa02   : > { %v11613_v8 = vadd.f32 %v19009_v50, %v11558_v18  ;;  %v11559_v7 = vmul.f32 %v13938_v52, %v19003_v35  ;;  %v11445_v6 = vpop.f32.mrb[95].mxu1 }
 0xa03   : > { %v11611_v59 = vadd.f32 %v19009_v50, %v11556_v58  ;;  %v11557_v26 = vmul.f32 %v19003_v35, %v11445_v6 }
 0xa04   : > { %v11661_v25 = vmax.f32 %v11613_v8, 0.0  ;;  %v11614_v17 = vadd.f32 %v19009_v50, %v11559_v7 }
 0xa05   : > { %v11659_v24 = vmax.f32 %v11611_v59, 0.0  ;;  %v11612_v62 = vadd.f32 %v19009_v50, %v11557_v26 }
 0xa06   : > { %11709 = vst.msk [vmem:[%s19018_s22 + $0x170] sm:$0xff] %vm1462_vm3, %v11661_v25  ;;  %v11662_v19 = vmax.f32 %v11614_v17, 0.0 }
 0xa07   : > { %11707 = vst.msk [vmem:[%s19018_s22 + $0x160] sm:$0xff] %vm1462_vm3, %v11659_v24  ;;  %v11660_v9 = vmax.f32 %v11612_v62, 0.0 }
 0xa08   : > { %11710 = vst.msk [vmem:[%s19018_s22 + $0x178] sm:$0xff] %vm1462_vm3, %v11662_v19 }
 0xa09   : > { %11708 = vst.msk [vmem:[%s19018_s22 + $0x168] sm:$0xff] %vm1462_vm3, %v11660_v9 }
 0xa0a PF: > { %s26_s21 = sadd.s32 1, %s14870_s21  }
 0xa0b   : > { %p23_p4 = scmp.ge.s32.totalorder %s26_s21, 4  }
 0xa0d   :  { %25 = sbr.rel (!%p23_p4) target bundleno = 2 (0x2), region = 133 }

</bundles_post_ra>
